<compile_context>
chip_gen: v5e
topology: v5e:2x2
jax: 0.10.0
libtpu: 0.0.40
codegen_flags: <defaults>
</compile_context>

<pallas_src>
import functools
import math

import jax
import jax.numpy as jnp
import numpy as np
from jax import lax
from jax.experimental import pallas as pl
from jax.experimental.pallas import tpu as pltpu


# ---------------------------------------------------------------------------
# Kernel 1: fused RMSNorm + QKV projection + rotary embedding
# ---------------------------------------------------------------------------
def _qkv_rope_kernel(x_ref, scale_ref, w_ref, cos_ref, sin_ref,
                     q_ref, k_ref, v_ref, *, eps, n_heads, head_dim):
    x = x_ref[0].astype(jnp.float32)                          # (TS, D)
    ms = jnp.mean(x * x, axis=-1, keepdims=True)
    xn = x * (scale_ref[...].astype(jnp.float32) * jax.lax.rsqrt(ms + eps))
    qkv = jnp.dot(xn.astype(w_ref.dtype), w_ref[...],
                  preferred_element_type=jnp.float32)         # (TS, 3*D)
    d = n_heads * head_dim
    cos = cos_ref[...].astype(jnp.float32)                    # (TS, hd//4)
    sin = sin_ref[...].astype(jnp.float32)
    half = cos.shape[-1]
    ro = 2 * half                                             # rotary dim

    def rope(t):                                              # t: (TS, D) f32
        parts = []
        for h in range(n_heads):
            b = h * head_dim
            a1 = t[:, b:b + half]
            a2 = t[:, b + half:b + ro]
            ap = t[:, b + ro:b + head_dim]
            parts.append(a1 * cos - a2 * sin)
            parts.append(a2 * cos + a1 * sin)
            parts.append(ap)
        return jnp.concatenate(parts, axis=-1)

    q_ref[0] = rope(qkv[:, :d]).astype(q_ref.dtype)
    k_ref[0] = rope(qkv[:, d:2 * d]).astype(k_ref.dtype)
    v_ref[0] = qkv[:, 2 * d:].astype(v_ref.dtype)


def qkv_rope(x, scale, w_qkv_t, cos, sin, n_heads, head_dim, eps=1e-6):
    """x: (B, S, D), w_qkv_t: (D, 3D), cos/sin: (S, hd//4) -> q, k, v (B, S, D)."""
    B, S, D = x.shape
    TS = min(S, 256)
    assert S % TS == 0
    R = cos.shape[-1]
    act_spec = pl.BlockSpec((1, TS, D), lambda b, s: (b, s, 0))
    rot_spec = pl.BlockSpec((TS, R), lambda b, s: (s, 0))
    kernel = functools.partial(_qkv_rope_kernel, eps=eps,
                               n_heads=n_heads, head_dim=head_dim)
    return pl.pallas_call(
        kernel,
        out_shape=(jax.ShapeDtypeStruct((B, S, D), x.dtype),) * 3,
        grid=(B, S // TS),
        in_specs=[act_spec,
                  pl.BlockSpec((1, D), lambda b, s: (0, 0)),
                  pl.BlockSpec((D, 3 * D), lambda b, s: (0, 0)),
                  rot_spec, rot_spec],
        out_specs=(act_spec, act_spec, act_spec),
        compiler_params=pltpu.CompilerParams(
            dimension_semantics=("parallel", "parallel")),
    )(x, scale.reshape(1, D), w_qkv_t, cos, sin)


# ---------------------------------------------------------------------------
# Kernel 2: flash-style causal attention + out_proj + residual (fused)
# ---------------------------------------------------------------------------
def _attn_out_kernel(q_ref, k_ref, v_ref, wo_ref, skip_ref, o_ref,
                     m_sc, l_sc, acc_sc, *, n_heads, head_dim, tq, tk, scale):
    qi = pl.program_id(1)
    ki = pl.program_id(2)
    q_start = qi * tq
    k_start = ki * tk

    @pl.when(ki == 0)
    def _():
        m_sc[...] = jnp.full(m_sc.shape, -1e30, jnp.float32)
        l_sc[...] = jnp.zeros(l_sc.shape, jnp.float32)
        acc_sc[...] = jnp.zeros(acc_sc.shape, jnp.float32)

    # Skip kv tiles that lie entirely above the causal diagonal.
    @pl.when(k_start < q_start + tq)
    def _():
        q2 = q_ref[0]                                         # (tq, D) bf16
        k2 = k_ref[0]
        v2 = v_ref[0]
        row = lax.broadcasted_iota(jnp.int32, (tq, tk), 0) + q_start
        col = lax.broadcasted_iota(jnp.int32, (tq, tk), 1) + k_start
        causal = col <= row
        for h in range(n_heads):
            sl = slice(h * head_dim, (h + 1) * head_dim)
            s = lax.dot_general(q2[:, sl], k2[:, sl],
                                (((1,), (1,)), ((), ())),
                                preferred_element_type=jnp.float32) * scale
            s = jnp.where(causal, s, -1e30)
            m_prev = m_sc[h]
            m_new = jnp.maximum(m_prev, jnp.max(s, axis=-1, keepdims=True))
            alpha = jnp.exp(m_prev - m_new)
            p = jnp.where(causal, jnp.exp(s - m_new), 0.0)
            l_sc[h] = alpha * l_sc[h] + jnp.sum(p, axis=-1, keepdims=True)
            acc_sc[:, sl] = alpha * acc_sc[:, sl] + jnp.dot(
                p.astype(v2.dtype), v2[:, sl],
                preferred_element_type=jnp.float32)
            m_sc[h] = m_new

    @pl.when(ki == pl.num_programs(2) - 1)
    def _():
        parts = []
        for h in range(n_heads):
            sl = slice(h * head_dim, (h + 1) * head_dim)
            parts.append(acc_sc[:, sl] * pl.reciprocal(l_sc[h], approx=True))
        attn = jnp.concatenate(parts, axis=-1)                # (tq, D) f32
        y = jnp.dot(attn.astype(wo_ref.dtype), wo_ref[...],
                    preferred_element_type=jnp.float32)
        o_ref[0] = (y + skip_ref[0].astype(jnp.float32)).astype(o_ref.dtype)


def attention_out_proj(q, k, v, w_out_t, skip, n_heads, head_dim):
    """q,k,v,skip: (B, S, D); w_out_t: (D, D) -> out_proj(attn(q,k,v)) + skip."""
    B, S, D = q.shape
    T = min(S, 256)
    assert S % T == 0
    nT = S // T
    scale = 1.0 / math.sqrt(head_dim)
    q_spec = pl.BlockSpec((1, T, D), lambda b, qi, ki: (b, qi, 0))
    kv_spec = pl.BlockSpec((1, T, D), lambda b, qi, ki: (b, ki, 0))
    kernel = functools.partial(_attn_out_kernel, n_heads=n_heads,
                               head_dim=head_dim, tq=T, tk=T, scale=scale)
    return pl.pallas_call(
        kernel,
        out_shape=jax.ShapeDtypeStruct((B, S, D), q.dtype),
        grid=(B, nT, nT),
        in_specs=[q_spec, kv_spec, kv_spec,
                  pl.BlockSpec((D, D), lambda b, qi, ki: (0, 0)),
                  q_spec],
        out_specs=q_spec,
        scratch_shapes=[pltpu.VMEM((n_heads, T, 1), jnp.float32),
                        pltpu.VMEM((n_heads, T, 1), jnp.float32),
                        pltpu.VMEM((T, D), jnp.float32)],
        compiler_params=pltpu.CompilerParams(
            dimension_semantics=("parallel", "parallel", "arbitrary")),
    )(q, k, v, w_out_t, skip)


# ---------------------------------------------------------------------------
# Kernel 3: fused FeedForward: RMSNorm -> SwiGLU up -> down -> residual
#           (hidden dimension tiled and accumulated)
# ---------------------------------------------------------------------------
def _ff_kernel(x_ref, scale_ref, wa_ref, wg_ref, wd_ref, o_ref,
               xn_sc, acc_sc, *, eps):
    h = pl.program_id(1)

    @pl.when(h == 0)
    def _():
        x = x_ref[...].astype(jnp.float32)                    # (TN, D)
        ms = jnp.mean(x * x, axis=-1, keepdims=True)
        xn = x * (scale_ref[...].astype(jnp.float32) * jax.lax.rsqrt(ms + eps))
        xn_sc[...] = xn.astype(xn_sc.dtype)
        acc_sc[...] = x                                       # residual / skip

    xn = xn_sc[...]
    a = jnp.dot(xn, wa_ref[...], preferred_element_type=jnp.float32)
    g = jnp.dot(xn, wg_ref[...], preferred_element_type=jnp.float32)
    z = a * (g * jax.nn.sigmoid(g))                           # SwiGLU
    acc_sc[...] += jnp.dot(z.astype(wd_ref.dtype), wd_ref[...],
                           preferred_element_type=jnp.float32)

    @pl.when(h == pl.num_programs(1) - 1)
    def _():
        o_ref[...] = acc_sc[...].astype(o_ref.dtype)


def feed_forward(x, scale, w_a_t, w_g_t, w_down_t, eps=1e-6):
    """x: (N, D); w_a_t/w_g_t: (D, hidden); w_down_t: (hidden, D) -> (N, D)."""
    N, D = x.shape
    hidden = w_a_t.shape[1]
    TN = min(N, 256)
    assert N % TN == 0
    TH = min(hidden, 512)
    assert hidden % TH == 0
    return pl.pallas_call(
        functools.partial(_ff_kernel, eps=eps),
        out_shape=jax.ShapeDtypeStruct((N, D), x.dtype),
        grid=(N // TN, hidden // TH),
        in_specs=[pl.BlockSpec((TN, D), lambda i, h: (i, 0)),
                  pl.BlockSpec((1, D), lambda i, h: (0, 0)),
                  pl.BlockSpec((D, TH), lambda i, h: (0, h)),
                  pl.BlockSpec((D, TH), lambda i, h: (0, h)),
                  pl.BlockSpec((TH, D), lambda i, h: (h, 0))],
        out_specs=pl.BlockSpec((TN, D), lambda i, h: (i, 0)),
        scratch_shapes=[pltpu.VMEM((TN, D), jnp.bfloat16),
                        pltpu.VMEM((TN, D), jnp.float32)],
        compiler_params=pltpu.CompilerParams(
            dimension_semantics=("parallel", "arbitrary")),
    )(x, scale.reshape(1, D), w_a_t, w_g_t, w_down_t)


# ---------------------------------------------------------------------------
# Parameter init (shapes from Block.__init__), weights pre-transposed + bf16
# ---------------------------------------------------------------------------
def make_axial_pos(h, w):
    h_pos = jnp.linspace(-1.0, 1.0, h + 1)
    w_pos = jnp.linspace(-1.0, 1.0, w + 1)
    h_pos = (h_pos[:-1] + h_pos[1:]) / 2
    w_pos = (w_pos[:-1] + w_pos[1:]) / 2
    hh, ww = jnp.meshgrid(h_pos, w_pos, indexing="ij")
    return jnp.stack([hh, ww], axis=-1).reshape(h * w, 2).astype(jnp.float32)


def init_block_params(key, dim, hidden_dim, head_dim, wdtype=jnp.bfloat16):
    ks = jax.random.split(key, 4)
    p = {}
    p["attn_norm_scale"] = jnp.ones((dim,), jnp.float32)
    p["ff_norm_scale"] = jnp.ones((dim,), jnp.float32)
    # NOTE: the original module zero-inits out_proj and ff.down; small random
    # values are used instead so the compute path is actually exercised.
    qkv_w = jax.random.normal(ks[0], (dim * 3, dim), jnp.float32) * 0.02
    out_w = jax.random.normal(ks[1], (dim, dim), jnp.float32) * 0.02
    up_w = jax.random.normal(ks[2], (hidden_dim * 2, dim), jnp.float32) * 0.02
    down_w = jax.random.normal(ks[3], (dim, hidden_dim), jnp.float32) * 0.02
    # pre-transposed (in, out) bf16 copies -- done once, never per forward call
    p["qkv_wt"] = qkv_w.T.astype(wdtype)
    p["out_wt"] = out_w.T.astype(wdtype)
    p["up_a_wt"] = up_w[:hidden_dim].T.astype(wdtype)
    p["up_g_wt"] = up_w[hidden_dim:].T.astype(wdtype)
    p["down_wt"] = down_w.T.astype(wdtype)
    # rotary tables -- mirrors SelfAttention.__init__
    log_min, log_max = math.log(math.pi), math.log(10 * math.pi)
    freqs = jnp.exp(jnp.linspace(log_min, log_max, head_dim // 8)).astype(jnp.float32)
    pos = make_axial_pos(32, 32)
    pos = jnp.concatenate([jnp.zeros((1, 2), jnp.float32), pos], axis=0)  # (1025, 2)
    theta_h = pos[:, 0:1] * freqs
    theta_w = pos[:, 1:2] * freqs
    theta = jnp.concatenate([theta_h, theta_w], axis=-1)                  # (1025, hd//4)
    p["cos"] = jnp.cos(theta)
    p["sin"] = jnp.sin(theta)
    return p


# ---------------------------------------------------------------------------
# Block forward (cache=None path)
# ---------------------------------------------------------------------------
def block_forward(params, x, head_dim):
    B, S, D = x.shape
    n_heads = D // head_dim
    q, k, v = qkv_rope(x, params["attn_norm_scale"], params["qkv_wt"],
                       params["cos"][:S], params["sin"][:S],
                       n_heads, head_dim)
    x = attention_out_proj(q, k, v, params["out_wt"], x, n_heads, head_dim)
    x = feed_forward(x.reshape(B * S, D), params["ff_norm_scale"],
                     params["up_a_wt"], params["up_g_wt"], params["down_wt"])
    return x.reshape(B, S, D)


# ---------------------------------------------------------------------------
# Pure-JAX f32 reference (same bf16 params, f32 math) for correctness check
# ---------------------------------------------------------------------------
def apply_rotary_ref(x, cos, sin):
    ro = cos.shape[-1] * 2
    x_ro, x_pass = x[..., :ro], x[..., ro:]
    half = ro // 2
    x1, x2 = x_ro[..., :half], x_ro[..., half:]
    c = cos[None, :, None, :]
    s = sin[None, :, None, :]
    return jnp.concatenate([x1 * c - x2 * s, x1 * s + x2 * c, x_pass], axis=-1)


def block_forward_ref(params, x, head_dim, eps=1e-6):
    f32 = jnp.float32
    x = x.astype(f32)
    B, S, D = x.shape
    H = D // head_dim

    def rms(v, scale):
        ms = jnp.mean(v ** 2, axis=-1, keepdims=True)
        return v * (scale.astype(f32) * jax.lax.rsqrt(ms + eps))

    skip = x
    xn = rms(x, params["attn_norm_scale"])
    qkv = (xn @ params["qkv_wt"].astype(f32)).reshape(B, S, 3, H, head_dim)
    q, k, v = qkv[:, :, 0], qkv[:, :, 1], qkv[:, :, 2]
    cos = params["cos"][:S].astype(f32)
    sin = params["sin"][:S].astype(f32)
    q = apply_rotary_ref(q, cos, sin)
    k = apply_rotary_ref(k, cos, sin)
    q, k, v = (t.transpose(0, 2, 1, 3) for t in (q, k, v))
    s = jnp.einsum("bhqd,bhkd->bhqk", q, k) / math.sqrt(head_dim)
    mask = jnp.tril(jnp.ones((S, S), bool))
    s = jnp.where(mask, s, -jnp.inf)
    p = jax.nn.softmax(s, axis=-1)
    o = jnp.einsum("bhqk,bhkd->bhqd", p, v).transpose(0, 2, 1, 3).reshape(B, S, D)
    x = o @ params["out_wt"].astype(f32) + skip

    skip2 = x
    xn = rms(x, params["ff_norm_scale"])
    a = xn @ params["up_a_wt"].astype(f32)
    g = xn @ params["up_g_wt"].astype(f32)
    z = a * (g * jax.nn.sigmoid(g))
    return z @ params["down_wt"].astype(f32) + skip2


# ---------------------------------------------------------------------------
if __name__ == "__main__":
    key = jax.random.PRNGKey(0)
    B, S = 2, 64
    dim, hidden_dim, head_dim = 64, 128, 16

    kp, kx = jax.random.split(key)
    params = init_block_params(kp, dim, hidden_dim, head_dim)
    x = jax.random.normal(kx, (B, S, dim), jnp.float32).astype(jnp.bfloat16)

    fwd = jax.jit(block_forward, static_argnums=2)
    out = jax.block_until_ready(fwd(params, x, head_dim))

    ref = jax.block_until_ready(block_forward_ref(params, x, head_dim))
    # bf16 activations / weights vs f32 reference -> bf16-level tolerance.
    np.testing.assert_allclose(np.asarray(out.astype(jnp.float32)),
                               np.asarray(ref),
                               rtol=5e-2, atol=5e-2)
    print("KERNEL_OK")
</pallas_src>

<mosaic_0001>
module attributes {stable_mosaic.version = 11 : i64} {
  func.func @_qkv_rope_kernel(%arg0: i32, %arg1: i32, %arg2: memref<1x64x64xbf16, #tpu.memory_space<vmem>>, %arg3: memref<1x64xf32, #tpu.memory_space<vmem>>, %arg4: memref<64x192xbf16, #tpu.memory_space<vmem>>, %arg5: memref<64x4xf32, #tpu.memory_space<vmem>>, %arg6: memref<64x4xf32, #tpu.memory_space<vmem>>, %arg7: memref<1x64x64xbf16, #tpu.memory_space<vmem>>, %arg8: memref<1x64x64xbf16, #tpu.memory_space<vmem>>, %arg9: memref<1x64x64xbf16, #tpu.memory_space<vmem>>) attributes {dimension_semantics = [#tpu.dimension_semantics<parallel>, #tpu.dimension_semantics<parallel>], iteration_bounds = array<i64: 2, 1>, scalar_prefetch = 0 : i64, scratch_operands = 0 : i64, tpu.core_type = #tpu.core_type<tc>, window_params = [{transform_indices = @transform_0, window_bounds = array<i64: 1, 64, 64>}, {pipeline_mode = #tpu.pipeline_mode<synchronous>, transform_indices = @transform_1, window_bounds = array<i64: 1, 64>}, {pipeline_mode = #tpu.pipeline_mode<synchronous>, transform_indices = @transform_2, window_bounds = array<i64: 64, 192>}, {transform_indices = @transform_3, window_bounds = array<i64: 64, 4>}, {transform_indices = @transform_4, window_bounds = array<i64: 64, 4>}, {transform_indices = @transform_5, window_bounds = array<i64: 1, 64, 64>}, {transform_indices = @transform_6, window_bounds = array<i64: 1, 64, 64>}, {transform_indices = @transform_7, window_bounds = array<i64: 1, 64, 64>}]} {
    %c0 = arith.constant 0 : index
    %c0_0 = arith.constant 0 : index
    %c0_1 = arith.constant 0 : index
    %0 = vector.load %arg2[%c0, %c0_0, %c0_1] : memref<1x64x64xbf16, #tpu.memory_space<vmem>>, vector<1x64x64xbf16>
    %1 = vector.shape_cast %0 : vector<1x64x64xbf16> to vector<64x64xbf16>
    %2 = arith.extf %1 : vector<64x64xbf16> to vector<64x64xf32>
    %3 = arith.mulf %2, %2 : vector<64x64xf32>
    %cst = arith.constant dense<0.000000e+00> : vector<64xf32>
    %4 = vector.multi_reduction <add>, %3, %cst [1] : vector<64x64xf32> to vector<64xf32>
    %5 = vector.shape_cast %4 : vector<64xf32> to vector<64x1xf32>
    %cst_2 = arith.constant 6.400000e+01 : f32
    %6 = vector.broadcast %cst_2 : f32 to vector<64x1xf32>
    %7 = arith.divf %5, %6 : vector<64x1xf32>
    %c0_3 = arith.constant 0 : index
    %c0_4 = arith.constant 0 : index
    %8 = vector.load %arg3[%c0_3, %c0_4] : memref<1x64xf32, #tpu.memory_space<vmem>>, vector<1x64xf32>
    %cst_5 = arith.constant 9.99999997E-7 : f32
    %9 = vector.broadcast %cst_5 : f32 to vector<64x1xf32>
    %10 = arith.addf %7, %9 : vector<64x1xf32>
    %11 = math.rsqrt %10 : vector<64x1xf32>
    %12 = vector.broadcast %8 : vector<1x64xf32> to vector<64x64xf32>
    %13 = vector.broadcast %11 : vector<64x1xf32> to vector<64x64xf32>
    %14 = arith.mulf %12, %13 : vector<64x64xf32>
    %15 = arith.mulf %2, %14 : vector<64x64xf32>
    %16 = arith.truncf %15 : vector<64x64xf32> to vector<64x64xbf16>
    %c0_6 = arith.constant 0 : index
    %c0_7 = arith.constant 0 : index
    %17 = vector.load %arg4[%c0_6, %c0_7] : memref<64x192xbf16, #tpu.memory_space<vmem>>, vector<64x192xbf16>
    %cst_8 = arith.constant dense<0.000000e+00> : vector<64x192xf32>
    %18 = tpu.matmul %16, %17, %cst_8 {dimension_numbers = #tpu.dot_dimension_numbers<[1], [0], [0], [1], [0, 0, 1, 1], [], []>} : vector<64x64xbf16>, vector<64x192xbf16>, vector<64x192xf32> -> vector<64x192xf32>
    %c0_9 = arith.constant 0 : index
    %c0_10 = arith.constant 0 : index
    %19 = vector.load %arg5[%c0_9, %c0_10] : memref<64x4xf32, #tpu.memory_space<vmem>>, vector<64x4xf32>
    %c0_11 = arith.constant 0 : index
    %c0_12 = arith.constant 0 : index
    %20 = vector.load %arg6[%c0_11, %c0_12] : memref<64x4xf32, #tpu.memory_space<vmem>>, vector<64x4xf32>
    %21 = vector.extract_strided_slice %18 {offsets = [0, 0], sizes = [64, 64], strides = [1, 1]} : vector<64x192xf32> to vector<64x64xf32>
    %22 = vector.extract_strided_slice %21 {offsets = [0, 0], sizes = [64, 4], strides = [1, 1]} : vector<64x64xf32> to vector<64x4xf32>
    %23 = vector.extract_strided_slice %21 {offsets = [0, 4], sizes = [64, 4], strides = [1, 1]} : vector<64x64xf32> to vector<64x4xf32>
    %24 = vector.extract_strided_slice %21 {offsets = [0, 8], sizes = [64, 8], strides = [1, 1]} : vector<64x64xf32> to vector<64x8xf32>
    %25 = arith.mulf %22, %19 : vector<64x4xf32>
    %26 = arith.mulf %23, %20 : vector<64x4xf32>
    %27 = arith.subf %25, %26 : vector<64x4xf32>
    %28 = arith.mulf %23, %19 : vector<64x4xf32>
    %29 = arith.mulf %22, %20 : vector<64x4xf32>
    %30 = arith.addf %28, %29 : vector<64x4xf32>
    %31 = vector.extract_strided_slice %21 {offsets = [0, 16], sizes = [64, 4], strides = [1, 1]} : vector<64x64xf32> to vector<64x4xf32>
    %32 = vector.extract_strided_slice %21 {offsets = [0, 20], sizes = [64, 4], strides = [1, 1]} : vector<64x64xf32> to vector<64x4xf32>
    %33 = vector.extract_strided_slice %21 {offsets = [0, 24], sizes = [64, 8], strides = [1, 1]} : vector<64x64xf32> to vector<64x8xf32>
    %34 = arith.mulf %31, %19 : vector<64x4xf32>
    %35 = arith.mulf %32, %20 : vector<64x4xf32>
    %36 = arith.subf %34, %35 : vector<64x4xf32>
    %37 = arith.mulf %32, %19 : vector<64x4xf32>
    %38 = arith.mulf %31, %20 : vector<64x4xf32>
    %39 = arith.addf %37, %38 : vector<64x4xf32>
    %40 = vector.extract_strided_slice %21 {offsets = [0, 32], sizes = [64, 4], strides = [1, 1]} : vector<64x64xf32> to vector<64x4xf32>
    %41 = vector.extract_strided_slice %21 {offsets = [0, 36], sizes = [64, 4], strides = [1, 1]} : vector<64x64xf32> to vector<64x4xf32>
    %42 = vector.extract_strided_slice %21 {offsets = [0, 40], sizes = [64, 8], strides = [1, 1]} : vector<64x64xf32> to vector<64x8xf32>
    %43 = arith.mulf %40, %19 : vector<64x4xf32>
    %44 = arith.mulf %41, %20 : vector<64x4xf32>
    %45 = arith.subf %43, %44 : vector<64x4xf32>
    %46 = arith.mulf %41, %19 : vector<64x4xf32>
    %47 = arith.mulf %40, %20 : vector<64x4xf32>
    %48 = arith.addf %46, %47 : vector<64x4xf32>
    %49 = vector.extract_strided_slice %21 {offsets = [0, 48], sizes = [64, 4], strides = [1, 1]} : vector<64x64xf32> to vector<64x4xf32>
    %50 = vector.extract_strided_slice %21 {offsets = [0, 52], sizes = [64, 4], strides = [1, 1]} : vector<64x64xf32> to vector<64x4xf32>
    %51 = vector.extract_strided_slice %21 {offsets = [0, 56], sizes = [64, 8], strides = [1, 1]} : vector<64x64xf32> to vector<64x8xf32>
    %52 = arith.mulf %49, %19 : vector<64x4xf32>
    %53 = arith.mulf %50, %20 : vector<64x4xf32>
    %54 = arith.subf %52, %53 : vector<64x4xf32>
    %55 = arith.mulf %50, %19 : vector<64x4xf32>
    %56 = arith.mulf %49, %20 : vector<64x4xf32>
    %57 = arith.addf %55, %56 : vector<64x4xf32>
    %58 = tpu.concatenate %27, %30, %24, %36, %39, %33, %45, %48, %42, %54, %57, %51 in 1 : vector<64x4xf32>, vector<64x4xf32>, vector<64x8xf32>, vector<64x4xf32>, vector<64x4xf32>, vector<64x8xf32>, vector<64x4xf32>, vector<64x4xf32>, vector<64x8xf32>, vector<64x4xf32>, vector<64x4xf32>, vector<64x8xf32> -> vector<64x64xf32>
    %59 = arith.truncf %58 : vector<64x64xf32> to vector<64x64xbf16>
    %c0_13 = arith.constant 0 : index
    %c0_14 = arith.constant 0 : index
    %c0_15 = arith.constant 0 : index
    %60 = vector.load %arg7[%c0_13, %c0_14, %c0_15] : memref<1x64x64xbf16, #tpu.memory_space<vmem>>, vector<1x64x64xbf16>
    %61 = vector.shape_cast %60 : vector<1x64x64xbf16> to vector<64x64xbf16>
    %62 = vector.shape_cast %59 : vector<64x64xbf16> to vector<1x64x64xbf16>
    tpu.vector_store %arg7[%c0_13, %c0_14, %c0_15], %62 {strides = array<i32>} : memref<1x64x64xbf16, #tpu.memory_space<vmem>>, vector<1x64x64xbf16>,
    %63 = vector.extract_strided_slice %18 {offsets = [0, 64], sizes = [64, 64], strides = [1, 1]} : vector<64x192xf32> to vector<64x64xf32>
    %64 = vector.extract_strided_slice %63 {offsets = [0, 0], sizes = [64, 4], strides = [1, 1]} : vector<64x64xf32> to vector<64x4xf32>
    %65 = vector.extract_strided_slice %63 {offsets = [0, 4], sizes = [64, 4], strides = [1, 1]} : vector<64x64xf32> to vector<64x4xf32>
    %66 = vector.extract_strided_slice %63 {offsets = [0, 8], sizes = [64, 8], strides = [1, 1]} : vector<64x64xf32> to vector<64x8xf32>
    %67 = arith.mulf %64, %19 : vector<64x4xf32>
    %68 = arith.mulf %65, %20 : vector<64x4xf32>
    %69 = arith.subf %67, %68 : vector<64x4xf32>
    %70 = arith.mulf %65, %19 : vector<64x4xf32>
    %71 = arith.mulf %64, %20 : vector<64x4xf32>
    %72 = arith.addf %70, %71 : vector<64x4xf32>
    %73 = vector.extract_strided_slice %63 {offsets = [0, 16], sizes = [64, 4], strides = [1, 1]} : vector<64x64xf32> to vector<64x4xf32>
    %74 = vector.extract_strided_slice %63 {offsets = [0, 20], sizes = [64, 4], strides = [1, 1]} : vector<64x64xf32> to vector<64x4xf32>
    %75 = vector.extract_strided_slice %63 {offsets = [0, 24], sizes = [64, 8], strides = [1, 1]} : vector<64x64xf32> to vector<64x8xf32>
    %76 = arith.mulf %73, %19 : vector<64x4xf32>
    %77 = arith.mulf %74, %20 : vector<64x4xf32>
    %78 = arith.subf %76, %77 : vector<64x4xf32>
    %79 = arith.mulf %74, %19 : vector<64x4xf32>
    %80 = arith.mulf %73, %20 : vector<64x4xf32>
    %81 = arith.addf %79, %80 : vector<64x4xf32>
    %82 = vector.extract_strided_slice %63 {offsets = [0, 32], sizes = [64, 4], strides = [1, 1]} : vector<64x64xf32> to vector<64x4xf32>
    %83 = vector.extract_strided_slice %63 {offsets = [0, 36], sizes = [64, 4], strides = [1, 1]} : vector<64x64xf32> to vector<64x4xf32>
    %84 = vector.extract_strided_slice %63 {offsets = [0, 40], sizes = [64, 8], strides = [1, 1]} : vector<64x64xf32> to vector<64x8xf32>
    %85 = arith.mulf %82, %19 : vector<64x4xf32>
    %86 = arith.mulf %83, %20 : vector<64x4xf32>
    %87 = arith.subf %85, %86 : vector<64x4xf32>
    %88 = arith.mulf %83, %19 : vector<64x4xf32>
    %89 = arith.mulf %82, %20 : vector<64x4xf32>
    %90 = arith.addf %88, %89 : vector<64x4xf32>
    %91 = vector.extract_strided_slice %63 {offsets = [0, 48], sizes = [64, 4], strides = [1, 1]} : vector<64x64xf32> to vector<64x4xf32>
    %92 = vector.extract_strided_slice %63 {offsets = [0, 52], sizes = [64, 4], strides = [1, 1]} : vector<64x64xf32> to vector<64x4xf32>
    %93 = vector.extract_strided_slice %63 {offsets = [0, 56], sizes = [64, 8], strides = [1, 1]} : vector<64x64xf32> to vector<64x8xf32>
    %94 = arith.mulf %91, %19 : vector<64x4xf32>
    %95 = arith.mulf %92, %20 : vector<64x4xf32>
    %96 = arith.subf %94, %95 : vector<64x4xf32>
    %97 = arith.mulf %92, %19 : vector<64x4xf32>
    %98 = arith.mulf %91, %20 : vector<64x4xf32>
    %99 = arith.addf %97, %98 : vector<64x4xf32>
    %100 = tpu.concatenate %69, %72, %66, %78, %81, %75, %87, %90, %84, %96, %99, %93 in 1 : vector<64x4xf32>, vector<64x4xf32>, vector<64x8xf32>, vector<64x4xf32>, vector<64x4xf32>, vector<64x8xf32>, vector<64x4xf32>, vector<64x4xf32>, vector<64x8xf32>, vector<64x4xf32>, vector<64x4xf32>, vector<64x8xf32> -> vector<64x64xf32>
    %101 = arith.truncf %100 : vector<64x64xf32> to vector<64x64xbf16>
    %c0_16 = arith.constant 0 : index
    %c0_17 = arith.constant 0 : index
    %c0_18 = arith.constant 0 : index
    %102 = vector.load %arg8[%c0_16, %c0_17, %c0_18] : memref<1x64x64xbf16, #tpu.memory_space<vmem>>, vector<1x64x64xbf16>
    %103 = vector.shape_cast %102 : vector<1x64x64xbf16> to vector<64x64xbf16>
    %104 = vector.shape_cast %101 : vector<64x64xbf16> to vector<1x64x64xbf16>
    tpu.vector_store %arg8[%c0_16, %c0_17, %c0_18], %104 {strides = array<i32>} : memref<1x64x64xbf16, #tpu.memory_space<vmem>>, vector<1x64x64xbf16>,
    %105 = vector.extract_strided_slice %18 {offsets = [0, 128], sizes = [64, 64], strides = [1, 1]} : vector<64x192xf32> to vector<64x64xf32>
    %106 = arith.truncf %105 : vector<64x64xf32> to vector<64x64xbf16>
    %c0_19 = arith.constant 0 : index
    %c0_20 = arith.constant 0 : index
    %c0_21 = arith.constant 0 : index
    %107 = vector.load %arg9[%c0_19, %c0_20, %c0_21] : memref<1x64x64xbf16, #tpu.memory_space<vmem>>, vector<1x64x64xbf16>
    %108 = vector.shape_cast %107 : vector<1x64x64xbf16> to vector<64x64xbf16>
    %109 = vector.shape_cast %106 : vector<64x64xbf16> to vector<1x64x64xbf16>
    tpu.vector_store %arg9[%c0_19, %c0_20, %c0_21], %109 {strides = array<i32>} : memref<1x64x64xbf16, #tpu.memory_space<vmem>>, vector<1x64x64xbf16>,
    return
  }
  func.func @transform_0(%arg0: i32, %arg1: i32) -> (i32, i32, i32) {
    %c0_i32 = arith.constant 0 : i32
    %c0_i32_0 = arith.constant 0 : i32
    return %arg0, %arg1, %c0_i32 : i32, i32, i32
  }
  func.func @transform_1(%arg0: i32, %arg1: i32) -> (i32, i32) {
    %c0_i32 = arith.constant 0 : i32
    %c0_i32_0 = arith.constant 0 : i32
    %c0_i32_1 = arith.constant 0 : i32
    return %c0_i32, %c0_i32_0 : i32, i32
  }
  func.func @transform_2(%arg0: i32, %arg1: i32) -> (i32, i32) {
    %c0_i32 = arith.constant 0 : i32
    %c0_i32_0 = arith.constant 0 : i32
    %c0_i32_1 = arith.constant 0 : i32
    return %c0_i32, %c0_i32_0 : i32, i32
  }
  func.func @transform_3(%arg0: i32, %arg1: i32) -> (i32, i32) {
    %c0_i32 = arith.constant 0 : i32
    %c0_i32_0 = arith.constant 0 : i32
    return %arg1, %c0_i32 : i32, i32
  }
  func.func @transform_4(%arg0: i32, %arg1: i32) -> (i32, i32) {
    %c0_i32 = arith.constant 0 : i32
    %c0_i32_0 = arith.constant 0 : i32
    return %arg1, %c0_i32 : i32, i32
  }
  func.func @transform_5(%arg0: i32, %arg1: i32) -> (i32, i32, i32) {
    %c0_i32 = arith.constant 0 : i32
    %c0_i32_0 = arith.constant 0 : i32
    return %arg0, %arg1, %c0_i32 : i32, i32, i32
  }
  func.func @transform_6(%arg0: i32, %arg1: i32) -> (i32, i32, i32) {
    %c0_i32 = arith.constant 0 : i32
    %c0_i32_0 = arith.constant 0 : i32
    return %arg0, %arg1, %c0_i32 : i32, i32, i32
  }
  func.func @transform_7(%arg0: i32, %arg1: i32) -> (i32, i32, i32) {
    %c0_i32 = arith.constant 0 : i32
    %c0_i32_0 = arith.constant 0 : i32
    return %arg0, %arg1, %c0_i32 : i32, i32, i32
  }
}

module attributes {stable_mosaic.version = 11 : i64} {
  func.func @_attn_out_kernel(%arg0: i32, %arg1: i32, %arg2: i32, %arg3: memref<1x64x64xbf16, #tpu.memory_space<vmem>>, %arg4: memref<1x64x64xbf16, #tpu.memory_space<vmem>>, %arg5: memref<1x64x64xbf16, #tpu.memory_space<vmem>>, %arg6: memref<64x64xbf16, #tpu.memory_space<vmem>>, %arg7: memref<1x64x64xbf16, #tpu.memory_space<vmem>>, %arg8: memref<1x64x64xbf16, #tpu.memory_space<vmem>>, %arg9: memref<4x64x1xf32, #tpu.memory_space<vmem>>, %arg10: memref<4x64x1xf32, #tpu.memory_space<vmem>>, %arg11: memref<64x64xf32, #tpu.memory_space<vmem>>) attributes {dimension_semantics = [#tpu.dimension_semantics<parallel>, #tpu.dimension_semantics<parallel>, #tpu.dimension_semantics<arbitrary>], iteration_bounds = array<i64: 2, 1, 1>, scalar_prefetch = 0 : i64, scratch_operands = 3 : i64, tpu.core_type = #tpu.core_type<tc>, window_params = [{transform_indices = @transform_0, window_bounds = array<i64: 1, 64, 64>}, {transform_indices = @transform_1, window_bounds = array<i64: 1, 64, 64>}, {transform_indices = @transform_2, window_bounds = array<i64: 1, 64, 64>}, {pipeline_mode = #tpu.pipeline_mode<synchronous>, transform_indices = @transform_3, window_bounds = array<i64: 64, 64>}, {transform_indices = @transform_4, window_bounds = array<i64: 1, 64, 64>}, {transform_indices = @transform_5, window_bounds = array<i64: 1, 64, 64>}]} {
    %c64_i32 = arith.constant 64 : i32
    %0 = arith.muli %arg1, %c64_i32 : i32
    %c64_i32_0 = arith.constant 64 : i32
    %1 = arith.muli %arg2, %c64_i32_0 : i32
    %c0_i32 = arith.constant 0 : i32
    %2 = arith.cmpi eq, %arg2, %c0_i32 : i32
    %3 = arith.extui %2 : i1 to i32
    %c0_i32_1 = arith.constant 0 : i32
    %4 = arith.cmpi ne, %3, %c0_i32_1 : i32
    scf.if %4 {
      %cst = arith.constant -1.000000e+30 : f32
      %12 = vector.broadcast %cst : f32 to vector<4x64x1xf32>
      %c0 = arith.constant 0 : index
      %c0_6 = arith.constant 0 : index
      %c0_7 = arith.constant 0 : index
      %13 = vector.load %arg9[%c0, %c0_6, %c0_7] : memref<4x64x1xf32, #tpu.memory_space<vmem>>, vector<4x64x1xf32>
      tpu.vector_store %arg9[%c0, %c0_6, %c0_7], %12 {strides = array<i32>} : memref<4x64x1xf32, #tpu.memory_space<vmem>>, vector<4x64x1xf32>,
      %cst_8 = arith.constant 0.000000e+00 : f32
      %14 = vector.broadcast %cst_8 : f32 to vector<4x64x1xf32>
      %c0_9 = arith.constant 0 : index
      %c0_10 = arith.constant 0 : index
      %c0_11 = arith.constant 0 : index
      %15 = vector.load %arg10[%c0_9, %c0_10, %c0_11] : memref<4x64x1xf32, #tpu.memory_space<vmem>>, vector<4x64x1xf32>
      tpu.vector_store %arg10[%c0_9, %c0_10, %c0_11], %14 {strides = array<i32>} : memref<4x64x1xf32, #tpu.memory_space<vmem>>, vector<4x64x1xf32>,
      %cst_12 = arith.constant 0.000000e+00 : f32
      %16 = vector.broadcast %cst_12 : f32 to vector<64x64xf32>
      %c0_13 = arith.constant 0 : index
      %c0_14 = arith.constant 0 : index
      %17 = vector.load %arg11[%c0_13, %c0_14] : memref<64x64xf32, #tpu.memory_space<vmem>>, vector<64x64xf32>
      tpu.vector_store %arg11[%c0_13, %c0_14], %16 {strides = array<i32>} : memref<64x64xf32, #tpu.memory_space<vmem>>, vector<64x64xf32>,
    } else {
    }
    %c64_i32_2 = arith.constant 64 : i32
    %5 = arith.addi %0, %c64_i32_2 : i32
    %6 = arith.cmpi slt, %1, %5 : i32
    %7 = arith.extui %6 : i1 to i32
    %c0_i32_3 = arith.constant 0 : i32
    %8 = arith.cmpi ne, %7, %c0_i32_3 : i32
    scf.if %8 {
      %c0 = arith.constant 0 : index
      %c0_6 = arith.constant 0 : index
      %c0_7 = arith.constant 0 : index
      %12 = vector.load %arg3[%c0, %c0_6, %c0_7] : memref<1x64x64xbf16, #tpu.memory_space<vmem>>, vector<1x64x64xbf16>
      %13 = vector.shape_cast %12 : vector<1x64x64xbf16> to vector<64x64xbf16>
      %c0_8 = arith.constant 0 : index
      %c0_9 = arith.constant 0 : index
      %c0_10 = arith.constant 0 : index
      %14 = vector.load %arg4[%c0_8, %c0_9, %c0_10] : memref<1x64x64xbf16, #tpu.memory_space<vmem>>, vector<1x64x64xbf16>
      %15 = vector.shape_cast %14 : vector<1x64x64xbf16> to vector<64x64xbf16>
      %c0_11 = arith.constant 0 : index
      %c0_12 = arith.constant 0 : index
      %c0_13 = arith.constant 0 : index
      %16 = vector.load %arg5[%c0_11, %c0_12, %c0_13] : memref<1x64x64xbf16, #tpu.memory_space<vmem>>, vector<1x64x64xbf16>
      %17 = vector.shape_cast %16 : vector<1x64x64xbf16> to vector<64x64xbf16>
      %18 = tpu.iota {dimensions = array<i32: 0>} : vector<64x64xi32>
      %19 = vector.broadcast %0 : i32 to vector<64x64xi32>
      %20 = arith.addi %18, %19 : vector<64x64xi32>
      %21 = tpu.iota {dimensions = array<i32: 1>} : vector<64x64xi32>
      %22 = vector.broadcast %1 : i32 to vector<64x64xi32>
      %23 = arith.addi %21, %22 : vector<64x64xi32>
      %24 = arith.cmpi sle, %23, %20 : vector<64x64xi32>
      %25 = vector.extract_strided_slice %13 {offsets = [0, 0], sizes = [64, 16], strides = [1, 1]} : vector<64x64xbf16> to vector<64x16xbf16>
      %26 = vector.extract_strided_slice %15 {offsets = [0, 0], sizes = [64, 16], strides = [1, 1]} : vector<64x64xbf16> to vector<64x16xbf16>
      %cst = arith.constant dense<0.000000e+00> : vector<64x64xf32>
      %27 = tpu.matmul %25, %26, %cst {dimension_numbers = #tpu.dot_dimension_numbers<[1], [1], [0], [0], [0, 0, 1, 0], [], []>} : vector<64x16xbf16>, vector<64x16xbf16>, vector<64x64xf32> -> vector<64x64xf32>
      %cst_14 = arith.constant 2.500000e-01 : f32
      %28 = vector.broadcast %cst_14 : f32 to vector<64x64xf32>
      %29 = arith.mulf %27, %28 : vector<64x64xf32>
      %cst_15 = arith.constant -1.000000e+30 : f32
      %30 = vector.broadcast %cst_15 : f32 to vector<64x64xf32>
      %31 = arith.select %24, %29, %30 : vector<64x64xi1>, vector<64x64xf32>
      %c0_16 = arith.constant 0 : index
      %c0_17 = arith.constant 0 : index
      %c0_18 = arith.constant 0 : index
      %32 = vector.load %arg9[%c0_16, %c0_17, %c0_18] : memref<4x64x1xf32, #tpu.memory_space<vmem>>, vector<1x64x1xf32>
      %33 = vector.shape_cast %32 : vector<1x64x1xf32> to vector<64x1xf32>
      %cst_19 = arith.constant dense<0xFF800000> : vector<64xf32>
      %34 = vector.multi_reduction <maximumf>, %31, %cst_19 [1] : vector<64x64xf32> to vector<64xf32>
      %35 = vector.shape_cast %34 : vector<64xf32> to vector<64x1xf32>
      %36 = arith.maximumf %33, %35 : vector<64x1xf32>
      %37 = arith.subf %33, %36 : vector<64x1xf32>
      %38 = math.exp %37 : vector<64x1xf32>
      %39 = vector.broadcast %36 : vector<64x1xf32> to vector<64x64xf32>
      %40 = arith.subf %31, %39 : vector<64x64xf32>
      %41 = math.exp %40 : vector<64x64xf32>
      %cst_20 = arith.constant 0.000000e+00 : f32
      %42 = vector.broadcast %cst_20 : f32 to vector<64x64xf32>
      %43 = arith.select %24, %41, %42 : vector<64x64xi1>, vector<64x64xf32>
      %c0_21 = arith.constant 0 : index
      %c0_22 = arith.constant 0 : index
      %c0_23 = arith.constant 0 : index
      %44 = vector.load %arg10[%c0_21, %c0_22, %c0_23] : memref<4x64x1xf32, #tpu.memory_space<vmem>>, vector<1x64x1xf32>
      %45 = vector.shape_cast %44 : vector<1x64x1xf32> to vector<64x1xf32>
      %46 = arith.mulf %38, %45 : vector<64x1xf32>
      %cst_24 = arith.constant dense<0.000000e+00> : vector<64xf32>
      %47 = vector.multi_reduction <add>, %43, %cst_24 [1] : vector<64x64xf32> to vector<64xf32>
      %48 = vector.shape_cast %47 : vector<64xf32> to vector<64x1xf32>
      %49 = arith.addf %46, %48 : vector<64x1xf32>
      %c0_25 = arith.constant 0 : index
      %c0_26 = arith.constant 0 : index
      %c0_27 = arith.constant 0 : index
      %50 = vector.load %arg10[%c0_25, %c0_26, %c0_27] : memref<4x64x1xf32, #tpu.memory_space<vmem>>, vector<1x64x1xf32>
      %51 = vector.shape_cast %50 : vector<1x64x1xf32> to vector<64x1xf32>
      %52 = vector.shape_cast %49 : vector<64x1xf32> to vector<1x64x1xf32>
      tpu.vector_store %arg10[%c0_25, %c0_26, %c0_27], %52 {strides = array<i32>} : memref<4x64x1xf32, #tpu.memory_space<vmem>>, vector<1x64x1xf32>,
      %c0_28 = arith.constant 0 : index
      %c0_29 = arith.constant 0 : index
      %53 = vector.load %arg11[%c0_28, %c0_29] : memref<64x64xf32, #tpu.memory_space<vmem>>, vector<64x16xf32>
      %54 = vector.broadcast %38 : vector<64x1xf32> to vector<64x16xf32>
      %55 = arith.mulf %54, %53 : vector<64x16xf32>
      %56 = arith.truncf %43 : vector<64x64xf32> to vector<64x64xbf16>
      %57 = vector.extract_strided_slice %17 {offsets = [0, 0], sizes = [64, 16], strides = [1, 1]} : vector<64x64xbf16> to vector<64x16xbf16>
      %cst_30 = arith.constant dense<0.000000e+00> : vector<64x16xf32>
      %58 = tpu.matmul %56, %57, %cst_30 {dimension_numbers = #tpu.dot_dimension_numbers<[1], [0], [0], [1], [0, 0, 1, 1], [], []>} : vector<64x64xbf16>, vector<64x16xbf16>, vector<64x16xf32> -> vector<64x16xf32>
      %59 = arith.addf %55, %58 : vector<64x16xf32>
      %c0_31 = arith.constant 0 : index
      %c0_32 = arith.constant 0 : index
      %60 = vector.load %arg11[%c0_31, %c0_32] : memref<64x64xf32, #tpu.memory_space<vmem>>, vector<64x16xf32>
      tpu.vector_store %arg11[%c0_31, %c0_32], %59 {strides = array<i32>} : memref<64x64xf32, #tpu.memory_space<vmem>>, vector<64x16xf32>,
      %c0_33 = arith.constant 0 : index
      %c0_34 = arith.constant 0 : index
      %c0_35 = arith.constant 0 : index
      %61 = vector.load %arg9[%c0_33, %c0_34, %c0_35] : memref<4x64x1xf32, #tpu.memory_space<vmem>>, vector<1x64x1xf32>
      %62 = vector.shape_cast %61 : vector<1x64x1xf32> to vector<64x1xf32>
      %63 = vector.shape_cast %36 : vector<64x1xf32> to vector<1x64x1xf32>
      tpu.vector_store %arg9[%c0_33, %c0_34, %c0_35], %63 {strides = array<i32>} : memref<4x64x1xf32, #tpu.memory_space<vmem>>, vector<1x64x1xf32>,
      %64 = vector.extract_strided_slice %13 {offsets = [0, 16], sizes = [64, 16], strides = [1, 1]} : vector<64x64xbf16> to vector<64x16xbf16>
      %65 = vector.extract_strided_slice %15 {offsets = [0, 16], sizes = [64, 16], strides = [1, 1]} : vector<64x64xbf16> to vector<64x16xbf16>
      %cst_36 = arith.constant dense<0.000000e+00> : vector<64x64xf32>
      %66 = tpu.matmul %64, %65, %cst_36 {dimension_numbers = #tpu.dot_dimension_numbers<[1], [1], [0], [0], [0, 0, 1, 0], [], []>} : vector<64x16xbf16>, vector<64x16xbf16>, vector<64x64xf32> -> vector<64x64xf32>
      %cst_37 = arith.constant 2.500000e-01 : f32
      %67 = vector.broadcast %cst_37 : f32 to vector<64x64xf32>
      %68 = arith.mulf %66, %67 : vector<64x64xf32>
      %cst_38 = arith.constant -1.000000e+30 : f32
      %69 = vector.broadcast %cst_38 : f32 to vector<64x64xf32>
      %70 = arith.select %24, %68, %69 : vector<64x64xi1>, vector<64x64xf32>
      %c1 = arith.constant 1 : index
      %c0_39 = arith.constant 0 : index
      %c0_40 = arith.constant 0 : index
      %71 = vector.load %arg9[%c1, %c0_39, %c0_40] : memref<4x64x1xf32, #tpu.memory_space<vmem>>, vector<1x64x1xf32>
      %72 = vector.shape_cast %71 : vector<1x64x1xf32> to vector<64x1xf32>
      %cst_41 = arith.constant dense<0xFF800000> : vector<64xf32>
      %73 = vector.multi_reduction <maximumf>, %70, %cst_41 [1] : vector<64x64xf32> to vector<64xf32>
      %74 = vector.shape_cast %73 : vector<64xf32> to vector<64x1xf32>
      %75 = arith.maximumf %72, %74 : vector<64x1xf32>
      %76 = arith.subf %72, %75 : vector<64x1xf32>
      %77 = math.exp %76 : vector<64x1xf32>
      %78 = vector.broadcast %75 : vector<64x1xf32> to vector<64x64xf32>
      %79 = arith.subf %70, %78 : vector<64x64xf32>
      %80 = math.exp %79 : vector<64x64xf32>
      %cst_42 = arith.constant 0.000000e+00 : f32
      %81 = vector.broadcast %cst_42 : f32 to vector<64x64xf32>
      %82 = arith.select %24, %80, %81 : vector<64x64xi1>, vector<64x64xf32>
      %c1_43 = arith.constant 1 : index
      %c0_44 = arith.constant 0 : index
      %c0_45 = arith.constant 0 : index
      %83 = vector.load %arg10[%c1_43, %c0_44, %c0_45] : memref<4x64x1xf32, #tpu.memory_space<vmem>>, vector<1x64x1xf32>
      %84 = vector.shape_cast %83 : vector<1x64x1xf32> to vector<64x1xf32>
      %85 = arith.mulf %77, %84 : vector<64x1xf32>
      %cst_46 = arith.constant dense<0.000000e+00> : vector<64xf32>
      %86 = vector.multi_reduction <add>, %82, %cst_46 [1] : vector<64x64xf32> to vector<64xf32>
      %87 = vector.shape_cast %86 : vector<64xf32> to vector<64x1xf32>
      %88 = arith.addf %85, %87 : vector<64x1xf32>
      %c1_47 = arith.constant 1 : index
      %c0_48 = arith.constant 0 : index
      %c0_49 = arith.constant 0 : index
      %89 = vector.load %arg10[%c1_47, %c0_48, %c0_49] : memref<4x64x1xf32, #tpu.memory_space<vmem>>, vector<1x64x1xf32>
      %90 = vector.shape_cast %89 : vector<1x64x1xf32> to vector<64x1xf32>
      %91 = vector.shape_cast %88 : vector<64x1xf32> to vector<1x64x1xf32>
      tpu.vector_store %arg10[%c1_47, %c0_48, %c0_49], %91 {strides = array<i32>} : memref<4x64x1xf32, #tpu.memory_space<vmem>>, vector<1x64x1xf32>,
      %c0_50 = arith.constant 0 : index
      %c16 = arith.constant 16 : index
      %92 = vector.load %arg11[%c0_50, %c16] : memref<64x64xf32, #tpu.memory_space<vmem>>, vector<64x16xf32>
      %93 = vector.broadcast %77 : vector<64x1xf32> to vector<64x16xf32>
      %94 = arith.mulf %93, %92 : vector<64x16xf32>
      %95 = arith.truncf %82 : vector<64x64xf32> to vector<64x64xbf16>
      %96 = vector.extract_strided_slice %17 {offsets = [0, 16], sizes = [64, 16], strides = [1, 1]} : vector<64x64xbf16> to vector<64x16xbf16>
      %cst_51 = arith.constant dense<0.000000e+00> : vector<64x16xf32>
      %97 = tpu.matmul %95, %96, %cst_51 {dimension_numbers = #tpu.dot_dimension_numbers<[1], [0], [0], [1], [0, 0, 1, 1], [], []>} : vector<64x64xbf16>, vector<64x16xbf16>, vector<64x16xf32> -> vector<64x16xf32>
      %98 = arith.addf %94, %97 : vector<64x16xf32>
      %c0_52 = arith.constant 0 : index
      %c16_53 = arith.constant 16 : index
      %99 = vector.load %arg11[%c0_52, %c16_53] : memref<64x64xf32, #tpu.memory_space<vmem>>, vector<64x16xf32>
      tpu.vector_store %arg11[%c0_52, %c16_53], %98 {strides = array<i32>} : memref<64x64xf32, #tpu.memory_space<vmem>>, vector<64x16xf32>,
      %c1_54 = arith.constant 1 : index
      %c0_55 = arith.constant 0 : index
      %c0_56 = arith.constant 0 : index
      %100 = vector.load %arg9[%c1_54, %c0_55, %c0_56] : memref<4x64x1xf32, #tpu.memory_space<vmem>>, vector<1x64x1xf32>
      %101 = vector.shape_cast %100 : vector<1x64x1xf32> to vector<64x1xf32>
      %102 = vector.shape_cast %75 : vector<64x1xf32> to vector<1x64x1xf32>
      tpu.vector_store %arg9[%c1_54, %c0_55, %c0_56], %102 {strides = array<i32>} : memref<4x64x1xf32, #tpu.memory_space<vmem>>, vector<1x64x1xf32>,
      %103 = vector.extract_strided_slice %13 {offsets = [0, 32], sizes = [64, 16], strides = [1, 1]} : vector<64x64xbf16> to vector<64x16xbf16>
      %104 = vector.extract_strided_slice %15 {offsets = [0, 32], sizes = [64, 16], strides = [1, 1]} : vector<64x64xbf16> to vector<64x16xbf16>
      %cst_57 = arith.constant dense<0.000000e+00> : vector<64x64xf32>
      %105 = tpu.matmul %103, %104, %cst_57 {dimension_numbers = #tpu.dot_dimension_numbers<[1], [1], [0], [0], [0, 0, 1, 0], [], []>} : vector<64x16xbf16>, vector<64x16xbf16>, vector<64x64xf32> -> vector<64x64xf32>
      %cst_58 = arith.constant 2.500000e-01 : f32
      %106 = vector.broadcast %cst_58 : f32 to vector<64x64xf32>
      %107 = arith.mulf %105, %106 : vector<64x64xf32>
      %cst_59 = arith.constant -1.000000e+30 : f32
      %108 = vector.broadcast %cst_59 : f32 to vector<64x64xf32>
      %109 = arith.select %24, %107, %108 : vector<64x64xi1>, vector<64x64xf32>
      %c2 = arith.constant 2 : index
      %c0_60 = arith.constant 0 : index
      %c0_61 = arith.constant 0 : index
      %110 = vector.load %arg9[%c2, %c0_60, %c0_61] : memref<4x64x1xf32, #tpu.memory_space<vmem>>, vector<1x64x1xf32>
      %111 = vector.shape_cast %110 : vector<1x64x1xf32> to vector<64x1xf32>
      %cst_62 = arith.constant dense<0xFF800000> : vector<64xf32>
      %112 = vector.multi_reduction <maximumf>, %109, %cst_62 [1] : vector<64x64xf32> to vector<64xf32>
      %113 = vector.shape_cast %112 : vector<64xf32> to vector<64x1xf32>
      %114 = arith.maximumf %111, %113 : vector<64x1xf32>
      %115 = arith.subf %111, %114 : vector<64x1xf32>
      %116 = math.exp %115 : vector<64x1xf32>
      %117 = vector.broadcast %114 : vector<64x1xf32> to vector<64x64xf32>
      %118 = arith.subf %109, %117 : vector<64x64xf32>
      %119 = math.exp %118 : vector<64x64xf32>
      %cst_63 = arith.constant 0.000000e+00 : f32
      %120 = vector.broadcast %cst_63 : f32 to vector<64x64xf32>
      %121 = arith.select %24, %119, %120 : vector<64x64xi1>, vector<64x64xf32>
      %c2_64 = arith.constant 2 : index
      %c0_65 = arith.constant 0 : index
      %c0_66 = arith.constant 0 : index
      %122 = vector.load %arg10[%c2_64, %c0_65, %c0_66] : memref<4x64x1xf32, #tpu.memory_space<vmem>>, vector<1x64x1xf32>
      %123 = vector.shape_cast %122 : vector<1x64x1xf32> to vector<64x1xf32>
      %124 = arith.mulf %116, %123 : vector<64x1xf32>
      %cst_67 = arith.constant dense<0.000000e+00> : vector<64xf32>
      %125 = vector.multi_reduction <add>, %121, %cst_67 [1] : vector<64x64xf32> to vector<64xf32>
      %126 = vector.shape_cast %125 : vector<64xf32> to vector<64x1xf32>
      %127 = arith.addf %124, %126 : vector<64x1xf32>
      %c2_68 = arith.constant 2 : index
      %c0_69 = arith.constant 0 : index
      %c0_70 = arith.constant 0 : index
      %128 = vector.load %arg10[%c2_68, %c0_69, %c0_70] : memref<4x64x1xf32, #tpu.memory_space<vmem>>, vector<1x64x1xf32>
      %129 = vector.shape_cast %128 : vector<1x64x1xf32> to vector<64x1xf32>
      %130 = vector.shape_cast %127 : vector<64x1xf32> to vector<1x64x1xf32>
      tpu.vector_store %arg10[%c2_68, %c0_69, %c0_70], %130 {strides = array<i32>} : memref<4x64x1xf32, #tpu.memory_space<vmem>>, vector<1x64x1xf32>,
      %c0_71 = arith.constant 0 : index
      %c32 = arith.constant 32 : index
      %131 = vector.load %arg11[%c0_71, %c32] : memref<64x64xf32, #tpu.memory_space<vmem>>, vector<64x16xf32>
      %132 = vector.broadcast %116 : vector<64x1xf32> to vector<64x16xf32>
      %133 = arith.mulf %132, %131 : vector<64x16xf32>
      %134 = arith.truncf %121 : vector<64x64xf32> to vector<64x64xbf16>
      %135 = vector.extract_strided_slice %17 {offsets = [0, 32], sizes = [64, 16], strides = [1, 1]} : vector<64x64xbf16> to vector<64x16xbf16>
      %cst_72 = arith.constant dense<0.000000e+00> : vector<64x16xf32>
      %136 = tpu.matmul %134, %135, %cst_72 {dimension_numbers = #tpu.dot_dimension_numbers<[1], [0], [0], [1], [0, 0, 1, 1], [], []>} : vector<64x64xbf16>, vector<64x16xbf16>, vector<64x16xf32> -> vector<64x16xf32>
      %137 = arith.addf %133, %136 : vector<64x16xf32>
      %c0_73 = arith.constant 0 : index
      %c32_74 = arith.constant 32 : index
      %138 = vector.load %arg11[%c0_73, %c32_74] : memref<64x64xf32, #tpu.memory_space<vmem>>, vector<64x16xf32>
      tpu.vector_store %arg11[%c0_73, %c32_74], %137 {strides = array<i32>} : memref<64x64xf32, #tpu.memory_space<vmem>>, vector<64x16xf32>,
      %c2_75 = arith.constant 2 : index
      %c0_76 = arith.constant 0 : index
      %c0_77 = arith.constant 0 : index
      %139 = vector.load %arg9[%c2_75, %c0_76, %c0_77] : memref<4x64x1xf32, #tpu.memory_space<vmem>>, vector<1x64x1xf32>
      %140 = vector.shape_cast %139 : vector<1x64x1xf32> to vector<64x1xf32>
      %141 = vector.shape_cast %114 : vector<64x1xf32> to vector<1x64x1xf32>
      tpu.vector_store %arg9[%c2_75, %c0_76, %c0_77], %141 {strides = array<i32>} : memref<4x64x1xf32, #tpu.memory_space<vmem>>, vector<1x64x1xf32>,
      %142 = vector.extract_strided_slice %13 {offsets = [0, 48], sizes = [64, 16], strides = [1, 1]} : vector<64x64xbf16> to vector<64x16xbf16>
      %143 = vector.extract_strided_slice %15 {offsets = [0, 48], sizes = [64, 16], strides = [1, 1]} : vector<64x64xbf16> to vector<64x16xbf16>
      %cst_78 = arith.constant dense<0.000000e+00> : vector<64x64xf32>
      %144 = tpu.matmul %142, %143, %cst_78 {dimension_numbers = #tpu.dot_dimension_numbers<[1], [1], [0], [0], [0, 0, 1, 0], [], []>} : vector<64x16xbf16>, vector<64x16xbf16>, vector<64x64xf32> -> vector<64x64xf32>
      %cst_79 = arith.constant 2.500000e-01 : f32
      %145 = vector.broadcast %cst_79 : f32 to vector<64x64xf32>
      %146 = arith.mulf %144, %145 : vector<64x64xf32>
      %cst_80 = arith.constant -1.000000e+30 : f32
      %147 = vector.broadcast %cst_80 : f32 to vector<64x64xf32>
      %148 = arith.select %24, %146, %147 : vector<64x64xi1>, vector<64x64xf32>
      %c3 = arith.constant 3 : index
      %c0_81 = arith.constant 0 : index
      %c0_82 = arith.constant 0 : index
      %149 = vector.load %arg9[%c3, %c0_81, %c0_82] : memref<4x64x1xf32, #tpu.memory_space<vmem>>, vector<1x64x1xf32>
      %150 = vector.shape_cast %149 : vector<1x64x1xf32> to vector<64x1xf32>
      %cst_83 = arith.constant dense<0xFF800000> : vector<64xf32>
      %151 = vector.multi_reduction <maximumf>, %148, %cst_83 [1] : vector<64x64xf32> to vector<64xf32>
      %152 = vector.shape_cast %151 : vector<64xf32> to vector<64x1xf32>
      %153 = arith.maximumf %150, %152 : vector<64x1xf32>
      %154 = arith.subf %150, %153 : vector<64x1xf32>
      %155 = math.exp %154 : vector<64x1xf32>
      %156 = vector.broadcast %153 : vector<64x1xf32> to vector<64x64xf32>
      %157 = arith.subf %148, %156 : vector<64x64xf32>
      %158 = math.exp %157 : vector<64x64xf32>
      %cst_84 = arith.constant 0.000000e+00 : f32
      %159 = vector.broadcast %cst_84 : f32 to vector<64x64xf32>
      %160 = arith.select %24, %158, %159 : vector<64x64xi1>, vector<64x64xf32>
      %c3_85 = arith.constant 3 : index
      %c0_86 = arith.constant 0 : index
      %c0_87 = arith.constant 0 : index
      %161 = vector.load %arg10[%c3_85, %c0_86, %c0_87] : memref<4x64x1xf32, #tpu.memory_space<vmem>>, vector<1x64x1xf32>
      %162 = vector.shape_cast %161 : vector<1x64x1xf32> to vector<64x1xf32>
      %163 = arith.mulf %155, %162 : vector<64x1xf32>
      %cst_88 = arith.constant dense<0.000000e+00> : vector<64xf32>
      %164 = vector.multi_reduction <add>, %160, %cst_88 [1] : vector<64x64xf32> to vector<64xf32>
      %165 = vector.shape_cast %164 : vector<64xf32> to vector<64x1xf32>
      %166 = arith.addf %163, %165 : vector<64x1xf32>
      %c3_89 = arith.constant 3 : index
      %c0_90 = arith.constant 0 : index
      %c0_91 = arith.constant 0 : index
      %167 = vector.load %arg10[%c3_89, %c0_90, %c0_91] : memref<4x64x1xf32, #tpu.memory_space<vmem>>, vector<1x64x1xf32>
      %168 = vector.shape_cast %167 : vector<1x64x1xf32> to vector<64x1xf32>
      %169 = vector.shape_cast %166 : vector<64x1xf32> to vector<1x64x1xf32>
      tpu.vector_store %arg10[%c3_89, %c0_90, %c0_91], %169 {strides = array<i32>} : memref<4x64x1xf32, #tpu.memory_space<vmem>>, vector<1x64x1xf32>,
      %c0_92 = arith.constant 0 : index
      %c48 = arith.constant 48 : index
      %170 = vector.load %arg11[%c0_92, %c48] : memref<64x64xf32, #tpu.memory_space<vmem>>, vector<64x16xf32>
      %171 = vector.broadcast %155 : vector<64x1xf32> to vector<64x16xf32>
      %172 = arith.mulf %171, %170 : vector<64x16xf32>
      %173 = arith.truncf %160 : vector<64x64xf32> to vector<64x64xbf16>
      %174 = vector.extract_strided_slice %17 {offsets = [0, 48], sizes = [64, 16], strides = [1, 1]} : vector<64x64xbf16> to vector<64x16xbf16>
      %cst_93 = arith.constant dense<0.000000e+00> : vector<64x16xf32>
      %175 = tpu.matmul %173, %174, %cst_93 {dimension_numbers = #tpu.dot_dimension_numbers<[1], [0], [0], [1], [0, 0, 1, 1], [], []>} : vector<64x64xbf16>, vector<64x16xbf16>, vector<64x16xf32> -> vector<64x16xf32>
      %176 = arith.addf %172, %175 : vector<64x16xf32>
      %c0_94 = arith.constant 0 : index
      %c48_95 = arith.constant 48 : index
      %177 = vector.load %arg11[%c0_94, %c48_95] : memref<64x64xf32, #tpu.memory_space<vmem>>, vector<64x16xf32>
      tpu.vector_store %arg11[%c0_94, %c48_95], %176 {strides = array<i32>} : memref<64x64xf32, #tpu.memory_space<vmem>>, vector<64x16xf32>,
      %c3_96 = arith.constant 3 : index
      %c0_97 = arith.constant 0 : index
      %c0_98 = arith.constant 0 : index
      %178 = vector.load %arg9[%c3_96, %c0_97, %c0_98] : memref<4x64x1xf32, #tpu.memory_space<vmem>>, vector<1x64x1xf32>
      %179 = vector.shape_cast %178 : vector<1x64x1xf32> to vector<64x1xf32>
      %180 = vector.shape_cast %153 : vector<64x1xf32> to vector<1x64x1xf32>
      tpu.vector_store %arg9[%c3_96, %c0_97, %c0_98], %180 {strides = array<i32>} : memref<4x64x1xf32, #tpu.memory_space<vmem>>, vector<1x64x1xf32>,
    } else {
    }
    %c0_i32_4 = arith.constant 0 : i32
    %9 = arith.cmpi eq, %arg2, %c0_i32_4 : i32
    %10 = arith.extui %9 : i1 to i32
    %c0_i32_5 = arith.constant 0 : i32
    %11 = arith.cmpi ne, %10, %c0_i32_5 : i32
    scf.if %11 {
      %c0 = arith.constant 0 : index
      %c0_6 = arith.constant 0 : index
      %12 = vector.load %arg11[%c0, %c0_6] : memref<64x64xf32, #tpu.memory_space<vmem>>, vector<64x16xf32>
      %c0_7 = arith.constant 0 : index
      %c0_8 = arith.constant 0 : index
      %c0_9 = arith.constant 0 : index
      %13 = vector.load %arg10[%c0_7, %c0_8, %c0_9] : memref<4x64x1xf32, #tpu.memory_space<vmem>>, vector<1x64x1xf32>
      %14 = vector.shape_cast %13 : vector<1x64x1xf32> to vector<64x1xf32>
      %15 = tpu.reciprocal %14 {approx = true} : vector<64x1xf32> -> vector<64x1xf32>
      %16 = vector.broadcast %15 : vector<64x1xf32> to vector<64x16xf32>
      %17 = arith.mulf %12, %16 : vector<64x16xf32>
      %c0_10 = arith.constant 0 : index
      %c16 = arith.constant 16 : index
      %18 = vector.load %arg11[%c0_10, %c16] : memref<64x64xf32, #tpu.memory_space<vmem>>, vector<64x16xf32>
      %c1 = arith.constant 1 : index
      %c0_11 = arith.constant 0 : index
      %c0_12 = arith.constant 0 : index
      %19 = vector.load %arg10[%c1, %c0_11, %c0_12] : memref<4x64x1xf32, #tpu.memory_space<vmem>>, vector<1x64x1xf32>
      %20 = vector.shape_cast %19 : vector<1x64x1xf32> to vector<64x1xf32>
      %21 = tpu.reciprocal %20 {approx = true} : vector<64x1xf32> -> vector<64x1xf32>
      %22 = vector.broadcast %21 : vector<64x1xf32> to vector<64x16xf32>
      %23 = arith.mulf %18, %22 : vector<64x16xf32>
      %c0_13 = arith.constant 0 : index
      %c32 = arith.constant 32 : index
      %24 = vector.load %arg11[%c0_13, %c32] : memref<64x64xf32, #tpu.memory_space<vmem>>, vector<64x16xf32>
      %c2 = arith.constant 2 : index
      %c0_14 = arith.constant 0 : index
      %c0_15 = arith.constant 0 : index
      %25 = vector.load %arg10[%c2, %c0_14, %c0_15] : memref<4x64x1xf32, #tpu.memory_space<vmem>>, vector<1x64x1xf32>
      %26 = vector.shape_cast %25 : vector<1x64x1xf32> to vector<64x1xf32>
      %27 = tpu.reciprocal %26 {approx = true} : vector<64x1xf32> -> vector<64x1xf32>
      %28 = vector.broadcast %27 : vector<64x1xf32> to vector<64x16xf32>
      %29 = arith.mulf %24, %28 : vector<64x16xf32>
      %c0_16 = arith.constant 0 : index
      %c48 = arith.constant 48 : index
      %30 = vector.load %arg11[%c0_16, %c48] : memref<64x64xf32, #tpu.memory_space<vmem>>, vector<64x16xf32>
      %c3 = arith.constant 3 : index
      %c0_17 = arith.constant 0 : index
      %c0_18 = arith.constant 0 : index
      %31 = vector.load %arg10[%c3, %c0_17, %c0_18] : memref<4x64x1xf32, #tpu.memory_space<vmem>>, vector<1x64x1xf32>
      %32 = vector.shape_cast %31 : vector<1x64x1xf32> to vector<64x1xf32>
      %33 = tpu.reciprocal %32 {approx = true} : vector<64x1xf32> -> vector<64x1xf32>
      %34 = vector.broadcast %33 : vector<64x1xf32> to vector<64x16xf32>
      %35 = arith.mulf %30, %34 : vector<64x16xf32>
      %36 = tpu.concatenate %17, %23, %29, %35 in 1 : vector<64x16xf32>, vector<64x16xf32>, vector<64x16xf32>, vector<64x16xf32> -> vector<64x64xf32>
      %37 = arith.truncf %36 : vector<64x64xf32> to vector<64x64xbf16>
      %c0_19 = arith.constant 0 : index
      %c0_20 = arith.constant 0 : index
      %38 = vector.load %arg6[%c0_19, %c0_20] : memref<64x64xbf16, #tpu.memory_space<vmem>>, vector<64x64xbf16>
      %cst = arith.constant dense<0.000000e+00> : vector<64x64xf32>
      %39 = tpu.matmul %37, %38, %cst {dimension_numbers = #tpu.dot_dimension_numbers<[1], [0], [0], [1], [0, 0, 1, 1], [], []>} : vector<64x64xbf16>, vector<64x64xbf16>, vector<64x64xf32> -> vector<64x64xf32>
      %c0_21 = arith.constant 0 : index
      %c0_22 = arith.constant 0 : index
      %c0_23 = arith.constant 0 : index
      %40 = vector.load %arg7[%c0_21, %c0_22, %c0_23] : memref<1x64x64xbf16, #tpu.memory_space<vmem>>, vector<1x64x64xbf16>
      %41 = vector.shape_cast %40 : vector<1x64x64xbf16> to vector<64x64xbf16>
      %42 = arith.extf %41 : vector<64x64xbf16> to vector<64x64xf32>
      %43 = arith.addf %39, %42 : vector<64x64xf32>
      %44 = arith.truncf %43 : vector<64x64xf32> to vector<64x64xbf16>
      %c0_24 = arith.constant 0 : index
      %c0_25 = arith.constant 0 : index
      %c0_26 = arith.constant 0 : index
      %45 = vector.load %arg8[%c0_24, %c0_25, %c0_26] : memref<1x64x64xbf16, #tpu.memory_space<vmem>>, vector<1x64x64xbf16>
      %46 = vector.shape_cast %45 : vector<1x64x64xbf16> to vector<64x64xbf16>
      %47 = vector.shape_cast %44 : vector<64x64xbf16> to vector<1x64x64xbf16>
      tpu.vector_store %arg8[%c0_24, %c0_25, %c0_26], %47 {strides = array<i32>} : memref<1x64x64xbf16, #tpu.memory_space<vmem>>, vector<1x64x64xbf16>,
    } else {
    }
    return
  }
  func.func @transform_0(%arg0: i32, %arg1: i32, %arg2: i32) -> (i32, i32, i32) {
    %c0_i32 = arith.constant 0 : i32
    %c0_i32_0 = arith.constant 0 : i32
    return %arg0, %arg1, %c0_i32 : i32, i32, i32
  }
  func.func @transform_1(%arg0: i32, %arg1: i32, %arg2: i32) -> (i32, i32, i32) {
    %c0_i32 = arith.constant 0 : i32
    %c0_i32_0 = arith.constant 0 : i32
    return %arg0, %arg2, %c0_i32 : i32, i32, i32
  }
  func.func @transform_2(%arg0: i32, %arg1: i32, %arg2: i32) -> (i32, i32, i32) {
    %c0_i32 = arith.constant 0 : i32
    %c0_i32_0 = arith.constant 0 : i32
    return %arg0, %arg2, %c0_i32 : i32, i32, i32
  }
  func.func @transform_3(%arg0: i32, %arg1: i32, %arg2: i32) -> (i32, i32) {
    %c0_i32 = arith.constant 0 : i32
    %c0_i32_0 = arith.constant 0 : i32
    %c0_i32_1 = arith.constant 0 : i32
    return %c0_i32, %c0_i32_0 : i32, i32
  }
  func.func @transform_4(%arg0: i32, %arg1: i32, %arg2: i32) -> (i32, i32, i32) {
    %c0_i32 = arith.constant 0 : i32
    %c0_i32_0 = arith.constant 0 : i32
    return %arg0, %arg1, %c0_i32 : i32, i32, i32
  }
  func.func @transform_5(%arg0: i32, %arg1: i32, %arg2: i32) -> (i32, i32, i32) {
    %c0_i32 = arith.constant 0 : i32
    %c0_i32_0 = arith.constant 0 : i32
    return %arg0, %arg1, %c0_i32 : i32, i32, i32
  }
}

module attributes {stable_mosaic.version = 11 : i64} {
  func.func @_ff_kernel(%arg0: i32, %arg1: i32, %arg2: memref<128x64xbf16, #tpu.memory_space<vmem>>, %arg3: memref<1x64xf32, #tpu.memory_space<vmem>>, %arg4: memref<64x128xbf16, #tpu.memory_space<vmem>>, %arg5: memref<64x128xbf16, #tpu.memory_space<vmem>>, %arg6: memref<128x64xbf16, #tpu.memory_space<vmem>>, %arg7: memref<128x64xbf16, #tpu.memory_space<vmem>>, %arg8: memref<128x64xbf16, #tpu.memory_space<vmem>>, %arg9: memref<128x64xf32, #tpu.memory_space<vmem>>) attributes {dimension_semantics = [#tpu.dimension_semantics<parallel>, #tpu.dimension_semantics<arbitrary>], iteration_bounds = array<i64: 1, 1>, scalar_prefetch = 0 : i64, scratch_operands = 2 : i64, tpu.core_type = #tpu.core_type<tc>, window_params = [{transform_indices = @transform_0, window_bounds = array<i64: 128, 64>}, {pipeline_mode = #tpu.pipeline_mode<synchronous>, transform_indices = @transform_1, window_bounds = array<i64: 1, 64>}, {transform_indices = @transform_2, window_bounds = array<i64: 64, 128>}, {transform_indices = @transform_3, window_bounds = array<i64: 64, 128>}, {transform_indices = @transform_4, window_bounds = array<i64: 128, 64>}, {transform_indices = @transform_5, window_bounds = array<i64: 128, 64>}]} {
    %c0_i32 = arith.constant 0 : i32
    %0 = arith.cmpi eq, %arg1, %c0_i32 : i32
    %1 = arith.extui %0 : i1 to i32
    %c0_i32_0 = arith.constant 0 : i32
    %2 = arith.cmpi ne, %1, %c0_i32_0 : i32
    scf.if %2 {
      %c0_17 = arith.constant 0 : index
      %c0_18 = arith.constant 0 : index
      %24 = vector.load %arg2[%c0_17, %c0_18] : memref<128x64xbf16, #tpu.memory_space<vmem>>, vector<128x64xbf16>
      %25 = arith.extf %24 : vector<128x64xbf16> to vector<128x64xf32>
      %26 = arith.mulf %25, %25 : vector<128x64xf32>
      %cst_19 = arith.constant dense<0.000000e+00> : vector<128xf32>
      %27 = vector.multi_reduction <add>, %26, %cst_19 [1] : vector<128x64xf32> to vector<128xf32>
      %28 = vector.shape_cast %27 : vector<128xf32> to vector<128x1xf32>
      %cst_20 = arith.constant 6.400000e+01 : f32
      %29 = vector.broadcast %cst_20 : f32 to vector<128x1xf32>
      %30 = arith.divf %28, %29 : vector<128x1xf32>
      %c0_21 = arith.constant 0 : index
      %c0_22 = arith.constant 0 : index
      %31 = vector.load %arg3[%c0_21, %c0_22] : memref<1x64xf32, #tpu.memory_space<vmem>>, vector<1x64xf32>
      %cst_23 = arith.constant 9.99999997E-7 : f32
      %32 = vector.broadcast %cst_23 : f32 to vector<128x1xf32>
      %33 = arith.addf %30, %32 : vector<128x1xf32>
      %34 = math.rsqrt %33 : vector<128x1xf32>
      %35 = vector.broadcast %31 : vector<1x64xf32> to vector<128x64xf32>
      %36 = vector.broadcast %34 : vector<128x1xf32> to vector<128x64xf32>
      %37 = arith.mulf %35, %36 : vector<128x64xf32>
      %38 = arith.mulf %25, %37 : vector<128x64xf32>
      %39 = arith.truncf %38 : vector<128x64xf32> to vector<128x64xbf16>
      %c0_24 = arith.constant 0 : index
      %c0_25 = arith.constant 0 : index
      %40 = vector.load %arg8[%c0_24, %c0_25] : memref<128x64xbf16, #tpu.memory_space<vmem>>, vector<128x64xbf16>
      tpu.vector_store %arg8[%c0_24, %c0_25], %39 {strides = array<i32>} : memref<128x64xbf16, #tpu.memory_space<vmem>>, vector<128x64xbf16>,
      %c0_26 = arith.constant 0 : index
      %c0_27 = arith.constant 0 : index
      %41 = vector.load %arg9[%c0_26, %c0_27] : memref<128x64xf32, #tpu.memory_space<vmem>>, vector<128x64xf32>
      tpu.vector_store %arg9[%c0_26, %c0_27], %25 {strides = array<i32>} : memref<128x64xf32, #tpu.memory_space<vmem>>, vector<128x64xf32>,
    } else {
    }
    %c0 = arith.constant 0 : index
    %c0_1 = arith.constant 0 : index
    %3 = vector.load %arg8[%c0, %c0_1] : memref<128x64xbf16, #tpu.memory_space<vmem>>, vector<128x64xbf16>
    %c0_2 = arith.constant 0 : index
    %c0_3 = arith.constant 0 : index
    %4 = vector.load %arg4[%c0_2, %c0_3] : memref<64x128xbf16, #tpu.memory_space<vmem>>, vector<64x128xbf16>
    %cst = arith.constant dense<0.000000e+00> : vector<128x128xf32>
    %5 = tpu.matmul %3, %4, %cst {dimension_numbers = #tpu.dot_dimension_numbers<[1], [0], [0], [1], [0, 0, 1, 1], [], []>} : vector<128x64xbf16>, vector<64x128xbf16>, vector<128x128xf32> -> vector<128x128xf32>
    %c0_4 = arith.constant 0 : index
    %c0_5 = arith.constant 0 : index
    %6 = vector.load %arg5[%c0_4, %c0_5] : memref<64x128xbf16, #tpu.memory_space<vmem>>, vector<64x128xbf16>
    %cst_6 = arith.constant dense<0.000000e+00> : vector<128x128xf32>
    %7 = tpu.matmul %3, %6, %cst_6 {dimension_numbers = #tpu.dot_dimension_numbers<[1], [0], [0], [1], [0, 0, 1, 1], [], []>} : vector<128x64xbf16>, vector<64x128xbf16>, vector<128x128xf32> -> vector<128x128xf32>
    %8 = arith.negf %7 : vector<128x128xf32>
    %9 = math.exp %8 : vector<128x128xf32>
    %cst_7 = arith.constant 1.000000e+00 : f32
    %10 = vector.broadcast %cst_7 : f32 to vector<128x128xf32>
    %11 = arith.addf %10, %9 : vector<128x128xf32>
    %12 = arith.divf %10, %11 : vector<128x128xf32>
    %13 = arith.mulf %7, %12 : vector<128x128xf32>
    %14 = arith.mulf %5, %13 : vector<128x128xf32>
    %c0_8 = arith.constant 0 : index
    %c0_9 = arith.constant 0 : index
    %15 = vector.load %arg9[%c0_8, %c0_9] : memref<128x64xf32, #tpu.memory_space<vmem>>, vector<128x64xf32>
    %16 = arith.truncf %14 : vector<128x128xf32> to vector<128x128xbf16>
    %c0_10 = arith.constant 0 : index
    %c0_11 = arith.constant 0 : index
    %17 = vector.load %arg6[%c0_10, %c0_11] : memref<128x64xbf16, #tpu.memory_space<vmem>>, vector<128x64xbf16>
    %cst_12 = arith.constant dense<0.000000e+00> : vector<128x64xf32>
    %18 = tpu.matmul %16, %17, %cst_12 {dimension_numbers = #tpu.dot_dimension_numbers<[1], [0], [0], [1], [0, 0, 1, 1], [], []>} : vector<128x128xbf16>, vector<128x64xbf16>, vector<128x64xf32> -> vector<128x64xf32>
    %19 = arith.addf %15, %18 : vector<128x64xf32>
    %c0_13 = arith.constant 0 : index
    %c0_14 = arith.constant 0 : index
    %20 = vector.load %arg9[%c0_13, %c0_14] : memref<128x64xf32, #tpu.memory_space<vmem>>, vector<128x64xf32>
    tpu.vector_store %arg9[%c0_13, %c0_14], %19 {strides = array<i32>} : memref<128x64xf32, #tpu.memory_space<vmem>>, vector<128x64xf32>,
    %c0_i32_15 = arith.constant 0 : i32
    %21 = arith.cmpi eq, %arg1, %c0_i32_15 : i32
    %22 = arith.extui %21 : i1 to i32
    %c0_i32_16 = arith.constant 0 : i32
    %23 = arith.cmpi ne, %22, %c0_i32_16 : i32
    scf.if %23 {
      %c0_17 = arith.constant 0 : index
      %c0_18 = arith.constant 0 : index
      %24 = vector.load %arg9[%c0_17, %c0_18] : memref<128x64xf32, #tpu.memory_space<vmem>>, vector<128x64xf32>
      %25 = arith.truncf %24 : vector<128x64xf32> to vector<128x64xbf16>
      %c0_19 = arith.constant 0 : index
      %c0_20 = arith.constant 0 : index
      %26 = vector.load %arg7[%c0_19, %c0_20] : memref<128x64xbf16, #tpu.memory_space<vmem>>, vector<128x64xbf16>
      tpu.vector_store %arg7[%c0_19, %c0_20], %25 {strides = array<i32>} : memref<128x64xbf16, #tpu.memory_space<vmem>>, vector<128x64xbf16>,
    } else {
    }
    return
  }
  func.func @transform_0(%arg0: i32, %arg1: i32) -> (i32, i32) {
    %c0_i32 = arith.constant 0 : i32
    %c0_i32_0 = arith.constant 0 : i32
    return %arg0, %c0_i32 : i32, i32
  }
  func.func @transform_1(%arg0: i32, %arg1: i32) -> (i32, i32) {
    %c0_i32 = arith.constant 0 : i32
    %c0_i32_0 = arith.constant 0 : i32
    %c0_i32_1 = arith.constant 0 : i32
    return %c0_i32, %c0_i32_0 : i32, i32
  }
  func.func @transform_2(%arg0: i32, %arg1: i32) -> (i32, i32) {
    %c0_i32 = arith.constant 0 : i32
    %c0_i32_0 = arith.constant 0 : i32
    return %c0_i32, %arg1 : i32, i32
  }
  func.func @transform_3(%arg0: i32, %arg1: i32) -> (i32, i32) {
    %c0_i32 = arith.constant 0 : i32
    %c0_i32_0 = arith.constant 0 : i32
    return %c0_i32, %arg1 : i32, i32
  }
  func.func @transform_4(%arg0: i32, %arg1: i32) -> (i32, i32) {
    %c0_i32 = arith.constant 0 : i32
    %c0_i32_0 = arith.constant 0 : i32
    return %arg1, %c0_i32 : i32, i32
  }
  func.func @transform_5(%arg0: i32, %arg1: i32) -> (i32, i32) {
    %c0_i32 = arith.constant 0 : i32
    %c0_i32_0 = arith.constant 0 : i32
    return %arg0, %c0_i32 : i32, i32
  }
}

</mosaic_0001>

<bundles_post_ra>
// kernel: block_forward.5
= control target key start
LH: loop header
LB: loop body
LE: loop exit
PB: predicated region body
PF: predicated region fallthrough
CT: control target
= control target key end

     0   :  { %vm74_vm0 = vcmask 523264   ;;  %s2122_s0 = inlined_call_operand.vmem [shape: bf16[128,64], index: 0, kind: input, shape index: {}]   ;;  %s2123_s1 = inlined_call_operand.vmem [shape: f32[1,64], index: 1, kind: input, shape index: {}]   ;;  %s2124_s2 = inlined_call_operand.vmem [shape: bf16[64,128], index: 2, kind: input, shape index: {}]   ;;  %s2125_s3 = inlined_call_operand.vmem [shape: bf16[64,128], index: 3, kind: input, shape index: {}]   ;;  %s2126_s4 = inlined_call_operand.vmem [shape: bf16[128,64], index: 4, kind: input, shape index: {}]   ;;  %s2127_s5 = inlined_call_operand.hbm [shape: bf16[128,64], index: 5, kind: output, shape index: {}]  }
   0x1   :  { %v1409_v0 = vld [vmem:[%s2122_s0 + $0x8] sm:$0xff]   ;;  %v1378_v1 = vld [vmem:[%s2122_s0] sm:$0xff]   ;;  %v1410_v2 = vld [vmem:[%s2122_s0 + $0x10] sm:$0xff]  }
   0x2   :  { %v1596_v3 = vunpack.c.l.bf16 %v1409_v0  ;;  %v1598_v4 = vunpack.c.l.bf16 %v1378_v1  ;;  %v1600_v5 = vunpack.c.l.bf16 %v1410_v2 }
   0x3   :  { %10 = vsyncpa [#allocation5], 0  ;;  %v1608_v8 = vunpack.c.h.bf16 %v1409_v0  ;;  %v1610_v9 = vunpack.c.h.bf16 %v1378_v1  ;;  %v1616_v11 = vunpack.c.h.bf16 %v1410_v2  ;;  %v1411_v12 = vld [vmem:[%s2122_s0 + $0x18] sm:$0xff]   ;;  %v1412_v16 = vld [vmem:[%s2122_s0 + $0x20] sm:$0xff]   ;;  %v1553_v56 = vmov 64.0   ;;  %s1213_s16 = sshll.u32 %s2127_s5, 4  ;;  %s1214_s16 = int_to_ptr.hbm [resolvable:$true] %s1213_s16 }
   0x4   :  { %v60_v6 = vmul.f32 %v1596_v3, %v1596_v3  ;;  %393 = vst.msk [vmem:[#allocation3 + $0x10] sm:$0xff] %vm74_vm0, %v1596_v3  ;;  %v58_v7 = vmul.f32 %v1598_v4, %v1598_v4  ;;  %v62_v10 = vmul.f32 %v1600_v5, %v1600_v5  ;;  %v1637_v19 = vunpack.c.h.bf16 %v1411_v12  ;;  %v1413_v22 = vld [vmem:[%s2122_s0 + $0x28] sm:$0xff]   ;;  %v1414_v25 = vld [vmem:[%s2122_s0 + $0x30] sm:$0xff]   ;;  %v1415_v31 = vld [vmem:[%s2122_s0 + $0x38] sm:$0xff]   ;;  %s1555_s17 = smov 64   ;;  %s1556_s18 = smov 4  }
   0x5   :  { %391 = vst.msk [vmem:[#allocation3] sm:$0xff] %vm74_vm0, %v1598_v4  ;;  %v61_v17 = vmul.f32 %v1608_v8, %v1608_v8  ;;  %v59_v18 = vmul.f32 %v1610_v9, %v1610_v9  ;;  %v63_v20 = vmul.f32 %v1616_v11, %v1616_v11  ;;  %v1643_v21 = vunpack.c.l.bf16 %v1411_v12  ;;  %v1364_v63 = vld [vmem:[%s2124_s2 + $0x18] sm:$0xff] }
   0x6   :  { %v81_v13 = vsel %vm74_vm0, %v60_v6, 0.0  ;;  %v75_v14 = vsel %vm74_vm0, %v58_v7, 0.0  ;;  %394 = vst.msk [vmem:[#allocation3 + $0x18] sm:$0xff] %vm74_vm0, %v1608_v8  ;;  %v87_v15 = vsel %vm74_vm0, %v62_v10, 0.0  ;;  %v1650_v23 = vunpack.c.l.bf16 %v1412_v16  ;;  %v1368_v0 = vld [vmem:[%s2125_s3 + $0x18] sm:$0xff]  ;;  %524 = vmatpush.bf16.msra.mxu0 %v1364_v63 }
   0x7   :  { %82 = vadd.xlane.f32.xlu1 %v81_v13  ;;  %76 = vadd.xlane.f32.xlu0 %v75_v14  ;;  %392 = vst.msk [vmem:[#allocation3 + $0x8] sm:$0xff] %vm74_vm0, %v1610_v9  ;;  %v1654_v24 = vunpack.c.h.bf16 %v1412_v16  ;;  %v84_v26 = vsel %vm74_vm0, %v61_v17, 0.0  ;;  %v78_v27 = vsel %vm74_vm0, %v59_v18, 0.0  ;;  %v1663_v28 = vunpack.c.h.bf16 %v1413_v22  ;;  %v1363_v13 = vld [vmem:[%s2124_s2 + $0x10] sm:$0xff]  ;;  %v1362_v18 = vld [vmem:[%s2124_s2 + $0x8] sm:$0xff] }
   0x8   :  { %88 = vadd.xlane.f32.xlu2 %v87_v15  ;;  %395 = vst.msk [vmem:[#allocation3 + $0x20] sm:$0xff] %vm74_vm0, %v1600_v5  ;;  %v90_v29 = vsel %vm74_vm0, %v63_v20, 0.0  ;;  %v1668_v30 = vunpack.c.l.bf16 %v1413_v22  ;;  %v1675_v32 = vunpack.c.h.bf16 %v1414_v25  ;;  %v1679_v33 = vunpack.c.l.bf16 %v1414_v25  ;;  %605 = vmatpush.bf16.msra.mxu1 %v1368_v0  ;;  %v1367_v14 = vld [vmem:[%s2125_s3 + $0x10] sm:$0xff]  ;;  %v1366_v20 = vld [vmem:[%s2125_s3 + $0x8] sm:$0xff] }
   0x9   :  { %396 = vst.msk [vmem:[#allocation3 + $0x28] sm:$0xff] %vm74_vm0, %v1616_v11  ;;  %v65_v34 = vmul.f32 %v1637_v19, %v1637_v19  ;;  %v64_v35 = vmul.f32 %v1643_v21, %v1643_v21  ;;  %v1687_v36 = vunpack.c.l.bf16 %v1415_v31  ;;  %v66_v37 = vmul.f32 %v1650_v23, %v1650_v23 }
   0xa   :  { %398 = vst.msk [vmem:[#allocation3 + $0x38] sm:$0xff] %vm74_vm0, %v1637_v19  ;;  %v1693_v38 = vunpack.c.h.bf16 %v1415_v31  ;;  %v67_v42 = vmul.f32 %v1654_v24, %v1654_v24  ;;  %v68_v43 = vmul.f32 %v1668_v30, %v1668_v30  ;;  %v69_v44 = vmul.f32 %v1663_v28, %v1663_v28  ;;  %525 = vmatpush.bf16.msra.mxu0 %v1363_v13 }
   0xb   :  { %397 = vst.msk [vmem:[#allocation3 + $0x30] sm:$0xff] %vm74_vm0, %v1643_v21  ;;  %v96_v39 = vsel %vm74_vm0, %v65_v34, 0.0  ;;  %v93_v40 = vsel %vm74_vm0, %v64_v35, 0.0  ;;  %v99_v41 = vsel %vm74_vm0, %v66_v37, 0.0  ;;  %v71_v48 = vmul.f32 %v1675_v32, %v1675_v32  ;;  %v1361_v34 = vld [vmem:[%s2124_s2] sm:$0xff] }
   0xc   :  { %399 = vst.msk [vmem:[#allocation3 + $0x40] sm:$0xff] %vm74_vm0, %v1650_v23  ;;  %v102_v45 = vsel %vm74_vm0, %v67_v42, 0.0  ;;  %v105_v46 = vsel %vm74_vm0, %v68_v43, 0.0  ;;  %v108_v47 = vsel %vm74_vm0, %v69_v44, 0.0  ;;  %v70_v49 = vmul.f32 %v1679_v33, %v1679_v33  ;;  %606 = vmatpush.bf16.msra.mxu1 %v1367_v14  ;;  %v1365_v35 = vld [vmem:[%s2125_s3] sm:$0xff] }
   0xd   :  { %400 = vst.msk [vmem:[#allocation3 + $0x48] sm:$0xff] %vm74_vm0, %v1654_v24  ;;  %v72_v50 = vmul.f32 %v1687_v36, %v1687_v36  ;;  %v114_v51 = vsel %vm74_vm0, %v71_v48, 0.0  ;;  %v73_v54 = vmul.f32 %v1693_v38, %v1693_v38  ;;  %1429 = vrcp.f32 %v1553_v56 }
   0xe   :  { %402 = vst.msk [vmem:[#allocation3 + $0x58] sm:$0xff] %vm74_vm0, %v1663_v28  ;;  %v111_v52 = vsel %vm74_vm0, %v70_v49, 0.0  ;;  %526 = vmatpush.bf16.msra.mxu0 %v1362_v18  ;;  %vm374_vm6 = vcmask 519168  }
   0xf   :  { %85 = vadd.xlane.f32.xlu1 %v84_v26  ;;  %79 = vadd.xlane.f32.xlu0 %v78_v27  ;;  %401 = vst.msk [vmem:[#allocation3 + $0x50] sm:$0xff] %vm74_vm0, %v1668_v30  ;;  %v117_v53 = vsel %vm74_vm0, %v72_v50, 0.0  ;;  %v120_v55 = vsel %vm74_vm0, %v73_v54, 0.0 }
  0x10   :  { %91 = vadd.xlane.f32.xlu2 %v90_v29  ;;  %404 = vst.msk [vmem:[#allocation3 + $0x68] sm:$0xff] %vm74_vm0, %v1675_v32  ;;  %607 = vmatpush.bf16.msra.mxu1 %v1366_v20 }
  0x11   :  { %403 = vst.msk [vmem:[#allocation3 + $0x60] sm:$0xff] %vm74_vm0, %v1679_v33 }
  0x12   :  { %405 = vst.msk [vmem:[#allocation3 + $0x70] sm:$0xff] %vm74_vm0, %v1687_v36  ;;  %527 = vmatpush.bf16.msra.mxu0 %v1361_v34 }
  0x13   :  { %406 = vst.msk [vmem:[#allocation3 + $0x78] sm:$0xff] %vm74_vm0, %v1693_v38  ;;  %v1430_v57 = vpop.eup %1429 }
  0x14   :  { %v124_v58 = vmul.f32 64.0, %v1430_v57  ;;  %vm128_vm1 = vweird.f32 %v1430_v57  ;;  %608 = vmatpush.bf16.msra.mxu1 %v1365_v35 }
  0x16   :  { %v125_v59 = vsub.f32 1.0, %v124_v58 }
  0x17   :  { %97 = vadd.xlane.f32.xlu1 %v96_v39  ;;  %94 = vadd.xlane.f32.xlu0 %v93_v40 }
  0x18   :  { %100 = vadd.xlane.f32.xlu2 %v99_v41  ;;  %v126_v60 = vmul.f32 %v1430_v57, %v125_v59 }
  0x1a   :  { %v127_v61 = vadd.f32 %v1430_v57, %v126_v60  ;;  %v1781_v60 = vld [vmem:[%s2123_s1] ss:$0 sm:$0xff] }
  0x1c   :  { %v1723_v62 = vsel %vm128_vm1, %v1430_v57, %v127_v61 }
  0x1f   :  { %103 = vadd.xlane.f32.xlu0 %v102_v45  ;;  %106 = vadd.xlane.f32.xlu1 %v105_v46 }
  0x20   :  { %109 = vadd.xlane.f32.xlu2 %v108_v47 }
  0x27   :  { %115 = vadd.xlane.f32.xlu1 %v114_v51  ;;  %112 = vadd.xlane.f32.xlu0 %v111_v52 }
  0x28   :  { %118 = vadd.xlane.f32.xlu2 %v117_v53 }
  0x2f   :  { %121 = vadd.xlane.f32.xlu0 %v120_v55 }
  0x7a   :  { %v83_v1 = vpop.xlane.xlu1 %82  ;;  %v77_v2 = vpop.xlane.xlu0 %76 }
  0x7b   :  { %v132_v6 = vmul.f32 %v1723_v62, %v83_v1  ;;  %v130_v7 = vmul.f32 %v1723_v62, %v77_v2  ;;  %v89_v10 = vpop.xlane.xlu2 %88 }
  0x7c   :  { %v134_v12 = vmul.f32 %v1723_v62, %v89_v10 }
  0x7d   :  { %v149_v15 = vadd.f32 1e-06, %v132_v6  ;;  %v1740_v16 = vadd.f32 1e-06, %v130_v7 }
  0x7e   :  { %v1742_v17 = vadd.f32 1e-06, %v134_v12 }
  0x7f   :  { %1431 = vrsqrt.f32 %v149_v15  ;;  %vm189_vm2 = vweird.f32 %v149_v15  ;;  %vm169_vm4 = vweird.f32 %v1740_v16 }
  0x80   :  { %1433 = vrsqrt.f32 %v1740_v16  ;;  %vm209_vm5 = vweird.f32 %v1742_v17 }
  0x81   :  { %1435 = vrsqrt.f32 %v1742_v17 }
  0x82   :  { %v86_v22 = vpop.xlane.xlu1 %85  ;;  %v80_v25 = vpop.xlane.xlu0 %79 }
  0x83   :  { %v133_v26 = vmul.f32 %v1723_v62, %v86_v22  ;;  %v131_v27 = vmul.f32 %v1723_v62, %v80_v25  ;;  %v92_v29 = vpop.xlane.xlu2 %91 }
  0x84   :  { %v135_v31 = vmul.f32 %v1723_v62, %v92_v29 }
  0x85   :  { %v1432_v37 = vpop.eup %1431  ;;  %v1761_v39 = vadd.f32 1e-06, %v133_v26  ;;  %v1763_v40 = vadd.f32 1e-06, %v131_v27 }
  0x86   :  { %v1434_v41 = vpop.eup %1433  ;;  %v184_v42 = vmul.f32 %v1432_v37, %v149_v15  ;;  %v1765_v43 = vadd.f32 1e-06, %v135_v31  ;;  %vm190_vm3 = vweird.f32 %v1432_v37 }
  0x87   :  { %v1436_v44 = vpop.eup %1435  ;;  %v164_v45 = vmul.f32 %v1434_v41, %v1740_v16  ;;  %1437 = vrsqrt.f32 %v1761_v39  ;;  %vm170_vm7 = vweird.f32 %v1434_v41  ;;  %vm1785_vm9 = vmor %vm189_vm2, %vm190_vm3  ;;  %vm199_vm10 = vweird.f32 %v1761_v39 }
  0x88   :  { %v185_v46 = vmul.f32 %v1432_v37, %v184_v42  ;;  %1439 = vrsqrt.f32 %v1763_v40  ;;  %v204_v47 = vmul.f32 %v1436_v44, %v1742_v17  ;;  %vm210_vm8 = vweird.f32 %v1436_v44  ;;  %vm171_vm14 = vmor %vm169_vm4, %vm170_vm7 }
  0x89   :  { %v165_v48 = vmul.f32 %v1434_v41, %v164_v45  ;;  %1441 = vrsqrt.f32 %v1765_v43  ;;  %vm219_vm11 = vweird.f32 %v1765_v43  ;;  %vm179_vm12 = vweird.f32 %v1763_v40  ;;  %vm1807_vm13 = vmor %vm209_vm5, %vm210_vm8 }
  0x8a   :  { %v186_v49 = vmul.f32 0.5, %v185_v46  ;;  %v205_v50 = vmul.f32 %v1436_v44, %v204_v47  ;;  %v98_v51 = vpop.xlane.xlu1 %97  ;;  %v95_v52 = vpop.xlane.xlu0 %94 }
  0x8b   :  { %v166_v53 = vmul.f32 0.5, %v165_v48  ;;  %v137_v54 = vmul.f32 %v1723_v62, %v98_v51  ;;  %v136_v55 = vmul.f32 %v1723_v62, %v95_v52  ;;  %v101_v58 = vpop.xlane.xlu2 %100 }
  0x8c   :  { %v187_v56 = vsub.f32 1.5, %v186_v49  ;;  %v206_v57 = vmul.f32 0.5, %v205_v50  ;;  %v138_v18 = vmul.f32 %v1723_v62, %v101_v58 }
  0x8d   :  { %v1776_v59 = vpop.eup %1437  ;;  %v167_v63 = vsub.f32 1.5, %v166_v53  ;;  %v1791_v0 = vadd.f32 1e-06, %v137_v54  ;;  %v1797_v10 = vadd.f32 1e-06, %v136_v55 }
  0x8e   :  { %v1793_v1 = vpop.eup %1439  ;;  %v188_v2 = vmul.f32 %v1432_v37, %v187_v56  ;;  %v194_v6 = vmul.f32 %v1776_v59, %v1761_v39  ;;  %v207_v7 = vsub.f32 1.5, %v206_v57  ;;  %vm200_vm15 = vweird.f32 %v1776_v59 }
  0x8f   :  { %v1799_v12 = vpop.eup %1441  ;;  %v168_v13 = vmul.f32 %v1434_v41, %v167_v63  ;;  %v174_v14 = vmul.f32 %v1793_v1, %v1763_v40  ;;  %1443 = vrsqrt.f32 %v1791_v0  ;;  %vm1837_vm2 = vmor %vm199_vm10, %vm200_vm15  ;;  %vm180_vm3 = vweird.f32 %v1793_v1 }
  0x90   :  { %v192_v20 = vsel %vm1785_vm9, %v1432_v37, %v188_v2  ;;  %v195_v22 = vmul.f32 %v1776_v59, %v194_v6  ;;  %v208_v25 = vmul.f32 %v1436_v44, %v207_v7  ;;  %v214_v17 = vmul.f32 %v1799_v12, %v1765_v43  ;;  %vm181_vm7 = vmor %vm179_vm12, %vm180_vm3 }
  0x91   :  { %v328_v26 = vmul.f32 %v1781_v60, %v192_v20  ;;  %v172_v27 = vsel %vm171_vm14, %v1434_v41, %v168_v13  ;;  %v175_v29 = vmul.f32 %v1793_v1, %v174_v14  ;;  %vm220_vm1 = vweird.f32 %v1799_v12 }
  0x92   :  { %v326_v31 = vmul.f32 %v1781_v60, %v172_v27  ;;  %v196_v34 = vmul.f32 0.5, %v195_v22  ;;  %v212_v16 = vsel %vm1807_vm13, %v1436_v44, %v208_v25  ;;  %v215_v35 = vmul.f32 %v1799_v12, %v214_v17  ;;  %vm1851_vm4 = vmor %vm219_vm11, %vm220_vm1  ;;  %v107_v20 = vpop.xlane.xlu1 %106 }
  0x93   :  { %v344_v37 = vmul.f32 %v1596_v3, %v328_v26  ;;  %v176_v42 = vmul.f32 0.5, %v175_v29  ;;  %v330_v45 = vmul.f32 %v1781_v60, %v212_v16  ;;  %1445 = vrsqrt.f32 %v1797_v10  ;;  %v110_v14 = vpop.xlane.xlu2 %109 }
  0x94   :  { %v342_v41 = vmul.f32 %v1598_v4, %v326_v31  ;;  %v197_v46 = vsub.f32 1.5, %v196_v34  ;;  %v216_v47 = vmul.f32 0.5, %v215_v35  ;;  %v104_v4 = vpop.xlane.xlu0 %103  ;;  %vm239_vm5 = vweird.f32 %v1791_v0 }
  0x95   :  { %v1444_v48 = vpop.eup %1443  ;;  %v360_v49 = vpack.c.bf16 %v344_v37, %v344_v37  ;;  %v177_v3 = vsub.f32 1.5, %v176_v42  ;;  %v346_v50 = vmul.f32 %v1600_v5, %v330_v45  ;;  %v1856_v5 = vadd.f32 1e-06, %v138_v18 }
  0x96   :  { %v358_v51 = vpack.c.bf16 %v342_v41, %v342_v41  ;;  %v198_v52 = vmul.f32 %v1776_v59, %v197_v46  ;;  %v217_v53 = vsub.f32 1.5, %v216_v47  ;;  %v234_v54 = vmul.f32 %v1444_v48, %v1791_v0 }
  0x97   :  { %377 = vst.msk [vmem:[#allocation2 + $0x8] sm:$0xf] %vm374_vm6, %v360_v49  ;;  %v178_v39 = vmul.f32 %v1793_v1, %v177_v3  ;;  %v362_v55 = vpack.c.bf16 %v346_v50, %v346_v50  ;;  %v139_v61 = vmul.f32 %v1723_v62, %v104_v4  ;;  %vm240_vm8 = vweird.f32 %v1444_v48 }
  0x98   :  { %375 = vst.msk [vmem:[#allocation2] sm:$0xf] %vm374_vm6, %v358_v51  ;;  %v202_v57 = vsel %vm1837_vm2, %v1776_v59, %v198_v52  ;;  %v218_v43 = vmul.f32 %v1799_v12, %v217_v53  ;;  %v235_v58 = vmul.f32 %v1444_v48, %v234_v54  ;;  %1447 = vrsqrt.f32 %v1856_v5  ;;  %vm1887_vm9 = vmor %vm239_vm5, %vm240_vm8 }
  0x99   :  { %v329_v63 = vmul.f32 %v1781_v60, %v202_v57  ;;  %v182_v2 = vsel %vm181_vm7, %v1793_v1, %v178_v39  ;;  %379 = vst.msk [vmem:[#allocation2 + $0x10] sm:$0xf] %vm374_vm6, %v362_v55  ;;  %v1446_v59 = vpop.eup %1445  ;;  %v1876_v13 = vadd.f32 1e-06, %v139_v61  ;;  %v141_v27 = vmul.f32 %v1723_v62, %v110_v14 }
  0x9a   :  { %v327_v6 = vmul.f32 %v1781_v60, %v182_v2  ;;  %v222_v40 = vsel %vm1851_vm4, %v1799_v12, %v218_v43  ;;  %v236_v7 = vmul.f32 0.5, %v235_v58  ;;  %v224_v18 = vmul.f32 %v1446_v59, %v1797_v10  ;;  %v116_v61 = vpop.xlane.xlu1 %115 }
  0x9b   :  { %v345_v15 = vmul.f32 %v1608_v8, %v329_v63  ;;  %v331_v1 = vmul.f32 %v1781_v60, %v222_v40  ;;  %1449 = vrsqrt.f32 %v1876_v13  ;;  %vm229_vm10 = vweird.f32 %v1797_v10 }
  0x9c   :  { %v343_v22 = vmul.f32 %v1610_v9, %v327_v6  ;;  %v237_v25 = vsub.f32 1.5, %v236_v7  ;;  %v225_v8 = vmul.f32 %v1446_v59, %v224_v18  ;;  %v140_v9 = vmul.f32 %v1723_v62, %v107_v20  ;;  %v113_v63 = vpop.xlane.xlu0 %112 }
  0x9d   :  { %v361_v17 = vpack.c.bf16 %v345_v15, %v345_v15  ;;  %v347_v26 = vmul.f32 %v1616_v11, %v331_v1  ;;  %vm230_vm11 = vweird.f32 %v1446_v59  ;;  %v1895_v0 = vadd.f32 1e-06, %v141_v27 }
  0x9e   :  { %v359_v29 = vpack.c.bf16 %v343_v22, %v343_v22  ;;  %v238_v31 = vmul.f32 %v1444_v48, %v237_v25  ;;  %v1448_v34 = vpop.eup %1447  ;;  %v226_v16 = vmul.f32 0.5, %v225_v8  ;;  %v1901_v42 = vadd.f32 1e-06, %v140_v9  ;;  %vm231_vm12 = vmor %vm229_vm10, %vm230_vm11 }
  0x9f   :  { %378 = vst.msk [vmem:[#allocation2 + $0xc] sm:$0xf] %vm374_vm6, %v361_v17  ;;  %v363_v11 = vpack.c.bf16 %v347_v26, %v347_v26  ;;  %v244_v37 = vmul.f32 %v1448_v34, %v1856_v5  ;;  %1451 = vrsqrt.f32 %v1895_v0  ;;  %vm249_vm13 = vweird.f32 %v1856_v5 }
  0xa0   :  { %376 = vst.msk [vmem:[#allocation2 + $0x4] sm:$0xf] %vm374_vm6, %v359_v29  ;;  %v242_v35 = vsel %vm1887_vm9, %v1444_v48, %v238_v31  ;;  %v227_v41 = vsub.f32 1.5, %v226_v16  ;;  %1453 = vrsqrt.f32 %v1901_v42  ;;  %vm250_vm14 = vweird.f32 %v1448_v34 }
  0xa1   :  { %380 = vst.msk [vmem:[#allocation2 + $0x14] sm:$0xf] %vm374_vm6, %v363_v11  ;;  %v333_v45 = vmul.f32 %v1781_v60, %v242_v35  ;;  %v1450_v46 = vpop.eup %1449  ;;  %v245_v47 = vmul.f32 %v1448_v34, %v244_v37  ;;  %vm1914_vm15 = vmor %vm249_vm13, %vm250_vm14  ;;  %vm259_vm1 = vweird.f32 %v1876_v13  ;;  %vm279_vm3 = vweird.f32 %v1895_v0 }
  0xa2   :  { %v228_v49 = vmul.f32 %v1446_v59, %v227_v41  ;;  %v254_v44 = vmul.f32 %v1450_v46, %v1876_v13  ;;  %vm260_vm2 = vweird.f32 %v1450_v46  ;;  %vm269_vm4 = vweird.f32 %v1901_v42 }
  0xa3   :  { %v349_v48 = vmul.f32 %v1637_v19, %v333_v45  ;;  %v246_v3 = vmul.f32 0.5, %v245_v47  ;;  %vm1931_vm5 = vmor %vm259_vm1, %vm260_vm2  ;;  %v143_v40 = vmul.f32 %v1723_v62, %v116_v61  ;;  %v142_v1 = vmul.f32 %v1723_v62, %v113_v63 }
  0xa4   :  { %v232_v4 = vsel %vm231_vm12, %v1446_v59, %v228_v49  ;;  %v255_v51 = vmul.f32 %v1450_v46, %v254_v44 }
  0xa5   :  { %v365_v50 = vpack.c.bf16 %v349_v48, %v349_v48  ;;  %v332_v52 = vmul.f32 %v1781_v60, %v232_v4  ;;  %v247_v53 = vsub.f32 1.5, %v246_v3  ;;  %v1452_v10 = vpop.eup %1451  ;;  %v160_v20 = vadd.f32 1e-06, %v143_v40 }
  0xa6   :  { %v256_v19 = vmul.f32 0.5, %v255_v51  ;;  %v1454_v55 = vpop.eup %1453  ;;  %v274_v57 = vmul.f32 %v1452_v10, %v1895_v0  ;;  %vm280_vm7 = vweird.f32 %v1452_v10  ;;  %v159_v17 = vadd.f32 1e-06, %v142_v1 }
  0xa7   :  { %382 = vst.msk [vmem:[#allocation2 + $0x1c] sm:$0xf] %vm374_vm6, %v365_v50  ;;  %v1353_v54 = vld [vmem:[#allocation2] sm:$0xff]  ;;  %v348_v56 = vmul.f32 %v1643_v21, %v332_v52  ;;  %v248_v5 = vmul.f32 %v1448_v34, %v247_v53  ;;  %v264_v58 = vmul.f32 %v1454_v55, %v1901_v42  ;;  %vm270_vm8 = vweird.f32 %v1454_v55  ;;  %vm281_vm9 = vmor %vm279_vm3, %vm280_vm7  ;;  %v122_v50 = vpop.xlane.xlu0 %121 }
  0xa8   :  { %1273 = vmatmul.msk.bf16.vlgmr.msra.gmra.mxu0 %vm74_vm0, %v1353_v54  ;;  %1297 = vmatmul.msk.bf16.vlgmr.msra.gmra.mxu1 %vm74_vm0, %v1353_v54  ;;  %v257_v43 = vsub.f32 1.5, %v256_v19  ;;  %v275_v6 = vmul.f32 %v1452_v10, %v274_v57  ;;  %1455 = vrsqrt.f32 %v160_v20  ;;  %vm271_vm10 = vmor %vm269_vm4, %vm270_vm8  ;;  %vm299_vm11 = vweird.f32 %v160_v20 }
  0xa9   :  { %v364_v2 = vpack.c.bf16 %v348_v56, %v348_v56  ;;  %v252_v21 = vsel %vm1914_vm15, %v1448_v34, %v248_v5  ;;  %v265_v15 = vmul.f32 %v1454_v55, %v264_v58  ;;  %1457 = vrsqrt.f32 %v159_v17 }
  0xaa   :  { %v334_v7 = vmul.f32 %v1781_v60, %v252_v21  ;;  %v258_v14 = vmul.f32 %v1450_v46, %v257_v43  ;;  %v276_v18 = vmul.f32 0.5, %v275_v6  ;;  %vm289_vm13 = vweird.f32 %v159_v17  ;;  %v1355_v6 = vld [vmem:[#allocation2 + $0x10] sm:$0xff] }
  0xab   :  { %381 = vst.msk [vmem:[#allocation2 + $0x18] sm:$0xf] %vm374_vm6, %v364_v2  ;;  %v266_v25 = vmul.f32 0.5, %v265_v15  ;;  %v145_v51 = vmul.f32 %v1723_v62, %v122_v50 }
  0xac   :  { %v350_v13 = vmul.f32 %v1650_v23, %v334_v7  ;;  %v262_v22 = vsel %vm1931_vm5, %v1450_v46, %v258_v14  ;;  %v277_v12 = vsub.f32 1.5, %v276_v18  ;;  %v1354_v46 = vld [vmem:[#allocation2 + $0x8] sm:$0xff] }
  0xad   :  { %v335_v26 = vmul.f32 %v1781_v60, %v262_v22  ;;  %v267_v27 = vsub.f32 1.5, %v266_v25  ;;  %v162_v54 = vadd.f32 1e-06, %v145_v51 }
  0xae   :  { %v366_v8 = vpack.c.bf16 %v350_v13, %v350_v13  ;;  %v278_v31 = vmul.f32 %v1452_v10, %v277_v12  ;;  %v1456_v35 = vpop.eup %1455 }
  0xaf   :  { %v351_v29 = vmul.f32 %v1654_v24, %v335_v26  ;;  %v268_v23 = vmul.f32 %v1454_v55, %v267_v27  ;;  %v1458_v37 = vpop.eup %1457  ;;  %v294_v45 = vmul.f32 %v1456_v35, %v160_v20  ;;  %vm300_vm12 = vweird.f32 %v1456_v35 }
  0xb0   :  { %383 = vst.msk [vmem:[#allocation2 + $0x20] sm:$0xf] %vm374_vm6, %v366_v8  ;;  %v282_v34 = vsel %vm281_vm9, %v1452_v10, %v278_v31  ;;  %v284_v41 = vmul.f32 %v1458_v37, %v159_v17  ;;  %vm290_vm14 = vweird.f32 %v1458_v37  ;;  %vm301_vm15 = vmor %vm299_vm11, %vm300_vm12  ;;  %vm319_vm4 = vweird.f32 %v162_v54  ;;  %v1375_v31 = vld [vmem:[%s2126_s4 + $0x30] sm:$0xff] }
  0xb1   :  { %v367_v9 = vpack.c.bf16 %v351_v29, %v351_v29  ;;  %v337_v11 = vmul.f32 %v1781_v60, %v282_v34  ;;  %v272_v16 = vsel %vm271_vm10, %v1454_v55, %v268_v23  ;;  %v295_v48 = vmul.f32 %v1456_v35, %v294_v45  ;;  %vm291_vm1 = vmor %vm289_vm13, %vm290_vm14  ;;  %v1373_v34 = vld [vmem:[%s2126_s4 + $0x20] sm:$0xff] }
  0xb2   :  { %v336_v0 = vmul.f32 %v1781_v60, %v272_v16  ;;  %v285_v44 = vmul.f32 %v1458_v37, %v284_v41  ;;  %v1356_v27 = vld [vmem:[#allocation2 + $0x18] sm:$0xff]  ;;  %v1371_v16 = vld [vmem:[%s2126_s4 + $0x10] sm:$0xff]  ;;  %v1369_v45 = vld [vmem:[%s2126_s4] sm:$0xff] }
  0xb3   :  { %384 = vst.msk [vmem:[#allocation2 + $0x24] sm:$0xf] %vm374_vm6, %v367_v9  ;;  %v353_v24 = vmul.f32 %v1663_v28, %v337_v11  ;;  %v296_v3 = vmul.f32 0.5, %v295_v48  ;;  %v119_v28 = vpop.xlane.xlu2 %118  ;;  %v1374_v9 = vld [vmem:[%s2126_s4 + $0x28] sm:$0xff]  ;;  %v1372_v11 = vld [vmem:[%s2126_s4 + $0x18] sm:$0xff] }
  0xb4   :  { %v352_v42 = vmul.f32 %v1668_v30, %v336_v0  ;;  %v286_v30 = vmul.f32 0.5, %v285_v44  ;;  %v144_v4 = vmul.f32 %v1723_v62, %v119_v28 }
  0xb5   :  { %v369_v47 = vpack.c.bf16 %v353_v24, %v353_v24  ;;  %v297_v52 = vsub.f32 1.5, %v296_v3  ;;  %v1370_v24 = vld [vmem:[%s2126_s4 + $0x8] sm:$0xff] }
  0xb6   :  { %v368_v49 = vpack.c.bf16 %v352_v42, %v352_v42  ;;  %v287_v53 = vsub.f32 1.5, %v286_v30  ;;  %v161_v10 = vadd.f32 1e-06, %v144_v4 }
  0xb7   :  { %386 = vst.msk [vmem:[#allocation2 + $0x2c] sm:$0xf] %vm374_vm6, %v369_v47  ;;  %v298_v39 = vmul.f32 %v1456_v35, %v297_v52 }
  0xb8   :  { %1274 = vmatmul.msk.bf16.gmra.mxu0 %vm74_vm0, %v1354_v46  ;;  %1298 = vmatmul.msk.bf16.gmra.mxu1 %vm74_vm0, %v1354_v46  ;;  %385 = vst.msk [vmem:[#allocation2 + $0x28] sm:$0xf] %vm374_vm6, %v368_v49  ;;  %v288_v19 = vmul.f32 %v1458_v37, %v287_v53  ;;  %1459 = vrsqrt.f32 %v161_v10  ;;  %vm309_vm2 = vweird.f32 %v161_v10 }
  0xb9   :  { %v302_v55 = vsel %vm301_vm15, %v1456_v35, %v298_v39  ;;  %1461 = vrsqrt.f32 %v162_v54 }
  0xba   :  { %v339_v56 = vmul.f32 %v1781_v60, %v302_v55  ;;  %v292_v5 = vsel %vm291_vm1, %v1458_v37, %v288_v19  ;;  %v1357_v29 = vld [vmem:[#allocation2 + $0x20] sm:$0xff] }
  0xbb   :  { %v338_v57 = vmul.f32 %v1781_v60, %v292_v5 }
  0xbc   :  { %v355_v43 = vmul.f32 %v1675_v32, %v339_v56 }
  0xbd   :  { %v354_v62 = vmul.f32 %v1679_v33, %v338_v57 }
  0xbe   :  { %v1460_v58 = vpop.eup %1459  ;;  %v371_v61 = vpack.c.bf16 %v355_v43, %v355_v43 }
  0xbf   :  { %v1462_v63 = vpop.eup %1461  ;;  %v370_v2 = vpack.c.bf16 %v354_v62, %v354_v62  ;;  %v304_v21 = vmul.f32 %v1460_v58, %v161_v10  ;;  %vm310_vm3 = vweird.f32 %v1460_v58 }
  0xc0   :  { %388 = vst.msk [vmem:[#allocation2 + $0x34] sm:$0xf] %vm374_vm6, %v371_v61  ;;  %v314_v59 = vmul.f32 %v1462_v63, %v162_v54  ;;  %vm320_vm5 = vweird.f32 %v1462_v63  ;;  %vm311_vm7 = vmor %vm309_vm2, %vm310_vm3 }
  0xc1   :  { %387 = vst.msk [vmem:[#allocation2 + $0x30] sm:$0xf] %vm374_vm6, %v370_v2  ;;  %v305_v40 = vmul.f32 %v1460_v58, %v304_v21  ;;  %vm321_vm8 = vmor %vm319_vm4, %vm320_vm5 }
  0xc2   :  { %v315_v7 = vmul.f32 %v1462_v63, %v314_v59 }
  0xc3   :  { %v306_v32 = vmul.f32 0.5, %v305_v40 }
  0xc4   :  { %v316_v33 = vmul.f32 0.5, %v315_v7 }
  0xc5   :  { %v307_v14 = vsub.f32 1.5, %v306_v32 }
  0xc6   :  { %v317_v15 = vsub.f32 1.5, %v316_v33 }
  0xc7   :  { %v308_v1 = vmul.f32 %v1460_v58, %v307_v14 }
  0xc8   :  { %1275 = vmatmul.msk.bf16.gmra.mxu0 %vm74_vm0, %v1355_v6  ;;  %1299 = vmatmul.msk.bf16.gmra.mxu1 %vm74_vm0, %v1355_v6  ;;  %v318_v18 = vmul.f32 %v1462_v63, %v317_v15 }
  0xc9   :  { %v312_v20 = vsel %vm311_vm7, %v1460_v58, %v308_v1 }
  0xca   :  { %v340_v13 = vmul.f32 %v1781_v60, %v312_v20  ;;  %v322_v22 = vsel %vm321_vm8, %v1462_v63, %v318_v18 }
  0xcb   :  { %v341_v25 = vmul.f32 %v1781_v60, %v322_v22  ;;  %v1358_v60 = vld [vmem:[#allocation2 + $0x28] sm:$0xff] }
  0xcc   :  { %v356_v17 = vmul.f32 %v1687_v36, %v340_v13  ;;  %v1359_v36 = vld [vmem:[#allocation2 + $0x30] sm:$0xff] }
  0xcd   :  { %v357_v26 = vmul.f32 %v1693_v38, %v341_v25  ;;  %v1376_v38 = vld [vmem:[%s2126_s4 + $0x38] sm:$0xff]  ;;  %s1554_s4 = smov [#allocation4]  }
  0xce   :  { %v372_v12 = vpack.c.bf16 %v356_v17, %v356_v17  ;;  %1074 = vmatpush.bf16.msra.mxu2 %v1376_v38  ;;  %1416 = vmatpush.bf16.msra.mxu3 %v1376_v38  ;;  %s1211_s13 = sshll.u32 %s1554_s4, 4  ;;  %s1212_s13 = int_to_ptr.vmem [resolvable:$true] %s1211_s13 }
  0xcf   :  { %v373_v8 = vpack.c.bf16 %v357_v26, %v357_v26 }
  0xd0   :  { %389 = vst.msk [vmem:[#allocation2 + $0x38] sm:$0xf] %vm374_vm6, %v372_v12 }
  0xd1   :  { %390 = vst.msk [vmem:[#allocation2 + $0x3c] sm:$0xf] %vm374_vm6, %v373_v8 }
  0xd2   :  { %1075 = vmatpush.bf16.msra.mxu2 %v1375_v31  ;;  %1417 = vmatpush.bf16.msra.mxu3 %v1375_v31 }
  0xd6   :  { %1076 = vmatpush.bf16.msra.mxu2 %v1374_v9  ;;  %1418 = vmatpush.bf16.msra.mxu3 %v1374_v9 }
  0xd8   :  { %1276 = vmatmul.msk.bf16.gmra.mxu0 %vm74_vm0, %v1356_v27  ;;  %1300 = vmatmul.msk.bf16.gmra.mxu1 %vm74_vm0, %v1356_v27  ;;  %v1360_v23 = vld [vmem:[#allocation2 + $0x38] sm:$0xff] }
  0xda   :  { %1077 = vmatpush.bf16.msra.mxu2 %v1373_v34  ;;  %1419 = vmatpush.bf16.msra.mxu3 %v1373_v34 }
  0xde   :  { %1078 = vmatpush.bf16.msra.mxu2 %v1372_v11  ;;  %1420 = vmatpush.bf16.msra.mxu3 %v1372_v11 }
  0xe2   :  { %1079 = vmatpush.bf16.msra.mxu2 %v1371_v16  ;;  %1421 = vmatpush.bf16.msra.mxu3 %v1371_v16 }
  0xe6   :  { %1080 = vmatpush.bf16.msra.mxu2 %v1370_v24  ;;  %1422 = vmatpush.bf16.msra.mxu3 %v1370_v24 }
  0xe8   :  { %1277 = vmatmul.msk.bf16.gmra.mxu0 %vm74_vm0, %v1357_v29  ;;  %1301 = vmatmul.msk.bf16.gmra.mxu1 %vm74_vm0, %v1357_v29 }
  0xea   :  { %1081 = vmatpush.bf16.msra.mxu2 %v1369_v45  ;;  %1423 = vmatpush.bf16.msra.mxu3 %v1369_v45 }
  0xf8   :  { %1278 = vmatmul.msk.bf16.gmra.mxu0 %vm74_vm0, %v1358_v60  ;;  %1302 = vmatmul.msk.bf16.gmra.mxu1 %vm74_vm0, %v1358_v60 }
 0x108   :  { %1279 = vmatmul.msk.bf16.gmra.mxu0 %vm74_vm0, %v1359_v36  ;;  %1303 = vmatmul.msk.bf16.gmra.mxu1 %vm74_vm0, %v1359_v36 }
 0x118   :  { %1280 = vmatmul.msk.bf16.gmra.mxu0 %vm74_vm0, %v1360_v23  ;;  %1304 = vmatmul.msk.bf16.gmra.mxu1 %vm74_vm0, %v1360_v23 }
 0x125   :  { %v2003_v35 = vpop.f32.mrf.mxu0  ;;  %v2005_v0 = vpop.f32.mrf.mxu1 }
 0x126   :  { %v1305_v37 = vmul.f32 -1.442695, %v2005_v0 }
 0x128   :  { %1463 = vpow2.f32 %v1305_v37 }
 0x12d   :  { %v612_v42 = vpop.f32.mrf.mxu1  ;;  %v531_v48 = vpop.f32.mrf.mxu0 }
 0x12e   :  { %v1464_v41 = vpop.eup %1463  ;;  %v1306_v46 = vmul.f32 -1.442695, %v612_v42 }
 0x12f   :  { %v698_v47 = vadd.f32 1.0, %v1464_v41 }
 0x130   :  { %1465 = vpow2.f32 %v1306_v46 }
 0x131   :  { %1467 = vrcp.f32 %v698_v47  ;;  %v725_v55 = vand.u32 2147483648, %v698_v47  ;;  %vm719_vm10 = vweird.f32 %v698_v47  ;;  %v723_v5 = vand.u32 2147483647, %v698_v47 }
 0x133   :  { %v726_v58 = vor.u32 1.1754944e-38, %v725_v55  ;;  %vm724_vm12 = vcmp.eq.f32.partialorder %v723_v5, 8.507059e+37 }
 0x135   :  { %v2014_v49 = vpop.f32.mrf.mxu1  ;;  %v2017_v4 = vpop.f32.mrf.mxu0 }
 0x136   :  { %v1466_v44 = vpop.eup %1465  ;;  %v1307_v3 = vmul.f32 -1.442695, %v2014_v49 }
 0x137   :  { %v1468_v28 = vpop.eup %1467  ;;  %v699_v50 = vadd.f32 1.0, %v1466_v44 }
 0x138   :  { %v715_v30 = vmul.f32 %v1468_v28, %v698_v47  ;;  %1469 = vpow2.f32 %v1307_v3  ;;  %vm720_vm9 = vweird.f32 %v1468_v28 }
 0x139   :  { %1471 = vrcp.f32 %v699_v50  ;;  %vm721_vm11 = vmor %vm719_vm10, %vm720_vm9  ;;  %v738_v61 = vand.u32 2147483647, %v699_v50  ;;  %v740_v63 = vand.u32 2147483648, %v699_v50  ;;  %vm734_vm14 = vweird.f32 %v699_v50 }
 0x13a   :  { %v716_v51 = vsub.f32 1.0, %v715_v30 }
 0x13b   :  { %vm739_vm1 = vcmp.eq.f32.partialorder %v738_v61, 8.507059e+37  ;;  %v741_v14 = vor.u32 1.1754944e-38, %v740_v63 }
 0x13c   :  { %v717_v52 = vmul.f32 %v1468_v28, %v716_v51 }
 0x13d   :  { %v2019_v53 = vpop.f32.mrf.mxu1  ;;  %v2022_v2 = vpop.f32.mrf.mxu0 }
 0x13e   :  { %v1470_v10 = vpop.eup %1469  ;;  %v718_v54 = vadd.f32 %v1468_v28, %v717_v52  ;;  %v1308_v39 = vmul.f32 -1.442695, %v2019_v53 }
 0x13f   :  { %v1472_v19 = vpop.eup %1471  ;;  %v700_v56 = vadd.f32 1.0, %v1470_v10 }
 0x140   :  { %v730_v57 = vmul.f32 %v1472_v19, %v699_v50  ;;  %1473 = vpow2.f32 %v1308_v39  ;;  %v722_v43 = vsel %vm721_vm11, %v1468_v28, %v718_v54  ;;  %vm735_vm13 = vweird.f32 %v1472_v19 }
 0x141   :  { %1475 = vrcp.f32 %v700_v56  ;;  %v727_v59 = vsel %vm724_vm12, %v726_v58, %v722_v43  ;;  %vm736_vm15 = vmor %vm734_vm14, %vm735_vm13  ;;  %v755_v23 = vand.u32 2147483648, %v700_v56  ;;  %vm749_vm3 = vweird.f32 %v700_v56 }
 0x142   :  { %v731_v62 = vsub.f32 1.0, %v730_v57  ;;  %v954_v1 = vmul.f32 %v727_v59, %v2005_v0  ;;  %v753_v34 = vand.u32 2147483647, %v700_v56 }
 0x143   :  { %v756_v0 = vor.u32 1.1754944e-38, %v755_v23 }
 0x144   :  { %v732_v21 = vmul.f32 %v1472_v19, %v731_v62  ;;  %v970_v26 = vmul.f32 %v954_v1, %v2003_v35  ;;  %vm754_vm5 = vcmp.eq.f32.partialorder %v753_v34, 8.507059e+37 }
 0x145   :  { %v2024_v6 = vpop.f32.mrf.mxu1  ;;  %v2029_v8 = vpop.f32.mrf.mxu0 }
 0x146   :  { %v1474_v40 = vpop.eup %1473  ;;  %v733_v7 = vadd.f32 %v1472_v19, %v732_v21  ;;  %v1309_v32 = vmul.f32 -1.442695, %v2024_v6 }
 0x147   :  { %v1476_v33 = vpop.eup %1475  ;;  %v701_v15 = vadd.f32 1.0, %v1474_v40 }
 0x148   :  { %v737_v18 = vsel %vm736_vm15, %v1472_v19, %v733_v7  ;;  %v745_v20 = vmul.f32 %v1476_v33, %v700_v56  ;;  %1477 = vpow2.f32 %v1309_v32  ;;  %vm750_vm2 = vweird.f32 %v1476_v33 }
 0x149   :  { %v742_v13 = vsel %vm739_vm1, %v741_v14, %v737_v18  ;;  %1479 = vrcp.f32 %v701_v15  ;;  %vm751_vm4 = vmor %vm749_vm3, %vm750_vm2  ;;  %v768_v37 = vand.u32 2147483647, %v701_v15  ;;  %v770_v24 = vand.u32 2147483648, %v701_v15 }
 0x14a   :  { %v955_v22 = vmul.f32 %v742_v13, %v612_v42  ;;  %v746_v25 = vsub.f32 1.0, %v745_v20  ;;  %vm764_vm8 = vweird.f32 %v701_v15 }
 0x14b   :  { %vm769_vm10 = vcmp.eq.f32.partialorder %v768_v37, 8.507059e+37  ;;  %v771_v3 = vor.u32 1.1754944e-38, %v770_v24 }
 0x14c   :  { %v747_v17 = vmul.f32 %v1476_v33, %v746_v25  ;;  %v971_v12 = vmul.f32 %v955_v22, %v531_v48 }
 0x14d   :  { %v2031_v27 = vpop.f32.mrf.mxu1  ;;  %v541_v28 = vpop.f32.mrf.mxu0 }
 0x14e   :  { %v1478_v29 = vpop.eup %1477  ;;  %v748_v60 = vadd.f32 %v1476_v33, %v747_v17  ;;  %v1310_v36 = vmul.f32 -1.442695, %v2031_v27  ;;  %v1002_v38 = vpack.c.bf16 %v971_v12, %v970_v26 }
 0x14f   :  { %v1480_v31 = vpop.eup %1479  ;;  %v702_v9 = vadd.f32 1.0, %v1478_v29 }
 0x150   :  { %v760_v11 = vmul.f32 %v1480_v31, %v701_v15  ;;  %1481 = vpow2.f32 %v1310_v36  ;;  %1082 = vmatmul.bf16.vlgmr.msra.gmra.mxu2 %v1002_v38  ;;  %v752_v16 = vsel %vm751_vm4, %v1476_v33, %v748_v60  ;;  %vm765_vm7 = vweird.f32 %v1480_v31 }
 0x151   :  { %1483 = vrcp.f32 %v702_v9  ;;  %v757_v42 = vsel %vm754_vm5, %v756_v0, %v752_v16  ;;  %vm766_vm9 = vmor %vm764_vm8, %vm765_vm7  ;;  %v785_v61 = vand.u32 2147483648, %v702_v9  ;;  %vm779_vm12 = vweird.f32 %v702_v9 }
 0x152   :  { %v761_v35 = vsub.f32 1.0, %v760_v11  ;;  %v956_v30 = vmul.f32 %v757_v42, %v2014_v49  ;;  %v783_v21 = vand.u32 2147483647, %v702_v9 }
 0x153   :  { %v786_v40 = vor.u32 1.1754944e-38, %v785_v61 }
 0x154   :  { %v762_v45 = vmul.f32 %v1480_v31, %v761_v35  ;;  %v972_v55 = vmul.f32 %v956_v30, %v2017_v4  ;;  %vm784_vm14 = vcmp.eq.f32.partialorder %v783_v21, 8.507059e+37 }
 0x155   :  { %v2034_v41 = vpop.f32.mrf.mxu1  ;;  %v2044_v4 = vpop.f32.mrf.mxu0 }
 0x156   :  { %v1482_v46 = vpop.eup %1481  ;;  %v763_v47 = vadd.f32 %v1480_v31, %v762_v45  ;;  %v1311_v48 = vmul.f32 -1.442695, %v2034_v41 }
 0x157   :  { %v1484_v44 = vpop.eup %1483  ;;  %v703_v50 = vadd.f32 1.0, %v1482_v46 }
 0x158   :  { %v767_v51 = vsel %vm766_vm9, %v1480_v31, %v763_v47  ;;  %v775_v52 = vmul.f32 %v1484_v44, %v702_v9  ;;  %1485 = vpow2.f32 %v1311_v48  ;;  %vm780_vm11 = vweird.f32 %v1484_v44 }
 0x159   :  { %v772_v10 = vsel %vm769_vm10, %v771_v3, %v767_v51  ;;  %1487 = vrcp.f32 %v703_v50  ;;  %vm781_vm13 = vmor %vm779_vm12, %vm780_vm11  ;;  %v798_v7 = vand.u32 2147483647, %v703_v50  ;;  %v800_v32 = vand.u32 2147483648, %v703_v50 }
 0x15a   :  { %v957_v54 = vmul.f32 %v772_v10, %v2019_v53  ;;  %v776_v39 = vsub.f32 1.0, %v775_v52  ;;  %vm794_vm1 = vweird.f32 %v703_v50 }
 0x15b   :  { %vm799_vm3 = vcmp.eq.f32.partialorder %v798_v7, 8.507059e+37  ;;  %v801_v22 = vor.u32 1.1754944e-38, %v800_v32 }
 0x15c   :  { %v777_v19 = vmul.f32 %v1484_v44, %v776_v39  ;;  %v973_v56 = vmul.f32 %v957_v54, %v2022_v2 }
 0x15d   :  { %v2041_v5 = vpop.f32.mrf.mxu1  ;;  %v546_v38 = vpop.f32.mrf.mxu0 }
 0x15e   :  { %v1486_v57 = vpop.eup %1485  ;;  %v778_v43 = vadd.f32 %v1484_v44, %v777_v19  ;;  %v1312_v49 = vmul.f32 -1.442695, %v2041_v5  ;;  %v1003_v62 = vpack.c.bf16 %v973_v56, %v972_v55 }
 0x15f   :  { %v1488_v58 = vpop.eup %1487  ;;  %v704_v63 = vadd.f32 1.0, %v1486_v57 }
 0x160   :  { %v790_v53 = vmul.f32 %v1488_v58, %v703_v50  ;;  %1489 = vpow2.f32 %v1312_v49  ;;  %1087 = vmatmul.bf16.gmra.mxu2 %v1003_v62  ;;  %v782_v2 = vsel %vm781_vm13, %v1484_v44, %v778_v43  ;;  %vm795_vm15 = vweird.f32 %v1488_v58 }
 0x161   :  { %1491 = vrcp.f32 %v704_v63  ;;  %v787_v14 = vsel %vm784_vm14, %v786_v40, %v782_v2  ;;  %vm796_vm2 = vmor %vm794_vm1, %vm795_vm15  ;;  %v815_v37 = vand.u32 2147483648, %v704_v63  ;;  %vm809_vm5 = vweird.f32 %v704_v63 }
 0x162   :  { %v791_v59 = vsub.f32 1.0, %v790_v53  ;;  %v958_v17 = vmul.f32 %v787_v14, %v2024_v6  ;;  %v813_v45 = vand.u32 2147483647, %v704_v63 }
 0x163   :  { %v816_v46 = vor.u32 1.1754944e-38, %v815_v37 }
 0x164   :  { %v792_v33 = vmul.f32 %v1488_v58, %v791_v59  ;;  %v974_v23 = vmul.f32 %v958_v17, %v2029_v8  ;;  %vm814_vm8 = vcmp.eq.f32.partialorder %v813_v45, 8.507059e+37 }
 0x165   :  { %v2046_v15 = vpop.f32.mrf.mxu1 }
 0x166   :  { %v1490_v1 = vpop.eup %1489  ;;  %v793_v18 = vadd.f32 %v1488_v58, %v792_v33  ;;  %v1313_v20 = vmul.f32 -1.442695, %v2046_v15 }
 0x167   :  { %v1492_v13 = vpop.eup %1491  ;;  %v705_v25 = vadd.f32 1.0, %v1490_v1 }
 0x168   :  { %v797_v26 = vsel %vm796_vm2, %v1488_v58, %v793_v18  ;;  %v805_v12 = vmul.f32 %v1492_v13, %v704_v63  ;;  %1493 = vpow2.f32 %v1313_v20  ;;  %vm810_vm4 = vweird.f32 %v1492_v13 }
 0x169   :  { %v802_v29 = vsel %vm799_vm3, %v801_v22, %v797_v26  ;;  %1495 = vrcp.f32 %v705_v25  ;;  %vm811_vm7 = vmor %vm809_vm5, %vm810_vm4  ;;  %v828_v47 = vand.u32 2147483647, %v705_v25  ;;  %v830_v48 = vand.u32 2147483648, %v705_v25 }
 0x16a   :  { %v959_v60 = vmul.f32 %v802_v29, %v2031_v27  ;;  %v806_v36 = vsub.f32 1.0, %v805_v12  ;;  %vm824_vm10 = vweird.f32 %v705_v25 }
 0x16b   :  { %vm829_vm12 = vcmp.eq.f32.partialorder %v828_v47, 8.507059e+37  ;;  %v831_v54 = vor.u32 1.1754944e-38, %v830_v48 }
 0x16c   :  { %v807_v31 = vmul.f32 %v1492_v13, %v806_v36  ;;  %v975_v9 = vmul.f32 %v959_v60, %v541_v28  ;;  %v2055_v28 = vpop.f32.mrf.mxu0 }
 0x16d   :  { %v2052_v34 = vpop.f32.mrf.mxu1 }
 0x16e   :  { %v1494_v11 = vpop.eup %1493  ;;  %v808_v16 = vadd.f32 %v1492_v13, %v807_v31  ;;  %v1314_v6 = vmul.f32 -1.442695, %v2052_v34  ;;  %v1004_v35 = vpack.c.bf16 %v975_v9, %v974_v23 }
 0x16f   :  { %v1496_v0 = vpop.eup %1495  ;;  %v706_v24 = vadd.f32 1.0, %v1494_v11 }
 0x170   :  { %v820_v27 = vmul.f32 %v1496_v0, %v705_v25  ;;  %1497 = vpow2.f32 %v1314_v6  ;;  %1092 = vmatmul.bf16.gmra.mxu2 %v1004_v35  ;;  %v812_v8 = vsel %vm811_vm7, %v1492_v13, %v808_v16  ;;  %vm825_vm9 = vweird.f32 %v1496_v0 }
 0x171   :  { %1499 = vrcp.f32 %v706_v24  ;;  %v817_v3 = vsel %vm814_vm8, %v816_v46, %v812_v8  ;;  %vm826_vm11 = vmor %vm824_vm10, %vm825_vm9  ;;  %v845_v40 = vand.u32 2147483648, %v706_v24  ;;  %vm839_vm14 = vweird.f32 %v706_v24 }
 0x172   :  { %v821_v42 = vsub.f32 1.0, %v820_v27  ;;  %v960_v19 = vmul.f32 %v817_v3, %v2034_v41  ;;  %v843_v33 = vand.u32 2147483647, %v706_v24 }
 0x173   :  { %v846_v1 = vor.u32 1.1754944e-38, %v845_v40 }
 0x174   :  { %v822_v44 = vmul.f32 %v1496_v0, %v821_v42  ;;  %v976_v58 = vmul.f32 %v960_v19, %v2044_v4  ;;  %v551_v7 = vpop.f32.mrf.mxu0  ;;  %vm844_vm1 = vcmp.eq.f32.partialorder %v843_v33, 8.507059e+37 }
 0x175   :  { %v2057_v50 = vpop.f32.mrf.mxu1 }
 0x176   :  { %v1498_v30 = vpop.eup %1497  ;;  %v823_v51 = vadd.f32 %v1496_v0, %v822_v44  ;;  %v1315_v52 = vmul.f32 -1.442695, %v2057_v50 }
 0x177   :  { %v1500_v10 = vpop.eup %1499  ;;  %v707_v39 = vadd.f32 1.0, %v1498_v30 }
 0x178   :  { %v827_v55 = vsel %vm826_vm11, %v1496_v0, %v823_v51  ;;  %v835_v56 = vmul.f32 %v1500_v10, %v706_v24  ;;  %1501 = vpow2.f32 %v1315_v52  ;;  %vm840_vm13 = vweird.f32 %v1500_v10 }
 0x179   :  { %v832_v57 = vsel %vm829_vm12, %v831_v54, %v827_v55  ;;  %1503 = vrcp.f32 %v707_v39  ;;  %vm841_vm15 = vmor %vm839_vm14, %vm840_vm13  ;;  %v858_v18 = vand.u32 2147483647, %v707_v39  ;;  %v860_v20 = vand.u32 2147483648, %v707_v39 }
 0x17a   :  { %v961_v43 = vmul.f32 %v832_v57, %v2041_v5  ;;  %v836_v49 = vsub.f32 1.0, %v835_v56  ;;  %vm854_vm3 = vweird.f32 %v707_v39 }
 0x17b   :  { %vm859_vm5 = vcmp.eq.f32.partialorder %v858_v18, 8.507059e+37  ;;  %v861_v60 = vor.u32 1.1754944e-38, %v860_v20 }
 0x17c   :  { %v837_v62 = vmul.f32 %v1500_v10, %v836_v49  ;;  %v977_v61 = vmul.f32 %v961_v43, %v546_v38  ;;  %v554_v11 = vpop.f32.mrf.mxu0 }
 0x17d   :  { %v2063_v63 = vpop.f32.mrf.mxu1 }
 0x17e   :  { %v1502_v21 = vpop.eup %1501  ;;  %v838_v53 = vadd.f32 %v1500_v10, %v837_v62  ;;  %v1316_v2 = vmul.f32 -1.442695, %v2063_v63  ;;  %v1005_v41 = vpack.c.bf16 %v977_v61, %v976_v58 }
 0x17f   :  { %v1504_v59 = vpop.eup %1503  ;;  %v708_v32 = vadd.f32 1.0, %v1502_v21 }
 0x180   :  { %v850_v5 = vmul.f32 %v1504_v59, %v707_v39  ;;  %1505 = vpow2.f32 %v1316_v2  ;;  %1097 = vmatmul.bf16.gmra.mxu2 %v1005_v41  ;;  %v842_v4 = vsel %vm841_vm15, %v1500_v10, %v838_v53  ;;  %vm855_vm2 = vweird.f32 %v1504_v59 }
 0x181   :  { %1507 = vrcp.f32 %v708_v32  ;;  %v847_v22 = vsel %vm844_vm1, %v846_v1, %v842_v4  ;;  %vm856_vm4 = vmor %vm854_vm3, %vm855_vm2  ;;  %v875_v46 = vand.u32 2147483648, %v708_v32  ;;  %vm869_vm8 = vweird.f32 %v708_v32 }
 0x182   :  { %v851_v14 = vsub.f32 1.0, %v850_v5  ;;  %v962_v38 = vmul.f32 %v847_v22, %v2046_v15  ;;  %v873_v48 = vand.u32 2147483647, %v708_v32 }
 0x184   :  { %v852_v13 = vmul.f32 %v1504_v59, %v851_v14  ;;  %v978_v0 = vmul.f32 %v962_v38, %v2055_v28  ;;  %v876_v28 = vor.u32 1.1754944e-38, %v875_v46  ;;  %v556_v30 = vpop.f32.mrf.mxu0  ;;  %vm874_vm10 = vcmp.eq.f32.partialorder %v873_v48, 8.507059e+37 }
 0x185   :  { %v2066_v25 = vpop.f32.mrf.mxu1 }
 0x186   :  { %v1506_v17 = vpop.eup %1505  ;;  %v853_v26 = vadd.f32 %v1504_v59, %v852_v13  ;;  %v1317_v12 = vmul.f32 -1.442695, %v2066_v25 }
 0x187   :  { %v1508_v29 = vpop.eup %1507  ;;  %v709_v36 = vadd.f32 1.0, %v1506_v17 }
 0x188   :  { %v857_v31 = vsel %vm856_vm4, %v1504_v59, %v853_v26  ;;  %v865_v23 = vmul.f32 %v1508_v29, %v708_v32  ;;  %1509 = vpow2.f32 %v1317_v12  ;;  %vm870_vm7 = vweird.f32 %v1508_v29 }
 0x189   :  { %v862_v9 = vsel %vm859_vm5, %v861_v60, %v857_v31  ;;  %1511 = vrcp.f32 %v709_v36  ;;  %vm871_vm9 = vmor %vm869_vm8, %vm870_vm7  ;;  %v888_v51 = vand.u32 2147483647, %v709_v36  ;;  %v890_v52 = vand.u32 2147483648, %v709_v36 }
 0x18a   :  { %v963_v16 = vmul.f32 %v862_v9, %v2052_v34  ;;  %v866_v6 = vsub.f32 1.0, %v865_v23  ;;  %vm884_vm12 = vweird.f32 %v709_v36 }
 0x18b   :  { %vm889_vm14 = vcmp.eq.f32.partialorder %v888_v51, 8.507059e+37  ;;  %v891_v43 = vor.u32 1.1754944e-38, %v890_v52 }
 0x18c   :  { %v867_v35 = vmul.f32 %v1508_v29, %v866_v6  ;;  %v979_v37 = vmul.f32 %v963_v16, %v551_v7  ;;  %v559_v7 = vpop.f32.mrf.mxu0 }
 0x18d   :  { %v2072_v24 = vpop.f32.mrf.mxu1 }
 0x18e   :  { %v1510_v45 = vpop.eup %1509  ;;  %v868_v27 = vadd.f32 %v1508_v29, %v867_v35  ;;  %v1318_v15 = vmul.f32 -1.442695, %v2072_v24  ;;  %v1006_v8 = vpack.c.bf16 %v979_v37, %v978_v0 }
 0x18f   :  { %v1512_v42 = vpop.eup %1511  ;;  %v710_v47 = vadd.f32 1.0, %v1510_v45 }
 0x190   :  { %v880_v44 = vmul.f32 %v1512_v42, %v709_v36  ;;  %1513 = vpow2.f32 %v1318_v15  ;;  %1102 = vmatmul.bf16.gmra.mxu2 %v1006_v8  ;;  %v872_v34 = vsel %vm871_vm9, %v1508_v29, %v868_v27  ;;  %vm885_vm11 = vweird.f32 %v1512_v42 }
 0x191   :  { %1515 = vrcp.f32 %v710_v47  ;;  %v877_v54 = vsel %vm874_vm10, %v876_v28, %v872_v34  ;;  %vm886_vm13 = vmor %vm884_vm12, %vm885_vm11  ;;  %v905_v1 = vand.u32 2147483648, %v710_v47  ;;  %vm899_vm1 = vweird.f32 %v710_v47 }
 0x192   :  { %v881_v3 = vsub.f32 1.0, %v880_v44  ;;  %v964_v62 = vmul.f32 %v877_v54, %v2057_v50  ;;  %v903_v20 = vand.u32 2147483647, %v710_v47 }
 0x193   :  { %v906_v17 = vor.u32 1.1754944e-38, %v905_v1 }
 0x194   :  { %v882_v10 = vmul.f32 %v1512_v42, %v881_v3  ;;  %v980_v59 = vmul.f32 %v964_v62, %v554_v11  ;;  %vm904_vm3 = vcmp.eq.f32.partialorder %v903_v20, 8.507059e+37  ;;  %v561_v23 = vpop.f32.mrf.mxu0 }
 0x195   :  { %v2075_v39 = vpop.f32.mrf.mxu1 }
 0x196   :  { %v1514_v19 = vpop.eup %1513  ;;  %v883_v55 = vadd.f32 %v1512_v42, %v882_v10  ;;  %v1319_v56 = vmul.f32 -1.442695, %v2075_v39 }
 0x197   :  { %v1516_v57 = vpop.eup %1515  ;;  %v711_v49 = vadd.f32 1.0, %v1514_v19 }
 0x198   :  { %v887_v58 = vsel %vm886_vm13, %v1512_v42, %v883_v55  ;;  %v895_v61 = vmul.f32 %v1516_v57, %v710_v47  ;;  %1517 = vpow2.f32 %v1319_v56  ;;  %vm900_vm15 = vweird.f32 %v1516_v57 }
 0x199   :  { %v892_v21 = vsel %vm889_vm14, %v891_v43, %v887_v58  ;;  %1519 = vrcp.f32 %v711_v49  ;;  %vm901_vm2 = vmor %vm899_vm1, %vm900_vm15  ;;  %v920_v26 = vand.u32 2147483648, %v711_v49  ;;  %v918_v29 = vand.u32 2147483647, %v711_v49 }
 0x19a   :  { %v965_v53 = vmul.f32 %v892_v21, %v2063_v63  ;;  %v896_v2 = vsub.f32 1.0, %v895_v61  ;;  %vm914_vm5 = vweird.f32 %v711_v49  ;;  %v986_v21 = vld [vmem:[#allocation3] sm:$0xff] }
 0x19b   :  { %v921_v9 = vor.u32 1.1754944e-38, %v920_v26  ;;  %vm919_vm8 = vcmp.eq.f32.partialorder %v918_v29, 8.507059e+37  ;;  %v991_v29 = vld [vmem:[#allocation3 + $0x28] sm:$0xff] }
 0x19c   :  { %v897_v41 = vmul.f32 %v1516_v57, %v896_v2  ;;  %v981_v40 = vmul.f32 %v965_v53, %v556_v30 }
 0x19d   :  { %v2080_v32 = vpop.f32.mrf.mxu1 }
 0x19e   :  { %v1518_v33 = vpop.eup %1517  ;;  %v898_v5 = vadd.f32 %v1516_v57, %v897_v41  ;;  %v1320_v4 = vmul.f32 -1.442695, %v2080_v32  ;;  %v1007_v50 = vpack.c.bf16 %v981_v40, %v980_v59  ;;  %v987_v41 = vld [vmem:[#allocation3 + $0x8] sm:$0xff] }
 0x19f   :  { %v1520_v14 = vpop.eup %1519  ;;  %v712_v18 = vadd.f32 1.0, %v1518_v33 }
 0x1a0   :  { %v910_v13 = vmul.f32 %v1520_v14, %v711_v49  ;;  %1521 = vpow2.f32 %v1320_v4  ;;  %1107 = vmatmul.bf16.gmra.mxu2 %v1007_v50  ;;  %v902_v63 = vsel %vm901_vm2, %v1516_v57, %v898_v5  ;;  %vm915_vm4 = vweird.f32 %v1520_v14 }
 0x1a1   :  { %1523 = vrcp.f32 %v712_v18  ;;  %v907_v60 = vsel %vm904_vm3, %v906_v17, %v902_v63  ;;  %vm916_vm7 = vmor %vm914_vm5, %vm915_vm4  ;;  %v935_v48 = vand.u32 2147483648, %v712_v18  ;;  %vm929_vm10 = vweird.f32 %v712_v18  ;;  %v990_v63 = vld [vmem:[#allocation3 + $0x20] sm:$0xff] }
 0x1a2   :  { %v911_v22 = vsub.f32 1.0, %v910_v13  ;;  %v966_v16 = vmul.f32 %v907_v60, %v2066_v25  ;;  %v933_v44 = vand.u32 2147483647, %v712_v18  ;;  %v564_v25 = vpop.f32.mrf.mxu0 }
 0x1a3   :  { %v936_v30 = vor.u32 1.1754944e-38, %v935_v48  ;;  %v995_v48 = vld [vmem:[#allocation3 + $0x48] sm:$0xff] }
 0x1a4   :  { %v912_v12 = vmul.f32 %v1520_v14, %v911_v22  ;;  %v982_v15 = vmul.f32 %v966_v16, %v559_v7  ;;  %vm934_vm12 = vcmp.eq.f32.partialorder %v933_v44, 8.507059e+37 }
 0x1a6   :  { %v1522_v36 = vpop.eup %1521  ;;  %v913_v38 = vadd.f32 %v1520_v14, %v912_v12 }
 0x1a7   :  { %v1524_v31 = vpop.eup %1523  ;;  %v713_v11 = vadd.f32 1.0, %v1522_v36 }
 0x1a8   :  { %v917_v6 = vsel %vm916_vm7, %v1520_v14, %v913_v38  ;;  %v925_v35 = vmul.f32 %v1524_v31, %v712_v18  ;;  %vm930_vm9 = vweird.f32 %v1524_v31  ;;  %v989_v14 = vld [vmem:[#allocation3 + $0x18] sm:$0xff] }
 0x1a9   :  { %v922_v0 = vsel %vm919_vm8, %v921_v9, %v917_v6  ;;  %1525 = vrcp.f32 %v713_v11  ;;  %vm931_vm11 = vmor %vm929_vm10, %vm930_vm9  ;;  %v950_v51 = vand.u32 2147483648, %v713_v11  ;;  %v948_v52 = vand.u32 2147483647, %v713_v11 }
 0x1aa   :  { %v967_v37 = vmul.f32 %v922_v0, %v2072_v24  ;;  %v926_v45 = vsub.f32 1.0, %v925_v35  ;;  %vm944_vm14 = vweird.f32 %v713_v11  ;;  %v566_v49 = vpop.f32.mrf.mxu0  ;;  %v993_v35 = vld [vmem:[#allocation3 + $0x38] sm:$0xff] }
 0x1ab   :  { %v951_v19 = vor.u32 1.1754944e-38, %v950_v51  ;;  %vm949_vm1 = vcmp.eq.f32.partialorder %v948_v52, 8.507059e+37 }
 0x1ac   :  { %v927_v27 = vmul.f32 %v1524_v31, %v926_v45  ;;  %v983_v8 = vmul.f32 %v967_v37, %v561_v23  ;;  %v992_v23 = vld [vmem:[#allocation3 + $0x30] sm:$0xff] }
 0x1ae   :  { %v928_v42 = vadd.f32 %v1524_v31, %v927_v27  ;;  %v1008_v46 = vpack.c.bf16 %v983_v8, %v982_v15  ;;  %v994_v15 = vld [vmem:[#allocation3 + $0x40] sm:$0xff] }
 0x1af   :  { %v1526_v47 = vpop.eup %1525 }
 0x1b0   :  { %v940_v34 = vmul.f32 %v1526_v47, %v713_v11  ;;  %1112 = vmatmul.bf16.vlgmr.msra.gmra.mxu3 %v1008_v46  ;;  %v932_v3 = vsel %vm931_vm11, %v1524_v31, %v928_v42  ;;  %vm945_vm13 = vweird.f32 %v1526_v47 }
 0x1b1   :  { %v937_v10 = vsel %vm934_vm12, %v936_v30, %v932_v3  ;;  %vm946_vm15 = vmor %vm944_vm14, %vm945_vm13 }
 0x1b2   :  { %v941_v28 = vsub.f32 1.0, %v940_v34  ;;  %v968_v55 = vmul.f32 %v937_v10, %v2075_v39  ;;  %v997_v10 = vld [vmem:[#allocation3 + $0x58] sm:$0xff] }
 0x1b4   :  { %v942_v24 = vmul.f32 %v1526_v47, %v941_v28  ;;  %v984_v58 = vmul.f32 %v968_v55, %v564_v25  ;;  %v996_v28 = vld [vmem:[#allocation3 + $0x50] sm:$0xff] }
 0x1b6   :  { %v943_v54 = vadd.f32 %v1526_v47, %v942_v24 }
 0x1b8   :  { %v947_v56 = vsel %vm946_vm15, %v1526_v47, %v943_v54 }
 0x1b9   :  { %v952_v57 = vsel %vm949_vm1, %v951_v19, %v947_v56 }
 0x1ba   :  { %v969_v43 = vmul.f32 %v952_v57, %v2080_v32  ;;  %v988_v32 = vld [vmem:[#allocation3 + $0x10] sm:$0xff]  ;;  %v998_v57 = vld [vmem:[#allocation3 + $0x60] sm:$0xff] }
 0x1bc   :  { %v985_v62 = vmul.f32 %v969_v43, %v566_v49 }
 0x1be   :  { %v1009_v61 = vpack.c.bf16 %v985_v62, %v984_v58 }
 0x1c0   :  { %1117 = vmatmul.bf16.gmra.mxu3 %v1009_v61  ;;  %v999_v61 = vld [vmem:[#allocation3 + $0x68] sm:$0xff] }
 0x1d3   :  { %v1083_v53 = vpop.f32.mrf.mxu2 }
 0x1d4   :  { %v1123_v2 = vadd.f32 %v1083_v53, %v986_v21 }
 0x1d6   :  { %1139 = vst.msk [vmem:[#allocation3] sm:$0xff] %vm74_vm0, %v1123_v2 }
 0x1db   :  { %v1085_v59 = vpop.f32.mrf.mxu2 }
 0x1dc   :  { %v1124_v40 = vadd.f32 %v1085_v59, %v987_v41  ;;  %v1000_v59 = vld [vmem:[#allocation3 + $0x70] sm:$0xff] }
 0x1dd   :  { %v1158_v7 = vld [vmem:[#allocation3] sm:$0xff] }
 0x1de   :  { %v1174_v39 = vpack.c.bf16 %v1158_v7, %v1158_v7  ;;  %1140 = vst.msk [vmem:[#allocation3 + $0x8] sm:$0xff] %vm74_vm0, %v1124_v40 }
 0x1e0   :  { %1191 = vst.msk [vmem:[#allocation4] sm:$0xf] %vm374_vm6, %v1174_v39 }
 0x1e3   :  { %v1088_v33 = vpop.f32.mrf.mxu2 }
 0x1e4   :  { %v1125_v5 = vadd.f32 %v1088_v33, %v988_v32  ;;  %v1001_v33 = vld [vmem:[#allocation3 + $0x78] sm:$0xff] }
 0x1e5   :  { %v1159_v4 = vld [vmem:[#allocation3 + $0x8] sm:$0xff] }
 0x1e6   :  { %v1175_v50 = vpack.c.bf16 %v1159_v4, %v1159_v4  ;;  %1141 = vst.msk [vmem:[#allocation3 + $0x10] sm:$0xff] %vm74_vm0, %v1125_v5 }
 0x1e8   :  { %1192 = vst.msk [vmem:[#allocation4 + $0x4] sm:$0xf] %vm374_vm6, %v1175_v50 }
 0x1eb   :  { %v1090_v1 = vpop.f32.mrf.mxu2 }
 0x1ec   :  { %v1126_v18 = vadd.f32 %v1090_v1, %v989_v14 }
 0x1ed   :  { %v1160_v20 = vld [vmem:[#allocation3 + $0x10] sm:$0xff] }
 0x1ee   :  { %v1176_v13 = vpack.c.bf16 %v1160_v20, %v1160_v20  ;;  %1142 = vst.msk [vmem:[#allocation3 + $0x18] sm:$0xff] %vm74_vm0, %v1126_v18 }
 0x1f0   :  { %1193 = vst.msk [vmem:[#allocation4 + $0x8] sm:$0xf] %vm374_vm6, %v1176_v13 }
 0x1f3   :  { %v1093_v22 = vpop.f32.mrf.mxu2 }
 0x1f4   :  { %v1127_v17 = vadd.f32 %v1093_v22, %v990_v63 }
 0x1f5   :  { %v1161_v26 = vld [vmem:[#allocation3 + $0x18] sm:$0xff] }
 0x1f6   :  { %v1177_v12 = vpack.c.bf16 %v1161_v26, %v1161_v26  ;;  %1143 = vst.msk [vmem:[#allocation3 + $0x20] sm:$0xff] %vm74_vm0, %v1127_v17 }
 0x1f8   :  { %1194 = vst.msk [vmem:[#allocation4 + $0xc] sm:$0xf] %vm374_vm6, %v1177_v12 }
 0x1fb   :  { %v1095_v60 = vpop.f32.mrf.mxu2 }
 0x1fc   :  { %v1128_v36 = vadd.f32 %v1095_v60, %v991_v29 }
 0x1fd   :  { %v1162_v38 = vld [vmem:[#allocation3 + $0x20] sm:$0xff] }
 0x1fe   :  { %v1178_v31 = vpack.c.bf16 %v1162_v38, %v1162_v38  ;;  %1144 = vst.msk [vmem:[#allocation3 + $0x28] sm:$0xff] %vm74_vm0, %v1128_v36 }
 0x200   :  { %1195 = vst.msk [vmem:[#allocation4 + $0x10] sm:$0xf] %vm374_vm6, %v1178_v31 }
 0x203   :  { %v1098_v9 = vpop.f32.mrf.mxu2 }
 0x204   :  { %v1129_v11 = vadd.f32 %v1098_v9, %v992_v23 }
 0x205   :  { %v1163_v16 = vld [vmem:[#allocation3 + $0x28] sm:$0xff] }
 0x206   :  { %v1179_v6 = vpack.c.bf16 %v1163_v16, %v1163_v16  ;;  %1145 = vst.msk [vmem:[#allocation3 + $0x30] sm:$0xff] %vm74_vm0, %v1129_v11 }
 0x208   :  { %1196 = vst.msk [vmem:[#allocation4 + $0x14] sm:$0xf] %vm374_vm6, %v1179_v6 }
 0x20b   :  { %v1100_v0 = vpop.f32.mrf.mxu2 }
 0x20c   :  { %v1130_v37 = vadd.f32 %v1100_v0, %v993_v35 }
 0x20d   :  { %v1164_v45 = vld [vmem:[#allocation3 + $0x30] sm:$0xff] }
 0x20e   :  { %v1180_v27 = vpack.c.bf16 %v1164_v45, %v1164_v45  ;;  %1146 = vst.msk [vmem:[#allocation3 + $0x38] sm:$0xff] %vm74_vm0, %v1130_v37 }
 0x210   :  { %1197 = vst.msk [vmem:[#allocation4 + $0x18] sm:$0xf] %vm374_vm6, %v1180_v27 }
 0x213   :  { %v1103_v8 = vpop.f32.mrf.mxu2 }
 0x214   :  { %v1131_v42 = vadd.f32 %v1103_v8, %v994_v15 }
 0x215   :  { %v1165_v46 = vld [vmem:[#allocation3 + $0x38] sm:$0xff] }
 0x216   :  { %v1181_v47 = vpack.c.bf16 %v1165_v46, %v1165_v46  ;;  %1147 = vst.msk [vmem:[#allocation3 + $0x40] sm:$0xff] %vm74_vm0, %v1131_v42 }
 0x218   :  { %1198 = vst.msk [vmem:[#allocation4 + $0x1c] sm:$0xf] %vm374_vm6, %v1181_v47 }
 0x21b   :  { %v1105_v44 = vpop.f32.mrf.mxu2 }
 0x21c   :  { %v1132_v34 = vadd.f32 %v1105_v44, %v995_v48 }
 0x21d   :  { %v1166_v25 = vld [vmem:[#allocation3 + $0x40] sm:$0xff] }
 0x21e   :  { %v1182_v3 = vpack.c.bf16 %v1166_v25, %v1166_v25  ;;  %1148 = vst.msk [vmem:[#allocation3 + $0x48] sm:$0xff] %vm74_vm0, %v1132_v34 }
 0x220   :  { %1199 = vst.msk [vmem:[#allocation4 + $0x20] sm:$0xf] %vm374_vm6, %v1182_v3 }
 0x223   :  { %v1108_v30 = vpop.f32.mrf.mxu2 }
 0x224   :  { %v1133_v51 = vadd.f32 %v1108_v30, %v996_v28 }
 0x225   :  { %v1167_v24 = vld [vmem:[#allocation3 + $0x48] sm:$0xff] }
 0x226   :  { %v1183_v52 = vpack.c.bf16 %v1167_v24, %v1167_v24  ;;  %1149 = vst.msk [vmem:[#allocation3 + $0x50] sm:$0xff] %vm74_vm0, %v1133_v51 }
 0x228   :  { %1200 = vst.msk [vmem:[#allocation4 + $0x24] sm:$0xf] %vm374_vm6, %v1183_v52 }
 0x22b   :  { %v1110_v54 = vpop.f32.mrf.mxu2 }
 0x22c   :  { %v1134_v19 = vadd.f32 %v1110_v54, %v997_v10 }
 0x22d   :  { %v1168_v55 = vld [vmem:[#allocation3 + $0x50] sm:$0xff] }
 0x22e   :  { %v1184_v56 = vpack.c.bf16 %v1168_v55, %v1168_v55  ;;  %1150 = vst.msk [vmem:[#allocation3 + $0x58] sm:$0xff] %vm74_vm0, %v1134_v19 }
 0x230   :  { %1201 = vst.msk [vmem:[#allocation4 + $0x28] sm:$0xf] %vm374_vm6, %v1184_v56 }
 0x233   :  { %v1113_v43 = vpop.f32.mrf.mxu3 }
 0x234   :  { %v1135_v49 = vadd.f32 %v1113_v43, %v998_v57 }
 0x235   :  { %v1169_v62 = vld [vmem:[#allocation3 + $0x58] sm:$0xff] }
 0x236   :  { %v1185_v58 = vpack.c.bf16 %v1169_v62, %v1169_v62  ;;  %1151 = vst.msk [vmem:[#allocation3 + $0x60] sm:$0xff] %vm74_vm0, %v1135_v49 }
 0x238   :  { %1202 = vst.msk [vmem:[#allocation4 + $0x2c] sm:$0xf] %vm374_vm6, %v1185_v58 }
 0x23b   :  { %v1115_v21 = vpop.f32.mrf.mxu3 }
 0x23c   :  { %v1136_v53 = vadd.f32 %v1115_v21, %v999_v61 }
 0x23d   :  { %v1170_v2 = vld [vmem:[#allocation3 + $0x60] sm:$0xff] }
 0x23e   :  { %v1186_v41 = vpack.c.bf16 %v1170_v2, %v1170_v2  ;;  %1152 = vst.msk [vmem:[#allocation3 + $0x68] sm:$0xff] %vm74_vm0, %v1136_v53 }
 0x240   :  { %1203 = vst.msk [vmem:[#allocation4 + $0x30] sm:$0xf] %vm374_vm6, %v1186_v41 }
 0x243   :  { %v1118_v40 = vpop.f32.mrf.mxu3 }
 0x244   :  { %v1137_v7 = vadd.f32 %v1118_v40, %v1000_v59 }
 0x245   :  { %v1171_v39 = vld [vmem:[#allocation3 + $0x68] sm:$0xff] }
 0x246   :  { %v1187_v32 = vpack.c.bf16 %v1171_v39, %v1171_v39  ;;  %1153 = vst.msk [vmem:[#allocation3 + $0x70] sm:$0xff] %vm74_vm0, %v1137_v7 }
 0x248   :  { %1204 = vst.msk [vmem:[#allocation4 + $0x34] sm:$0xf] %vm374_vm6, %v1187_v32 }
 0x24b   :  { %v1120_v5 = vpop.f32.mrf.mxu3 }
 0x24c   :  { %v1138_v4 = vadd.f32 %v1120_v5, %v1001_v33 }
 0x24d   :  { %v1172_v50 = vld [vmem:[#allocation3 + $0x70] sm:$0xff] }
 0x24e   :  { %v1188_v14 = vpack.c.bf16 %v1172_v50, %v1172_v50  ;;  %1154 = vst.msk [vmem:[#allocation3 + $0x78] sm:$0xff] %vm74_vm0, %v1138_v4 }
 0x250   :  { %1205 = vst.msk [vmem:[#allocation4 + $0x38] sm:$0xf] %vm374_vm6, %v1188_v14 }
 0x255   :  { %v1173_v1 = vld [vmem:[#allocation3 + $0x78] sm:$0xff] }
 0x256   :  { %v1189_v18 = vpack.c.bf16 %v1173_v1, %v1173_v1 }
 0x258   :  { %1206 = vst.msk [vmem:[#allocation4 + $0x3c] sm:$0xf] %vm374_vm6, %v1189_v18 }
 0x259   :  { %1219 = dma.vmem_to_hbm [thread:$0]  %s1212_s13, 1024, %s1214_s16, [#allocation5], %s1555_s17, %s1555_s17, %s1556_s18  }
 0x25a   :  { %1551 = dma.done.wait [#allocation5], 1024  }
 0x25b   :  { %1552 = vsyncadd [#allocation5], 4294966272 }
 0x25c   :  { %1224 = vsyncpa [#allocation5], 1 }

// kernel: block_forward.3
= control target key start
LH: loop header
LB: loop body
LE: loop exit
PB: predicated region body
PF: predicated region fallthrough
CT: control target
= control target key end

     0   :  { %13 = vsyncpa [#allocation3], 0  ;;  %s6251_s0 = inlined_call_operand.hbm [shape: bf16[2,64,64], index: 0, kind: input, shape index: {}]   ;;  %s6252_s1 = inlined_call_operand.vmem [shape: f32[1,64], index: 1, kind: input, shape index: {}]   ;;  %s6253_s2 = inlined_call_operand.vmem [shape: bf16[64,192], index: 2, kind: input, shape index: {}]   ;;  %s6254_s3 = inlined_call_operand.vmem [shape: f32[64,4], index: 3, kind: input, shape index: {}]   ;;  %s6255_s4 = inlined_call_operand.vmem [shape: f32[64,4], index: 4, kind: input, shape index: {}]   ;;  %s6256_s5 = inlined_call_operand.vmem [shape: bf16[2,64,64], index: 5, kind: output, shape index: {0}]   ;;  %s6257_s6 = inlined_call_operand.vmem [shape: bf16[2,64,64], index: 6, kind: output, shape index: {1}]   ;;  %s6258_s7 = inlined_call_operand.vmem [shape: bf16[2,64,64], index: 7, kind: output, shape index: {2}]  }
   0x1   :  { %15 = vsyncpa [#allocation3 + $0x1], 0  ;;  %s3656_s24 = smov 0   ;;  %s3658_s25 = smov 0  }
   0x2   :  { %s3660_s26 = smov 0   ;;  %s3662_s27 = smov 0  }
   0x3   :  { %s3664_s28 = smov 0   ;;  %s3666_s29 = smov 0  }
   0x4 LB: > { %s3112_s30 = sadd.s32 4294967295, %s3595_s29   ;;  %s33_s8 = sadd.s32 1, %s3591_s28  ;;  %s3595_s29 = sphi %s3666_s29, %s21_s29   ;;  %s3591_s28 = sphi %s3664_s28, %s6534_s28   ;;  %s3587_s27 = sphi %s3662_s27, %s6533_s27   ;;  %s3583_s26 = sphi %s3660_s26, %s6532_s26   ;;  %s3579_s25 = sphi %s3658_s25, %s6531_s25   ;;  %s3575_s24 = sphi %s3656_s24, %s6530_s24  }
   0x5   : > { %p35_p0 = scmp.ge.s32.totalorder %s33_s8, 2  ;;  %s42_s9 = sadd.s32 1, %s3583_s26 }
   0x6   : > { %p49_p1 = scmp.ne.s32.totalorder %s3583_s26, %s3579_s25  ;;  %p50_p2 = scmp.eq.s32.totalorder %s3595_s29, 0 }
   0x7   : > { %s6536_s8 = smov (%p35_p0, %s33_s8), 0  ;;  %p55_p4 = scmp.ne.s32.totalorder %s3579_s25, %s3575_s24 }
   0x8   : > { %p3692_p3 = por %p50_p2, %p49_p1  ;;  %s37_s11 = ssub.s32 %s3591_s28, %s6536_s8 }
   0x9   : > { %p56_p5 = scmp.eq.s32.totalorder %s3112_s30, 0  ;;  %p40_p6 = scmp.eq.s32.totalorder %s37_s11, 0 }
   0xa   : > { %p3216_p8 = scmp.lt.s32.totalorder %s3595_s29, 2  ;;  %s281_s14 = sand.u32 1, %s3583_s26  }
   0xb   : > { %p3699_p7 = por %p56_p5, %p55_p4  ;;  %s3171_s15 = sshll.u32 %s3591_s28, 5 }
   0xc   : > { %s3705_s13 = scalar_select %p40_p6, %s3583_s26, %s42_s9  }
   0xd   : > { %s3118_s16 = sshll.u32 %s281_s14, 5  ;;  %s292_s19 = scalar_lea.hbm %s6251_s0, %s3171_s15 }
   0xe   : > { %s293_s20 = sshll.u32 %s292_s19, 4  ;;  %s285_s21 = scalar_lea.vmem [#allocation2], %s3118_s16  ;;  %s294_s20 = int_to_ptr.hbm [resolvable:$true] %s293_s20 }
   0xf   : > { %s295_s22 = sshll.u32 %s285_s21, 4  ;;  %p3213_p9 = pnand %p3216_p8, %p3692_p3  ;;  %s296_s22 = int_to_ptr.vmem [resolvable:$true] %s295_s22 }
  0x10   : > { %p3121_p10 = scmp.ge.s32.totalorder %s3595_s29, 1  ;;  %p303_p11 = scmp.lt.s32.totalorder %s3595_s29, 3 }
  0x11   : > { %s282_s23 = scalar_lea.sflag [#allocation3], %s281_s14  ;;  %s3597_s24 = smov 64  }
  0x12   : > { %s3598_s30 = smov 4   ;;  %p304_p12 = pnand %p3121_p10, %p303_p11 }
  0x13   : > { %3215 = dma.hbm_to_vmem [thread:$0]  (!%p3213_p9), %s294_s20, 512, %s296_s22, %s282_s23, %s3597_s24, %s3597_s24, %s3598_s30  }
  0x14   : > { %307 = sbr.rel (%p304_p12) target bundleno = 2334 (0x91e), region = 40 }
  0x19   : > { %s309_s9 = sand.u32 1, %s3579_s25  }
  0x1a   : > { %s3122_s11 = sshll.u32 %s309_s9, 5  ;;  %s310_s15 = scalar_lea.sflag [#allocation3], %s309_s9 }
  0x1b   : > { %s313_s17 = scalar_lea.vmem [#allocation2], %s3122_s11 }
  0x1c   : > { %3570 = dma.done.wait (%p3699_p7), %s310_s15, 512  }
  0x1d   : > { %3572 = vsyncadd (%p3699_p7), %s310_s15, 4294966784  ;;  %v3200_v0 = vld [vmem:[%s313_s17 + $0x10] sm:$0xff]   ;;  %v3199_v1 = vld [vmem:[%s313_s17 + $0x8] sm:$0xff]   ;;  %vm445_vm0 = vcmask 523264   ;;  %s3599_s14 = smov 4   ;;  %s3600_s10 = smov 16  }
  0x1e   : > { %v3184_v2 = vld [vmem:[%s313_s17] sm:$0xff]   ;;  %v3721_v3 = vunpack.c.l.bf16 %v3200_v0  ;;  %v3723_v4 = vunpack.c.l.bf16 %v3199_v1  ;;  %v3727_v6 = vunpack.c.h.bf16 %v3200_v0  ;;  %v3735_v10 = vunpack.c.h.bf16 %v3199_v1  ;;  %v3201_v18 = vld [vmem:[%s313_s17 + $0x18] sm:$0xff]   ;;  %v3771_v29 = vld [vmem:[%s6255_s4 + $0x8] sm:$0xff]  ;;  %s3602_s18 = smov 20   ;;  %s3604_s11 = smov 36  }
  0x1f   : > { %v3725_v5 = vunpack.c.l.bf16 %v3184_v2  ;;  %v3737_v11 = vunpack.c.h.bf16 %v3184_v2  ;;  %v3750_v21 = vunpack.c.h.bf16 %v3201_v18  ;;  %v3753_v23 = vunpack.c.l.bf16 %v3201_v18  ;;  %v3764_v28 = vld [vmem:[%s6255_s4] sm:$0xff]  ;;  %v3778_v30 = vld [vmem:[%s6255_s4 + $0x18] sm:$0xff]  ;;  %v3783_v31 = vld [vmem:[%s6255_s4 + $0x10] sm:$0xff]  ;;  %p391_p13 = scmp.lt.s32.totalorder %s3587_s27, 1  ;;  %s3606_s16 = smov 48  }
  0x20   : > { %v441_v7 = vmul.f32 %v3721_v3, %v3721_v3  ;;  %v439_v8 = vmul.f32 %v3723_v4, %v3723_v4  ;;  %v442_v15 = vmul.f32 %v3727_v6, %v3727_v6  ;;  %v440_v16 = vmul.f32 %v3735_v10, %v3735_v10  ;;  %v3792_v32 = vld [vmem:[%s6255_s4 + $0x20] sm:$0xff]  ;;  %v3799_v33 = vld [vmem:[%s6255_s4 + $0x28] sm:$0xff]  ;;  %v3804_v34 = vld [vmem:[%s6255_s4 + $0x30] sm:$0xff]  ;;  %s3607_s21 = smov 52   ;;  %s3611_s19 = smov 84  }
  0x21   : > { %v437_v9 = vmul.f32 %v3725_v5, %v3725_v5  ;;  %v438_v17 = vmul.f32 %v3737_v11, %v3737_v11  ;;  %v444_v24 = vmul.f32 %v3750_v21, %v3750_v21  ;;  %v443_v25 = vmul.f32 %v3753_v23, %v3753_v23  ;;  %v3813_v35 = vld [vmem:[%s6255_s4 + $0x38] sm:$0xff]  ;;  %v3820_v36 = vld [vmem:[%s6254_s3 + $0x8] sm:$0xff]  ;;  %v3825_v37 = vld [vmem:[%s6254_s3 + $0x10] sm:$0xff]  ;;  %s6538_s27 = smov (!%p391_p13, %s3587_s27), 1  ;;  %s3613_s22 = smov 100  }
  0x22   : > { %v458_v12 = vsel %vm445_vm0, %v441_v7, 0.0  ;;  %v452_v13 = vsel %vm445_vm0, %v439_v8, 0.0  ;;  %v461_v19 = vsel %vm445_vm0, %v442_v15, 0.0  ;;  %v455_v20 = vsel %vm445_vm0, %v440_v16, 0.0  ;;  %v3834_v38 = vld [vmem:[%s6254_s3] sm:$0xff]  ;;  %v3846_v40 = vld [vmem:[%s6254_s3 + $0x28] sm:$0xff] }
  0x23   : > { %v446_v14 = vsel %vm445_vm0, %v437_v9, 0.0  ;;  %459 = vadd.xlane.f32.xlu2 %v458_v12  ;;  %453 = vadd.xlane.f32.xlu1 %v452_v13  ;;  %v449_v22 = vsel %vm445_vm0, %v438_v17, 0.0  ;;  %v467_v26 = vsel %vm445_vm0, %v444_v24, 0.0  ;;  %v464_v27 = vsel %vm445_vm0, %v443_v25, 0.0  ;;  %v3841_v39 = vld [vmem:[%s6254_s3 + $0x20] sm:$0xff]  ;;  %v3855_v41 = vld [vmem:[%s6254_s3 + $0x18] sm:$0xff] }
  0x24   : > { %447 = vadd.xlane.f32.xlu0 %v446_v14  ;;  %v3862_v42 = vld [vmem:[%s6254_s3 + $0x38] sm:$0xff]  ;;  %v3871_v43 = vld [vmem:[%s6254_s3 + $0x30] sm:$0xff]  ;;  %v3601_v44 = vmov 64.0   ;;  %v3147_v56 = vld [vmem:[%s6253_s2 + $0x20] sm:$0xf] }
  0x25   : > { %3465 = vrcp.f32 %v3601_v44  ;;  %v3155_v49 = vld [vmem:[%s6253_s2 + $0x30] sm:$0xf]  ;;  %v3182_v50 = vld [vmem:[%s6253_s2 + $0x34] sm:$0xf0]  ;;  %v3181_v51 = vld [vmem:[%s6253_s2 + $0x34] sm:$0xf] }
  0x26   : > { %v3156_v52 = vor.u32 %v3182_v50, %v3155_v49  ;;  %v3157_v53 = vld [vmem:[%s6253_s2 + $0x38] sm:$0xf0]  ;;  %v3180_v57 = vld [vmem:[%s6253_s2 + $0x24] sm:$0xf0]  ;;  %v3179_v58 = vld [vmem:[%s6253_s2 + $0x24] sm:$0xf] }
  0x27   : > { %v3160_v54 = vor.u32 %v3181_v51, %v3157_v53  ;;  %v3148_v59 = vor.u32 %v3180_v57, %v3147_v56  ;;  %v3149_v60 = vld [vmem:[%s6253_s2 + $0x28] sm:$0xf0]  ;;  %v3139_v63 = vld [vmem:[%s6253_s2 + $0x10] sm:$0xf]  ;;  %v3178_v0 = vld [vmem:[%s6253_s2 + $0x14] sm:$0xf0] }
  0x28   : > { %661 = vmatpush.bf16.msra.mxu0 %v3156_v52  ;;  %3202 = vmatpush.bf16.msra.mxu2 %v3156_v52  ;;  %v3152_v61 = vor.u32 %v3179_v58, %v3149_v60  ;;  %v3177_v1 = vld [vmem:[%s6253_s2 + $0x14] sm:$0xf]  ;;  %v3140_v8 = vor.u32 %v3178_v0, %v3139_v63  ;;  %v3141_v9 = vld [vmem:[%s6253_s2 + $0x18] sm:$0xf0]  ;;  %v3131_v18 = vld [vmem:[%s6253_s2] sm:$0xf] }
  0x29   : > { %690 = vmatpush.bf16.msra.mxu1 %v3160_v54  ;;  %3206 = vmatpush.bf16.msra.mxu3 %v3160_v54  ;;  %v3144_v14 = vor.u32 %v3177_v1, %v3141_v9  ;;  %v3133_v25 = vld [vmem:[%s6253_s2 + $0x8] sm:$0xf0] }
  0x2b   : > { %462 = vadd.xlane.f32.xlu2 %v461_v19  ;;  %456 = vadd.xlane.f32.xlu1 %v455_v20  ;;  %v3466_v45 = vpop.eup %3465  ;;  %v3176_v20 = vld [vmem:[%s6253_s2 + $0x4] sm:$0xf0] }
  0x2c   : > { %450 = vadd.xlane.f32.xlu0 %v449_v22  ;;  %v471_v46 = vmul.f32 64.0, %v3466_v45  ;;  %vm475_vm1 = vweird.f32 %v3466_v45  ;;  %662 = vmatpush.bf16.msra.mxu0 %v3148_v59  ;;  %v3175_v22 = vld [vmem:[%s6253_s2 + $0x4] sm:$0xf]  ;;  %v3132_v24 = vor.u32 %v3176_v20, %v3131_v18 }
  0x2d   : > { %3203 = vmatpush.bf16.msra.mxu2 %v3148_v59  ;;  %691 = vmatpush.bf16.msra.mxu1 %v3152_v61 }
  0x2e   : > { %v472_v47 = vsub.f32 1.0, %v471_v46  ;;  %3207 = vmatpush.bf16.msra.mxu3 %v3152_v61 }
  0x30   : > { %v473_v48 = vmul.f32 %v3466_v45, %v472_v47  ;;  %663 = vmatpush.bf16.msra.mxu0 %v3140_v8 }
  0x31   : > { %3204 = vmatpush.bf16.msra.mxu2 %v3140_v8  ;;  %692 = vmatpush.bf16.msra.mxu1 %v3144_v14 }
  0x32   : > { %v474_v55 = vadd.f32 %v3466_v45, %v473_v48  ;;  %3208 = vmatpush.bf16.msra.mxu3 %v3144_v14 }
  0x33   : > { %468 = vadd.xlane.f32.xlu1 %v467_v26 }
  0x34   : > { %465 = vadd.xlane.f32.xlu0 %v464_v27  ;;  %v3927_v62 = vsel %vm475_vm1, %v3466_v45, %v474_v55  ;;  %v3136_v27 = vor.u32 %v3175_v22, %v3133_v25  ;;  %664 = vmatpush.bf16.msra.mxu0 %v3132_v24 }
  0x35   : > { %3205 = vmatpush.bf16.msra.mxu2 %v3132_v24 }
  0x36   : > { %693 = vmatpush.bf16.msra.mxu1 %v3136_v27  ;;  %3209 = vmatpush.bf16.msra.mxu3 %v3136_v27 }
  0x43   : > { %747 = vrot.lane.b32.xlu2 %v3764_v28, %s3599_s14 }
  0x48   : > { %749 = vrot.lane.b32.xlu0 %v3771_v29, %s3599_s14 }
  0x4b   : > { %753 = vrot.lane.b32.xlu2 %v3778_v30, %s3599_s14 }
  0x4c   : > { %751 = vrot.lane.b32.xlu1 %v3783_v31, %s3599_s14 }
  0x50   : > { %755 = vrot.lane.b32.xlu0 %v3792_v32, %s3599_s14 }
  0x53   : > { %757 = vrot.lane.b32.xlu2 %v3799_v33, %s3599_s14 }
  0x54   : > { %759 = vrot.lane.b32.xlu1 %v3804_v34, %s3599_s14 }
  0x58   : > { %761 = vrot.lane.b32.xlu0 %v3813_v35, %s3599_s14 }
  0x5b   : > { %829 = vrot.lane.b32.xlu2 %v3820_v36, %s3599_s14 }
  0x5c   : > { %831 = vrot.lane.b32.xlu1 %v3825_v37, %s3599_s14 }
  0x60   : > { %827 = vrot.lane.b32.xlu0 %v3834_v38, %s3599_s14 }
  0x63   : > { %835 = vrot.lane.b32.xlu2 %v3841_v39, %s3599_s14 }
  0x64   : > { %837 = vrot.lane.b32.xlu1 %v3846_v40, %s3599_s14 }
  0x68   : > { %833 = vrot.lane.b32.xlu0 %v3855_v41, %s3599_s14 }
  0x6b   : > { %841 = vrot.lane.b32.xlu2 %v3862_v42, %s3599_s14 }
  0x6c   : > { %909 = vrot.lane.b32.xlu1 %v3820_v36, %s3600_s10 }
  0x70   : > { %839 = vrot.lane.b32.xlu0 %v3871_v43, %s3599_s14 }
  0x73   : > { %907 = vrot.lane.b32.xlu2 %v3834_v38, %s3600_s10 }
  0x74   : > { %915 = vrot.lane.b32.xlu1 %v3841_v39, %s3600_s10 }
  0x78   : > { %911 = vrot.lane.b32.xlu0 %v3825_v37, %s3600_s10 }
  0x7b   : > { %913 = vrot.lane.b32.xlu2 %v3855_v41, %s3600_s10 }
  0x7c   : > { %921 = vrot.lane.b32.xlu1 %v3862_v42, %s3600_s10 }
  0x80   : > { %917 = vrot.lane.b32.xlu0 %v3846_v40, %s3600_s10 }
  0x83   : > { %919 = vrot.lane.b32.xlu2 %v3871_v43, %s3600_s10 }
  0x84   : > { %943 = vrot.lane.b32.xlu1 %v3783_v31, %s3602_s18 }
  0x88   : > { %939 = vrot.lane.b32.xlu0 %v3764_v28, %s3602_s18 }
  0x8b   : > { %941 = vrot.lane.b32.xlu2 %v3771_v29, %s3602_s18 }
  0x8c   : > { %949 = vrot.lane.b32.xlu1 %v3799_v33, %s3602_s18 }
  0x90   : > { %945 = vrot.lane.b32.xlu0 %v3778_v30, %s3602_s18 }
  0x93   : > { %947 = vrot.lane.b32.xlu2 %v3792_v32, %s3602_s18 }
  0x94   : > { %1013 = vrot.lane.b32.xlu1 %v3820_v36, %s3602_s18 }
  0x96   : > { %v460_v2 = vpop.xlane.xlu2 %459  ;;  %v454_v7 = vpop.xlane.xlu1 %453 }
  0x97   : > { %v481_v12 = vmul.f32 %v3927_v62, %v460_v2  ;;  %v448_v13 = vpop.xlane.xlu0 %447  ;;  %v479_v15 = vmul.f32 %v3927_v62, %v454_v7 }
  0x98   : > { %v477_v16 = vmul.f32 %v3927_v62, %v448_v13  ;;  %951 = vrot.lane.b32.xlu0 %v3804_v34, %s3602_s18 }
  0x99   : > { %v3946_v17 = vadd.f32 1e-06, %v481_v12  ;;  %v3965_v26 = vadd.f32 1e-06, %v479_v15 }
  0x9a   : > { %v3951_v19 = vadd.f32 1e-06, %v477_v16 }
  0x9b   : > { %3467 = vrsqrt.f32 %v3946_v17  ;;  %953 = vrot.lane.b32.xlu2 %v3813_v35, %s3602_s18  ;;  %vm540_vm2 = vweird.f32 %v3946_v17  ;;  %vm520_vm13 = vweird.f32 %v3965_v26 }
  0x9c   : > { %1019 = vrot.lane.b32.xlu1 %v3841_v39, %s3602_s18  ;;  %3469 = vrsqrt.f32 %v3951_v19  ;;  %vm500_vm6 = vweird.f32 %v3951_v19 }
  0x9d   : > { %3471 = vrsqrt.f32 %v3965_v26 }
  0x9e   : > { %v463_v44 = vpop.xlane.xlu2 %462  ;;  %v457_v45 = vpop.xlane.xlu1 %456 }
  0x9f   : > { %v482_v46 = vmul.f32 %v3927_v62, %v463_v44  ;;  %v480_v47 = vmul.f32 %v3927_v62, %v457_v45  ;;  %v451_v48 = vpop.xlane.xlu0 %450 }
  0xa0   : > { %v478_v49 = vmul.f32 %v3927_v62, %v451_v48  ;;  %1015 = vrot.lane.b32.xlu0 %v3825_v37, %s3602_s18 }
  0xa1   : > { %v3976_v50 = vpop.eup %3467  ;;  %v3978_v51 = vadd.f32 1e-06, %v482_v46  ;;  %v3980_v52 = vadd.f32 1e-06, %v480_v47 }
  0xa2   : > { %v535_v53 = vmul.f32 %v3976_v50, %v3946_v17  ;;  %v3984_v54 = vadd.f32 1e-06, %v478_v49  ;;  %v3986_v55 = vpop.eup %3469  ;;  %vm541_vm3 = vweird.f32 %v3976_v50  ;;  %v4046_v49 = vld [vmem:[%s6252_s1] ss:$0 sm:$0xff] }
  0xa3   : > { %3473 = vrsqrt.f32 %v3978_v51  ;;  %1011 = vrot.lane.b32.xlu2 %v3834_v38, %s3602_s18  ;;  %v495_v57 = vmul.f32 %v3986_v55, %v3951_v19  ;;  %v3998_v58 = vpop.eup %3471  ;;  %vm501_vm4 = vweird.f32 %v3986_v55  ;;  %vm4036_vm5 = vmor %vm540_vm2, %vm541_vm3  ;;  %vm550_vm7 = vweird.f32 %v3978_v51 }
  0xa4   : > { %v536_v56 = vmul.f32 %v3976_v50, %v535_v53  ;;  %3475 = vrsqrt.f32 %v3980_v52  ;;  %1025 = vrot.lane.b32.xlu1 %v3862_v42, %s3602_s18  ;;  %v515_v9 = vmul.f32 %v3998_v58, %v3965_v26  ;;  %vm4058_vm9 = vmor %vm500_vm6, %vm501_vm4  ;;  %vm510_vm12 = vweird.f32 %v3984_v54 }
  0xa5   : > { %3477 = vrsqrt.f32 %v3984_v54  ;;  %v496_v60 = vmul.f32 %v3986_v55, %v495_v57  ;;  %vm521_vm2 = vweird.f32 %v3998_v58  ;;  %vm530_vm3 = vweird.f32 %v3980_v52 }
  0xa6   : > { %v537_v59 = vmul.f32 0.5, %v536_v56  ;;  %v4001_v61 = vpop.permute.xlu2 %747  ;;  %v469_v63 = vpop.xlane.xlu1 %468  ;;  %v516_v25 = vmul.f32 %v3998_v58, %v515_v9  ;;  %vm4110_vm6 = vmor %vm520_vm13, %vm521_vm2  ;;  %vm1549_vm13 = vcmask 130048   ;;  %vm1585_vm2 = vcmask 293888  }
  0xa7   : > { %v484_v0 = vmul.f32 %v3927_v62, %v469_v63  ;;  %v466_v1 = vpop.xlane.xlu0 %465  ;;  %v497_v7 = vmul.f32 0.5, %v496_v60 }
  0xa8   : > { %v538_v2 = vsub.f32 1.5, %v537_v59  ;;  %1021 = vrot.lane.b32.xlu0 %v3846_v40, %s3602_s18  ;;  %v483_v13 = vmul.f32 %v3927_v62, %v466_v1  ;;  %v517_v59 = vmul.f32 0.5, %v516_v25 }
  0xa9   : > { %v3474_v8 = vpop.eup %3473  ;;  %v4008_v12 = vadd.f32 1e-06, %v484_v0  ;;  %v498_v15 = vsub.f32 1.5, %v497_v7 }
  0xaa   : > { %v4011_v14 = vpop.eup %3475  ;;  %v545_v16 = vmul.f32 %v3474_v8, %v3978_v51  ;;  %v539_v20 = vmul.f32 %v3976_v50, %v538_v2  ;;  %v4026_v27 = vadd.f32 1e-06, %v483_v13  ;;  %vm551_vm8 = vweird.f32 %v3474_v8 }
  0xab   : > { %v3478_v18 = vpop.eup %3477  ;;  %3479 = vrsqrt.f32 %v4008_v12  ;;  %1017 = vrot.lane.b32.xlu2 %v3855_v41, %s3602_s18  ;;  %v525_v62 = vmul.f32 %v4011_v14, %v3980_v52  ;;  %v499_v44 = vmul.f32 %v3986_v55, %v498_v15  ;;  %vm552_vm11 = vmor %vm550_vm7, %vm551_vm8  ;;  %vm570_vm15 = vweird.f32 %v4008_v12 }
  0xac   : > { %v546_v22 = vmul.f32 %v3474_v8, %v545_v16  ;;  %v505_v24 = vmul.f32 %v3478_v18, %v3984_v54  ;;  %1047 = vrot.lane.b32.xlu1 %v3783_v31, %s3600_s10  ;;  %3481 = vrsqrt.f32 %v4026_v27  ;;  %v543_v19 = vsel %vm4036_vm5, %v3976_v50, %v539_v20 }
  0xad   : > { %v526_v56 = vmul.f32 %v4011_v14, %v525_v62  ;;  %vm511_vm10 = vweird.f32 %v3478_v18  ;;  %v503_v2 = vsel %vm4058_vm9, %v3986_v55, %v499_v44  ;;  %v581_v50 = vmul.f32 %v4046_v49, %v543_v19 }
  0xae   : > { %v547_v45 = vmul.f32 0.5, %v546_v22  ;;  %v506_v46 = vmul.f32 %v3478_v18, %v505_v24  ;;  %v4030_v47 = vpop.permute.xlu2 %753  ;;  %vm512_vm14 = vmor %vm510_vm12, %vm511_vm10  ;;  %v577_v51 = vmul.f32 %v4046_v49, %v503_v2  ;;  %v518_v16 = vsub.f32 1.5, %v517_v59 }
  0xaf   : > { %v527_v7 = vmul.f32 0.5, %v526_v56  ;;  %v589_v25 = vmul.f32 %v3721_v3, %v581_v50  ;;  %vm531_vm4 = vweird.f32 %v4011_v14  ;;  %vm560_vm7 = vweird.f32 %v4026_v27 }
  0xb0   : > { %v548_v53 = vsub.f32 1.5, %v547_v45  ;;  %v507_v17 = vmul.f32 0.5, %v506_v46  ;;  %1043 = vrot.lane.b32.xlu0 %v3764_v28, %s3600_s10  ;;  %v519_v19 = vmul.f32 %v3998_v58, %v518_v16  ;;  %vm4124_vm9 = vmor %vm530_vm3, %vm531_vm4  ;;  %vm1540_vm12 = vcmask 64512  }
  0xb1   : > { %v4054_v57 = vpop.eup %3479  ;;  %v528_v45 = vsub.f32 1.5, %v527_v7  ;;  %vm1594_vm3 = vcmask 326656   ;;  %vm1612_vm4 = vcmask 424960  }
  0xb2   : > { %v549_v63 = vmul.f32 %v3474_v8, %v548_v53  ;;  %v508_v0 = vsub.f32 1.5, %v507_v17  ;;  %v565_v1 = vmul.f32 %v4054_v57, %v4008_v12  ;;  %v3482_v55 = vpop.eup %3481  ;;  %vm571_vm1 = vweird.f32 %v4054_v57 }
  0xb3   : > { %1023 = vrot.lane.b32.xlu2 %v3871_v43, %s3602_s18  ;;  %v555_v22 = vmul.f32 %v3482_v55, %v4026_v27  ;;  %vm4102_vm5 = vmor %vm570_vm15, %vm571_vm1  ;;  %v529_v60 = vmul.f32 %v4011_v14, %v528_v45  ;;  %vm561_vm8 = vweird.f32 %v3482_v55  ;;  %s3603_s18 = smov 32   ;;  %v523_v52 = vsel %vm4110_vm6, %v3998_v58, %v519_v19 }
  0xb4   : > { %v509_v9 = vmul.f32 %v3478_v18, %v508_v0  ;;  %v566_v13 = vmul.f32 %v4054_v57, %v565_v1  ;;  %1053 = vrot.lane.b32.xlu1 %v3799_v33, %s3600_s10  ;;  %v553_v15 = vsel %vm552_vm11, %v3474_v8, %v549_v63  ;;  %vm562_vm10 = vmor %vm560_vm7, %vm561_vm8  ;;  %vm1531_vm11 = vcmask 31744  }
  0xb5   : > { %v582_v54 = vmul.f32 %v4046_v49, %v553_v15  ;;  %v556_v48 = vmul.f32 %v3482_v55, %v555_v22  ;;  %v533_v2 = vsel %vm4124_vm9, %v4011_v14, %v529_v60  ;;  %vm1567_vm15 = vcmask 195584  }
  0xb6   : > { %v567_v20 = vmul.f32 0.5, %v566_v13  ;;  %v4082_v62 = vpop.permute.xlu2 %757  ;;  %v513_v24 = vsel %vm512_vm14, %v3478_v18, %v509_v9  ;;  %v585_v18 = vmul.f32 %v3725_v5, %v577_v51  ;;  %v580_v15 = vmul.f32 %v4046_v49, %v533_v2 }
  0xb7   : > { %v578_v8 = vmul.f32 %v4046_v49, %v513_v24  ;;  %v590_v44 = vmul.f32 %v3727_v6, %v582_v54  ;;  %v557_v6 = vmul.f32 0.5, %v556_v48  ;;  %vm1558_vm14 = vcmask 162816  }
  0xb8   : > { %v568_v46 = vsub.f32 1.5, %v567_v20  ;;  %1049 = vrot.lane.b32.xlu0 %v3778_v30, %s3600_s10  ;;  %v588_v16 = vmul.f32 %v3735_v10, %v580_v15  ;;  %vm1576_vm1 = vcmask 261120   ;;  %vm1621_vm6 = vcmask 457728  }
  0xb9   : > { %v586_v53 = vmul.f32 %v3737_v11, %v578_v8  ;;  %v595_v56 = vpack.c.bf16 %v590_v44, %v589_v25  ;;  %v558_v63 = vsub.f32 1.5, %v557_v6 }
  0xba   : > { %v569_v3 = vmul.f32 %v4054_v57, %v568_v46  ;;  %v4097_v17 = vpop.permute.xlu0 %749 }
  0xbb   : > { %v593_v5 = vpack.c.bf16 %v586_v53, %v585_v18  ;;  %3163 = vmatmul.msk.bf16.vlgmr.msra.gmra.mxu2 %vm445_vm0, %v595_v56  ;;  %3167 = vmatmul.msk.bf16.vlgmr.msra.gmra.mxu3 %vm445_vm0, %v595_v56  ;;  %v559_v12 = vmul.f32 %v3482_v55, %v558_v63 }
  0xbc   : > { %1117 = vrot.lane.b32.xlu1 %v3820_v36, %s3603_s18  ;;  %1045 = vrot.lane.b32.xlu2 %v3771_v29, %s3600_s10  ;;  %v573_v1 = vsel %vm4102_vm5, %v4054_v57, %v569_v3  ;;  %v579_v57 = vmul.f32 %v4046_v49, %v523_v52  ;;  %vm1603_vm5 = vcmask 392192  }
  0xbd   : > { %3161 = vmatmul.msk.bf16.vlgmr.msra.gmra.mxu0 %vm445_vm0, %v593_v5  ;;  %3165 = vmatmul.msk.bf16.vlgmr.msra.gmra.mxu1 %vm445_vm0, %v593_v5  ;;  %v563_v50 = vsel %vm562_vm10, %v3482_v55, %v559_v12  ;;  %v584_v9 = vmul.f32 %v4046_v49, %v573_v1 }
  0xbe   : > { %v4130_v27 = vpop.permute.xlu2 %829  ;;  %v4132_v0 = vpop.permute.xlu1 %751  ;;  %v583_v7 = vmul.f32 %v4046_v49, %v563_v50  ;;  %v587_v54 = vmul.f32 %v3723_v4, %v579_v57 }
  0xbf   : > { %6279 = vst [vmem:[#allocation5_spill] sm:$0xff] %v4130_v27  ;;  %v592_v14 = vmul.f32 %v3750_v21, %v584_v9 }
  0xc0   : > { %1055 = vrot.lane.b32.xlu0 %v3804_v34, %s3600_s10  ;;  %v591_v58 = vmul.f32 %v3753_v23, %v583_v7  ;;  %v594_v22 = vpack.c.bf16 %v588_v16, %v587_v54 }
  0xc2   : > { %v4147_v13 = vpop.permute.xlu0 %755  ;;  %v596_v49 = vpack.c.bf16 %v592_v14, %v591_v58 }
  0xc4   : > { %1123 = vrot.lane.b32.xlu1 %v3841_v39, %s3603_s18  ;;  %1051 = vrot.lane.b32.xlu2 %v3792_v32, %s3600_s10 }
  0xc6   : > { %v4157_v55 = vpop.permute.xlu2 %835  ;;  %v4159_v51 = vpop.permute.xlu1 %759 }
  0xc8   : > { %1119 = vrot.lane.b32.xlu0 %v3825_v37, %s3603_s18 }
  0xca   : > { %v4165_v20 = vpop.permute.xlu0 %761 }
  0xcb   : > { %3164 = vmatmul.msk.bf16.gmra.mxu2 %vm445_vm0, %v596_v49  ;;  %3168 = vmatmul.msk.bf16.gmra.mxu3 %vm445_vm0, %v596_v49 }
  0xcc   : > { %1129 = vrot.lane.b32.xlu1 %v3862_v42, %s3603_s18  ;;  %1057 = vrot.lane.b32.xlu2 %v3813_v35, %s3600_s10  ;;  %s4273_s10 = sshll.u32 %s6538_s27, 5  ;;  %s3605_s27 = smov 124  }
  0xcd   : > { %3162 = vmatmul.msk.bf16.gmra.mxu0 %vm445_vm0, %v594_v22  ;;  %3166 = vmatmul.msk.bf16.gmra.mxu1 %vm445_vm0, %v594_v22  ;;  %s4281_s12 = scalar_lea.vmem %s6258_s7, %s4273_s10  ;;  %vm1638_vm0 = vcmask 519168   ;;  %s4914_s17 = scalar_lea.vmem %s6256_s5, %s4273_s10 }
  0xce   : > { %v4175_v4 = vpop.permute.xlu2 %841  ;;  %v4177_v10 = vpop.permute.xlu1 %831 }
  0xcf   : > { %6280 = vst [vmem:[#allocation6_spill] sm:$0xff] %v4175_v4 }
  0xd0   : > { %1125 = vrot.lane.b32.xlu0 %v3846_v40, %s3603_s18 }
  0xd2   : > { %v4181_v21 = vpop.permute.xlu0 %827 }
  0xd4   : > { %1151 = vrot.lane.b32.xlu1 %v3783_v31, %s3604_s11  ;;  %1115 = vrot.lane.b32.xlu2 %v3834_v38, %s3603_s18 }
  0xd6   : > { %v4187_v23 = vpop.permute.xlu2 %907  ;;  %v4189_v24 = vpop.permute.xlu1 %837 }
  0xd8   : > { %1147 = vrot.lane.b32.xlu0 %v3764_v28, %s3604_s11 }
  0xda   : > { %v4193_v8 = vpop.permute.xlu0 %833 }
  0xdb   : > { %6281 = vst [vmem:[#allocation7_spill] sm:$0xff] %v4193_v8 }
  0xdc   : > { %1157 = vrot.lane.b32.xlu1 %v3799_v33, %s3604_s11  ;;  %1121 = vrot.lane.b32.xlu2 %v3855_v41, %s3603_s18 }
  0xde   : > { %v4199_v25 = vpop.permute.xlu2 %913  ;;  %v4201_v44 = vpop.permute.xlu1 %909 }
  0xdf   : > { %6282 = vst [vmem:[#allocation8_spill] sm:$0xff] %v4199_v25 }
  0xe0   : > { %6283 = vst [vmem:[#allocation9_spill] sm:$0xff] %v4201_v44  ;;  %1153 = vrot.lane.b32.xlu0 %v3778_v30, %s3604_s11 }
  0xe2   : > { %v4205_v45 = vpop.permute.xlu0 %839 }
  0xe3   : > { %6284 = vst [vmem:[#allocation10_spill] sm:$0xff] %v4205_v45 }
  0xe4   : > { %1127 = vrot.lane.b32.xlu2 %v3871_v43, %s3603_s18 }
  0xe6   : > { %v4209_v46 = vpop.permute.xlu2 %919  ;;  %v4211_v48 = vpop.permute.xlu1 %915 }
  0xe7   : > { %6285 = vst [vmem:[#allocation11_spill] sm:$0xff] %v4209_v46 }
  0xe8   : > { %6286 = vst [vmem:[#allocation12_spill] sm:$0xff] %v4211_v48  ;;  %1159 = vrot.lane.b32.xlu0 %v3804_v34, %s3604_s11 }
  0xea   : > { %v4215_v18 = vpop.permute.xlu0 %911 }
  0xec   : > { %1149 = vrot.lane.b32.xlu2 %v3771_v29, %s3604_s11 }
  0xee   : > { %v4219_v53 = vpop.permute.xlu2 %941  ;;  %v4221_v56 = vpop.permute.xlu1 %921 }
  0xef   : > { %6287 = vst [vmem:[#allocation13_spill] sm:$0xff] %v4221_v56 }
  0xf2   : > { %v4223_v3 = vpop.permute.xlu0 %917 }
  0xf4   : > { %1155 = vrot.lane.b32.xlu2 %v3792_v32, %s3604_s11 }
  0xf6   : > { %v948_v6 = vpop.permute.xlu2 %947  ;;  %v4227_v19 = vpop.permute.xlu1 %943 }
  0xfa   : > { %v940_v59 = vpop.permute.xlu0 %939 }
  0xfc   : > { %1161 = vrot.lane.b32.xlu2 %v3813_v35, %s3604_s11 }
  0xfe   : > { %v4231_v5 = vpop.permute.xlu2 %953  ;;  %v4233_v11 = vpop.permute.xlu1 %949 }
 0x102   : > { %v4235_v60 = vpop.permute.xlu0 %945 }
 0x106   : > { %v4237_v63 = vpop.permute.xlu2 %1011  ;;  %v4239_v26 = vpop.permute.xlu1 %1013 }
 0x107   : > { %6288 = vst [vmem:[#allocation14_spill] sm:$0xff] %v4239_v26 }
 0x10a   : > { %v4241_v12 = vpop.permute.xlu0 %951 }
 0x10e   : > { %v4243_v1 = vpop.permute.xlu2 %1017  ;;  %v4245_v52 = vpop.permute.xlu1 %1019 }
 0x10f   : > { %6289 = vst [vmem:[#allocation15_spill] sm:$0xff] %v4243_v1 }
 0x110   : > { %6290 = vst [vmem:[#allocation16_spill] sm:$0xff] %v4245_v52 }
 0x112   : > { %v4247_v2 = vpop.permute.xlu0 %1015 }
 0x116   : > { %v4249_v50 = vpop.permute.xlu2 %1023  ;;  %v4251_v7 = vpop.permute.xlu1 %1025 }
 0x117   : > { %6291 = vst [vmem:[#allocation17_spill] sm:$0xff] %v4249_v50 }
 0x118   : > { %6292 = vst [vmem:[#allocation18_spill] sm:$0xff] %v4251_v7 }
 0x11a   : > { %v4253_v9 = vpop.permute.xlu0 %1021 }
 0x11e   : > { %v4255_v57 = vpop.permute.xlu2 %1045  ;;  %v4257_v15 = vpop.permute.xlu1 %1047 }
 0x122   : > { %v1044_v58 = vpop.permute.xlu0 %1043 }
 0x126   : > { %v1052_v14 = vpop.permute.xlu2 %1051  ;;  %v4259_v54 = vpop.permute.xlu1 %1053 }
 0x12a   : > { %v4261_v16 = vpop.permute.xlu0 %1049 }
 0x12e   : > { %v4263_v49 = vpop.permute.xlu2 %1057  ;;  %v4268_v56 = vpop.permute.xlu1 %1117 }
 0x12f   : > { %6293 = vst [vmem:[#allocation19_spill] sm:$0xff] %v4268_v56 }
 0x132   : > { %v4266_v22 = vpop.permute.xlu0 %1055 }
 0x136   : > { %v4271_v7 = vpop.permute.xlu2 %1115  ;;  %v4289_v45 = vpop.permute.xlu1 %1123 }
 0x137   : > { %6294 = vst [vmem:[#allocation20_spill] sm:$0xff] %v4271_v7 }
 0x138   : > { %6295 = vst [vmem:[#allocation21_spill] sm:$0xff] %v4289_v45 }
 0x13a   : > { %v4275_v4 = vpop.f32.mrf.mxu0  ;;  %v695_v1 = vpop.f32.mrf.mxu1 }
 0x13b   : > { %v2871_v25 = vpack.c.bf16 %v695_v1, %v695_v1  ;;  %v4283_v8 = vpop.permute.xlu0 %1119  ;;  %v859_v50 = vmul.f32 %v3764_v28, %v4275_v4  ;;  %v771_v46 = vmul.f32 %v4001_v61, %v4275_v4 }
 0x13d   : > { %2879 = vst.msk [vmem:[%s4281_s12] sm:$0xf] %vm1638_vm0, %v2871_v25  ;;  %875 = vrot.lane.b32.xlu1 %v859_v50, %s3599_s14  ;;  %787 = vrot.lane.b32.xlu2 %v771_v46, %s3605_s27  ;;  %v963_v50 = vmul.f32 %v940_v59, %v4275_v4 }
 0x13e   : > { %v4295_v56 = vpop.f32.mrf.mxu2  ;;  %v705_v1 = vpop.f32.mrf.mxu3 }
 0x13f   : > { %v2875_v26 = vpack.c.bf16 %v705_v1, %v705_v1  ;;  %v4297_v44 = vpop.permute.xlu2 %1121  ;;  %v863_v27 = vmul.f32 %v3792_v32, %v4295_v56  ;;  %v4317_v59 = vpop.permute.xlu1 %1129 }
 0x140   : > { %6296 = vst [vmem:[#allocation22_spill] sm:$0xff] %v4297_v44 }
 0x141   : > { %2883 = vst.msk [vmem:[%s4281_s12 + $0x10] sm:$0xf] %vm1638_vm0, %v2875_v26  ;;  %883 = vrot.lane.b32.xlu0 %v863_v27, %s3599_s14  ;;  %v967_v26 = vmul.f32 %v948_v6, %v4295_v56 }
 0x142   : > { %v697_v61 = vpop.f32.mrf.mxu1  ;;  %6298 = vst [vmem:[#allocation24_spill] sm:$0xff] %v4317_v59  ;;  %v1071_v59 = vmul.f32 %v1052_v14, %v4295_v56 }
 0x143   : > { %v2872_v25 = vpack.c.bf16 %v697_v61, %v697_v61  ;;  %v4307_v46 = vpop.permute.xlu0 %1125 }
 0x145   : > { %2880 = vst.msk [vmem:[%s4281_s12 + $0x4] sm:$0xf] %vm1638_vm0, %v2872_v25  ;;  %979 = vrot.lane.b32.xlu1 %v963_v50, %s3605_s27 }
 0x146   : > { %v4310_v1 = vpop.f32.mrf.mxu2  ;;  %v707_v44 = vpop.f32.mrf.mxu3 }
 0x147   : > { %v2876_v45 = vpack.c.bf16 %v707_v44, %v707_v44  ;;  %v4312_v7 = vpop.permute.xlu2 %1127  ;;  %v864_v27 = vmul.f32 %v3799_v33, %v4310_v1  ;;  %v1067_v44 = vmul.f32 %v1044_v58, %v4275_v4  ;;  %v1152_v58 = vpop.permute.xlu1 %1151 }
 0x148   : > { %6297 = vst [vmem:[#allocation23_spill] sm:$0xff] %v4312_v7 }
 0x149   : > { %2884 = vst.msk [vmem:[%s4281_s12 + $0x14] sm:$0xf] %vm1638_vm0, %v2876_v45  ;;  %987 = vrot.lane.b32.xlu0 %v967_v26, %s3605_s27  ;;  %885 = vrot.lane.b32.xlu2 %v864_v27, %s3599_s14  ;;  %v968_v45 = vmul.f32 %v4233_v11, %v4310_v1 }
 0x14a   : > { %v700_v61 = vpop.f32.mrf.mxu1 }
 0x14b   : > { %v2873_v25 = vpack.c.bf16 %v700_v61, %v700_v61  ;;  %v1148_v26 = vpop.permute.xlu0 %1147 }
 0x14c   : > { %v1171_v61 = vmul.f32 %v1148_v26, %v4275_v4 }
 0x14d   : > { %2881 = vst.msk [vmem:[%s4281_s12 + $0x8] sm:$0xf] %vm1638_vm0, %v2873_v25  ;;  %1083 = vrot.lane.b32.xlu1 %v1067_v44, %s3599_s14 }
 0x14e   : > { %v710_v6 = vpop.f32.mrf.mxu3 }
 0x14f   : > { %v1150_v50 = vpop.permute.xlu2 %1149  ;;  %v2877_v7 = vpack.c.bf16 %v710_v6, %v710_v6  ;;  %v1072_v6 = vmul.f32 %v4259_v54, %v4310_v1  ;;  %v1158_v26 = vpop.permute.xlu1 %1157 }
 0x151   : > { %2885 = vst.msk [vmem:[%s4281_s12 + $0x18] sm:$0xf] %vm1638_vm0, %v2877_v7  ;;  %1091 = vrot.lane.b32.xlu0 %v1071_v59, %s3599_s14  ;;  %989 = vrot.lane.b32.xlu2 %v968_v45, %s3605_s27  ;;  %v4344_v59 = vpop.f32.mrf.mxu0  ;;  %v775_v45 = vmul.f32 %v4147_v13, %v4295_v56 }
 0x152   : > { %v702_v27 = vpop.f32.mrf.mxu1  ;;  %v860_v54 = vmul.f32 %v3771_v29, %v4344_v59 }
 0x153   : > { %v2874_v25 = vpack.c.bf16 %v702_v27, %v702_v27  ;;  %v1176_v27 = vmul.f32 %v1158_v26, %v4310_v1  ;;  %v1172_v26 = vmul.f32 %v1150_v50, %v4344_v59 }
 0x155   : > { %2882 = vst.msk [vmem:[%s4281_s12 + $0xc] sm:$0xf] %vm1638_vm0, %v2874_v25  ;;  %1187 = vrot.lane.b32.xlu1 %v1171_v61, %s3605_s27  ;;  %v772_v61 = vmul.f32 %v4097_v17, %v4344_v59 }
 0x156   : > { %v712_v14 = vpop.f32.mrf.mxu3 }
 0x157   : > { %v1156_v44 = vpop.permute.xlu2 %1155  ;;  %v2878_v11 = vpack.c.bf16 %v712_v14, %v712_v14  ;;  %v4362_v14 = vpop.f32.mrf.mxu2 }
 0x158   : > { %v1175_v7 = vmul.f32 %v1156_v44, %v4295_v56  ;;  %v964_v44 = vmul.f32 %v4219_v53, %v4344_v59  ;;  %v969_v53 = vmul.f32 %v4241_v12, %v4362_v14  ;;  %v777_v50 = vmul.f32 %v4159_v51, %v4362_v14 }
 0x159   : > { %2886 = vst.msk [vmem:[%s4281_s12 + $0x1c] sm:$0xf] %vm1638_vm0, %v2878_v11  ;;  %1093 = vrot.lane.b32.xlu2 %v1072_v6, %s3599_s14  ;;  %v4357_v25 = vpop.f32.mrf.mxu0  ;;  %v865_v11 = vmul.f32 %v3804_v34, %v4362_v14  ;;  %v1068_v6 = vmul.f32 %v4255_v57, %v4344_v59  ;;  %s3610_s12 = smov 80  }
 0x15a   : > { %1195 = vrot.lane.b32.xlu0 %v1175_v7, %s3605_s27  ;;  %v861_v13 = vmul.f32 %v3783_v31, %v4357_v25  ;;  %v965_v17 = vmul.f32 %v4227_v19, %v4357_v25  ;;  %v1154_v7 = vpop.permute.xlu0 %1153  ;;  %v1073_v19 = vmul.f32 %v4266_v22, %v4362_v14  ;;  %v1173_v57 = vmul.f32 %v1152_v58, %v4357_v25 }
 0x15b   : > { %v773_v22 = vmul.f32 %v4132_v0, %v4357_v25 }
 0x15d   : > { %795 = vrot.lane.b32.xlu1 %v775_v45, %s3605_s27  ;;  %v1069_v45 = vmul.f32 %v4257_v15, %v4357_v25 }
 0x15f   : > { %v1162_v0 = vpop.permute.xlu2 %1161 }
 0x161   : > { %1197 = vrot.lane.b32.xlu2 %v1176_v27, %s3605_s27  ;;  %v776_v27 = vmul.f32 %v4082_v62, %v4310_v1  ;;  %v4401_v58 = vpop.f32.mrf.mxu0  ;;  %v4403_v62 = vpop.f32.mrf.mxu2 }
 0x162   : > { %877 = vrot.lane.b32.xlu0 %v860_v54, %s3599_s14  ;;  %v1160_v12 = vpop.permute.xlu0 %1159  ;;  %v774_v54 = vmul.f32 %v4030_v47, %v4401_v58  ;;  %v866_v51 = vmul.f32 %v3813_v35, %v4403_v62  ;;  %v966_v47 = vmul.f32 %v4235_v60, %v4401_v58  ;;  %v1174_v60 = vmul.f32 %v1154_v7, %v4401_v58 }
 0x163   : > { %v1177_v15 = vmul.f32 %v1160_v12, %v4362_v14 }
 0x165   : > { %789 = vrot.lane.b32.xlu1 %v772_v61, %s3605_s27  ;;  %v862_v61 = vmul.f32 %v3778_v30, %v4401_v58 }
 0x169   : > { %879 = vrot.lane.b32.xlu2 %v861_v13, %s3599_s14  ;;  %v970_v13 = vmul.f32 %v4231_v5, %v4403_v62 }
 0x16a   : > { %981 = vrot.lane.b32.xlu0 %v964_v44, %s3605_s27  ;;  %v1074_v44 = vmul.f32 %v4263_v49, %v4403_v62 }
 0x16d   : > { %887 = vrot.lane.b32.xlu1 %v865_v11, %s3599_s14  ;;  %v1178_v11 = vmul.f32 %v1162_v0, %v4403_v62 }
 0x171   : > { %983 = vrot.lane.b32.xlu2 %v965_v17, %s3605_s27 }
 0x172   : > { %1085 = vrot.lane.b32.xlu0 %v1068_v6, %s3599_s14 }
 0x175   : > { %991 = vrot.lane.b32.xlu1 %v969_v53, %s3605_s27 }
 0x179   : > { %1087 = vrot.lane.b32.xlu2 %v1069_v45, %s3599_s14 }
 0x17a   : > { %1189 = vrot.lane.b32.xlu0 %v1172_v26, %s3605_s27 }
 0x17d   : > { %1095 = vrot.lane.b32.xlu1 %v1073_v19, %s3599_s14 }
 0x181   : > { %1191 = vrot.lane.b32.xlu2 %v1173_v57, %s3605_s27 }
 0x182   : > { %797 = vrot.lane.b32.xlu0 %v776_v27, %s3605_s27 }
 0x185   : > { %1199 = vrot.lane.b32.xlu1 %v1177_v15, %s3605_s27 }
 0x189   : > { %799 = vrot.lane.b32.xlu2 %v777_v50, %s3605_s27 }
 0x18a   : > { %791 = vrot.lane.b32.xlu0 %v773_v22, %s3605_s27 }
 0x18d   : > { %1221 = vrot.lane.b32.xlu1 %v3820_v36, %s3604_s11 }
 0x191   : > { %793 = vrot.lane.b32.xlu2 %v774_v54, %s3605_s27 }
 0x192   : > { %889 = vrot.lane.b32.xlu0 %v866_v51, %s3599_s14 }
 0x195   : > { %881 = vrot.lane.b32.xlu1 %v862_v61, %s3599_s14 }
 0x197   : > { %v4421_v36 = vpop.permute.xlu2 %787 }
 0x198   : > { %6299 = vst [vmem:[#allocation25_spill] sm:$0xff] %v4421_v36 }
 0x199   : > { %1219 = vrot.lane.b32.xlu2 %v3834_v38, %s3604_s11  ;;  %v1070_v38 = vmul.f32 %v4261_v16, %v4401_v58 }
 0x19a   : > { %993 = vrot.lane.b32.xlu0 %v970_v13, %s3605_s27 }
 0x19d   : > { %985 = vrot.lane.b32.xlu1 %v966_v47, %s3605_s27 }
 0x1a1   : > { %1225 = vrot.lane.b32.xlu2 %v3855_v41, %s3604_s11 }
 0x1a2   : > { %1097 = vrot.lane.b32.xlu0 %v1074_v44, %s3599_s14 }
 0x1a3   : > { %v4431_v5 = vpop.permute.xlu2 %885 }
 0x1a5   : > { %1089 = vrot.lane.b32.xlu1 %v1070_v38, %s3599_s14 }
 0x1a9   : > { %1231 = vrot.lane.b32.xlu2 %v3871_v43, %s3604_s11  ;;  %v778_v43 = vmul.f32 %v4165_v20, %v4403_v62 }
 0x1aa   : > { %1201 = vrot.lane.b32.xlu0 %v1178_v11, %s3605_s27 }
 0x1ab   : > { %v4441_v49 = vpop.permute.xlu2 %989 }
 0x1ad   : > { %1193 = vrot.lane.b32.xlu1 %v1174_v60, %s3605_s27 }
 0x1af   : > { %v4444_v41 = vpop.permute.xlu1 %875 }
 0x1b0   : > { %6300 = vst [vmem:[#allocation26_spill] sm:$0xff] %v4444_v41 }
 0x1b1   : > { %1253 = vrot.lane.b32.xlu2 %v3771_v29, %s3603_s18 }
 0x1b2   : > { %1223 = vrot.lane.b32.xlu0 %v3825_v37, %s3604_s11 }
 0x1b3   : > { %v4450_v16 = vpop.permute.xlu2 %1093  ;;  %v4454_v17 = vpop.permute.xlu0 %883 }
 0x1b4   : > { %6301 = vst [vmem:[#allocation27_spill] sm:$0xff] %v4454_v17 }
 0x1b5   : > { %801 = vrot.lane.b32.xlu1 %v778_v43, %s3605_s27 }
 0x1b7   : > { %v4457_v6 = vpop.permute.xlu1 %979 }
 0x1b8   : > { %6302 = vst [vmem:[#allocation28_spill] sm:$0xff] %v4457_v6 }
 0x1b9   : > { %1259 = vrot.lane.b32.xlu2 %v3792_v32, %s3603_s18 }
 0x1ba   : > { %1229 = vrot.lane.b32.xlu0 %v3846_v40, %s3604_s11 }
 0x1bb   : > { %v4463_v29 = vpop.permute.xlu2 %1197  ;;  %v4465_v53 = vpop.permute.xlu0 %987 }
 0x1bc   : > { %6303 = vst [vmem:[#allocation29_spill] sm:$0xff] %v4465_v53 }
 0x1bd   : > { %1227 = vrot.lane.b32.xlu1 %v3841_v39, %s3604_s11 }
 0x1bf   : > { %v4469_v20 = vpop.permute.xlu1 %1083 }
 0x1c0   : > { %6304 = vst [vmem:[#allocation30_spill] sm:$0xff] %v4469_v20 }
 0x1c1   : > { %1265 = vrot.lane.b32.xlu2 %v3813_v35, %s3603_s18 }
 0x1c2   : > { %1251 = vrot.lane.b32.xlu0 %v3764_v28, %s3603_s18 }
 0x1c3   : > { %v4475_v7 = vpop.permute.xlu2 %879  ;;  %v4477_v32 = vpop.permute.xlu0 %1091 }
 0x1c4   : > { %6305 = vst [vmem:[#allocation31_spill] sm:$0xff] %v4477_v32 }
 0x1c5   : > { %1233 = vrot.lane.b32.xlu1 %v3862_v42, %s3604_s11 }
 0x1c7   : > { %v4481_v45 = vpop.permute.xlu1 %1187 }
 0x1c8   : > { %6306 = vst [vmem:[#allocation32_spill] sm:$0xff] %v4481_v45 }
 0x1ca   : > { %1257 = vrot.lane.b32.xlu0 %v3778_v30, %s3603_s18 }
 0x1cb   : > { %v4485_v39 = vpop.permute.xlu2 %983 }
 0x1cc   : > { %v4487_v26 = vpop.permute.xlu0 %1195 }
 0x1cd   : > { %6307 = vst [vmem:[#allocation33_spill] sm:$0xff] %v4487_v26  ;;  %1255 = vrot.lane.b32.xlu1 %v3783_v31, %s3603_s18 }
 0x1cf   : > { %v4491_v28 = vpop.permute.xlu1 %795 }
 0x1d0   : > { %6308 = vst [vmem:[#allocation34_spill] sm:$0xff] %v4491_v28 }
 0x1d2   : > { %1263 = vrot.lane.b32.xlu0 %v3804_v34, %s3603_s18 }
 0x1d3   : > { %v4495_v35 = vpop.permute.xlu2 %1087 }
 0x1d4   : > { %v4497_v42 = vpop.permute.xlu0 %877 }
 0x1d5   : > { %6309 = vst [vmem:[#allocation35_spill] sm:$0xff] %v4497_v42  ;;  %1261 = vrot.lane.b32.xlu1 %v3799_v33, %s3603_s18 }
 0x1d7   : > { %v4501_v30 = vpop.permute.xlu1 %789 }
 0x1d8   : > { %6310 = vst [vmem:[#allocation36_spill] sm:$0xff] %v4501_v30 }
 0x1db   : > { %v4503_v19 = vpop.permute.xlu2 %1191 }
 0x1dc   : > { %v4505_v57 = vpop.permute.xlu0 %981 }
 0x1dd   : > { %6311 = vst [vmem:[#allocation37_spill] sm:$0xff] %v4505_v57 }
 0x1df   : > { %v4507_v12 = vpop.permute.xlu1 %887 }
 0x1e0   : > { %6312 = vst [vmem:[#allocation38_spill] sm:$0xff] %v4507_v12 }
 0x1e3   : > { %v4509_v31 = vpop.permute.xlu2 %799 }
 0x1e4   : > { %6313 = vst [vmem:[#allocation39_spill] sm:$0xff] %v4509_v31  ;;  %v4511_v27 = vpop.permute.xlu0 %1085 }
 0x1e5   : > { %6314 = vst [vmem:[#allocation40_spill] sm:$0xff] %v4511_v27 }
 0x1e7   : > { %v4513_v34 = vpop.permute.xlu1 %991 }
 0x1e8   : > { %6315 = vst [vmem:[#allocation41_spill] sm:$0xff] %v4513_v34  ;;  %v4675_v34 = vld [vmem:[%s6255_s4 + $0x38] sm:$0xff] }
 0x1eb   : > { %v4515_v15 = vpop.permute.xlu2 %793 }
 0x1ec   : > { %6316 = vst [vmem:[#allocation42_spill] sm:$0xff] %v4515_v15  ;;  %v4517_v50 = vpop.permute.xlu0 %1189  ;;  %v4654_v15 = vld [vmem:[%s6255_s4 + $0x8] sm:$0xff] }
 0x1ed   : > { %6317 = vst [vmem:[#allocation43_spill] sm:$0xff] %v4517_v50 }
 0x1ef   : > { %v4519_v22 = vpop.permute.xlu1 %1095 }
 0x1f0   : > { %6318 = vst [vmem:[#allocation44_spill] sm:$0xff] %v4519_v22 }
 0x1f3   : > { %v4521_v33 = vpop.permute.xlu2 %1219 }
 0x1f4   : > { %6319 = vst [vmem:[#allocation45_spill] sm:$0xff] %v4521_v33  ;;  %v4523_v54 = vpop.permute.xlu0 %797 }
 0x1f7   : > { %v4525_v51 = vpop.permute.xlu1 %1199 }
 0x1f8   : > { %6320 = vst [vmem:[#allocation46_spill] sm:$0xff] %v4525_v51 }
 0x1fb   : > { %v4527_v0 = vpop.permute.xlu2 %1225 }
 0x1fc   : > { %6321 = vst [vmem:[#allocation47_spill] sm:$0xff] %v4527_v0  ;;  %v4529_v61 = vpop.permute.xlu0 %791 }
 0x1ff   : > { %v4531_v13 = vpop.permute.xlu1 %1221 }
 0x200   : > { %6322 = vst [vmem:[#allocation48_spill] sm:$0xff] %v4531_v13  ;;  %v4668_v13 = vld [vmem:[%s6255_s4 + $0x20] sm:$0xff] }
 0x203   : > { %v4533_v47 = vpop.permute.xlu2 %1231 }
 0x204   : > { %6323 = vst [vmem:[#allocation49_spill] sm:$0xff] %v4533_v47  ;;  %v4535_v44 = vpop.permute.xlu0 %889 }
 0x205   : > { %6324 = vst [vmem:[#allocation50_spill] sm:$0xff] %v4535_v44 }
 0x207   : > { %v4537_v38 = vpop.permute.xlu1 %881 }
 0x208   : > { %6325 = vst [vmem:[#allocation51_spill] sm:$0xff] %v4537_v38 }
 0x20b   : > { %v1254_v11 = vpop.permute.xlu2 %1253 }
 0x20c   : > { %v1276_v60 = vmul.f32 %v1254_v11, %v4344_v59  ;;  %v4540_v43 = vpop.permute.xlu0 %993 }
 0x20d   : > { %6326 = vst [vmem:[#allocation52_spill] sm:$0xff] %v4540_v43 }
 0x20e   : > { %1293 = vrot.lane.b32.xlu0 %v1276_v60, %s3599_s14 }
 0x20f   : > { %v4543_v51 = vpop.permute.xlu1 %985 }
 0x210   : > { %6327 = vst [vmem:[#allocation53_spill] sm:$0xff] %v4543_v51  ;;  %v4647_v51 = vld [vmem:[%s6255_s4 + $0x10] sm:$0xff] }
 0x213   : > { %v1260_v0 = vpop.permute.xlu2 %1259 }
 0x214   : > { %v1279_v33 = vmul.f32 %v1260_v0, %v4295_v56  ;;  %v4546_v26 = vpop.permute.xlu0 %1097 }
 0x215   : > { %6328 = vst [vmem:[#allocation54_spill] sm:$0xff] %v4546_v26 }
 0x216   : > { %1299 = vrot.lane.b32.xlu0 %v1279_v33, %s3599_s14 }
 0x217   : > { %v4549_v47 = vpop.permute.xlu1 %1089 }
 0x218   : > { %6329 = vst [vmem:[#allocation55_spill] sm:$0xff] %v4549_v47 }
 0x21b   : > { %v1266_v44 = vpop.permute.xlu2 %1265 }
 0x21c   : > { %v1282_v22 = vmul.f32 %v1266_v44, %v4403_v62  ;;  %v4552_v50 = vpop.permute.xlu0 %1201 }
 0x21d   : > { %6330 = vst [vmem:[#allocation56_spill] sm:$0xff] %v4552_v50 }
 0x21e   : > { %1305 = vrot.lane.b32.xlu0 %v1282_v22, %s3599_s14 }
 0x21f   : > { %v4555_v11 = vpop.permute.xlu1 %1193 }
 0x220   : > { %6331 = vst [vmem:[#allocation57_spill] sm:$0xff] %v4555_v11  ;;  %v4573_v11 = vld [vmem:[%s6255_s4] sm:$0xff] }
 0x224   : > { %v4557_v60 = vpop.permute.xlu0 %1223 }
 0x226   : > { %1327 = vrot.lane.b32.xlu0 %v3825_v37, %s3606_s16 }
 0x227   : > { %v4561_v0 = vpop.permute.xlu1 %801 }
 0x228   : > { %6332 = vst [vmem:[#allocation58_spill] sm:$0xff] %v4561_v0  ;;  %v4661_v0 = vld [vmem:[%s6255_s4 + $0x28] sm:$0xff] }
 0x22c   : > { %v4563_v33 = vpop.permute.xlu0 %1229 }
 0x22e   : > { %1333 = vrot.lane.b32.xlu0 %v3846_v40, %s3606_s16 }
 0x22f   : > { %v4567_v44 = vpop.permute.xlu1 %1227 }
 0x230   : > { %6333 = vst [vmem:[#allocation59_spill] sm:$0xff] %v4567_v44 }
 0x234   : > { %v1252_v50 = vpop.permute.xlu0 %1251 }
 0x235   : > { %v1275_v22 = vmul.f32 %v1252_v50, %v4275_v4  ;;  %v4584_v50 = vld [vmem:[%s6255_s4 + $0x18] sm:$0xff] }
 0x236   : > { %1355 = vrot.lane.b32.xlu0 %v4573_v11, %s3607_s21 }
 0x237   : > { %v4577_v37 = vpop.permute.xlu1 %1233  ;;  %1291 = vrot.lane.b32.xlu1 %v1275_v22, %s3599_s14 }
 0x238   : > { %6334 = vst [vmem:[#allocation60_spill] sm:$0xff] %v4577_v37 }
 0x23c   : > { %v1258_v26 = vpop.permute.xlu0 %1257 }
 0x23d   : > { %v1278_v40 = vmul.f32 %v1258_v26, %v4401_v58  ;;  %v4595_v26 = vld [vmem:[%s6255_s4 + $0x30] sm:$0xff] }
 0x23e   : > { %1361 = vrot.lane.b32.xlu0 %v4584_v50, %s3607_s21 }
 0x23f   : > { %v1256_v44 = vpop.permute.xlu1 %1255  ;;  %1297 = vrot.lane.b32.xlu1 %v1278_v40, %s3599_s14 }
 0x240   : > { %v1277_v43 = vmul.f32 %v1256_v44, %v4357_v25  ;;  %v4612_v44 = vld [vmem:[%s6254_s3] sm:$0xff] }
 0x242   : > { %1295 = vrot.lane.b32.xlu2 %v1277_v43, %s3599_s14  ;;  %v4605_v43 = vld [vmem:[%s6254_s3 + $0x8] sm:$0xff] }
 0x244   : > { %v1264_v37 = vpop.permute.xlu0 %1263 }
 0x245   : > { %v1281_v22 = vmul.f32 %v1264_v37, %v4362_v14  ;;  %v4626_v37 = vld [vmem:[%s6254_s3 + $0x18] sm:$0xff] }
 0x246   : > { %1367 = vrot.lane.b32.xlu0 %v4595_v26, %s3607_s21 }
 0x247   : > { %v1262_v47 = vpop.permute.xlu1 %1261  ;;  %1303 = vrot.lane.b32.xlu1 %v1281_v22, %s3599_s14  ;;  %v4633_v22 = vld [vmem:[%s6254_s3 + $0x38] sm:$0xff] }
 0x248   : > { %v1280_v40 = vmul.f32 %v1262_v47, %v4310_v1  ;;  %v4619_v47 = vld [vmem:[%s6254_s3 + $0x20] sm:$0xff] }
 0x24a   : > { %1301 = vrot.lane.b32.xlu2 %v1280_v40, %s3599_s14  ;;  %v4640_v40 = vld [vmem:[%s6254_s3 + $0x30] sm:$0xff] }
 0x24f   : > { %1325 = vrot.lane.b32.xlu1 %v4605_v43, %s3606_s16 }
 0x252   : > { %1323 = vrot.lane.b32.xlu2 %v4612_v44, %s3606_s16 }
 0x257   : > { %1331 = vrot.lane.b32.xlu1 %v4619_v47, %s3606_s16 }
 0x25a   : > { %1329 = vrot.lane.b32.xlu2 %v4626_v37, %s3606_s16 }
 0x25f   : > { %1337 = vrot.lane.b32.xlu1 %v4633_v22, %s3606_s16 }
 0x262   : > { %1335 = vrot.lane.b32.xlu2 %v4640_v40, %s3606_s16 }
 0x267   : > { %1359 = vrot.lane.b32.xlu1 %v4647_v51, %s3607_s21 }
 0x26a   : > { %1357 = vrot.lane.b32.xlu2 %v4654_v15, %s3607_s21 }
 0x26f   : > { %1365 = vrot.lane.b32.xlu1 %v4661_v0, %s3607_s21 }
 0x272   : > { %1363 = vrot.lane.b32.xlu2 %v4668_v13, %s3607_s21 }
 0x27a   : > { %1369 = vrot.lane.b32.xlu2 %v4675_v34, %s3607_s21 }
 0x280   : > { %v4679_v38 = vpop.permute.xlu0 %1293 }
 0x281   : > { %6335 = vst [vmem:[#allocation61_spill] sm:$0xff] %v4679_v38 }
 0x288   : > { %v4681_v45 = vpop.permute.xlu0 %1299 }
 0x289   : > { %6336 = vst [vmem:[#allocation62_spill] sm:$0xff] %v4681_v45 }
 0x290   : > { %v4683_v32 = vpop.permute.xlu0 %1305 }
 0x291   : > { %6337 = vst [vmem:[#allocation63_spill] sm:$0xff] %v4683_v32 }
 0x298   : > { %v4685_v27 = vpop.permute.xlu0 %1327 }
 0x29c   : > { %v4687_v12 = vpop.permute.xlu2 %1295 }
 0x2a0   : > { %v4689_v57 = vpop.permute.xlu0 %1333 }
 0x2a4   : > { %v4691_v31 = vpop.permute.xlu2 %1301 }
 0x2a8   : > { %v1356_v53 = vpop.permute.xlu0 %1355 }
 0x2a9   : > { %v4693_v42 = vpop.permute.xlu1 %1291  ;;  %v1379_v20 = vmul.f32 %v1356_v53, %v4275_v4 }
 0x2aa   : > { %6338 = vst [vmem:[#allocation64_spill] sm:$0xff] %v4693_v42 }
 0x2ab   : > { %1395 = vrot.lane.b32.xlu1 %v1379_v20, %s3605_s27 }
 0x2ac   : > { %v4697_v38 = vpop.permute.xlu2 %1323 }
 0x2ad   : > { %6339 = vst [vmem:[#allocation65_spill] sm:$0xff] %v4697_v38 }
 0x2b0   : > { %v1362_v45 = vpop.permute.xlu0 %1361 }
 0x2b1   : > { %v4699_v30 = vpop.permute.xlu1 %1297  ;;  %v1382_v32 = vmul.f32 %v1362_v45, %v4401_v58 }
 0x2b2   : > { %6340 = vst [vmem:[#allocation66_spill] sm:$0xff] %v4699_v30 }
 0x2b3   : > { %1401 = vrot.lane.b32.xlu1 %v1382_v32, %s3605_s27 }
 0x2b4   : > { %v4703_v6 = vpop.permute.xlu2 %1329 }
 0x2b5   : > { %6341 = vst [vmem:[#allocation67_spill] sm:$0xff] %v4703_v6 }
 0x2b8   : > { %v1368_v36 = vpop.permute.xlu0 %1367 }
 0x2b9   : > { %v4705_v17 = vpop.permute.xlu1 %1303  ;;  %v1385_v42 = vmul.f32 %v1368_v36, %v4362_v14 }
 0x2ba   : > { %6342 = vst [vmem:[#allocation68_spill] sm:$0xff] %v4705_v17 }
 0x2bb   : > { %1407 = vrot.lane.b32.xlu1 %v1385_v42, %s3605_s27 }
 0x2bc   : > { %v4709_v53 = vpop.permute.xlu2 %1335 }
 0x2bd   : > { %6343 = vst [vmem:[#allocation69_spill] sm:$0xff] %v4709_v53 }
 0x2c1   : > { %v4711_v20 = vpop.permute.xlu1 %1325 }
 0x2c2   : > { %6344 = vst [vmem:[#allocation70_spill] sm:$0xff] %v4711_v20 }
 0x2c3   : > { %1429 = vrot.lane.b32.xlu1 %v4605_v43, %s3607_s21 }
 0x2c4   : > { %v1358_v30 = vpop.permute.xlu2 %1357 }
 0x2c5   : > { %v1380_v45 = vmul.f32 %v1358_v30, %v4344_v59 }
 0x2c7   : > { %1397 = vrot.lane.b32.xlu0 %v1380_v45, %s3605_s27 }
 0x2c9   : > { %v4717_v32 = vpop.permute.xlu1 %1331 }
 0x2ca   : > { %6345 = vst [vmem:[#allocation71_spill] sm:$0xff] %v4717_v32 }
 0x2cb   : > { %1435 = vrot.lane.b32.xlu1 %v4619_v47, %s3607_s21 }
 0x2cc   : > { %v1364_v36 = vpop.permute.xlu2 %1363 }
 0x2cd   : > { %v1383_v42 = vmul.f32 %v1364_v36, %v4295_v56  ;;  %v4736_v36 = vld [vmem:[%s6254_s3 + $0x10] sm:$0xff] }
 0x2cf   : > { %1403 = vrot.lane.b32.xlu0 %v1383_v42, %s3605_s27 }
 0x2d1   : > { %v4723_v53 = vpop.permute.xlu1 %1337 }
 0x2d2   : > { %6346 = vst [vmem:[#allocation72_spill] sm:$0xff] %v4723_v53 }
 0x2d3   : > { %1441 = vrot.lane.b32.xlu1 %v4633_v22, %s3607_s21 }
 0x2d4   : > { %v1370_v17 = vpop.permute.xlu2 %1369 }
 0x2d5   : > { %v1386_v30 = vmul.f32 %v1370_v17, %v4403_v62 }
 0x2d7   : > { %1409 = vrot.lane.b32.xlu0 %v1386_v30, %s3605_s27 }
 0x2d9   : > { %v1360_v45 = vpop.permute.xlu1 %1359 }
 0x2da   : > { %v1381_v6 = vmul.f32 %v1360_v45, %v4357_v25 }
 0x2db   : > { %1463 = vrot.lane.b32.xlu1 %v4647_v51, %s3606_s16 }
 0x2dc   : > { %1399 = vrot.lane.b32.xlu2 %v1381_v6, %s3605_s27  ;;  %v4747_v6 = vld [vmem:[%s6254_s3 + $0x28] sm:$0xff] }
 0x2df   : > { %1431 = vrot.lane.b32.xlu0 %v4736_v36, %s3607_s21 }
 0x2e1   : > { %v1366_v42 = vpop.permute.xlu1 %1365 }
 0x2e2   : > { %v1384_v17 = vmul.f32 %v1366_v42, %v4310_v1 }
 0x2e3   : > { %1469 = vrot.lane.b32.xlu1 %v4661_v0, %s3606_s16 }
 0x2e4   : > { %1405 = vrot.lane.b32.xlu2 %v1384_v17, %s3605_s27 }
 0x2e7   : > { %1437 = vrot.lane.b32.xlu0 %v4747_v6, %s3607_s21 }
 0x2ec   : > { %1427 = vrot.lane.b32.xlu2 %v4612_v44, %s3607_s21 }
 0x2ef   : > { %1459 = vrot.lane.b32.xlu0 %v4573_v11, %s3606_s16 }
 0x2f4   : > { %1433 = vrot.lane.b32.xlu2 %v4626_v37, %s3607_s21 }
 0x2f7   : > { %1465 = vrot.lane.b32.xlu0 %v4584_v50, %s3606_s16 }
 0x2fc   : > { %1439 = vrot.lane.b32.xlu2 %v4640_v40, %s3607_s21  ;;  %s3609_s21 = smov 68  }
 0x2ff   : > { %1471 = vrot.lane.b32.xlu0 %v4595_v26, %s3606_s16 }
 0x304   : > { %1461 = vrot.lane.b32.xlu2 %v4654_v15, %s3606_s16 }
 0x30c   : > { %1467 = vrot.lane.b32.xlu2 %v4668_v13, %s3606_s16 }
 0x314   : > { %1473 = vrot.lane.b32.xlu2 %v4675_v34, %s3606_s16  ;;  %s3608_s16 = smov 64  }
 0x31d   : > { %v4769_v30 = vpop.permute.xlu1 %1395 }
 0x31e   : > { %6347 = vst [vmem:[#allocation73_spill] sm:$0xff] %v4769_v30 }
 0x325   : > { %v4771_v45 = vpop.permute.xlu1 %1401 }
 0x326   : > { %6348 = vst [vmem:[#allocation74_spill] sm:$0xff] %v4771_v45 }
 0x32d   : > { %v4773_v42 = vpop.permute.xlu1 %1407 }
 0x32e   : > { %6349 = vst [vmem:[#allocation75_spill] sm:$0xff] %v4773_v42 }
 0x335   : > { %v4775_v17 = vpop.permute.xlu1 %1429 }
 0x336   : > { %6350 = vst [vmem:[#allocation76_spill] sm:$0xff] %v4775_v17  ;;  %v4777_v53 = vpop.permute.xlu2 %1399 }
 0x339   : > { %v4779_v32 = vpop.permute.xlu0 %1397 }
 0x33a   : > { %6351 = vst [vmem:[#allocation77_spill] sm:$0xff] %v4779_v32 }
 0x33d   : > { %v4781_v38 = vpop.permute.xlu1 %1435 }
 0x33e   : > { %6352 = vst [vmem:[#allocation78_spill] sm:$0xff] %v4781_v38  ;;  %v4783_v20 = vpop.permute.xlu2 %1405 }
 0x341   : > { %v4785_v52 = vpop.permute.xlu0 %1403 }
 0x342   : > { %6353 = vst [vmem:[#allocation79_spill] sm:$0xff] %v4785_v52 }
 0x345   : > { %v4787_v48 = vpop.permute.xlu1 %1441 }
 0x346   : > { %6354 = vst [vmem:[#allocation80_spill] sm:$0xff] %v4787_v48  ;;  %v4789_v41 = vpop.permute.xlu2 %1427 }
 0x347   : > { %6355 = vst [vmem:[#allocation81_spill] sm:$0xff] %v4789_v41 }
 0x349   : > { %v4791_v30 = vpop.permute.xlu0 %1409 }
 0x34a   : > { %6356 = vst [vmem:[#allocation82_spill] sm:$0xff] %v4791_v30 }
 0x34d   : > { %v1464_v45 = vpop.permute.xlu1 %1463 }
 0x34e   : > { %v4793_v42 = vpop.permute.xlu2 %1433  ;;  %v1485_v17 = vmul.f32 %v1464_v45, %v4357_v25 }
 0x34f   : > { %6357 = vst [vmem:[#allocation83_spill] sm:$0xff] %v4793_v42 }
 0x350   : > { %1503 = vrot.lane.b32.xlu2 %v1485_v17, %s3599_s14 }
 0x351   : > { %v4797_v32 = vpop.permute.xlu0 %1431 }
 0x355   : > { %v1470_v38 = vpop.permute.xlu1 %1469 }
 0x356   : > { %v4799_v28 = vpop.permute.xlu2 %1439  ;;  %v1488_v52 = vmul.f32 %v1470_v38, %v4310_v1 }
 0x357   : > { %6358 = vst [vmem:[#allocation84_spill] sm:$0xff] %v4799_v28 }
 0x358   : > { %1509 = vrot.lane.b32.xlu2 %v1488_v52, %s3599_s14 }
 0x359   : > { %v4803_v48 = vpop.permute.xlu0 %1437 }
 0x35e   : > { %v1462_v41 = vpop.permute.xlu2 %1461 }
 0x35f   : > { %v1484_v30 = vmul.f32 %v1462_v41, %v4344_v59 }
 0x360   : > { %1647 = vrot.lane.b32.xlu2 %v4612_v44, %s3608_s16 }
 0x361   : > { %v1460_v45 = vpop.permute.xlu0 %1459  ;;  %1501 = vrot.lane.b32.xlu0 %v1484_v30, %s3599_s14 }
 0x362   : > { %v1483_v17 = vmul.f32 %v1460_v45, %v4275_v4 }
 0x364   : > { %1499 = vrot.lane.b32.xlu1 %v1483_v17, %s3599_s14  ;;  %v853_v17 = vmul.f32 %v4177_v10, %v4357_v25  ;;  %v736_v10 = vmul.f32 %v4747_v6, %v4310_v1 }
 0x366   : > { %v1468_v28 = vpop.permute.xlu2 %1467 }
 0x367   : > { %v1487_v38 = vmul.f32 %v1468_v28, %v4295_v56 }
 0x368   : > { %1653 = vrot.lane.b32.xlu2 %v4626_v37, %s3608_s16 }
 0x369   : > { %v1466_v52 = vpop.permute.xlu0 %1465  ;;  %1507 = vrot.lane.b32.xlu0 %v1487_v38, %s3599_s14 }
 0x36a   : > { %v1486_v41 = vmul.f32 %v1466_v52, %v4401_v58  ;;  %v901_v52 = vadd.f32 %v4475_v7, %v853_v17 }
 0x36c   : > { %1505 = vrot.lane.b32.xlu1 %v1486_v41, %s3599_s14 }
 0x36e   : > { %v1474_v42 = vpop.permute.xlu2 %1473 }
 0x36f   : > { %v1490_v30 = vmul.f32 %v1474_v42, %v4403_v62  ;;  %v733_v42 = vmul.f32 %v4736_v36, %v4357_v25 }
 0x370   : > { %1659 = vrot.lane.b32.xlu2 %v4640_v40, %s3608_s16 }
 0x371   : > { %v1472_v45 = vpop.permute.xlu0 %1471  ;;  %1513 = vrot.lane.b32.xlu0 %v1490_v30, %s3599_s14  ;;  %v813_v38 = vsub.f32 %v733_v42, %v4529_v61  ;;  %v933_v30 = vmul.f32 %v4215_v18, %v4357_v25  ;;  %v1037_v18 = vmul.f32 %v4247_v2, %v4357_v25  ;;  %v1141_v2 = vmul.f32 %v4283_v8, %v4357_v25 }
 0x372   : > { %v1489_v28 = vmul.f32 %v1472_v45, %v4362_v14  ;;  %v856_v45 = vmul.f32 %v4189_v24, %v4310_v1  ;;  %v1349_v8 = vmul.f32 %v4685_v27, %v4357_v25  ;;  %v1248_v27 = vmul.f32 %v4563_v33, %v4310_v1 }
 0x373   : > { %v1534_v41 = vsel %vm1531_vm11, %v813_v38, %v901_v52  ;;  %v1005_v7 = vsub.f32 %v933_v30, %v4485_v39  ;;  %v1109_v38 = vadd.f32 %v4495_v35, %v1037_v18  ;;  %v1245_v52 = vmul.f32 %v4557_v60, %v4357_v25 }
 0x374   : > { %1511 = vrot.lane.b32.xlu1 %v1489_v28, %s3599_s14  ;;  %v1543_v61 = vsel %vm1540_vm12, %v1534_v41, %v4357_v25  ;;  %v816_v28 = vsub.f32 %v736_v10, %v4523_v54  ;;  %v904_v42 = vadd.f32 %v4431_v5, %v856_v45  ;;  %v936_v54 = vmul.f32 %v4223_v3, %v4310_v1 }
 0x375   : > { %v1552_v17 = vsel %vm1549_vm13, %v1543_v61, %v1005_v7  ;;  %v1317_v41 = vadd.f32 %v4687_v12, %v1245_v52  ;;  %v1040_v3 = vmul.f32 %v4253_v9, %v4310_v1  ;;  %v1213_v10 = vsub.f32 %v1141_v2, %v4503_v19 }
 0x376   : > { %v1537_v24 = vsel %vm1531_vm11, %v816_v28, %v904_v42  ;;  %v1561_v39 = vsel %vm1558_vm14, %v1552_v17, %v1109_v38  ;;  %v1008_v35 = vsub.f32 %v936_v54, %v4441_v49  ;;  %v1421_v45 = vsub.f32 %v1349_v8, %v4777_v53 }
 0x377   : > { %v1546_v5 = vsel %vm1540_vm12, %v1537_v24, %v4310_v1  ;;  %v1570_v30 = vsel %vm1567_vm15, %v1561_v39, %v4357_v25  ;;  %v1112_v61 = vadd.f32 %v4450_v16, %v1040_v3  ;;  %v1453_v9 = vmul.f32 %v4797_v32, %v4357_v25 }
 0x378   : > { %1681 = vrot.lane.b32.xlu2 %v4654_v15, %s3609_s21  ;;  %v1555_v60 = vsel %vm1549_vm13, %v1546_v5, %v1008_v35  ;;  %v1579_v49 = vsel %vm1576_vm1, %v1570_v30, %v1213_v10  ;;  %v1144_v19 = vmul.f32 %v4307_v46, %v4310_v1  ;;  %v1320_v18 = vadd.f32 %v4691_v31, %v1248_v27  ;;  %v6363_v27 = vld [vmem:[#allocation16_spill] sm:$0xff] }
 0x379   : > { %1651 = vrot.lane.b32.xlu0 %v4736_v36, %s3608_s16  ;;  %v1588_v12 = vsel %vm1585_vm2, %v1579_v49, %v1317_v41  ;;  %v1564_v7 = vsel %vm1558_vm14, %v1555_v60, %v1112_v61  ;;  %v1352_v17 = vmul.f32 %v4689_v57, %v4310_v1  ;;  %v1456_v54 = vmul.f32 %v4803_v48, %v4310_v1  ;;  %v6360_v49 = vld [vmem:[#allocation34_spill] sm:$0xff] }
 0x37a   : > { %v1597_v28 = vsel %vm1594_vm3, %v1588_v12, %v4357_v25  ;;  %v1573_v32 = vsel %vm1567_vm15, %v1564_v7, %v4310_v1  ;;  %v1216_v46 = vsub.f32 %v1144_v19, %v4463_v29  ;;  %v735_v48 = vmul.f32 %v4619_v47, %v4295_v56 }
 0x37b   : > { %v1606_v42 = vsel %vm1603_vm5, %v1597_v28, %v1421_v45  ;;  %v1424_v39 = vsub.f32 %v1352_v17, %v4783_v20  ;;  %v731_v3 = vmul.f32 %v4612_v44, %v4275_v4  ;;  %v851_v10 = vmul.f32 %v4181_v21, %v4275_v4  ;;  %v6361_v45 = vld [vmem:[#allocation26_spill] sm:$0xff]  ;;  %v6364_v21 = vld [vmem:[#allocation20_spill] sm:$0xff]  ;;  %v6369_v17 = vld [vmem:[#allocation9_spill] sm:$0xff] }
 0x37c   : > { %1649 = vrot.lane.b32.xlu1 %v4605_v43, %s3608_s16  ;;  %v1582_v38 = vsel %vm1576_vm1, %v1573_v32, %v1216_v46  ;;  %v855_v60 = vmul.f32 %v4157_v55, %v4295_v56  ;;  %v931_v8 = vmul.f32 %v4187_v23, %v4275_v4  ;;  %v1035_v61 = vmul.f32 %v4237_v63, %v4275_v4  ;;  %v6365_v55 = vld [vmem:[#allocation27_spill] sm:$0xff]  ;;  %v6366_v23 = vld [vmem:[#allocation21_spill] sm:$0xff] }
 0x37d   : > { %v1591_v29 = vsel %vm1585_vm2, %v1582_v38, %v1320_v18  ;;  %v815_v12 = vsub.f32 %v735_v48, %v6360_v49  ;;  %v899_v7 = vadd.f32 %v6361_v45, %v851_v10  ;;  %v1139_v28 = vmul.f32 %v6364_v21, %v4275_v4  ;;  %v6367_v63 = vld [vmem:[#allocation5_spill] sm:$0xff]  ;;  %v6370_v38 = vld [vmem:[#allocation14_spill] sm:$0xff]  ;;  %v6378_v21 = vld [vmem:[#allocation23_spill] sm:$0xff] }
 0x37e   : > { %v1600_v2 = vsel %vm1594_vm3, %v1591_v29, %v4310_v1  ;;  %v4960_v18 = vmul.f32 %v6366_v23, %v4295_v56  ;;  %v852_v32 = vmul.f32 %v6367_v63, %v4344_v59  ;;  %v6368_v46 = vld [vmem:[#allocation25_spill] sm:$0xff]  ;;  %v6371_v29 = vld [vmem:[#allocation19_spill] sm:$0xff] }
 0x37f   : > { %v1609_v5 = vsel %vm1603_vm5, %v1600_v2, %v1424_v39  ;;  %v4973_v39 = vmul.f32 %v6371_v29, %v4344_v59  ;;  %v6380_v23 = vld [vmem:[#allocation35_spill] sm:$0xff] }
 0x380   : > { %1687 = vrot.lane.b32.xlu2 %v4668_v13, %s3609_s21  ;;  %v900_v63 = vadd.f32 %v6380_v23, %v852_v32 }
 0x381   : > { %1657 = vrot.lane.b32.xlu0 %v4747_v6, %s3608_s16 }
 0x384   : > { %1655 = vrot.lane.b32.xlu1 %v4619_v47, %s3608_s16 }
 0x388   : > { %1693 = vrot.lane.b32.xlu2 %v4675_v34, %s3609_s21 }
 0x389   : > { %1679 = vrot.lane.b32.xlu0 %v4573_v11, %s3609_s21 }
 0x38c   : > { %1661 = vrot.lane.b32.xlu1 %v4633_v22, %s3608_s16 }
 0x391   : > { %1685 = vrot.lane.b32.xlu0 %v4584_v50, %s3609_s21 }
 0x394   : > { %1683 = vrot.lane.b32.xlu1 %v4647_v51, %s3609_s21 }
 0x399   : > { %1691 = vrot.lane.b32.xlu0 %v4595_v26, %s3609_s21 }
 0x39c   : > { %1689 = vrot.lane.b32.xlu1 %v4661_v0, %s3609_s21 }
 0x3aa   : > { %v1504_v16 = vpop.permute.xlu2 %1503 }
 0x3ab   : > { %v1525_v53 = vadd.f32 %v1504_v16, %v1453_v9  ;;  %v6362_v9 = vld [vmem:[#allocation12_spill] sm:$0xff]  ;;  %v1039_v16 = vmul.f32 %v6363_v27, %v4295_v56  ;;  %v734_v27 = vmul.f32 %v4626_v37, %v4401_v58 }
 0x3ac   : > { %v935_v19 = vmul.f32 %v6362_v9, %v4295_v56 }
 0x3ad   : > { %v1615_v33 = vsel %vm1612_vm4, %v1606_v42, %v1525_v53  ;;  %v903_v53 = vadd.f32 %v6365_v55, %v855_v60  ;;  %v732_v42 = vmul.f32 %v4605_v43, %v4344_v59  ;;  %v6376_v60 = vld [vmem:[#allocation17_spill] sm:$0xff]  ;;  %v4994_v55 = vmul.f32 %v6378_v21, %v4362_v14  ;;  %v6387_v21 = vld [vmem:[#allocation6_spill] sm:$0xff] }
 0x3ae   : > { %v1624_v31 = vsel %vm1621_vm6, %v1615_v33, %v4357_v25  ;;  %v811_v33 = vsub.f32 %v731_v3, %v6368_v46  ;;  %v6375_v3 = vld [vmem:[#allocation36_spill] sm:$0xff]  ;;  %v1041_v49 = vmul.f32 %v6376_v60, %v4362_v14  ;;  %v6386_v60 = vld [vmem:[#allocation37_spill] sm:$0xff] }
 0x3af   : > { %v1632_v24 = vpack.c.bf16 %v1624_v31, %v1624_v31  ;;  %v932_v31 = vmul.f32 %v6369_v17, %v4344_v59  ;;  %v812_v10 = vsub.f32 %v732_v42, %v6375_v3  ;;  %v6381_v42 = vld [vmem:[#allocation8_spill] sm:$0xff] }
 0x3b0   : > { %v5003_v46 = vmul.f32 %v6381_v42, %v4401_v58 }
 0x3b1   : > { %1641 = vst.msk [vmem:[%s4914_s17 + $0x8] sm:$0xf] %vm1638_vm0, %v1632_v24  ;;  %v1036_v24 = vmul.f32 %v6370_v38, %v4344_v59  ;;  %v6383_v38 = vld [vmem:[#allocation29_spill] sm:$0xff] }
 0x3b2   : > { %v1510_v52 = vpop.permute.xlu2 %1509  ;;  %v1007_v29 = vsub.f32 %v935_v19, %v6383_v38  ;;  %v6388_v19 = vld [vmem:[#allocation38_spill] sm:$0xff]  ;;  %v6390_v38 = vld [vmem:[#allocation31_spill] sm:$0xff] }
 0x3b3   : > { %v1528_v57 = vadd.f32 %v1510_v52, %v1456_v54  ;;  %v1536_v54 = vsel %vm1531_vm11, %v815_v12, %v903_v53  ;;  %v6372_v52 = vld [vmem:[#allocation10_spill] sm:$0xff] }
 0x3b4   : > { %v857_v2 = vmul.f32 %v6372_v52, %v4362_v14  ;;  %v6377_v12 = vld [vmem:[#allocation30_spill] sm:$0xff]  ;;  %v6384_v52 = vld [vmem:[#allocation39_spill] sm:$0xff] }
 0x3b5   : > { %v1618_v35 = vsel %vm1612_vm4, %v1609_v5, %v1528_v57  ;;  %v737_v57 = vmul.f32 %v4640_v40, %v4362_v14  ;;  %v6373_v5 = vld [vmem:[#allocation11_spill] sm:$0xff]  ;;  %v1107_v9 = vadd.f32 %v6377_v12, %v1035_v61  ;;  %v1004_v12 = vsub.f32 %v932_v31, %v6386_v60  ;;  %v6393_v31 = vld [vmem:[#allocation24_spill] sm:$0xff] }
 0x3b6   : > { %v1627_v41 = vsel %vm1621_vm6, %v1618_v35, %v4310_v1  ;;  %v937_v35 = vmul.f32 %v6373_v5, %v4362_v14  ;;  %v6382_v61 = vld [vmem:[#allocation15_spill] sm:$0xff]  ;;  %v905_v42 = vadd.f32 %v6388_v19, %v857_v2  ;;  %v6394_v60 = vld [vmem:[#allocation32_spill] sm:$0xff] }
 0x3b7   : > { %v1635_v30 = vpack.c.bf16 %v1627_v41, %v1627_v41  ;;  %v1532_v41 = vsel %vm1531_vm11, %v811_v33, %v899_v7  ;;  %v6379_v7 = vld [vmem:[#allocation7_spill] sm:$0xff]  ;;  %v1038_v33 = vmul.f32 %v6382_v61, %v4401_v58  ;;  %v817_v5 = vsub.f32 %v737_v57, %v6384_v52  ;;  %v6389_v57 = vld [vmem:[#allocation40_spill] sm:$0xff] }
 0x3b8   : > { %v854_v53 = vmul.f32 %v6379_v7, %v4401_v58  ;;  %v1541_v17 = vsel %vm1540_vm12, %v1532_v41, %v4275_v4  ;;  %v858_v7 = vmul.f32 %v6387_v21, %v4403_v62  ;;  %v1108_v61 = vadd.f32 %v6389_v57, %v1036_v24 }
 0x3b9   : > { %1644 = vst.msk [vmem:[%s4914_s17 + $0x14] sm:$0xf] %vm1638_vm0, %v1635_v30  ;;  %v6374_v30 = vld [vmem:[#allocation28_spill] sm:$0xff]  ;;  %v1111_v52 = vadd.f32 %v6390_v38, %v1039_v16  ;;  %v1538_v2 = vsel %vm1531_vm11, %v817_v5, %v905_v42  ;;  %v738_v16 = vmul.f32 %v4633_v22, %v4403_v62  ;;  %v6397_v38 = vld [vmem:[#allocation41_spill] sm:$0xff] }
 0x3ba   : > { %v4935_v20 = vpop.permute.xlu2 %1647  ;;  %v1003_v48 = vsub.f32 %v931_v8, %v6374_v30  ;;  %v1545_v8 = vsel %vm1540_vm12, %v1536_v54, %v4295_v56  ;;  %v6385_v30 = vld [vmem:[#allocation22_spill] sm:$0xff]  ;;  %v1533_v54 = vsel %vm1531_vm11, %v812_v10, %v900_v63  ;;  %v6398_v5 = vld [vmem:[#allocation48_spill] sm:$0xff] }
 0x3bb   : > { %6359 = vst [vmem:[#allocation85_spill] sm:$0xff] %v4935_v20  ;;  %v5013_v3 = vmul.f32 %v6385_v30, %v4401_v58  ;;  %v1554_v41 = vsel %vm1549_vm13, %v1545_v8, %v1007_v29  ;;  %v6391_v30 = vld [vmem:[#allocation13_spill] sm:$0xff]  ;;  %v6392_v10 = vld [vmem:[#allocation18_spill] sm:$0xff]  ;;  %v1542_v8 = vsel %vm1540_vm12, %v1533_v54, %v4344_v59  ;;  %v1009_v54 = vsub.f32 %v937_v35, %v6397_v38 }
 0x3bc   : > { %v1550_v32 = vsel %vm1549_vm13, %v1541_v17, %v1003_v48  ;;  %v938_v48 = vmul.f32 %v6391_v30, %v4403_v62  ;;  %v1042_v63 = vmul.f32 %v6392_v10, %v4403_v62  ;;  %v5031_v17 = vmul.f32 %v6393_v31, %v4403_v62  ;;  %v6399_v30 = vld [vmem:[#allocation58_spill] sm:$0xff]  ;;  %v6404_v35 = vld [vmem:[#allocation61_spill] sm:$0xff] }
 0x3bd   : > { %v1559_v23 = vsel %vm1558_vm14, %v1550_v32, %v1107_v9  ;;  %v1211_v9 = vsub.f32 %v1139_v28, %v6394_v60  ;;  %v1551_v29 = vsel %vm1549_vm13, %v1542_v8, %v1004_v12  ;;  %v6395_v32 = vld [vmem:[#allocation51_spill] sm:$0xff]  ;;  %v1563_v19 = vsel %vm1558_vm14, %v1554_v41, %v1111_v52  ;;  %v6400_v31 = vld [vmem:[#allocation42_spill] sm:$0xff]  ;;  %v6402_v41 = vld [vmem:[#allocation44_spill] sm:$0xff] }
 0x3be   : > { %v1568_v24 = vsel %vm1567_vm15, %v1559_v23, %v4275_v4  ;;  %v902_v21 = vadd.f32 %v6395_v32, %v854_v53  ;;  %v1560_v28 = vsel %vm1558_vm14, %v1551_v29, %v1108_v61  ;;  %v1244_v42 = vmul.f32 %v6398_v5, %v4344_v59  ;;  %v6401_v60 = vld [vmem:[#allocation43_spill] sm:$0xff]  ;;  %v6403_v61 = vld [vmem:[#allocation50_spill] sm:$0xff] }
 0x3bf   : > { %v818_v10 = vsub.f32 %v738_v16, %v6399_v30  ;;  %v1547_v23 = vsel %vm1540_vm12, %v1538_v2, %v4362_v14  ;;  %v814_v12 = vsub.f32 %v734_v27, %v6400_v31  ;;  %v1212_v53 = vsub.f32 %v4973_v39, %v6401_v60  ;;  %v6405_v16 = vld [vmem:[#allocation33_spill] sm:$0xff]  ;;  %v6409_v60 = vld [vmem:[#allocation64_spill] sm:$0xff] }
 0x3c0   : > { %v1113_v52 = vadd.f32 %v6402_v41, %v1041_v49  ;;  %v1577_v8 = vsel %vm1576_vm1, %v1568_v24, %v1211_v9  ;;  %v906_v29 = vadd.f32 %v6403_v61, %v858_v7  ;;  %v1316_v32 = vadd.f32 %v6404_v35, %v1244_v42  ;;  %v6406_v2 = vld [vmem:[#allocation45_spill] sm:$0xff]  ;;  %v6412_v61 = vld [vmem:[#allocation55_spill] sm:$0xff] }
 0x3c1   : > { %v1572_v38 = vsel %vm1567_vm15, %v1563_v19, %v4295_v56  ;;  %v1215_v5 = vsub.f32 %v4960_v18, %v6405_v16  ;;  %v1569_v27 = vsel %vm1567_vm15, %v1560_v28, %v4344_v59  ;;  %v1243_v39 = vmul.f32 %v6406_v2, %v4275_v4  ;;  %v6407_v24 = vld [vmem:[#allocation53_spill] sm:$0xff]  ;;  %v6408_v19 = vld [vmem:[#allocation70_spill] sm:$0xff] }
 0x3c2   : > { %v4987_v45 = vpop.permute.xlu2 %1653  ;;  %v1535_v49 = vsel %vm1531_vm11, %v814_v12, %v902_v21  ;;  %v1556_v9 = vsel %vm1549_vm13, %v1547_v23, %v1009_v54  ;;  %v1006_v7 = vsub.f32 %v5003_v46, %v6407_v24  ;;  %v1539_v42 = vsel %vm1531_vm11, %v818_v10, %v906_v29  ;;  %v6410_v21 = vld [vmem:[#allocation47_spill] sm:$0xff]  ;;  %v6411_v23 = vld [vmem:[#allocation77_spill] sm:$0xff] }
 0x3c3   : > { %v1348_v30 = vmul.f32 %v6408_v19, %v4344_v59  ;;  %v1578_v18 = vsel %vm1576_vm1, %v1569_v27, %v1212_v53  ;;  %v5077_v31 = vsel %vm1558_vm14, %v1556_v9, %v1113_v52  ;;  %v1581_v28 = vsel %vm1576_vm1, %v1572_v38, %v1215_v5  ;;  %v6413_v52 = vld [vmem:[#allocation65_spill] sm:$0xff]  ;;  %v6414_v38 = vld [vmem:[#allocation76_spill] sm:$0xff] }
 0x3c4   : > { %v1315_v41 = vadd.f32 %v6409_v60, %v1243_v39  ;;  %v1246_v54 = vmul.f32 %v6410_v21, %v4401_v58  ;;  %v1544_v46 = vsel %vm1540_vm12, %v1535_v49, %v4401_v58  ;;  %v1587_v10 = vsel %vm1585_vm2, %v1578_v18, %v1316_v32  ;;  %v6415_v27 = vld [vmem:[#allocation52_spill] sm:$0xff]  ;;  %v6416_v32 = vld [vmem:[#allocation59_spill] sm:$0xff]  ;;  %v6418_v21 = vld [vmem:[#allocation62_spill] sm:$0xff] }
 0x3c5   : > { %v1420_v12 = vsub.f32 %v1348_v30, %v6411_v23  ;;  %v1110_v29 = vadd.f32 %v6412_v61, %v1038_v33  ;;  %v1548_v53 = vsel %vm1540_vm12, %v1539_v42, %v4403_v62  ;;  %v1347_v35 = vmul.f32 %v6413_v52, %v4275_v4  ;;  %v6417_v42 = vld [vmem:[#allocation73_spill] sm:$0xff]  ;;  %v6420_v61 = vld [vmem:[#allocation54_spill] sm:$0xff] }
 0x3c6   : > { %v1452_v16 = vmul.f32 %v6414_v38, %v4344_v59  ;;  %v1010_v2 = vsub.f32 %v938_v48, %v6415_v27  ;;  %v1553_v39 = vsel %vm1549_vm13, %v1544_v46, %v1006_v7  ;;  %v1247_v49 = vmul.f32 %v6416_v32, %v4295_v56  ;;  %v6419_v46 = vld [vmem:[#allocation81_spill] sm:$0xff] }
 0x3c7   : > { %v1586_v24 = vsel %vm1585_vm2, %v1577_v8, %v1315_v41  ;;  %v1419_v19 = vsub.f32 %v1347_v35, %v6417_v42  ;;  %v1596_v30 = vsel %vm1594_vm3, %v1587_v10, %v4344_v59  ;;  %v1451_v23 = vmul.f32 %v6419_v46, %v4275_v4  ;;  %v6421_v41 = vld [vmem:[#allocation57_spill] sm:$0xff] }
 0x3c8   : > { %v1557_v60 = vsel %vm1549_vm13, %v1548_v53, %v1010_v2  ;;  %v1319_v48 = vadd.f32 %v6418_v21, %v1247_v49  ;;  %v1605_v7 = vsel %vm1603_vm5, %v1596_v30, %v1420_v12  ;;  %v1114_v52 = vadd.f32 %v6420_v61, %v1042_v63  ;;  %v6422_v53 = vld [vmem:[#allocation71_spill] sm:$0xff] }
 0x3c9   : > { %v1562_v8 = vsel %vm1558_vm14, %v1553_v39, %v1110_v29  ;;  %v1214_v35 = vsub.f32 %v5013_v3, %v6421_v41  ;;  %v1595_v12 = vsel %vm1594_vm3, %v1586_v24, %v4275_v4  ;;  %v6423_v29 = vld [vmem:[#allocation66_spill] sm:$0xff]  ;;  %v6425_v30 = vld [vmem:[#allocation67_spill] sm:$0xff] }
 0x3ca   : > { %v5044_v57 = vpop.permute.xlu2 %1659  ;;  %v1566_v63 = vsel %vm1558_vm14, %v1557_v60, %v1114_v52  ;;  %v1318_v2 = vadd.f32 %v6423_v29, %v1246_v54  ;;  %v1604_v3 = vsel %vm1603_vm5, %v1595_v12, %v1419_v19  ;;  %v1571_v32 = vsel %vm1567_vm15, %v1562_v8, %v4401_v58  ;;  %v6426_v60 = vld [vmem:[#allocation78_spill] sm:$0xff]  ;;  %v6430_v12 = vld [vmem:[#allocation83_spill] sm:$0xff]  ;;  %v6432_v29 = vld [vmem:[#allocation49_spill] sm:$0xff] }
 0x3cb   : > { %6396 = vst [vmem:[#allocation34_spill] sm:$0xff] %v5044_v57  ;;  %v1590_v49 = vsel %vm1585_vm2, %v1581_v28, %v1319_v48  ;;  %v1580_v42 = vsel %vm1576_vm1, %v1571_v32, %v1214_v35  ;;  %v1455_v54 = vmul.f32 %v6426_v60, %v4295_v56  ;;  %v6427_v28 = vld [vmem:[#allocation60_spill] sm:$0xff]  ;;  %v6428_v8 = vld [vmem:[#allocation74_spill] sm:$0xff] }
 0x3cc   : > { %v1250_v48 = vmul.f32 %v6427_v28, %v4403_v62  ;;  %v1589_v52 = vsel %vm1585_vm2, %v1580_v42, %v1318_v2  ;;  %v1599_v35 = vsel %vm1594_vm3, %v1590_v49, %v4295_v56  ;;  %v1249_v2 = vmul.f32 %v6432_v29, %v4362_v14 }
 0x3d2   : > { %v1682_v5 = vpop.permute.xlu2 %1681 }
 0x3d3   : > { %v1704_v9 = vmul.f32 %v1682_v5, %v4344_v59  ;;  %v1502_v33 = vpop.permute.xlu0 %1501 }
 0x3d4   : > { %v1524_v18 = vadd.f32 %v1502_v33, %v1452_v16  ;;  %v1351_v16 = vmul.f32 %v6422_v53, %v4295_v56 }
 0x3d5   : > { %1721 = vrot.lane.b32.xlu0 %v1704_v9, %s3605_s27  ;;  %v6424_v9 = vld [vmem:[#allocation79_spill] sm:$0xff] }
 0x3d6   : > { %v1614_v10 = vsel %vm1612_vm4, %v1605_v7, %v1524_v18  ;;  %v1500_v38 = vpop.permute.xlu1 %1499  ;;  %v1423_v33 = vsub.f32 %v1351_v16, %v6424_v9  ;;  %v1350_v18 = vmul.f32 %v6425_v30, %v4401_v58  ;;  %v1575_v7 = vsel %vm1567_vm15, %v1566_v63, %v4403_v62  ;;  %v6434_v9 = vld [vmem:[#allocation72_spill] sm:$0xff] }
 0x3d7   : > { %v1623_v5 = vsel %vm1621_vm6, %v1614_v10, %v4344_v59  ;;  %v1523_v27 = vadd.f32 %v1500_v38, %v1451_v23  ;;  %v6429_v38 = vld [vmem:[#allocation63_spill] sm:$0xff] }
 0x3d8   : > { %v1631_v39 = vpack.c.bf16 %v1623_v5, %v1623_v5  ;;  %v1422_v41 = vsub.f32 %v1350_v18, %v6428_v8  ;;  %v1322_v53 = vadd.f32 %v6429_v38, %v1250_v48  ;;  %v1608_v16 = vsel %vm1603_vm5, %v1599_v35, %v1423_v33  ;;  %v6435_v18 = vld [vmem:[#allocation68_spill] sm:$0xff] }
 0x3d9   : > { %v1613_v24 = vsel %vm1612_vm4, %v1604_v3, %v1523_v27  ;;  %v1454_v5 = vmul.f32 %v6430_v12, %v4401_v58  ;;  %v6431_v27 = vld [vmem:[#allocation46_spill] sm:$0xff]  ;;  %v6433_v3 = vld [vmem:[#allocation56_spill] sm:$0xff]  ;;  %v1354_v33 = vmul.f32 %v6434_v9, %v4403_v62  ;;  %v1321_v60 = vadd.f32 %v6435_v18, %v1249_v2 }
 0x3da   : > { %1640 = vst.msk [vmem:[%s4914_s17 + $0x4] sm:$0xf] %vm1638_vm0, %v1631_v39  ;;  %v1622_v19 = vsel %vm1621_vm6, %v1613_v24, %v4275_v4  ;;  %v1688_v21 = vpop.permute.xlu2 %1687  ;;  %v1217_v63 = vsub.f32 %v4994_v55, %v6431_v27  ;;  %v1218_v39 = vsub.f32 %v5031_v17, %v6433_v3  ;;  %v1598_v24 = vsel %vm1594_vm3, %v1589_v52, %v4401_v58  ;;  %v6440_v2 = vld [vmem:[#allocation84_spill] sm:$0xff] }
 0x3db   : > { %v1630_v46 = vpack.c.bf16 %v1622_v19, %v1622_v19  ;;  %v1707_v23 = vmul.f32 %v1688_v21, %v4295_v56  ;;  %v1508_v61 = vpop.permute.xlu0 %1507  ;;  %v1607_v17 = vsel %vm1603_vm5, %v1598_v24, %v1422_v41  ;;  %v6436_v21 = vld [vmem:[#allocation82_spill] sm:$0xff]  ;;  %v1457_v3 = vmul.f32 %v6440_v2, %v4362_v14 }
 0x3dc   : > { %v1527_v10 = vadd.f32 %v1508_v61, %v1455_v54  ;;  %v1584_v30 = vsel %vm1576_vm1, %v1575_v7, %v1218_v39  ;;  %v1426_v28 = vsub.f32 %v1354_v33, %v6436_v21  ;;  %v6438_v7 = vld [vmem:[#allocation80_spill] sm:$0xff] }
 0x3dd   : > { %1639 = vst.msk [vmem:[%s4914_s17] sm:$0xf] %vm1638_vm0, %v1630_v46  ;;  %1727 = vrot.lane.b32.xlu0 %v1707_v23, %s3605_s27  ;;  %v1593_v19 = vsel %vm1585_vm2, %v1584_v30, %v1322_v53  ;;  %v1574_v46 = vsel %vm1567_vm15, %v5077_v31, %v4362_v14  ;;  %v6437_v23 = vld [vmem:[#allocation69_spill] sm:$0xff]  ;;  %v1458_v52 = vmul.f32 %v6438_v7, %v4403_v62 }
 0x3de   : > { %v1617_v32 = vsel %vm1612_vm4, %v1608_v16, %v1527_v10  ;;  %v1506_v49 = vpop.permute.xlu1 %1505  ;;  %v1353_v61 = vmul.f32 %v6437_v23, %v4362_v14  ;;  %v1583_v35 = vsel %vm1576_vm1, %v1574_v46, %v1217_v63  ;;  %v6439_v16 = vld [vmem:[#allocation75_spill] sm:$0xff] }
 0x3df   : > { %v1626_v42 = vsel %vm1621_vm6, %v1617_v32, %v4295_v56  ;;  %v1526_v55 = vadd.f32 %v1506_v49, %v1454_v5  ;;  %v1592_v31 = vsel %vm1585_vm2, %v1583_v35, %v1321_v60  ;;  %v1602_v5 = vsel %vm1594_vm3, %v1593_v19, %v4403_v62 }
 0x3e0   : > { %v1634_v54 = vpack.c.bf16 %v1626_v42, %v1626_v42  ;;  %v1425_v12 = vsub.f32 %v1353_v61, %v6439_v16  ;;  %v1611_v29 = vsel %vm1603_vm5, %v1602_v5, %v1426_v28  ;;  %v1601_v32 = vsel %vm1594_vm3, %v1592_v31, %v4362_v14 }
 0x3e1   : > { %v1616_v48 = vsel %vm1612_vm4, %v1607_v17, %v1526_v55 }
 0x3e2   : > { %1643 = vst.msk [vmem:[%s4914_s17 + $0x10] sm:$0xf] %vm1638_vm0, %v1634_v54  ;;  %v1625_v8 = vsel %vm1621_vm6, %v1616_v48, %v4401_v58  ;;  %v1694_v41 = vpop.permute.xlu2 %1693  ;;  %v1610_v33 = vsel %vm1603_vm5, %v1601_v32, %v1425_v12 }
 0x3e3   : > { %v1633_v10 = vpack.c.bf16 %v1625_v8, %v1625_v8  ;;  %v1710_v38 = vmul.f32 %v1694_v41, %v4403_v62  ;;  %v1514_v53 = vpop.permute.xlu0 %1513 }
 0x3e4   : > { %v1530_v27 = vadd.f32 %v1514_v53, %v1458_v52 }
 0x3e5   : > { %1642 = vst.msk [vmem:[%s4914_s17 + $0xc] sm:$0xf] %vm1638_vm0, %v1633_v10  ;;  %1733 = vrot.lane.b32.xlu0 %v1710_v38, %s3605_s27 }
 0x3e6   : > { %v1620_v63 = vsel %vm1612_vm4, %v1611_v29, %v1530_v27  ;;  %v1512_v39 = vpop.permute.xlu1 %1511 }
 0x3e7   : > { %v1629_v49 = vsel %vm1621_vm6, %v1620_v63, %v4403_v62  ;;  %v1529_v9 = vadd.f32 %v1512_v39, %v1457_v3 }
 0x3e8   : > { %v1637_v24 = vpack.c.bf16 %v1629_v49, %v1629_v49 }
 0x3e9   : > { %v1619_v42 = vsel %vm1612_vm4, %v1610_v33, %v1529_v9 }
 0x3ea   : > { %1646 = vst.msk [vmem:[%s4914_s17 + $0x1c] sm:$0xf] %vm1638_vm0, %v1637_v24  ;;  %v1628_v55 = vsel %vm1621_vm6, %v1619_v42, %v4362_v14 }
 0x3eb   : > { %v1636_v30 = vpack.c.bf16 %v1628_v55, %v1628_v55  ;;  %v5206_v18 = vpop.permute.xlu0 %1651 }
 0x3ed   : > { %1645 = vst.msk [vmem:[%s4914_s17 + $0x18] sm:$0xf] %vm1638_vm0, %v1636_v30  ;;  %1755 = vrot.lane.b32.xlu0 %v4736_v36, %s3609_s21  ;;  %s3614_s17 = smov 112  }
 0x3ee   : > { %v5212_v60 = vpop.permute.xlu1 %1649 }
 0x3ef   : > { %6441 = vst [vmem:[#allocation26_spill] sm:$0xff] %v5212_v60 }
 0x3f3   : > { %v5214_v17 = vpop.permute.xlu0 %1657 }
 0x3f5   : > { %1761 = vrot.lane.b32.xlu0 %v4747_v6, %s3609_s21 }
 0x3f6   : > { %v5218_v54 = vpop.permute.xlu1 %1655 }
 0x3fb   : > { %v1680_v19 = vpop.permute.xlu0 %1679 }
 0x3fc   : > { %v1703_v21 = vmul.f32 %v1680_v19, %v4275_v4 }
 0x3fd   : > { %1783 = vrot.lane.b32.xlu0 %v4573_v11, %s3608_s16 }
 0x3fe   : > { %v5223_v28 = vpop.permute.xlu1 %1661  ;;  %1719 = vrot.lane.b32.xlu1 %v1703_v21, %s3605_s27 }
 0x3ff   : > { %6442 = vst [vmem:[#allocation12_spill] sm:$0xff] %v5223_v28 }
 0x403   : > { %v1686_v48 = vpop.permute.xlu0 %1685 }
 0x404   : > { %v1706_v46 = vmul.f32 %v1686_v48, %v4401_v58 }
 0x405   : > { %1789 = vrot.lane.b32.xlu0 %v4584_v50, %s3608_s16 }
 0x406   : > { %v1684_v23 = vpop.permute.xlu1 %1683  ;;  %1725 = vrot.lane.b32.xlu1 %v1706_v46, %s3605_s27 }
 0x407   : > { %v1705_v61 = vmul.f32 %v1684_v23, %v4357_v25 }
 0x409   : > { %1723 = vrot.lane.b32.xlu2 %v1705_v61, %s3605_s27 }
 0x40b   : > { %v1692_v7 = vpop.permute.xlu0 %1691 }
 0x40c   : > { %v1709_v52 = vmul.f32 %v1692_v7, %v4362_v14 }
 0x40d   : > { %1795 = vrot.lane.b32.xlu0 %v4595_v26, %s3608_s16 }
 0x40e   : > { %v1690_v8 = vpop.permute.xlu1 %1689  ;;  %1731 = vrot.lane.b32.xlu1 %v1709_v52, %s3605_s27 }
 0x40f   : > { %v1708_v41 = vmul.f32 %v1690_v8, %v4310_v1 }
 0x411   : > { %1729 = vrot.lane.b32.xlu2 %v1708_v41, %s3605_s27 }
 0x416   : > { %1753 = vrot.lane.b32.xlu1 %v4605_v43, %s3609_s21 }
 0x419   : > { %1751 = vrot.lane.b32.xlu2 %v4612_v44, %s3609_s21 }
 0x41e   : > { %1759 = vrot.lane.b32.xlu1 %v4619_v47, %s3609_s21 }
 0x421   : > { %1757 = vrot.lane.b32.xlu2 %v4626_v37, %s3609_s21 }
 0x426   : > { %1765 = vrot.lane.b32.xlu1 %v4633_v22, %s3609_s21 }
 0x429   : > { %1763 = vrot.lane.b32.xlu2 %v4640_v40, %s3609_s21 }
 0x42e   : > { %1787 = vrot.lane.b32.xlu1 %v4647_v51, %s3608_s16 }
 0x431   : > { %1785 = vrot.lane.b32.xlu2 %v4654_v15, %s3608_s16 }
 0x436   : > { %1793 = vrot.lane.b32.xlu1 %v4661_v0, %s3608_s16 }
 0x439   : > { %1791 = vrot.lane.b32.xlu2 %v4668_v13, %s3608_s16 }
 0x441   : > { %1797 = vrot.lane.b32.xlu2 %v4675_v34, %s3608_s16 }
 0x447   : > { %v5260_v35 = vpop.permute.xlu0 %1721 }
 0x448   : > { %6443 = vst [vmem:[#allocation16_spill] sm:$0xff] %v5260_v35 }
 0x44f   : > { %v5262_v10 = vpop.permute.xlu0 %1727 }
 0x457   : > { %v5264_v38 = vpop.permute.xlu0 %1733 }
 0x458   : > { %6444 = vst [vmem:[#allocation20_spill] sm:$0xff] %v5264_v38 }
 0x45f   : > { %v5266_v53 = vpop.permute.xlu0 %1755 }
 0x460   : > { %6445 = vst [vmem:[#allocation27_spill] sm:$0xff] %v5266_v53 }
 0x463   : > { %v5268_v31 = vpop.permute.xlu2 %1723 }
 0x467   : > { %v5270_v16 = vpop.permute.xlu0 %1761 }
 0x468   : > { %6446 = vst [vmem:[#allocation21_spill] sm:$0xff] %v5270_v16 }
 0x46b   : > { %v5272_v12 = vpop.permute.xlu2 %1729 }
 0x46f   : > { %v1784_v5 = vpop.permute.xlu0 %1783 }
 0x470   : > { %v5274_v27 = vpop.permute.xlu1 %1719  ;;  %v1807_v29 = vmul.f32 %v1784_v5, %v4275_v4 }
 0x471   : > { %6447 = vst [vmem:[#allocation5_spill] sm:$0xff] %v5274_v27 }
 0x472   : > { %1823 = vrot.lane.b32.xlu1 %v1807_v29, %s3599_s14 }
 0x473   : > { %v5278_v2 = vpop.permute.xlu2 %1751 }
 0x477   : > { %v1790_v3 = vpop.permute.xlu0 %1789 }
 0x478   : > { %v5280_v63 = vpop.permute.xlu1 %1725  ;;  %v1810_v39 = vmul.f32 %v1790_v3, %v4401_v58 }
 0x47a   : > { %1829 = vrot.lane.b32.xlu1 %v1810_v39, %s3599_s14 }
 0x47b   : > { %v5284_v32 = vpop.permute.xlu2 %1757 }
 0x47c   : > { %6448 = vst [vmem:[#allocation25_spill] sm:$0xff] %v5284_v32 }
 0x47f   : > { %v1796_v49 = vpop.permute.xlu0 %1795 }
 0x480   : > { %v5286_v9 = vpop.permute.xlu1 %1731  ;;  %v1813_v33 = vmul.f32 %v1796_v49, %v4362_v14 }
 0x481   : > { %6449 = vst [vmem:[#allocation9_spill] sm:$0xff] %v5286_v9 }
 0x482   : > { %1835 = vrot.lane.b32.xlu1 %v1813_v33, %s3599_s14 }
 0x483   : > { %v5290_v24 = vpop.permute.xlu2 %1763 }
 0x488   : > { %v5292_v42 = vpop.permute.xlu1 %1753 }
 0x48a   : > { %1857 = vrot.lane.b32.xlu1 %v4605_v43, %s3610_s12 }
 0x48b   : > { %v1786_v55 = vpop.permute.xlu2 %1785 }
 0x48c   : > { %v1808_v30 = vmul.f32 %v1786_v55, %v4344_v59 }
 0x48e   : > { %1825 = vrot.lane.b32.xlu0 %v1808_v30, %s3599_s14 }
 0x490   : > { %v5298_v19 = vpop.permute.xlu1 %1759 }
 0x491   : > { %6450 = vst [vmem:[#allocation14_spill] sm:$0xff] %v5298_v19 }
 0x492   : > { %1863 = vrot.lane.b32.xlu1 %v4619_v47, %s3610_s12 }
 0x493   : > { %v1792_v21 = vpop.permute.xlu2 %1791 }
 0x494   : > { %v1811_v48 = vmul.f32 %v1792_v21, %v4295_v56 }
 0x496   : > { %1831 = vrot.lane.b32.xlu0 %v1811_v48, %s3599_s14 }
 0x498   : > { %v5304_v46 = vpop.permute.xlu1 %1765 }
 0x49a   : > { %1869 = vrot.lane.b32.xlu1 %v4633_v22, %s3610_s12 }
 0x49b   : > { %v1798_v43 = vpop.permute.xlu2 %1797 }
 0x49c   : > { %v1814_v23 = vmul.f32 %v1798_v43, %v4403_v62 }
 0x49e   : > { %1837 = vrot.lane.b32.xlu0 %v1814_v23, %s3599_s14 }
 0x4a0   : > { %v1788_v61 = vpop.permute.xlu1 %1787 }
 0x4a1   : > { %v1809_v7 = vmul.f32 %v1788_v61, %v4357_v25 }
 0x4a2   : > { %1891 = vrot.lane.b32.xlu1 %v4647_v51, %s3611_s19 }
 0x4a3   : > { %1827 = vrot.lane.b32.xlu2 %v1809_v7, %s3599_s14 }
 0x4a6   : > { %1859 = vrot.lane.b32.xlu0 %v4736_v36, %s3610_s12 }
 0x4a8   : > { %v1794_v47 = vpop.permute.xlu1 %1793 }
 0x4a9   : > { %v1812_v22 = vmul.f32 %v1794_v47, %v4310_v1 }
 0x4aa   : > { %1897 = vrot.lane.b32.xlu1 %v4661_v0, %s3611_s19 }
 0x4ab   : > { %1833 = vrot.lane.b32.xlu2 %v1812_v22, %s3599_s14 }
 0x4ae   : > { %1865 = vrot.lane.b32.xlu0 %v4747_v6, %s3610_s12 }
 0x4b3   : > { %1855 = vrot.lane.b32.xlu2 %v4612_v44, %s3610_s12 }
 0x4b6   : > { %1887 = vrot.lane.b32.xlu0 %v4573_v11, %s3611_s19 }
 0x4bb   : > { %1861 = vrot.lane.b32.xlu2 %v4626_v37, %s3610_s12 }
 0x4be   : > { %1893 = vrot.lane.b32.xlu0 %v4584_v50, %s3611_s19 }
 0x4c3   : > { %1867 = vrot.lane.b32.xlu2 %v4640_v40, %s3610_s12 }
 0x4c6   : > { %1899 = vrot.lane.b32.xlu0 %v4595_v26, %s3611_s19 }
 0x4cb   : > { %1889 = vrot.lane.b32.xlu2 %v4654_v15, %s3611_s19 }
 0x4d3   : > { %1895 = vrot.lane.b32.xlu2 %v4668_v13, %s3611_s19 }
 0x4db   : > { %1901 = vrot.lane.b32.xlu2 %v4675_v34, %s3611_s19 }
 0x4e4   : > { %v5340_v51 = vpop.permute.xlu1 %1823 }
 0x4ec   : > { %v5342_v11 = vpop.permute.xlu1 %1829 }
 0x4ed   : > { %6451 = vst [vmem:[#allocation19_spill] sm:$0xff] %v5342_v11 }
 0x4f4   : > { %v5344_v0 = vpop.permute.xlu1 %1835 }
 0x4fc   : > { %v5346_v50 = vpop.permute.xlu1 %1857 }
 0x4fd   : > { %6452 = vst [vmem:[#allocation10_spill] sm:$0xff] %v5346_v50  ;;  %v5348_v40 = vpop.permute.xlu2 %1827 }
 0x4fe   : > { %6453 = vst [vmem:[#allocation11_spill] sm:$0xff] %v5348_v40 }
 0x500   : > { %v5350_v26 = vpop.permute.xlu0 %1825 }
 0x504   : > { %v5352_v52 = vpop.permute.xlu1 %1863 }
 0x505   : > { %6454 = vst [vmem:[#allocation28_spill] sm:$0xff] %v5352_v52  ;;  %v5354_v15 = vpop.permute.xlu2 %1833 }
 0x506   : > { %6455 = vst [vmem:[#allocation36_spill] sm:$0xff] %v5354_v15 }
 0x508   : > { %v5356_v13 = vpop.permute.xlu0 %1831 }
 0x509   : > { %6456 = vst [vmem:[#allocation17_spill] sm:$0xff] %v5356_v13 }
 0x50c   : > { %v5358_v8 = vpop.permute.xlu1 %1869 }
 0x50d   : > { %6457 = vst [vmem:[#allocation30_spill] sm:$0xff] %v5358_v8  ;;  %v5360_v34 = vpop.permute.xlu2 %1855 }
 0x50e   : > { %6458 = vst [vmem:[#allocation23_spill] sm:$0xff] %v5360_v34 }
 0x510   : > { %v5362_v41 = vpop.permute.xlu0 %1837 }
 0x514   : > { %v1892_v5 = vpop.permute.xlu1 %1891 }
 0x515   : > { %v5364_v29 = vpop.permute.xlu2 %1861  ;;  %v1913_v3 = vmul.f32 %v1892_v5, %v4357_v25 }
 0x517   : > { %1931 = vrot.lane.b32.xlu2 %v1913_v3, %s3605_s27  ;;  %v5392_v3 = vld [vmem:[%s6254_s3 + $0x30] sm:$0xff] }
 0x518   : > { %v5368_v39 = vpop.permute.xlu0 %1859 }
 0x519   : > { %6459 = vst [vmem:[#allocation7_spill] sm:$0xff] %v5368_v39 }
 0x51c   : > { %v1898_v49 = vpop.permute.xlu1 %1897 }
 0x51d   : > { %v5370_v33 = vpop.permute.xlu2 %1867  ;;  %v1916_v55 = vmul.f32 %v1898_v49, %v4310_v1 }
 0x51e   : > { %6460 = vst [vmem:[#allocation35_spill] sm:$0xff] %v5370_v33 }
 0x51f   : > { %1937 = vrot.lane.b32.xlu2 %v1916_v55, %s3605_s27  ;;  %v5402_v55 = vld [vmem:[%s6255_s4 + $0x8] sm:$0xff] }
 0x520   : > { %v5374_v30 = vpop.permute.xlu0 %1865 }
 0x521   : > { %6461 = vst [vmem:[#allocation8_spill] sm:$0xff] %v5374_v30 }
 0x525   : > { %v1890_v21 = vpop.permute.xlu2 %1889 }
 0x526   : > { %v1912_v48 = vmul.f32 %v1890_v21, %v4344_v59  ;;  %v5411_v21 = vld [vmem:[%s6254_s3 + $0x8] sm:$0xff] }
 0x527   : > { %1959 = vrot.lane.b32.xlu2 %v4612_v44, %s3611_s19 }
 0x528   : > { %v1888_v43 = vpop.permute.xlu0 %1887  ;;  %1929 = vrot.lane.b32.xlu0 %v1912_v48, %s3605_s27  ;;  %v5418_v48 = vld [vmem:[%s6255_s4 + $0x20] sm:$0xff] }
 0x529   : > { %v1911_v23 = vmul.f32 %v1888_v43, %v4275_v4  ;;  %v5427_v43 = vld [vmem:[%s6254_s3 + $0x20] sm:$0xff] }
 0x52b   : > { %1927 = vrot.lane.b32.xlu1 %v1911_v23, %s3605_s27  ;;  %v5434_v23 = vld [vmem:[%s6255_s4 + $0x38] sm:$0xff] }
 0x52d   : > { %v1896_v61 = vpop.permute.xlu2 %1895 }
 0x52e   : > { %v1915_v7 = vmul.f32 %v1896_v61, %v4295_v56  ;;  %v5441_v61 = vld [vmem:[%s6255_s4] sm:$0xff] }
 0x52f   : > { %1965 = vrot.lane.b32.xlu2 %v4626_v37, %s3611_s19 }
 0x530   : > { %v1894_v47 = vpop.permute.xlu0 %1893  ;;  %1935 = vrot.lane.b32.xlu0 %v1915_v7, %s3605_s27  ;;  %v5448_v7 = vld [vmem:[%s6254_s3 + $0x38] sm:$0xff] }
 0x531   : > { %v1914_v22 = vmul.f32 %v1894_v47, %v4401_v58  ;;  %v5455_v47 = vld [vmem:[%s6255_s4 + $0x18] sm:$0xff] }
 0x533   : > { %1933 = vrot.lane.b32.xlu1 %v1914_v22, %s3605_s27  ;;  %v5462_v22 = vld [vmem:[%s6255_s4 + $0x10] sm:$0xff] }
 0x535   : > { %v1902_v44 = vpop.permute.xlu2 %1901 }
 0x536   : > { %v1918_v5 = vmul.f32 %v1902_v44, %v4403_v62  ;;  %v5469_v44 = vld [vmem:[%s6255_s4 + $0x30] sm:$0xff] }
 0x537   : > { %1971 = vrot.lane.b32.xlu2 %v5392_v3, %s3611_s19 }
 0x538   : > { %v1900_v49 = vpop.permute.xlu0 %1899  ;;  %1941 = vrot.lane.b32.xlu0 %v1918_v5, %s3605_s27  ;;  %v5476_v5 = vld [vmem:[%s6255_s4 + $0x28] sm:$0xff] }
 0x539   : > { %v1917_v37 = vmul.f32 %v1900_v49, %v4362_v14 }
 0x53b   : > { %1939 = vrot.lane.b32.xlu1 %v1917_v37, %s3605_s27 }
 0x53f   : > { %1993 = vrot.lane.b32.xlu2 %v5402_v55, %s3610_s12 }
 0x540   : > { %1963 = vrot.lane.b32.xlu0 %v4736_v36, %s3611_s19 }
 0x543   : > { %1961 = vrot.lane.b32.xlu1 %v5411_v21, %s3611_s19 }
 0x547   : > { %1999 = vrot.lane.b32.xlu2 %v5418_v48, %s3610_s12 }
 0x548   : > { %1969 = vrot.lane.b32.xlu0 %v4747_v6, %s3611_s19 }
 0x54b   : > { %1967 = vrot.lane.b32.xlu1 %v5427_v43, %s3611_s19 }
 0x54f   : > { %2005 = vrot.lane.b32.xlu2 %v5434_v23, %s3610_s12 }
 0x550   : > { %1991 = vrot.lane.b32.xlu0 %v5441_v61, %s3610_s12 }
 0x553   : > { %1973 = vrot.lane.b32.xlu1 %v5448_v7, %s3611_s19  ;;  %s3615_s19 = smov 116  }
 0x558   : > { %1997 = vrot.lane.b32.xlu0 %v5455_v47, %s3610_s12 }
 0x55b   : > { %1995 = vrot.lane.b32.xlu1 %v5462_v22, %s3610_s12 }
 0x560   : > { %2003 = vrot.lane.b32.xlu0 %v5469_v44, %s3610_s12 }
 0x563   : > { %2001 = vrot.lane.b32.xlu1 %v5476_v5, %s3610_s12  ;;  %s3612_s12 = smov 96  }
 0x571   : > { %v5480_v49 = vpop.permute.xlu2 %1931 }
 0x572   : > { %6462 = vst [vmem:[#allocation15_spill] sm:$0xff] %v5480_v49 }
 0x579   : > { %v5482_v37 = vpop.permute.xlu2 %1937 }
 0x57a   : > { %6463 = vst [vmem:[#allocation29_spill] sm:$0xff] %v5482_v37 }
 0x581   : > { %v5484_v8 = vpop.permute.xlu2 %1959 }
 0x582   : > { %v1983_v32 = vmul.f32 %v5484_v8, %v4275_v4 }
 0x589   : > { %v5486_v33 = vpop.permute.xlu2 %1965 }
 0x591   : > { %v5488_v50 = vpop.permute.xlu2 %1971 }
 0x599   : > { %v1994_v34 = vpop.permute.xlu2 %1993 }
 0x59a   : > { %v2016_v30 = vmul.f32 %v1994_v34, %v4344_v59  ;;  %v5491_v15 = vpop.permute.xlu0 %1929 }
 0x59b   : > { %6464 = vst [vmem:[#allocation39_spill] sm:$0xff] %v5491_v15 }
 0x59c   : > { %2033 = vrot.lane.b32.xlu0 %v2016_v30, %s3599_s14 }
 0x59d   : > { %v5494_v52 = vpop.permute.xlu1 %1927 }
 0x59e   : > { %6465 = vst [vmem:[#allocation22_spill] sm:$0xff] %v5494_v52 }
 0x5a1   : > { %v2000_v13 = vpop.permute.xlu2 %1999 }
 0x5a2   : > { %v2019_v16 = vmul.f32 %v2000_v13, %v4295_v56  ;;  %v5497_v19 = vpop.permute.xlu0 %1935 }
 0x5a3   : > { %6466 = vst [vmem:[#allocation37_spill] sm:$0xff] %v5497_v19 }
 0x5a4   : > { %2039 = vrot.lane.b32.xlu0 %v2019_v16, %s3599_s14 }
 0x5a5   : > { %v5500_v37 = vpop.permute.xlu1 %1933 }
 0x5a6   : > { %6467 = vst [vmem:[#allocation6_spill] sm:$0xff] %v5500_v37 }
 0x5a9   : > { %v2006_v38 = vpop.permute.xlu2 %2005 }
 0x5aa   : > { %v2022_v9 = vmul.f32 %v2006_v38, %v4403_v62  ;;  %v5503_v28 = vpop.permute.xlu0 %1941 }
 0x5ab   : > { %6468 = vst [vmem:[#allocation38_spill] sm:$0xff] %v5503_v28 }
 0x5ac   : > { %2045 = vrot.lane.b32.xlu0 %v2022_v9, %s3599_s14 }
 0x5ad   : > { %v5506_v34 = vpop.permute.xlu1 %1939 }
 0x5ae   : > { %6469 = vst [vmem:[#allocation40_spill] sm:$0xff] %v5506_v34 }
 0x5b2   : > { %v5508_v30 = vpop.permute.xlu0 %1963 }
 0x5b3   : > { %v1985_v8 = vmul.f32 %v5508_v30, %v4357_v25 }
 0x5b4   : > { %2067 = vrot.lane.b32.xlu0 %v4736_v36, %s3612_s12 }
 0x5b5   : > { %v1962_v13 = vpop.permute.xlu1 %1961 }
 0x5b6   : > { %v1984_v49 = vmul.f32 %v1962_v13, %v4344_v59 }
 0x5ba   : > { %v1970_v15 = vpop.permute.xlu0 %1969 }
 0x5bb   : > { %v1988_v35 = vmul.f32 %v1970_v15, %v4310_v1 }
 0x5bc   : > { %2073 = vrot.lane.b32.xlu0 %v4747_v6, %s3612_s12 }
 0x5bd   : > { %v1968_v16 = vpop.permute.xlu1 %1967 }
 0x5be   : > { %v1987_v27 = vmul.f32 %v1968_v16, %v4295_v56 }
 0x5c2   : > { %v1992_v52 = vpop.permute.xlu0 %1991 }
 0x5c3   : > { %v2015_v38 = vmul.f32 %v1992_v52, %v4275_v4 }
 0x5c4   : > { %2095 = vrot.lane.b32.xlu0 %v5441_v61, %s3613_s22 }
 0x5c5   : > { %v1974_v9 = vpop.permute.xlu1 %1973  ;;  %2031 = vrot.lane.b32.xlu1 %v2015_v38, %s3599_s14 }
 0x5ca   : > { %v1998_v28 = vpop.permute.xlu0 %1997 }
 0x5cb   : > { %v2018_v34 = vmul.f32 %v1998_v28, %v4401_v58 }
 0x5cc   : > { %2101 = vrot.lane.b32.xlu0 %v5455_v47, %s3613_s22 }
 0x5cd   : > { %v1996_v36 = vpop.permute.xlu1 %1995  ;;  %2037 = vrot.lane.b32.xlu1 %v2018_v34, %s3599_s14  ;;  %v5535_v34 = vld [vmem:[%s6254_s3] sm:$0xff] }
 0x5ce   : > { %v2017_v6 = vmul.f32 %v1996_v36, %v4357_v25 }
 0x5d0   : > { %2035 = vrot.lane.b32.xlu2 %v2017_v6, %s3599_s14 }
 0x5d2   : > { %v2004_v52 = vpop.permute.xlu0 %2003 }
 0x5d3   : > { %v2021_v19 = vmul.f32 %v2004_v52, %v4362_v14 }
 0x5d4   : > { %2107 = vrot.lane.b32.xlu0 %v5469_v44, %s3613_s22 }
 0x5d5   : > { %v2002_v38 = vpop.permute.xlu1 %2001  ;;  %2043 = vrot.lane.b32.xlu1 %v2021_v19, %s3599_s14  ;;  %v5544_v19 = vld [vmem:[%s6254_s3 + $0x18] sm:$0xff] }
 0x5d6   : > { %v2020_v28 = vmul.f32 %v2002_v38, %v4310_v1 }
 0x5d8   : > { %2041 = vrot.lane.b32.xlu2 %v2020_v28, %s3599_s14 }
 0x5dd   : > { %2065 = vrot.lane.b32.xlu1 %v5411_v21, %s3612_s12 }
 0x5e0   : > { %2063 = vrot.lane.b32.xlu2 %v5535_v34, %s3612_s12 }
 0x5e5   : > { %2071 = vrot.lane.b32.xlu1 %v5427_v43, %s3612_s12 }
 0x5e8   : > { %2069 = vrot.lane.b32.xlu2 %v5544_v19, %s3612_s12 }
 0x5ed   : > { %2077 = vrot.lane.b32.xlu1 %v5448_v7, %s3612_s12 }
 0x5f0   : > { %2075 = vrot.lane.b32.xlu2 %v5392_v3, %s3612_s12 }
 0x5f5   : > { %2099 = vrot.lane.b32.xlu1 %v5462_v22, %s3613_s22 }
 0x5f8   : > { %2097 = vrot.lane.b32.xlu2 %v5402_v55, %s3613_s22 }
 0x5fd   : > { %2105 = vrot.lane.b32.xlu1 %v5476_v5, %s3613_s22 }
 0x600   : > { %2103 = vrot.lane.b32.xlu2 %v5418_v48, %s3613_s22 }
 0x608   : > { %2109 = vrot.lane.b32.xlu2 %v5434_v23, %s3613_s22 }
 0x60e   : > { %v2034_v36 = vpop.permute.xlu0 %2033 }
 0x60f   : > { %v5578_v15 = vadd.f32 %v2034_v36, %v1984_v49  ;;  %v1990_v36 = vmul.f32 %v1974_v9, %v4403_v62 }
 0x611   : > { %6472 = vst [vmem:[#allocation18_spill] sm:$0xff] %v5578_v15 }
 0x616   : > { %v2040_v6 = vpop.permute.xlu0 %2039 }
 0x617   : > { %v5568_v20 = vadd.f32 %v2040_v6, %v1987_v27  ;;  %v1986_v27 = vmul.f32 %v5486_v33, %v4401_v58  ;;  %v1989_v33 = vmul.f32 %v5488_v50, %v4362_v14 }
 0x619   : > { %6470 = vst [vmem:[#allocation31_spill] sm:$0xff] %v5568_v20 }
 0x61e   : > { %v2046_v52 = vpop.permute.xlu0 %2045 }
 0x626   : > { %v5562_v38 = vpop.permute.xlu0 %2067 }
 0x62a   : > { %v2036_v28 = vpop.permute.xlu2 %2035 }
 0x62b   : > { %v5590_v49 = vadd.f32 %v2036_v28, %v1985_v8 }
 0x62d   : > { %6474 = vst [vmem:[#allocation32_spill] sm:$0xff] %v5590_v49  ;;  %v2089_v49 = vmul.f32 %v5562_v38, %v4357_v25 }
 0x62e   : > { %v5564_v57 = vpop.permute.xlu0 %2073 }
 0x632   : > { %v2042_v60 = vpop.permute.xlu2 %2041 }
 0x633   : > { %v5570_v11 = vadd.f32 %v2042_v60, %v1988_v35 }
 0x635   : > { %6471 = vst [vmem:[#allocation13_spill] sm:$0xff] %v5570_v11 }
 0x636   : > { %v2096_v53 = vpop.permute.xlu0 %2095 }
 0x637   : > { %v2032_v37 = vpop.permute.xlu1 %2031  ;;  %v2119_v39 = vmul.f32 %v2096_v53, %v4275_v4 }
 0x638   : > { %v5580_v16 = vadd.f32 %v2032_v37, %v1983_v32 }
 0x639   : > { %2135 = vrot.lane.b32.xlu1 %v2119_v39, %s3605_s27 }
 0x63a   : > { %6473 = vst [vmem:[#allocation24_spill] sm:$0xff] %v5580_v16  ;;  %v2064_v35 = vpop.permute.xlu2 %2063 }
 0x63e   : > { %v2102_v13 = vpop.permute.xlu0 %2101 }
 0x63f   : > { %v2038_v6 = vpop.permute.xlu1 %2037  ;;  %v2122_v53 = vmul.f32 %v2102_v13, %v4401_v58  ;;  %v5601_v13 = vadd.f32 %v2046_v52, %v1990_v36 }
 0x640   : > { %v5592_v32 = vadd.f32 %v2038_v6, %v1986_v27 }
 0x641   : > { %2141 = vrot.lane.b32.xlu1 %v2122_v53, %s3605_s27  ;;  %6476 = vst [vmem:[#allocation41_spill] sm:$0xff] %v5601_v13 }
 0x642   : > { %6475 = vst [vmem:[#allocation51_spill] sm:$0xff] %v5592_v32  ;;  %v2070_v37 = vpop.permute.xlu2 %2069 }
 0x646   : > { %v2108_v30 = vpop.permute.xlu0 %2107 }
 0x647   : > { %v2044_v40 = vpop.permute.xlu1 %2043  ;;  %v2125_v60 = vmul.f32 %v2108_v30, %v4362_v14 }
 0x648   : > { %v5603_v28 = vadd.f32 %v2044_v40, %v1989_v33 }
 0x649   : > { %2147 = vrot.lane.b32.xlu1 %v2125_v60, %s3605_s27 }
 0x64a   : > { %6477 = vst [vmem:[#allocation48_spill] sm:$0xff] %v5603_v28  ;;  %v2076_v8 = vpop.permute.xlu2 %2075 }
 0x64b   : > { %v2093_v27 = vmul.f32 %v2076_v8, %v4362_v14  ;;  %v2092_v8 = vmul.f32 %v5564_v57, %v4310_v1 }
 0x64f   : > { %v2066_v6 = vpop.permute.xlu1 %2065 }
 0x650   : > { %v2088_v16 = vmul.f32 %v2066_v6, %v4344_v59 }
 0x651   : > { %2169 = vrot.lane.b32.xlu1 %v5411_v21, %s3613_s22 }
 0x652   : > { %v2098_v50 = vpop.permute.xlu2 %2097 }
 0x653   : > { %v2120_v9 = vmul.f32 %v2098_v50, %v4344_v59 }
 0x655   : > { %2137 = vrot.lane.b32.xlu0 %v2120_v9, %s3605_s27  ;;  %v5627_v9 = vld [vmem:[%s6254_s3 + $0x10] sm:$0xff] }
 0x657   : > { %v2072_v53 = vpop.permute.xlu1 %2071 }
 0x658   : > { %v2091_v38 = vmul.f32 %v2072_v53, %v4295_v56 }
 0x659   : > { %2175 = vrot.lane.b32.xlu1 %v5427_v43, %s3613_s22 }
 0x65a   : > { %v2104_v40 = vpop.permute.xlu2 %2103 }
 0x65b   : > { %v2123_v52 = vmul.f32 %v2104_v40, %v4295_v56 }
 0x65d   : > { %2143 = vrot.lane.b32.xlu0 %v2123_v52, %s3605_s27 }
 0x65f   : > { %v2078_v60 = vpop.permute.xlu1 %2077 }
 0x661   : > { %2181 = vrot.lane.b32.xlu1 %v5448_v7, %s3613_s22 }
 0x662   : > { %v2110_v33 = vpop.permute.xlu2 %2109 }
 0x663   : > { %v2126_v36 = vmul.f32 %v2110_v33, %v4403_v62  ;;  %v5638_v33 = vld [vmem:[%s6254_s3 + $0x28] sm:$0xff] }
 0x665   : > { %2149 = vrot.lane.b32.xlu0 %v2126_v36, %s3605_s27  ;;  %v2087_v36 = vmul.f32 %v2064_v35, %v4275_v4 }
 0x667   : > { %v2100_v30 = vpop.permute.xlu1 %2099 }
 0x668   : > { %v2121_v50 = vmul.f32 %v2100_v30, %v4357_v25 }
 0x669   : > { %2203 = vrot.lane.b32.xlu1 %v5462_v22, %s3612_s12 }
 0x66a   : > { %2139 = vrot.lane.b32.xlu2 %v2121_v50, %s3605_s27 }
 0x66d   : > { %2171 = vrot.lane.b32.xlu0 %v5627_v9, %s3613_s22 }
 0x66f   : > { %v2106_v40 = vpop.permute.xlu1 %2105 }
 0x670   : > { %v2124_v52 = vmul.f32 %v2106_v40, %v4310_v1  ;;  %v2090_v40 = vmul.f32 %v2070_v37, %v4401_v58 }
 0x671   : > { %2209 = vrot.lane.b32.xlu1 %v5476_v5, %s3612_s12 }
 0x672   : > { %2145 = vrot.lane.b32.xlu2 %v2124_v52, %s3605_s27 }
 0x675   : > { %2177 = vrot.lane.b32.xlu0 %v5638_v33, %s3613_s22 }
 0x67a   : > { %2167 = vrot.lane.b32.xlu2 %v5535_v34, %s3613_s22 }
 0x67d   : > { %2199 = vrot.lane.b32.xlu0 %v5441_v61, %s3612_s12 }
 0x682   : > { %2173 = vrot.lane.b32.xlu2 %v5544_v19, %s3613_s22 }
 0x685   : > { %2205 = vrot.lane.b32.xlu0 %v5455_v47, %s3612_s12 }
 0x68a   : > { %2179 = vrot.lane.b32.xlu2 %v5392_v3, %s3613_s22 }
 0x68d   : > { %2211 = vrot.lane.b32.xlu0 %v5469_v44, %s3612_s12 }
 0x692   : > { %2201 = vrot.lane.b32.xlu2 %v5402_v55, %s3612_s12 }
 0x69a   : > { %2207 = vrot.lane.b32.xlu2 %v5418_v48, %s3612_s12 }
 0x6a2   : > { %2213 = vrot.lane.b32.xlu2 %v5434_v23, %s3612_s12 }
 0x6ab   : > { %v2136_v30 = vpop.permute.xlu1 %2135 }
 0x6ac   : > { %v2159_v50 = vsub.f32 %v2087_v36, %v2136_v30 }
 0x6b3   : > { %v2142_v52 = vpop.permute.xlu1 %2141 }
 0x6b4   : > { %v2162_v39 = vsub.f32 %v2090_v40, %v2142_v52 }
 0x6bb   : > { %v2148_v20 = vpop.permute.xlu1 %2147 }
 0x6bc   : > { %v2165_v11 = vsub.f32 %v2093_v27, %v2148_v20 }
 0x6c3   : > { %v5665_v32 = vpop.permute.xlu1 %2169 }
 0x6c4   : > { %v2140_v28 = vpop.permute.xlu2 %2139 }
 0x6c5   : > { %v2161_v13 = vsub.f32 %v2089_v49, %v2140_v28 }
 0x6c7   : > { %v5668_v35 = vpack.i.bf16 %v2162_v39, %v2161_v13  ;;  %v2138_v36 = vpop.permute.xlu0 %2137 }
 0x6c8   : > { %v2160_v30 = vsub.f32 %v2088_v16, %v2138_v36  ;;  %v2094_v16 = vmul.f32 %v2078_v60, %v4403_v62 }
 0x6c9   : > { %6478 = vst [vmem:[#allocation58_spill] sm:$0xff] %v5668_v35 }
 0x6ca   : > { %v5670_v37 = vpack.i.bf16 %v2160_v30, %v2159_v50 }
 0x6cb   : > { %v5674_v40 = vpop.permute.xlu1 %2175 }
 0x6cc   : > { %6479 = vst [vmem:[#allocation42_spill] sm:$0xff] %v5670_v37  ;;  %v2146_v20 = vpop.permute.xlu2 %2145 }
 0x6cd   : > { %v2164_v27 = vsub.f32 %v2092_v8, %v2146_v20 }
 0x6cf   : > { %v2144_v52 = vpop.permute.xlu0 %2143 }
 0x6d0   : > { %v2163_v15 = vsub.f32 %v2091_v38, %v2144_v52 }
 0x6d2   : > { %v5677_v49 = vpack.i.bf16 %v2164_v27, %v2163_v15 }
 0x6d3   : > { %v5679_v28 = vpop.permute.xlu1 %2181 }
 0x6d4   : > { %v5681_v39 = vpop.permute.xlu2 %2167 }
 0x6d7   : > { %v2150_v13 = vpop.permute.xlu0 %2149 }
 0x6d8   : > { %v2166_v6 = vsub.f32 %v2094_v16, %v2150_v13 }
 0x6da   : > { %v5684_v50 = vpack.i.bf16 %v2166_v6, %v2165_v11 }
 0x6db   : > { %v2204_v57 = vpop.permute.xlu1 %2203 }
 0x6dc   : > { %6480 = vst [vmem:[#allocation43_spill] sm:$0xff] %v5684_v50  ;;  %v5686_v36 = vpop.permute.xlu2 %2173  ;;  %v2225_v30 = vmul.f32 %v2204_v57, %v4357_v25 }
 0x6de   : > { %2243 = vrot.lane.b32.xlu2 %v2225_v30, %s3599_s14 }
 0x6df   : > { %v2172_v53 = vpop.permute.xlu0 %2171 }
 0x6e3   : > { %v2210_v15 = vpop.permute.xlu1 %2209 }
 0x6e4   : > { %v5690_v8 = vpop.permute.xlu2 %2179  ;;  %v2228_v20 = vmul.f32 %v2210_v15, %v4310_v1 }
 0x6e6   : > { %2249 = vrot.lane.b32.xlu2 %v2228_v20, %s3599_s14 }
 0x6e7   : > { %v2178_v60 = vpop.permute.xlu0 %2177 }
 0x6ec   : > { %v2202_v27 = vpop.permute.xlu2 %2201 }
 0x6ed   : > { %v2224_v11 = vmul.f32 %v2202_v27, %v4344_v59 }
 0x6ee   : > { %2271 = vrot.lane.b32.xlu2 %v5535_v34, %s3614_s17 }
 0x6ef   : > { %v2200_v38 = vpop.permute.xlu0 %2199  ;;  %2241 = vrot.lane.b32.xlu0 %v2224_v11, %s3599_s14  ;;  %v2193_v11 = vmul.f32 %v2172_v53, %v4357_v25 }
 0x6f0   : > { %v2223_v52 = vmul.f32 %v2200_v38, %v4275_v4 }
 0x6f2   : > { %2239 = vrot.lane.b32.xlu1 %v2223_v52, %s3599_s14 }
 0x6f4   : > { %v2208_v16 = vpop.permute.xlu2 %2207 }
 0x6f5   : > { %v2227_v13 = vmul.f32 %v2208_v16, %v4295_v56  ;;  %v2196_v16 = vmul.f32 %v2178_v60, %v4310_v1  ;;  %v2191_v60 = vmul.f32 %v5681_v39, %v4275_v4  ;;  %v2194_v39 = vmul.f32 %v5686_v36, %v4401_v58 }
 0x6f6   : > { %2277 = vrot.lane.b32.xlu2 %v5544_v19, %s3614_s17  ;;  %v2197_v36 = vmul.f32 %v5690_v8, %v4362_v14 }
 0x6f7   : > { %v2206_v6 = vpop.permute.xlu0 %2205  ;;  %2247 = vrot.lane.b32.xlu0 %v2227_v13, %s3599_s14 }
 0x6f8   : > { %v2226_v57 = vmul.f32 %v2206_v6, %v4401_v58 }
 0x6fa   : > { %2245 = vrot.lane.b32.xlu1 %v2226_v57, %s3599_s14 }
 0x6fc   : > { %v2214_v30 = vpop.permute.xlu2 %2213 }
 0x6fd   : > { %v2230_v15 = vmul.f32 %v2214_v30, %v4403_v62 }
 0x6fe   : > { %2283 = vrot.lane.b32.xlu2 %v5392_v3, %s3614_s17 }
 0x6ff   : > { %v2212_v20 = vpop.permute.xlu0 %2211  ;;  %2253 = vrot.lane.b32.xlu0 %v2230_v15, %s3599_s14 }
 0x700   : > { %v2229_v27 = vmul.f32 %v2212_v20, %v4362_v14  ;;  %v2192_v20 = vmul.f32 %v5665_v32, %v4344_v59  ;;  %v2195_v32 = vmul.f32 %v5674_v40, %v4295_v56 }
 0x702   : > { %2251 = vrot.lane.b32.xlu1 %v2229_v27, %s3599_s14 }
 0x706   : > { %2305 = vrot.lane.b32.xlu2 %v5402_v55, %s3615_s19 }
 0x707   : > { %2275 = vrot.lane.b32.xlu0 %v5627_v9, %s3614_s17 }
 0x70a   : > { %2273 = vrot.lane.b32.xlu1 %v5411_v21, %s3614_s17 }
 0x70e   : > { %2311 = vrot.lane.b32.xlu2 %v5418_v48, %s3615_s19 }
 0x70f   : > { %2281 = vrot.lane.b32.xlu0 %v5638_v33, %s3614_s17 }
 0x712   : > { %2279 = vrot.lane.b32.xlu1 %v5427_v43, %s3614_s17 }
 0x716   : > { %2317 = vrot.lane.b32.xlu2 %v5434_v23, %s3615_s19 }
 0x717   : > { %2303 = vrot.lane.b32.xlu0 %v5441_v61, %s3615_s19 }
 0x71a   : > { %2285 = vrot.lane.b32.xlu1 %v5448_v7, %s3614_s17 }
 0x71f   : > { %2309 = vrot.lane.b32.xlu0 %v5455_v47, %s3615_s19 }
 0x722   : > { %2307 = vrot.lane.b32.xlu1 %v5462_v22, %s3615_s19 }
 0x727   : > { %2315 = vrot.lane.b32.xlu0 %v5469_v44, %s3615_s19 }
 0x72a   : > { %2313 = vrot.lane.b32.xlu1 %v5476_v5, %s3615_s19 }
 0x738   : > { %v2244_v38 = vpop.permute.xlu2 %2243 }
 0x739   : > { %v5739_v52 = vadd.f32 %v2244_v38, %v2193_v11 }
 0x740   : > { %v2250_v13 = vpop.permute.xlu2 %2249 }
 0x741   : > { %v5742_v6 = vadd.f32 %v2250_v13, %v2196_v16 }
 0x748   : > { %v5744_v57 = vpop.permute.xlu2 %2271 }
 0x750   : > { %v5746_v30 = vpop.permute.xlu2 %2277 }
 0x758   : > { %v5748_v15 = vpop.permute.xlu2 %2283 }
 0x760   : > { %v2306_v27 = vpop.permute.xlu2 %2305 }
 0x761   : > { %v2328_v53 = vmul.f32 %v2306_v27, %v4344_v59  ;;  %v2242_v35 = vpop.permute.xlu0 %2241 }
 0x762   : > { %v5753_v11 = vadd.f32 %v2242_v35, %v2192_v20 }
 0x763   : > { %2345 = vrot.lane.b32.xlu0 %v2328_v53, %s3605_s27 }
 0x764   : > { %v2240_v38 = vpop.permute.xlu1 %2239 }
 0x765   : > { %v5758_v16 = vadd.f32 %v2240_v38, %v2191_v60 }
 0x768   : > { %v2312_v50 = vpop.permute.xlu2 %2311 }
 0x769   : > { %v2331_v27 = vmul.f32 %v2312_v50, %v4295_v56  ;;  %v2248_v37 = vpop.permute.xlu0 %2247  ;;  %v2198_v50 = vmul.f32 %v5679_v28, %v4403_v62 }
 0x76a   : > { %v5765_v35 = vadd.f32 %v2248_v37, %v2195_v32 }
 0x76b   : > { %2351 = vrot.lane.b32.xlu0 %v2331_v27, %s3605_s27 }
 0x76c   : > { %v2246_v53 = vpop.permute.xlu1 %2245 }
 0x76d   : > { %v5772_v60 = vadd.f32 %v2246_v53, %v2194_v39 }
 0x76f   : > { %v3409_v40 = vpack.i.bf16 %v5772_v60, %v5739_v52  ;;  %v6517_v52 = vld [vmem:[#allocation35_spill] sm:$0xff] }
 0x770   : > { %v2318_v38 = vpop.permute.xlu2 %2317  ;;  %v1885_v60 = vmul.f32 %v6517_v52, %v4362_v14 }
 0x771   : > { %v2334_v37 = vmul.f32 %v2318_v38, %v4403_v62  ;;  %v2254_v32 = vpop.permute.xlu0 %2253 }
 0x772   : > { %v5779_v13 = vadd.f32 %v2254_v32, %v2198_v50 }
 0x773   : > { %2357 = vrot.lane.b32.xlu0 %v2334_v37, %s3605_s27 }
 0x774   : > { %v2252_v27 = vpop.permute.xlu1 %2251 }
 0x775   : > { %v5784_v39 = vadd.f32 %v2252_v27, %v2197_v36 }
 0x779   : > { %v2276_v20 = vpop.permute.xlu0 %2275 }
 0x77b   : > { %2379 = vrot.lane.b32.xlu0 %v5627_v9, %s3615_s19 }
 0x77c   : > { %v2274_v28 = vpop.permute.xlu1 %2273 }
 0x781   : > { %v2282_v38 = vpop.permute.xlu0 %2281 }
 0x783   : > { %2385 = vrot.lane.b32.xlu0 %v5638_v33, %s3615_s19 }
 0x784   : > { %v2280_v50 = vpop.permute.xlu1 %2279 }
 0x789   : > { %v2304_v32 = vpop.permute.xlu0 %2303 }
 0x78a   : > { %v2327_v8 = vmul.f32 %v2304_v32, %v4275_v4 }
 0x78b   : > { %2407 = vrot.lane.b32.xlu0 %v5441_v61, %s3614_s17 }
 0x78c   : > { %v2286_v37 = vpop.permute.xlu1 %2285  ;;  %2343 = vrot.lane.b32.xlu1 %v2327_v8, %s3605_s27 }
 0x791   : > { %v2310_v36 = vpop.permute.xlu0 %2309 }
 0x792   : > { %v2330_v27 = vmul.f32 %v2310_v36, %v4401_v58 }
 0x793   : > { %2413 = vrot.lane.b32.xlu0 %v5455_v47, %s3614_s17 }
 0x794   : > { %v2308_v9 = vpop.permute.xlu1 %2307  ;;  %2349 = vrot.lane.b32.xlu1 %v2330_v27, %s3605_s27 }
 0x795   : > { %v2329_v33 = vmul.f32 %v2308_v9, %v4357_v25 }
 0x797   : > { %2347 = vrot.lane.b32.xlu2 %v2329_v33, %s3605_s27 }
 0x799   : > { %v2316_v32 = vpop.permute.xlu0 %2315 }
 0x79a   : > { %v2333_v53 = vmul.f32 %v2316_v32, %v4362_v14 }
 0x79b   : > { %2419 = vrot.lane.b32.xlu0 %v5469_v44, %s3614_s17  ;;  %v2302_v44 = vmul.f32 %v2286_v37, %v4403_v62 }
 0x79c   : > { %v2314_v61 = vpop.permute.xlu1 %2313  ;;  %2355 = vrot.lane.b32.xlu1 %v2333_v53, %s3605_s27 }
 0x79d   : > { %v2332_v8 = vmul.f32 %v2314_v61, %v4310_v1 }
 0x79f   : > { %2353 = vrot.lane.b32.xlu2 %v2332_v8, %s3605_s27 }
 0x7a4   : > { %2377 = vrot.lane.b32.xlu1 %v5411_v21, %s3615_s19  ;;  %v2296_v21 = vmul.f32 %v2274_v28, %v4344_v59 }
 0x7a7   : > { %2375 = vrot.lane.b32.xlu2 %v5535_v34, %s3615_s19 }
 0x7ac   : > { %2383 = vrot.lane.b32.xlu1 %v5427_v43, %s3615_s19 }
 0x7af   : > { %2381 = vrot.lane.b32.xlu2 %v5544_v19, %s3615_s19 }
 0x7b4   : > { %2389 = vrot.lane.b32.xlu1 %v5448_v7, %s3615_s19 }
 0x7b7   : > { %2387 = vrot.lane.b32.xlu2 %v5392_v3, %s3615_s19  ;;  %v2299_v3 = vmul.f32 %v2280_v50, %v4295_v56  ;;  %v2295_v50 = vmul.f32 %v5744_v57, %v4275_v4 }
 0x7bc   : > { %2411 = vrot.lane.b32.xlu1 %v5462_v22, %s3614_s17 }
 0x7bf   : > { %2409 = vrot.lane.b32.xlu2 %v5402_v55, %s3614_s17 }
 0x7c4   : > { %2417 = vrot.lane.b32.xlu1 %v5476_v5, %s3614_s17  ;;  %v2297_v5 = vmul.f32 %v2276_v20, %v4357_v25 }
 0x7c7   : > { %2415 = vrot.lane.b32.xlu2 %v5418_v48, %s3614_s17 }
 0x7cf   : > { %2421 = vrot.lane.b32.xlu2 %v5434_v23, %s3614_s17  ;;  %v2300_v23 = vmul.f32 %v2282_v38, %v4310_v1  ;;  %v2298_v38 = vmul.f32 %v5746_v30, %v4401_v58  ;;  %v1674_v30 = vmul.f32 %v4987_v45, %v4401_v58 }
 0x7d5   : > { %v2346_v43 = vpop.permute.xlu0 %2345 }
 0x7d6   : > { %v2368_v7 = vsub.f32 %v2296_v21, %v2346_v43 }
 0x7dd   : > { %v2352_v47 = vpop.permute.xlu0 %2351 }
 0x7de   : > { %v2371_v22 = vsub.f32 %v2299_v3, %v2352_v47 }
 0x7e5   : > { %v2358_v55 = vpop.permute.xlu0 %2357 }
 0x7e6   : > { %v2374_v34 = vsub.f32 %v2302_v44, %v2358_v55 }
 0x7ed   : > { %v5833_v19 = vpop.permute.xlu0 %2379 }
 0x7f1   : > { %v2348_v48 = vpop.permute.xlu2 %2347 }
 0x7f2   : > { %v2369_v53 = vsub.f32 %v2297_v5, %v2348_v48 }
 0x7f5   : > { %v5836_v36 = vpop.permute.xlu0 %2385 }
 0x7f9   : > { %v2354_v28 = vpop.permute.xlu2 %2353 }
 0x7fa   : > { %v2372_v27 = vsub.f32 %v2300_v23, %v2354_v28 }
 0x7fc   : > { %v5839_v9 = vpack.i.bf16 %v2372_v27, %v2371_v22  ;;  %v1746_v27 = vsub.f32 %v1674_v30, %v5280_v63 }
 0x7fd   : > { %v2408_v37 = vpop.permute.xlu0 %2407 }
 0x7fe   : > { %v2344_v33 = vpop.permute.xlu1 %2343  ;;  %v2431_v32 = vmul.f32 %v2408_v37, %v4275_v4 }
 0x7ff   : > { %v2367_v61 = vsub.f32 %v2295_v50, %v2344_v33  ;;  %v1776_v33 = vmul.f32 %v5292_v42, %v4344_v59  ;;  %v1782_v42 = vmul.f32 %v5304_v46, %v4403_v62 }
 0x800   : > { %2447 = vrot.lane.b32.xlu1 %v2431_v32, %s3599_s14 }
 0x801   : > { %v5845_v20 = vpack.i.bf16 %v2368_v7, %v2367_v61  ;;  %v5847_v8 = vpop.permute.xlu2 %2375  ;;  %v2301_v7 = vmul.f32 %v5748_v15, %v4362_v14  ;;  %v1848_v32 = vadd.f32 %v5350_v26, %v1776_v33  ;;  %v1854_v26 = vadd.f32 %v5362_v41, %v1782_v42 }
 0x805   : > { %v2414_v21 = vpop.permute.xlu0 %2413 }
 0x806   : > { %v2350_v43 = vpop.permute.xlu1 %2349  ;;  %v2434_v3 = vmul.f32 %v2414_v21, %v4401_v58 }
 0x807   : > { %v2370_v47 = vsub.f32 %v2298_v38, %v2350_v43 }
 0x808   : > { %2453 = vrot.lane.b32.xlu1 %v2434_v3, %s3599_s14 }
 0x809   : > { %v5853_v57 = vpack.i.bf16 %v2370_v47, %v2369_v53  ;;  %v5855_v22 = vpop.permute.xlu2 %2381  ;;  %v1673_v53 = vmul.f32 %v5206_v18, %v4357_v25 }
 0x80b   : > { %v1745_v15 = vsub.f32 %v1673_v53, %v5268_v31 }
 0x80d   : > { %v2420_v44 = vpop.permute.xlu0 %2419  ;;  %v3289_v50 = vpack.i.bf16 %v1746_v27, %v1745_v15  ;;  %v6483_v27 = vld [vmem:[#allocation27_spill] sm:$0xff] }
 0x80e   : > { %v2356_v55 = vpop.permute.xlu1 %2355  ;;  %v2437_v5 = vmul.f32 %v2420_v44, %v4362_v14  ;;  %v3334_v44 = vpack.i.bf16 %v4310_v1, %v4295_v56  ;;  %v1777_v15 = vmul.f32 %v6483_v27, %v4357_v25 }
 0x80f   : > { %v2373_v48 = vsub.f32 %v2301_v7, %v2356_v55  ;;  %v1676_v7 = vmul.f32 %v5214_v17, %v4310_v1 }
 0x810   : > { %2459 = vrot.lane.b32.xlu1 %v2437_v5, %s3599_s14 }
 0x811   : > { %v5863_v23 = vpack.i.bf16 %v2374_v34, %v2373_v48  ;;  %v5865_v28 = vpop.permute.xlu2 %2387  ;;  %v1775_v34 = vmul.f32 %v5278_v2, %v4275_v4  ;;  %v1781_v2 = vmul.f32 %v5290_v24, %v4362_v14  ;;  %v1675_v24 = vmul.f32 %v5218_v54, %v4295_v56  ;;  %v6481_v54 = vld [vmem:[#allocation7_spill] sm:$0xff] }
 0x812   : > { %v1882_v48 = vmul.f32 %v5364_v29, %v4401_v58  ;;  %v1881_v30 = vmul.f32 %v6481_v54, %v4357_v25 }
 0x813   : > { %v1847_v63 = vadd.f32 %v5340_v51, %v1775_v34  ;;  %v1853_v51 = vadd.f32 %v5344_v0, %v1781_v2  ;;  %v1748_v0 = vsub.f32 %v1676_v7, %v5272_v12  ;;  %v1747_v5 = vsub.f32 %v1675_v24, %v5262_v10  ;;  %v6482_v12 = vld [vmem:[#allocation6_spill] sm:$0xff]  ;;  %v6485_v10 = vld [vmem:[#allocation25_spill] sm:$0xff] }
 0x814   : > { %v1954_v53 = vsub.f32 %v1882_v48, %v6482_v12  ;;  %v1778_v29 = vmul.f32 %v6485_v10, %v4401_v58  ;;  %v3324_v48 = vpack.i.bf16 %v4344_v59, %v4275_v4 }
 0x815   : > { %v3304_v31 = vpack.i.bf16 %v1848_v32, %v1847_v63  ;;  %v3319_v43 = vpack.i.bf16 %v1854_v26, %v1853_v51  ;;  %v3294_v17 = vpack.i.bf16 %v1748_v0, %v1747_v5  ;;  %v6492_v0 = vld [vmem:[#allocation18_spill] sm:$0xff] }
 0x816   : > { %v5871_v37 = vpop.permute.xlu1 %2377 }
 0x818   : > { %3290 = vrot.lane.b32.xlu1 %v3289_v50, %s3608_s16  ;;  %v6484_v50 = vld [vmem:[#allocation15_spill] sm:$0xff] }
 0x819   : > { %v2410_v45 = vpop.permute.xlu2 %2409  ;;  %v1953_v33 = vsub.f32 %v1881_v30, %v6484_v50  ;;  %v6497_v30 = vld [vmem:[#allocation9_spill] sm:$0xff] }
 0x81a   : > { %v2432_v18 = vmul.f32 %v2410_v45, %v4344_v59  ;;  %v6486_v45 = vld [vmem:[#allocation11_spill] sm:$0xff]  ;;  %v6499_v50 = vld [vmem:[#allocation41_spill] sm:$0xff] }
 0x81b   : > { %v1849_v34 = vadd.f32 %v6486_v45, %v1777_v15  ;;  %v3349_v32 = vpack.i.bf16 %v1954_v53, %v1953_v33  ;;  %v6498_v53 = vld [vmem:[#allocation20_spill] sm:$0xff] }
 0x81c   : > { %2449 = vrot.lane.b32.xlu0 %v2432_v18, %s3599_s14  ;;  %v6500_v33 = vld [vmem:[#allocation48_spill] sm:$0xff] }
 0x81d   : > { %v6501_v10 = vpack.i.bf16 %v6499_v50, %v6500_v33  ;;  %v6519_v33 = vld [vmem:[#allocation40_spill] sm:$0xff] }
 0x81e   : > { %v5882_v61 = vpop.permute.xlu1 %2383 }
 0x820   : > { %3305 = vrot.lane.b32.xlu1 %v3304_v31, %s3608_s16  ;;  %v6487_v31 = vld [vmem:[#allocation19_spill] sm:$0xff] }
 0x821   : > { %v2416_v38 = vpop.permute.xlu2 %2415  ;;  %v1850_v42 = vadd.f32 %v6487_v31, %v1778_v29  ;;  %v6502_v29 = vld [vmem:[#allocation14_spill] sm:$0xff] }
 0x822   : > { %v2435_v21 = vmul.f32 %v2416_v38, %v4295_v56  ;;  %v6488_v38 = vld [vmem:[#allocation85_spill] sm:$0xff]  ;;  %v1779_v45 = vmul.f32 %v6502_v29, %v4295_v56  ;;  %v6520_v29 = vld [vmem:[#allocation42_spill] sm:$0xff] }
 0x823   : > { %v1671_v2 = vmul.f32 %v6488_v38, %v4275_v4  ;;  %v3309_v26 = vpack.i.bf16 %v1850_v42, %v1849_v34  ;;  %v3339_v34 = vpack.i.bf16 %v4403_v62, %v4362_v14  ;;  %v6505_v42 = vld [vmem:[#allocation28_spill] sm:$0xff] }
 0x824   : > { %2455 = vrot.lane.b32.xlu0 %v2435_v21, %s3599_s14  ;;  %v6489_v21 = vld [vmem:[#allocation26_spill] sm:$0xff]  ;;  %v1883_v38 = vmul.f32 %v6505_v42, %v4295_v56 }
 0x825   : > { %v1672_v51 = vmul.f32 %v6489_v21, %v4344_v59  ;;  %v6507_v21 = vld [vmem:[#allocation8_spill] sm:$0xff] }
 0x826   : > { %v5893_v3 = vpop.permute.xlu1 %2389 }
 0x828   : > { %3320 = vrot.lane.b32.xlu1 %v3319_v43, %s3608_s16  ;;  %v6490_v43 = vld [vmem:[#allocation5_spill] sm:$0xff] }
 0x829   : > { %v2422_v46 = vpop.permute.xlu2 %2421 }
 0x82a   : > { %v2438_v47 = vmul.f32 %v2422_v46, %v4403_v62  ;;  %v1743_v46 = vsub.f32 %v1671_v2, %v6490_v43  ;;  %v6506_v2 = vld [vmem:[#allocation36_spill] sm:$0xff]  ;;  %v6508_v43 = vld [vmem:[#allocation37_spill] sm:$0xff] }
 0x82c   : > { %2461 = vrot.lane.b32.xlu0 %v2438_v47, %s3599_s14  ;;  %v6491_v47 = vld [vmem:[#allocation16_spill] sm:$0xff] }
 0x82d   : > { %v1744_v7 = vsub.f32 %v1672_v51, %v6491_v47  ;;  %v1884_v51 = vmul.f32 %v6507_v21, %v4310_v1 }
 0x82e   : > { %v2412_v41 = vpop.permute.xlu1 %2411 }
 0x82f   : > { %v2433_v55 = vmul.f32 %v2412_v41, %v4357_v25  ;;  %v3284_v24 = vpack.i.bf16 %v1744_v7, %v1743_v46  ;;  %v6493_v41 = vld [vmem:[#allocation24_spill] sm:$0xff]  ;;  %v1955_v46 = vsub.f32 %v1883_v38, %v6508_v43  ;;  %v6509_v7 = vld [vmem:[#allocation29_spill] sm:$0xff]  ;;  %v6526_v38 = vpack.i.bf16 %v5742_v6, %v5765_v35 }
 0x830   : > { %3335 = vrot.lane.b32.xlu1 %v3334_v44, %s3608_s16  ;;  %v6494_v44 = vpack.i.bf16 %v6492_v0, %v6493_v41  ;;  %v3329_v41 = vpack.i.bf16 %v4401_v58, %v4357_v25  ;;  %v2401_v6 = vmul.f32 %v5833_v19, %v4357_v25  ;;  %v2402_v35 = vmul.f32 %v5855_v22, %v4401_v58 }
 0x831   : > { %2451 = vrot.lane.b32.xlu2 %v2433_v55, %s3599_s14  ;;  %v6495_v55 = vld [vmem:[#allocation34_spill] sm:$0xff]  ;;  %v2404_v19 = vmul.f32 %v5836_v36, %v4310_v1 }
 0x832   : > { %v1677_v5 = vmul.f32 %v6495_v55, %v4362_v14 }
 0x834   : > { %3295 = vrot.lane.b32.xlu0 %v3294_v17, %s3608_s16  ;;  %v6496_v17 = vld [vmem:[#allocation12_spill] sm:$0xff]  ;;  %v1749_v12 = vsub.f32 %v1677_v5, %v6497_v30 }
 0x835   : > { %v1678_v54 = vmul.f32 %v6496_v17, %v4403_v62  ;;  %v6514_v30 = vld [vmem:[#allocation32_spill] sm:$0xff] }
 0x836   : > { %v2418_v18 = vpop.permute.xlu1 %2417 }
 0x837   : > { %v2436_v63 = vmul.f32 %v2418_v18, %v4310_v1  ;;  %v1750_v27 = vsub.f32 %v1678_v54, %v6498_v53  ;;  %v6513_v54 = vld [vmem:[#allocation51_spill] sm:$0xff] }
 0x838   : > { %3350 = vrot.lane.b32.xlu1 %v3349_v32, %s3608_s16  ;;  %v6503_v32 = vld [vmem:[#allocation21_spill] sm:$0xff]  ;;  %v6516_v53 = vld [vmem:[#allocation39_spill] sm:$0xff] }
 0x839   : > { %2457 = vrot.lane.b32.xlu2 %v2436_v63, %s3599_s14  ;;  %v3299_v15 = vpack.i.bf16 %v1750_v27, %v1749_v12  ;;  %v1780_v18 = vmul.f32 %v6503_v32, %v4310_v1  ;;  %v6504_v63 = vld [vmem:[#allocation17_spill] sm:$0xff]  ;;  %v6515_v12 = vpack.i.bf16 %v6513_v54, %v6514_v30  ;;  %v2405_v1 = vmul.f32 %v5865_v28, %v4362_v14 }
 0x83a   : > { %v1851_v31 = vadd.f32 %v6504_v63, %v1779_v45  ;;  %v6521_v45 = vld [vmem:[#allocation38_spill] sm:$0xff]  ;;  %v6524_v63 = vld [vmem:[#allocation31_spill] sm:$0xff] }
 0x83c   : > { %3310 = vrot.lane.b32.xlu0 %v3309_v26, %s3608_s16  ;;  %v1852_v26 = vadd.f32 %v6506_v2, %v1780_v18  ;;  %v6523_v18 = vld [vmem:[#allocation13_spill] sm:$0xff]  ;;  %v6527_v2 = vld [vmem:[#allocation58_spill] sm:$0xff] }
 0x83e   : > { %v3314_v47 = vpack.i.bf16 %v1852_v26, %v1851_v31  ;;  %v6525_v31 = vpack.i.bf16 %v6523_v18, %v6524_v63  ;;  %v6528_v26 = vpack.i.bf16 %v5753_v11, %v5758_v16  ;;  %v2399_v11 = vmul.f32 %v5847_v8, %v4275_v4 }
 0x83f   : > { %v2400_v16 = vmul.f32 %v5871_v37, %v4344_v59 }
 0x840   : > { %3365 = vrot.lane.b32.xlu1 %v6494_v44, %s3608_s16  ;;  %v6510_v44 = vld [vmem:[#allocation23_spill] sm:$0xff] }
 0x841   : > { %3285 = vrot.lane.b32.xlu2 %v3284_v24, %s3608_s16  ;;  %v1956_v24 = vsub.f32 %v1884_v51, %v6509_v7  ;;  %v1879_v55 = vmul.f32 %v6510_v44, %v4275_v4  ;;  %v6529_v51 = vpack.i.bf16 %v5779_v13, %v5784_v39  ;;  %v2403_v4 = vmul.f32 %v5882_v61, %v4295_v56 }
 0x842   : > { %v2406_v56 = vmul.f32 %v5893_v3, %v4403_v62 }
 0x843   : > { %v3354_v0 = vpack.i.bf16 %v1956_v24, %v1955_v46 }
 0x844   : > { %3325 = vrot.lane.b32.xlu0 %v3324_v48, %s3608_s16  ;;  %v6512_v48 = vld [vmem:[#allocation22_spill] sm:$0xff] }
 0x845   : > { %v1951_v17 = vsub.f32 %v1879_v55, %v6512_v48 }
 0x848   : > { %3380 = vrot.lane.b32.xlu1 %v6501_v10, %s3608_s16  ;;  %v1957_v10 = vsub.f32 %v1885_v60, %v6519_v33 }
 0x849   : > { %3300 = vrot.lane.b32.xlu2 %v3299_v15, %s3608_s16 }
 0x84c   : > { %3340 = vrot.lane.b32.xlu0 %v3339_v34, %s3608_s16 }
 0x850   : > { %3395 = vrot.lane.b32.xlu1 %v5677_v49, %s3608_s16  ;;  %v6511_v49 = vld [vmem:[#allocation10_spill] sm:$0xff] }
 0x851   : > { %3315 = vrot.lane.b32.xlu2 %v3314_v47, %s3608_s16  ;;  %v1880_v5 = vmul.f32 %v6511_v49, %v4344_v59 }
 0x853   : > { %v1952_v27 = vsub.f32 %v1880_v5, %v6516_v53 }
 0x854   : > { %3355 = vrot.lane.b32.xlu0 %v3354_v0, %s3608_s16 }
 0x855   : > { %v3344_v15 = vpack.i.bf16 %v1952_v27, %v1951_v17 }
 0x858   : > { %3410 = vrot.lane.b32.xlu1 %v3409_v40, %s3608_s16  ;;  %v6518_v40 = vld [vmem:[#allocation30_spill] sm:$0xff] }
 0x859   : > { %3330 = vrot.lane.b32.xlu2 %v3329_v41, %s3608_s16  ;;  %v1886_v50 = vmul.f32 %v6518_v40, %v4403_v62 }
 0x85b   : > { %v1958_v34 = vsub.f32 %v1886_v50, %v6521_v45 }
 0x85c   : > { %3370 = vrot.lane.b32.xlu0 %v6515_v12, %s3608_s16 }
 0x85d   : > { %v3359_v32 = vpack.i.bf16 %v1958_v34, %v1957_v10 }
 0x860   : > { %3425 = vrot.lane.b32.xlu1 %v5845_v20, %s3608_s16  ;;  %v6522_v20 = vld [vmem:[#allocation43_spill] sm:$0xff] }
 0x861   : > { %3345 = vrot.lane.b32.xlu2 %v3344_v15, %s3608_s16 }
 0x864   : > { %3385 = vrot.lane.b32.xlu0 %v6520_v29, %s3608_s16 }
 0x868   : > { %3440 = vrot.lane.b32.xlu1 %v5863_v23, %s3608_s16 }
 0x869   : > { %3360 = vrot.lane.b32.xlu2 %v3359_v32, %s3608_s16 }
 0x86c   : > { %3400 = vrot.lane.b32.xlu0 %v6522_v20, %s3608_s16 }
 0x871   : > { %3375 = vrot.lane.b32.xlu2 %v6525_v31, %s3608_s16 }
 0x872   : > { %v2448_v42 = vpop.permute.xlu1 %2447 }
 0x873   : > { %v2471_v39 = vadd.f32 %v2448_v42, %v2399_v11 }
 0x874   : > { %3415 = vrot.lane.b32.xlu0 %v6526_v38, %s3608_s16 }
 0x879   : > { %3390 = vrot.lane.b32.xlu2 %v6527_v2, %s3608_s16 }
 0x87a   : > { %v2454_v23 = vpop.permute.xlu1 %2453 }
 0x87b   : > { %v2474_v46 = vadd.f32 %v2454_v23, %v2402_v35 }
 0x87c   : > { %3430 = vrot.lane.b32.xlu0 %v5853_v57, %s3608_s16 }
 0x881   : > { %3405 = vrot.lane.b32.xlu2 %v6528_v26, %s3608_s16 }
 0x882   : > { %v2460_v21 = vpop.permute.xlu1 %2459 }
 0x883   : > { %v2477_v17 = vadd.f32 %v2460_v21, %v2405_v1 }
 0x889   : > { %3420 = vrot.lane.b32.xlu2 %v6529_v51, %s3608_s16 }
 0x88a   : > { %v6027_v43 = vpop.permute.xlu1 %3290 }
 0x88b   : > { %v2452_v57 = vpop.permute.xlu2 %2451 }
 0x88c   : > { %v2473_v47 = vadd.f32 %v2452_v57, %v2401_v6 }
 0x88e   : > { %v3449_v7 = vpack.i.bf16 %v2474_v46, %v2473_v47  ;;  %v2450_v13 = vpop.permute.xlu0 %2449 }
 0x88f   : > { %v2472_v24 = vadd.f32 %v2450_v13, %v2400_v16 }
 0x891   : > { %v3444_v0 = vpack.i.bf16 %v2472_v24, %v2471_v39  ;;  %3435 = vrot.lane.b32.xlu2 %v5839_v9, %s3608_s16 }
 0x892   : > { %v3306_v25 = vpop.permute.xlu1 %3305 }
 0x893   : > { %3445 = vrot.lane.b32.xlu0 %v3444_v0, %s3608_s16  ;;  %v2458_v58 = vpop.permute.xlu2 %2457  ;;  %v3308_v44 = vunpack.i.h.bf16 %v3306_v25  ;;  %v3307_v55 = vunpack.i.l.bf16 %v3306_v25 }
 0x894   : > { %v2476_v59 = vadd.f32 %v2458_v58, %v2404_v19 }
 0x896   : > { %v2456_v8 = vpop.permute.xlu0 %2455 }
 0x897   : > { %v2475_v22 = vadd.f32 %v2456_v8, %v2403_v4 }
 0x899   : > { %v3454_v37 = vpack.i.bf16 %v2476_v59, %v2475_v22  ;;  %3450 = vrot.lane.b32.xlu2 %v3449_v7, %s3608_s16 }
 0x89a   : > { %v3321_v41 = vpop.permute.xlu1 %3320 }
 0x89b   : > { %3455 = vrot.lane.b32.xlu1 %v3454_v37, %s3608_s16  ;;  %v3286_v9 = vpop.permute.xlu2 %3285  ;;  %v3323_v53 = vunpack.i.h.bf16 %v3321_v41  ;;  %v3322_v27 = vunpack.i.l.bf16 %v3321_v41 }
 0x89c   : > { %v3288_v49 = vunpack.i.h.bf16 %v3286_v9  ;;  %v3287_v5 = vunpack.i.l.bf16 %v3286_v9 }
 0x89e   : > { %v2767_v36 = vsel %vm1531_vm11, %v3287_v5, %v3307_v55  ;;  %v2768_v61 = vsel %vm1531_vm11, %v3288_v49, %v3308_v44  ;;  %v2462_v48 = vpop.permute.xlu0 %2461 }
 0x89f   : > { %v2478_v54 = vadd.f32 %v2462_v48, %v2406_v56 }
 0x8a1   : > { %v3459_v30 = vpack.i.bf16 %v2478_v54, %v2477_v17 }
 0x8a2   : > { %v6049_v60 = vpop.permute.xlu1 %3335 }
 0x8a3   : > { %3460 = vrot.lane.b32.xlu0 %v3459_v30, %s3608_s16  ;;  %v3301_v12 = vpop.permute.xlu2 %3300  ;;  %s6159_s16 = scalar_lea.vmem %s6257_s6, %s4273_s10 }
 0x8a4   : > { %v3303_v15 = vunpack.i.h.bf16 %v3301_v12  ;;  %v3302_v52 = vunpack.i.l.bf16 %v3301_v12 }
 0x8a6   : > { %v2773_v14 = vsel %vm1531_vm11, %v3302_v52, %v3322_v27  ;;  %v2774_v62 = vsel %vm1531_vm11, %v3303_v15, %v3323_v53  ;;  %v3296_v28 = vpop.permute.xlu0 %3295 }
 0x8a7   : > { %v3298_v40 = vunpack.i.h.bf16 %v3296_v28  ;;  %v3297_v50 = vunpack.i.l.bf16 %v3296_v28 }
 0x8aa   : > { %v6059_v34 = vpop.permute.xlu1 %3350 }
 0x8ab   : > { %v3316_v3 = vpop.permute.xlu2 %3315 }
 0x8ac   : > { %v3318_v33 = vunpack.i.h.bf16 %v3316_v3  ;;  %v3317_v10 = vunpack.i.l.bf16 %v3316_v3 }
 0x8ae   : > { %v6054_v29 = vsel %vm1531_vm11, %v3297_v50, %v3317_v10  ;;  %v6057_v45 = vsel %vm1531_vm11, %v3298_v40, %v3318_v33  ;;  %v6061_v32 = vpop.permute.xlu0 %3310 }
 0x8af   : > { %v3313_v28 = vunpack.i.h.bf16 %v6061_v32  ;;  %v3312_v3 = vunpack.i.l.bf16 %v6061_v32 }
 0x8b2   : > { %v3366_v42 = vpop.permute.xlu1 %3365 }
 0x8b3   : > { %v3331_v20 = vpop.permute.xlu2 %3330  ;;  %v3368_v51 = vunpack.i.h.bf16 %v3366_v42  ;;  %v3367_v6 = vunpack.i.l.bf16 %v3366_v42  ;;  %v3292_v42 = vunpack.i.l.bf16 %v6027_v43 }
 0x8b4   : > { %v3333_v40 = vunpack.i.h.bf16 %v3331_v20  ;;  %v3332_v50 = vunpack.i.l.bf16 %v3331_v20 }
 0x8b6   : > { %v3326_v18 = vpop.permute.xlu0 %3325 }
 0x8b7   : > { %v6063_v63 = vunpack.i.h.bf16 %v3326_v18  ;;  %v6065_v31 = vunpack.i.l.bf16 %v3326_v18  ;;  %v3293_v18 = vunpack.i.h.bf16 %v6027_v43 }
 0x8b9   : > { %v2775_v38 = vsel %vm1540_vm12, %v2767_v36, %v6065_v31  ;;  %v2776_v2 = vsel %vm1540_vm12, %v2768_v61, %v6063_v63 }
 0x8ba   : > { %v3381_v25 = vpop.permute.xlu1 %3380 }
 0x8bb   : > { %v3346_v23 = vpop.permute.xlu2 %3345  ;;  %v3383_v8 = vunpack.i.h.bf16 %v3381_v25  ;;  %v3382_v59 = vunpack.i.l.bf16 %v3381_v25 }
 0x8bc   : > { %v3348_v26 = vunpack.i.h.bf16 %v3346_v23  ;;  %v3347_v21 = vunpack.i.l.bf16 %v3346_v23  ;;  %v2770_v23 = vsel %vm1531_vm11, %v3293_v18, %v3313_v28 }
 0x8bd   : > { %v2778_v32 = vsel %vm1540_vm12, %v2770_v23, %v3333_v40 }
 0x8be   : > { %v2783_v35 = vsel %vm1549_vm13, %v2775_v38, %v3347_v21  ;;  %v2784_v57 = vsel %vm1549_vm13, %v2776_v2, %v3348_v26  ;;  %v3341_v46 = vpop.permute.xlu0 %3340  ;;  %v2769_v26 = vsel %vm1531_vm11, %v3292_v42, %v3312_v3 }
 0x8bf   : > { %v2791_v47 = vsel %vm1558_vm14, %v2783_v35, %v3367_v6  ;;  %v2792_v11 = vsel %vm1558_vm14, %v2784_v57, %v3368_v51  ;;  %v6075_v16 = vunpack.i.h.bf16 %v3341_v46  ;;  %v6077_v7 = vunpack.i.l.bf16 %v3341_v46 }
 0x8c0   : > { %v2799_v13 = vsel %vm1567_vm15, %v2791_v47, %v6065_v31  ;;  %v2800_v39 = vsel %vm1567_vm15, %v2792_v11, %v6063_v63  ;;  %v2777_v6 = vsel %vm1540_vm12, %v2769_v26, %v3332_v50 }
 0x8c1   : > { %v2781_v24 = vsel %vm1540_vm12, %v2773_v14, %v6077_v7  ;;  %v2782_v0 = vsel %vm1540_vm12, %v2774_v62, %v6075_v16 }
 0x8c2   : > { %v6115_v38 = vpop.permute.xlu1 %3395 }
 0x8c3   : > { %v3361_v58 = vpop.permute.xlu2 %3360 }
 0x8c4   : > { %v3363_v19 = vunpack.i.h.bf16 %v3361_v58  ;;  %v3362_v4 = vunpack.i.l.bf16 %v3361_v58 }
 0x8c6   : > { %v2789_v22 = vsel %vm1549_vm13, %v2781_v24, %v3362_v4  ;;  %v2790_v37 = vsel %vm1549_vm13, %v2782_v0, %v3363_v19  ;;  %v6089_v41 = vpop.permute.xlu0 %3355 }
 0x8c7   : > { %v2797_v9 = vsel %vm1558_vm14, %v2789_v22, %v3382_v59  ;;  %v2798_v44 = vsel %vm1558_vm14, %v2790_v37, %v3383_v8  ;;  %v3358_v23 = vunpack.i.h.bf16 %v6089_v41  ;;  %v3357_v26 = vunpack.i.l.bf16 %v6089_v41 }
 0x8c8   : > { %v2805_v55 = vsel %vm1567_vm15, %v2797_v9, %v6077_v7  ;;  %v2806_v49 = vsel %vm1567_vm15, %v2798_v44, %v6075_v16 }
 0x8cb   : > { %v6097_v5 = vpop.permute.xlu2 %3375 }
 0x8ce   : > { %v3371_v1 = vpop.permute.xlu0 %3370 }
 0x8cf   : > { %v3373_v57 = vunpack.i.h.bf16 %v3371_v1  ;;  %v3372_v46 = vunpack.i.l.bf16 %v3371_v1 }
 0x8d3   : > { %v3391_v56 = vpop.permute.xlu2 %3390 }
 0x8d4   : > { %v3393_v8 = vunpack.i.h.bf16 %v3391_v56  ;;  %v3392_v59 = vunpack.i.l.bf16 %v3391_v56 }
 0x8d6   : > { %v3386_v36 = vpop.permute.xlu0 %3385 }
 0x8d7   : > { %v3388_v61 = vunpack.i.h.bf16 %v3386_v36  ;;  %v3387_v48 = vunpack.i.l.bf16 %v3386_v36 }
 0x8d9   : > { %v2807_v12 = vsel %vm1576_vm1, %v2799_v13, %v3387_v48  ;;  %v2808_v53 = vsel %vm1576_vm1, %v2800_v39, %v3388_v61  ;;  %v3353_v13 = vunpack.i.h.bf16 %v6059_v34  ;;  %v3352_v39 = vunpack.i.l.bf16 %v6059_v34  ;;  %v3411_v34 = vpop.permute.xlu1 %3410 }
 0x8da   : > { %v3413_v1 = vunpack.i.h.bf16 %v3411_v34  ;;  %v3412_v36 = vunpack.i.l.bf16 %v3411_v34 }
 0x8db   : > { %v3406_v17 = vpop.permute.xlu2 %3405  ;;  %v2785_v25 = vsel %vm1549_vm13, %v2777_v6, %v3352_v39  ;;  %v2786_v58 = vsel %vm1549_vm13, %v2778_v32, %v3353_v13  ;;  %v3378_v6 = vunpack.i.h.bf16 %v6097_v5 }
 0x8dc   : > { %v3408_v54 = vunpack.i.h.bf16 %v3406_v17  ;;  %v3407_v30 = vunpack.i.l.bf16 %v3406_v17  ;;  %v2793_v19 = vsel %vm1558_vm14, %v2785_v25, %v3372_v46  ;;  %v2794_v4 = vsel %vm1558_vm14, %v2786_v58, %v3373_v57 }
 0x8dd   : > { %v2801_v37 = vsel %vm1567_vm15, %v2793_v19, %v3332_v50  ;;  %v2802_v9 = vsel %vm1567_vm15, %v2794_v4, %v3333_v40  ;;  %v3398_v4 = vunpack.i.h.bf16 %v6115_v38 }
 0x8de   : > { %v2815_v27 = vsel %vm1585_vm2, %v2807_v12, %v3407_v30  ;;  %v2816_v15 = vsel %vm1585_vm2, %v2808_v53, %v3408_v54  ;;  %v3401_v52 = vpop.permute.xlu0 %3400  ;;  %v2809_v44 = vsel %vm1576_vm1, %v2801_v37, %v3392_v59 }
 0x8df   : > { %v6105_v14 = vsel %vm1594_vm3, %v2815_v27, %v6065_v31  ;;  %v6109_v62 = vsel %vm1594_vm3, %v2816_v15, %v6063_v63  ;;  %v3403_v33 = vunpack.i.h.bf16 %v3401_v52  ;;  %v3402_v10 = vunpack.i.l.bf16 %v3401_v52 }
 0x8e0   : > { %v2817_v61 = vsel %vm1585_vm2, %v2809_v44, %v3412_v36 }
 0x8e1   : > { %v2813_v20 = vsel %vm1576_vm1, %v2805_v55, %v3402_v10  ;;  %v2814_v35 = vsel %vm1576_vm1, %v2806_v49, %v3403_v33  ;;  %v2810_v55 = vsel %vm1576_vm1, %v2802_v9, %v3393_v8  ;;  %v2825_v30 = vsel %vm1594_vm3, %v2817_v61, %v3332_v50 }
 0x8e2   : > { %v2818_v48 = vsel %vm1585_vm2, %v2810_v55, %v3413_v1  ;;  %v3397_v8 = vunpack.i.l.bf16 %v6115_v38 }
 0x8e3   : > { %v3421_v2 = vpop.permute.xlu2 %3420  ;;  %v2826_v12 = vsel %vm1594_vm3, %v2818_v48, %v3333_v40 }
 0x8e4   : > { %v3423_v21 = vunpack.i.h.bf16 %v3421_v2  ;;  %v3422_v51 = vunpack.i.l.bf16 %v3421_v2  ;;  %v3426_v2 = vpop.permute.xlu1 %3425 }
 0x8e5   : > { %v3428_v46 = vunpack.i.h.bf16 %v3426_v2 }
 0x8e6   : > { %v2821_v43 = vsel %vm1585_vm2, %v2813_v20, %v3422_v51  ;;  %v2822_v47 = vsel %vm1585_vm2, %v2814_v35, %v3423_v21  ;;  %v6125_v11 = vpop.permute.xlu0 %3415  ;;  %v3338_v21 = vunpack.i.h.bf16 %v6049_v60  ;;  %v3337_v51 = vunpack.i.l.bf16 %v6049_v60 }
 0x8e7   : > { %v6131_v24 = vsel %vm1594_vm3, %v2821_v43, %v6077_v7  ;;  %v6135_v0 = vsel %vm1594_vm3, %v2822_v47, %v6075_v16  ;;  %v3427_v60 = vunpack.i.l.bf16 %v3426_v2  ;;  %v3417_v25 = vunpack.i.l.bf16 %v6125_v11 }
 0x8e8   : > { %v2780_v32 = vsel %vm1540_vm12, %v6057_v45, %v3338_v21  ;;  %v3418_v45 = vunpack.i.h.bf16 %v6125_v11  ;;  %v2832_v19 = vsel %vm1603_vm5, %v6109_v62, %v3428_v46 }
 0x8e9   : > { %v2788_v35 = vsel %vm1549_vm13, %v2780_v32, %v3358_v23  ;;  %v2831_v58 = vsel %vm1603_vm5, %v6105_v14, %v3427_v60 }
 0x8ea   : > { %v2796_v57 = vsel %vm1558_vm14, %v2788_v35, %v3378_v6 }
 0x8eb   : > { %v6141_v22 = vpop.permute.xlu2 %3435  ;;  %v2804_v13 = vsel %vm1567_vm15, %v2796_v57, %v3338_v21 }
 0x8ec   : > { %v3441_v43 = vpop.permute.xlu1 %3440  ;;  %v2812_v9 = vsel %vm1576_vm1, %v2804_v13, %v3398_v4  ;;  %v3437_v1 = vunpack.i.l.bf16 %v6141_v22 }
 0x8ed   : > { %v2820_v38 = vsel %vm1585_vm2, %v2812_v9, %v3418_v45 }
 0x8ee   : > { %v3431_v49 = vpop.permute.xlu0 %3430  ;;  %v2828_v36 = vsel %vm1594_vm3, %v2820_v38, %v3338_v21 }
 0x8ef   : > { %v3433_v56 = vunpack.i.h.bf16 %v3431_v49  ;;  %v3432_v17 = vunpack.i.l.bf16 %v3431_v49  ;;  %v3438_v49 = vunpack.i.h.bf16 %v6141_v22 }
 0x8f1   : > { %v2833_v15 = vsel %vm1603_vm5, %v2825_v30, %v3432_v17  ;;  %v2834_v52 = vsel %vm1603_vm5, %v2826_v12, %v3433_v56  ;;  %v2836_v17 = vsel %vm1603_vm5, %v2828_v36, %v3438_v49 }
 0x8f3   : > { %v3451_v54 = vpop.permute.xlu2 %3450 }
 0x8f4   : > { %v3453_v53 = vunpack.i.h.bf16 %v3451_v54  ;;  %v3452_v27 = vunpack.i.l.bf16 %v3451_v54 }
 0x8f6   : > { %v2841_v28 = vsel %vm1612_vm4, %v2833_v15, %v3452_v27  ;;  %v2842_v3 = vsel %vm1612_vm4, %v2834_v52, %v3453_v53  ;;  %v3443_v15 = vunpack.i.h.bf16 %v3441_v43  ;;  %v3442_v52 = vunpack.i.l.bf16 %v3441_v43 }
 0x8f7   : > { %v2849_v33 = vsel %vm1621_vm6, %v2841_v28, %v3332_v50  ;;  %v2850_v10 = vsel %vm1621_vm6, %v2842_v3, %v3333_v40  ;;  %v3377_v50 = vunpack.i.l.bf16 %v6097_v5  ;;  %v2779_v40 = vsel %vm1540_vm12, %v6054_v29, %v3337_v51 }
 0x8f8   : > { %v2857_v18 = vpack.c.bf16 %v2849_v33, %v2849_v33  ;;  %v2858_v42 = vpack.c.bf16 %v2850_v10, %v2850_v10  ;;  %v2787_v20 = vsel %vm1549_vm13, %v2779_v40, %v3357_v26  ;;  %v2837_v10 = vsel %vm1603_vm5, %v6131_v24, %v3442_v52 }
 0x8f9   : > { %v2795_v41 = vsel %vm1558_vm14, %v2787_v20, %v3377_v50 }
 0x8fa   : > { %2865 = vst.msk [vmem:[%s6159_s16 + $0x8] sm:$0xf] %vm1638_vm0, %v2857_v18  ;;  %v2803_v5 = vsel %vm1567_vm15, %v2795_v41, %v3337_v51  ;;  %v2838_v18 = vsel %vm1603_vm5, %v6135_v0, %v3443_v15 }
 0x8fb   : > { %2866 = vst.msk [vmem:[%s6159_s16 + $0xc] sm:$0xf] %vm1638_vm0, %v2858_v42  ;;  %v2811_v14 = vsel %vm1576_vm1, %v2803_v5, %v3397_v8 }
 0x8fc   : > { %v2819_v55 = vsel %vm1585_vm2, %v2811_v14, %v3417_v25 }
 0x905   : > { %v3446_v47 = vpop.permute.xlu0 %3445 }
 0x906   : > { %v3448_v29 = vunpack.i.h.bf16 %v3446_v47  ;;  %v3447_v39 = vunpack.i.l.bf16 %v3446_v47 }
 0x908   : > { %v2839_v59 = vsel %vm1612_vm4, %v2831_v58, %v3447_v39  ;;  %v2840_v34 = vsel %vm1612_vm4, %v2832_v19, %v3448_v29 }
 0x909   : > { %v2847_v37 = vsel %vm1621_vm6, %v2839_v59, %v6065_v31  ;;  %v2848_v11 = vsel %vm1621_vm6, %v2840_v34, %v6063_v63  ;;  %v2827_v31 = vsel %vm1594_vm3, %v2819_v55, %v3337_v51 }
 0x90a   : > { %v2855_v62 = vpack.c.bf16 %v2847_v37, %v2847_v37  ;;  %v2856_v44 = vpack.c.bf16 %v2848_v11, %v2848_v11  ;;  %v2835_v56 = vsel %vm1603_vm5, %v2827_v31, %v3437_v1 }
 0x90c   : > { %2863 = vst.msk [vmem:[%s6159_s16] sm:$0xf] %vm1638_vm0, %v2855_v62 }
 0x90d   : > { %2864 = vst.msk [vmem:[%s6159_s16 + $0x4] sm:$0xf] %vm1638_vm0, %v2856_v44  ;;  %v3456_v63 = vpop.permute.xlu1 %3455 }
 0x90e   : > { %v3458_v61 = vunpack.i.h.bf16 %v3456_v63  ;;  %v3457_v48 = vunpack.i.l.bf16 %v3456_v63 }
 0x910   : > { %v2843_v54 = vsel %vm1612_vm4, %v2835_v56, %v3457_v48  ;;  %v2844_v22 = vsel %vm1612_vm4, %v2836_v17, %v3458_v61 }
 0x911   : > { %v2851_v30 = vsel %vm1621_vm6, %v2843_v54, %v3337_v51  ;;  %v2852_v12 = vsel %vm1621_vm6, %v2844_v22, %v3338_v21 }
 0x912   : > { %v2859_v53 = vpack.c.bf16 %v2851_v30, %v2851_v30  ;;  %v2860_v27 = vpack.c.bf16 %v2852_v12, %v2852_v12 }
 0x914   : > { %2867 = vst.msk [vmem:[%s6159_s16 + $0x10] sm:$0xf] %vm1638_vm0, %v2859_v53 }
 0x915   : > { %2868 = vst.msk [vmem:[%s6159_s16 + $0x14] sm:$0xf] %vm1638_vm0, %v2860_v27  ;;  %v3461_v28 = vpop.permute.xlu0 %3460 }
 0x916   : > { %v3463_v3 = vunpack.i.h.bf16 %v3461_v28  ;;  %v3462_v33 = vunpack.i.l.bf16 %v3461_v28 }
 0x918   : > { %v2845_v42 = vsel %vm1612_vm4, %v2837_v10, %v3462_v33  ;;  %v2846_v2 = vsel %vm1612_vm4, %v2838_v18, %v3463_v3 }
 0x919   : > { %v2853_v23 = vsel %vm1621_vm6, %v2845_v42, %v6077_v7  ;;  %v2854_v26 = vsel %vm1621_vm6, %v2846_v2, %v6075_v16 }
 0x91a   : > { %v2861_v21 = vpack.c.bf16 %v2853_v23, %v2853_v23  ;;  %v2862_v51 = vpack.c.bf16 %v2854_v26, %v2854_v26 }
 0x91c   : > { %2869 = vst.msk [vmem:[%s6159_s16 + $0x18] sm:$0xf] %vm1638_vm0, %v2861_v21 }
 0x91d   : > { %2870 = vst.msk [vmem:[%s6159_s16 + $0x1c] sm:$0xf] %vm1638_vm0, %v2862_v51 }
 0x91e PF: > { %s21_s29 = sadd.s32 1, %s3595_s29   ;;  %s6530_s24 = smov %s3579_s25 }
 0x91f   : > { %p18_p0 = scmp.ge.s32.totalorder %s21_s29, 4   ;;  %s6531_s25 = smov %s3583_s26 }
 0x920   : > { %s6532_s26 = smov %s3705_s13  ;;  %s6533_s27 = smov %s3591_s28 }
 0x921   : > { %s6534_s28 = smov %s6536_s8  ;;  %20 = sbr.rel (!%p18_p0) target bundleno = 4 (0x4), region = 110 }
 0x926   :  { %2967 = vsyncpa [#allocation3], 1 }
 0x927   :  { %2969 = vsyncpa [#allocation3 + $0x1], 1 }

// kernel: block_forward.4
= control target key start
LH: loop header
LB: loop body
LE: loop exit
PB: predicated region body
PF: predicated region fallthrough
CT: control target
= control target key end

     0   :  { %10 = vsyncpa [#allocation6], 0  ;;  %s4921_s0 = inlined_call_operand.vmem [shape: bf16[2,64,64], index: 0, kind: input, shape index: {}]   ;;  %s4922_s1 = inlined_call_operand.vmem [shape: bf16[2,64,64], index: 1, kind: input, shape index: {}]   ;;  %s4923_s2 = inlined_call_operand.vmem [shape: bf16[2,64,64], index: 2, kind: input, shape index: {}]   ;;  %s4924_s3 = inlined_call_operand.vmem [shape: bf16[64,64], index: 3, kind: input, shape index: {}]   ;;  %s4925_s4 = inlined_call_operand.hbm [shape: bf16[2,64,64], index: 4, kind: input, shape index: {}]   ;;  %s4926_s5 = inlined_call_operand.vmem [shape: bf16[2,64,64], index: 5, kind: output, shape index: {}]  }
   0x1   :  { %12 = vsyncpa [#allocation6 + $0x1], 0  ;;  %s3437_s18 = smov 0   ;;  %s3439_s19 = smov 0  }
   0x2   :  { %s3441_s20 = smov 0   ;;  %s3443_s21 = smov 0  }
   0x3   :  { %s3445_s22 = smov 0   ;;  %s3447_s23 = smov 0  }
   0x4 LB: > { %s2890_s24 = sadd.s32 4294967295, %s3394_s23   ;;  %s37_s25 = sadd.s32 1, %s3390_s22  ;;  %s3394_s23 = sphi %s3447_s23, %s18_s23   ;;  %s3390_s22 = sphi %s3445_s22, %s4988_s22   ;;  %s3386_s21 = sphi %s3443_s21, %s4987_s21   ;;  %s3382_s20 = sphi %s3441_s20, %s4986_s20   ;;  %s3378_s19 = sphi %s3439_s19, %s4985_s19   ;;  %s3374_s18 = sphi %s3437_s18, %s4984_s18  }
   0x5   : > { %p39_p0 = scmp.ge.s32.totalorder %s37_s25, 2  ;;  %s151_s26 = sadd.s32 1, %s3382_s20 }
   0x6   : > { %p158_p1 = scmp.ne.s32.totalorder %s3382_s20, %s3378_s19  ;;  %p159_p2 = scmp.eq.s32.totalorder %s3394_s23, 0 }
   0x7   : > { %s4990_s25 = smov (%p39_p0, %s37_s25), 0  ;;  %p164_p4 = scmp.ne.s32.totalorder %s3378_s19, %s3374_s18 }
   0x8   : > { %p3473_p3 = por %p159_p2, %p158_p1  ;;  %s146_s28 = ssub.s32 %s3390_s22, %s4990_s25 }
   0x9   : > { %p165_p5 = scmp.eq.s32.totalorder %s2890_s24, 0  ;;  %p149_p6 = scmp.eq.s32.totalorder %s146_s28, 0 }
   0xa   : > { %p3059_p8 = scmp.lt.s32.totalorder %s3394_s23, 2  ;;  %s258_s6 = sand.u32 1, %s3382_s20  }
   0xb   : > { %p3480_p7 = por %p165_p5, %p164_p4  ;;  %s3009_s7 = sshll.u32 %s3390_s22, 5 }
   0xc   : > { %s3486_s30 = scalar_select %p149_p6, %s3382_s20, %s151_s26  }
   0xd   : > { %s2894_s8 = sshll.u32 %s258_s6, 5  ;;  %s269_s11 = scalar_lea.hbm %s4925_s4, %s3009_s7 }
   0xe   : > { %s270_s12 = sshll.u32 %s269_s11, 4  ;;  %s262_s13 = scalar_lea.vmem [#allocation5], %s2894_s8  ;;  %s271_s12 = int_to_ptr.hbm [resolvable:$true] %s270_s12 }
   0xf   : > { %s272_s14 = sshll.u32 %s262_s13, 4  ;;  %p3056_p9 = pnand %p3059_p8, %p3473_p3  ;;  %s273_s14 = int_to_ptr.vmem [resolvable:$true] %s272_s14 }
  0x10   : > { %p2897_p10 = scmp.ge.s32.totalorder %s3394_s23, 1  ;;  %p280_p11 = scmp.lt.s32.totalorder %s3394_s23, 3 }
  0x11   : > { %s259_s15 = scalar_lea.sflag [#allocation6], %s258_s6  ;;  %s3396_s16 = smov 64  }
  0x12   : > { %s3397_s17 = smov 4   ;;  %p281_p12 = pnand %p2897_p10, %p280_p11 }
  0x13   : > { %3058 = dma.hbm_to_vmem [thread:$0]  (!%p3056_p9), %s271_s12, 512, %s273_s14, %s259_s15, %s3396_s16, %s3396_s16, %s3397_s17  }
  0x14   : > { %284 = sbr.rel (%p281_p12) target bundleno = 1721 (0x6b9), region = 40 }
  0x19   : > { %s286_s18 = sand.u32 1, %s3378_s19  }
  0x1a   : > { %s2898_s24 = sshll.u32 %s286_s18, 5  ;;  %s287_s26 = scalar_lea.sflag [#allocation6], %s286_s18 }
  0x1b   : > { %s3498_s28 = scalar_lea.vmem [#allocation5], %s2898_s24 }
  0x1c   : > { %3369 = dma.done.wait (%p3480_p7), %s287_s26, 512  }
  0x1d   : > { %3371 = vsyncadd (%p3480_p7), %s287_s26, 4294966784  ;;  %p350_p13 = scmp.lt.s32.totalorder %s3386_s21, 1  ;;  %vm570_vm0 = vcmask 130048   ;;  %s3398_s29 = smov 112   ;;  %v500_v39 = vlaneseq  ;;  %vm462_vm2 = vcmask 523264   ;;  %vm397_vm5 = vcmask 7168  }
  0x1e   : > { %s3399_s14 = smov 96   ;;  %s3400_s15 = smov 80   ;;  %vm1415_vm11 = vcmask 261248   ;;  %vm1864_vm12 = vcmask 392448   ;;  %vm2313_vm13 = vcmask 523648   ;;  %vm2609_vm14 = vcmask 261120  }
  0x1f   : > { %s4992_s21 = smov (!%p350_p13, %s3386_s21), 1  ;;  %v3564_v40 = vshrl.u32 %v500_v39, 7  ;;  %v3566_v41 = vand.u32 127, %v500_v39  ;;  %v3403_v39 = vmov 0.0   ;;  %s3404_s16 = smov 48   ;;  %vm2618_vm15 = vcmask 392192  }
  0x20   : > { %s3506_s27 = sshll.u32 %s4992_s21, 5  ;;  %464 = vst.msk [vmem:[#allocation4 + $0x8] sm:$0xff] %vm462_vm2, %v3403_v39  ;;  %s3405_s17 = smov 16  }
  0x21   : > { %s357_s8 = scalar_lea.vmem %s4921_s0, %s3506_s27  ;;  %s367_s11 = scalar_lea.vmem %s4922_s1, %s3506_s27  ;;  %vm3574_vm1 = vcmp.le.s32.totalorder %v3566_v41, %v3564_v40  ;;  %v502_v51 = vadd.s32 8, %v3564_v40  ;;  %430 = vst.msk [vmem:[#allocation3] sm:$0xff] %vm397_vm5, %v3403_v39 }
  0x22   : > { %v3015_v0 = vld [vmem:[%s357_s8 + $0x8] sm:$0xff]  ;;  %v3021_v1 = vld [vmem:[%s367_s11 + $0x18] sm:$0xff]  ;;  %v3016_v2 = vld [vmem:[%s357_s8 + $0x10] sm:$0xff]  ;;  %s377_s13 = scalar_lea.vmem %s4923_s2, %s3506_s27  ;;  %431 = vst.msk [vmem:[#allocation3 + $0x8] sm:$0xff] %vm397_vm5, %v3403_v39  ;;  %s3406_s18 = smov 32  }
  0x23   : > { %v3014_v3 = vld [vmem:[%s357_s8] sm:$0xff]  ;;  %985 = vrot.lane.b32.xlu1 %v3015_v0, %s3398_s29  ;;  %v593_v4 = vsel %vm570_vm0, %v3021_v1, 0  ;;  %987 = vrot.lane.b32.xlu0 %v3016_v2, %s3398_s29  ;;  %v3020_v5 = vld [vmem:[%s367_s11 + $0x10] sm:$0xff]  ;;  %vm3589_vm3 = vcmp.le.s32.totalorder %v3566_v41, %v502_v51  ;;  %432 = vst.msk [vmem:[#allocation3 + $0x10] sm:$0xff] %vm397_vm5, %v3403_v39  ;;  %s4882_s12 = scalar_lea.vmem %s4926_s5, %s3506_s27 }
  0x24   : > { %599 = vmatpush.bf16.xpose.msra.mxu0 %v593_v4  ;;  %983 = vrot.lane.b32.xlu2 %v3014_v3, %s3398_s29  ;;  %v3018_v6 = vld [vmem:[%s367_s11] sm:$0xff]  ;;  %v590_v7 = vsel %vm570_vm0, %v3020_v5, 0  ;;  %v3017_v8 = vld [vmem:[%s357_s8 + $0x18] sm:$0xff]  ;;  %v3019_v9 = vld [vmem:[%s367_s11 + $0x8] sm:$0xff]  ;;  %433 = vst.msk [vmem:[#allocation3 + $0x18] sm:$0xff] %vm397_vm5, %v3403_v39 }
  0x25   : > { %v3025_v10 = vld [vmem:[%s377_s13 + $0x18] sm:$0xff]  ;;  %v3024_v11 = vld [vmem:[%s377_s13 + $0x10] sm:$0xff]  ;;  %v3023_v12 = vld [vmem:[%s377_s13 + $0x8] sm:$0xff]  ;;  %v587_v13 = vsel %vm570_vm0, %v3019_v9, 0  ;;  %v584_v15 = vsel %vm570_vm0, %v3018_v6, 0  ;;  %434 = vst.msk [vmem:[#allocation3 + $0x20] sm:$0xff] %vm397_vm5, %v3403_v39 }
  0x26   : > { %3049 = vmatpush.bf16.msra.mxu3 %v3025_v10  ;;  %934 = vmatpush.bf16.msra.mxu1 %v3025_v10  ;;  %v3022_v14 = vld [vmem:[%s377_s13] sm:$0xff]  ;;  %435 = vst.msk [vmem:[#allocation3 + $0x28] sm:$0xff] %vm397_vm5, %v3403_v39 }
  0x27   : > { %436 = vst.msk [vmem:[#allocation3 + $0x30] sm:$0xff] %vm397_vm5, %v3403_v39 }
  0x28   : > { %437 = vst.msk [vmem:[#allocation3 + $0x38] sm:$0xff] %vm397_vm5, %v3403_v39 }
  0x29   : > { %438 = vst.msk [vmem:[#allocation3 + $0x40] sm:$0xff] %vm397_vm5, %v3403_v39 }
  0x2a   : > { %3050 = vmatpush.bf16.msra.mxu3 %v3024_v11  ;;  %935 = vmatpush.bf16.msra.mxu1 %v3024_v11  ;;  %439 = vst.msk [vmem:[#allocation3 + $0x48] sm:$0xff] %vm397_vm5, %v3403_v39 }
  0x2b   : > { %991 = vrot.lane.b32.xlu1 %v3018_v6, %s3398_s29  ;;  %993 = vrot.lane.b32.xlu0 %v3019_v9, %s3398_s29  ;;  %440 = vst.msk [vmem:[#allocation3 + $0x50] sm:$0xff] %vm397_vm5, %v3403_v39 }
  0x2c   : > { %600 = vmatpush.bf16.xpose.msra.mxu0 %v590_v7  ;;  %989 = vrot.lane.b32.xlu2 %v3017_v8, %s3398_s29  ;;  %441 = vst.msk [vmem:[#allocation3 + $0x58] sm:$0xff] %vm397_vm5, %v3403_v39 }
  0x2d   : > { %442 = vst.msk [vmem:[#allocation3 + $0x60] sm:$0xff] %vm397_vm5, %v3403_v39 }
  0x2e   : > { %3051 = vmatpush.bf16.msra.mxu3 %v3023_v12  ;;  %936 = vmatpush.bf16.msra.mxu1 %v3023_v12  ;;  %443 = vst.msk [vmem:[#allocation3 + $0x68] sm:$0xff] %vm397_vm5, %v3403_v39 }
  0x2f   : > { %444 = vst.msk [vmem:[#allocation3 + $0x70] sm:$0xff] %vm397_vm5, %v3403_v39 }
  0x30   : > { %445 = vst.msk [vmem:[#allocation3 + $0x78] sm:$0xff] %vm397_vm5, %v3403_v39 }
  0x31   : > { %446 = vst.msk [vmem:[#allocation3 + $0x80] sm:$0xff] %vm397_vm5, %v3403_v39 }
  0x32   : > { %3052 = vmatpush.bf16.msra.mxu3 %v3022_v14  ;;  %937 = vmatpush.bf16.msra.mxu1 %v3022_v14  ;;  %447 = vst.msk [vmem:[#allocation3 + $0x88] sm:$0xff] %vm397_vm5, %v3403_v39 }
  0x33   : > { %997 = vrot.lane.b32.xlu1 %v3021_v1, %s3398_s29  ;;  %1324 = vrot.lane.b32.xlu0 %v3023_v12, %s3398_s29  ;;  %448 = vst.msk [vmem:[#allocation3 + $0x90] sm:$0xff] %vm397_vm5, %v3403_v39 }
  0x34   : > { %601 = vmatpush.bf16.xpose.msra.mxu0 %v587_v13  ;;  %995 = vrot.lane.b32.xlu2 %v3020_v5, %s3398_s29  ;;  %449 = vst.msk [vmem:[#allocation3 + $0x98] sm:$0xff] %vm397_vm5, %v3403_v39 }
  0x35   : > { %450 = vst.msk [vmem:[#allocation3 + $0xa0] sm:$0xff] %vm397_vm5, %v3403_v39 }
  0x36   : > { %451 = vst.msk [vmem:[#allocation3 + $0xa8] sm:$0xff] %vm397_vm5, %v3403_v39 }
  0x37   : > { %452 = vst.msk [vmem:[#allocation3 + $0xb0] sm:$0xff] %vm397_vm5, %v3403_v39 }
  0x38   : > { %453 = vst.msk [vmem:[#allocation3 + $0xb8] sm:$0xff] %vm397_vm5, %v3403_v39 }
  0x39   : > { %454 = vst.msk [vmem:[#allocation3 + $0xc0] sm:$0xff] %vm397_vm5, %v3403_v39 }
  0x3a   : > { %455 = vst.msk [vmem:[#allocation3 + $0xc8] sm:$0xff] %vm397_vm5, %v3403_v39 }
  0x3b   : > { %1326 = vrot.lane.b32.xlu1 %v3024_v11, %s3398_s29  ;;  %1442 = vrot.lane.b32.xlu0 %v3019_v9, %s3399_s14  ;;  %456 = vst.msk [vmem:[#allocation3 + $0xd0] sm:$0xff] %vm397_vm5, %v3403_v39 }
  0x3c   : > { %602 = vmatpush.bf16.xpose.msra.mxu0 %v584_v15  ;;  %1322 = vrot.lane.b32.xlu2 %v3022_v14, %s3398_s29  ;;  %457 = vst.msk [vmem:[#allocation3 + $0xd8] sm:$0xff] %vm397_vm5, %v3403_v39 }
  0x3d   : > { %458 = vst.msk [vmem:[#allocation3 + $0xe0] sm:$0xff] %vm397_vm5, %v3403_v39 }
  0x3e   : > { %459 = vst.msk [vmem:[#allocation3 + $0xe8] sm:$0xff] %vm397_vm5, %v3403_v39 }
  0x3f   : > { %460 = vst.msk [vmem:[#allocation3 + $0xf0] sm:$0xff] %vm397_vm5, %v3403_v39 }
  0x40   : > { %461 = vst.msk [vmem:[#allocation3 + $0xf8] sm:$0xff] %vm397_vm5, %v3403_v39 }
  0x41   : > { %463 = vst.msk [vmem:[#allocation4] sm:$0xff] %vm462_vm2, %v3403_v39 }
  0x42   : > { %465 = vst.msk [vmem:[#allocation4 + $0x10] sm:$0xff] %vm462_vm2, %v3403_v39 }
  0x43   : > { %1446 = vrot.lane.b32.xlu1 %v3021_v1, %s3399_s14  ;;  %2939 = vmatmul.msk.bf16.vlgmr.msra.gmra.mxu0 %vm570_vm0, %v3014_v3  ;;  %466 = vst.msk [vmem:[#allocation4 + $0x18] sm:$0xff] %vm462_vm2, %v3403_v39 }
  0x44   : > { %1440 = vrot.lane.b32.xlu0 %v3018_v6, %s3399_s14  ;;  %1328 = vrot.lane.b32.xlu2 %v3025_v10, %s3398_s29  ;;  %467 = vst.msk [vmem:[#allocation4 + $0x20] sm:$0xff] %vm462_vm2, %v3403_v39 }
  0x45   : > { %468 = vst.msk [vmem:[#allocation4 + $0x28] sm:$0xff] %vm462_vm2, %v3403_v39 }
  0x46   : > { %469 = vst.msk [vmem:[#allocation4 + $0x30] sm:$0xff] %vm462_vm2, %v3403_v39 }
  0x47   : > { %470 = vst.msk [vmem:[#allocation4 + $0x38] sm:$0xff] %vm462_vm2, %v3403_v39 }
  0x4b   : > { %1444 = vrot.lane.b32.xlu1 %v3020_v5, %s3399_s14 }
  0x4c   : > { %1432 = vrot.lane.b32.xlu0 %v3014_v3, %s3399_s14  ;;  %1895 = vrot.lane.b32.xlu2 %v3021_v1, %s3400_s15 }
  0x53   : > { %1891 = vrot.lane.b32.xlu1 %v3019_v9, %s3400_s15  ;;  %2940 = vmatmul.msk.bf16.gmra.mxu0 %vm570_vm0, %v3015_v0  ;;  %v504_v9 = vadd.s32 24, %v3564_v40 }
  0x54   : > { %1883 = vrot.lane.b32.xlu0 %v3015_v0, %s3400_s15  ;;  %1893 = vrot.lane.b32.xlu2 %v3020_v5, %s3400_s15 }
  0x55   : > { %vm3628_vm6 = vcmp.le.s32.totalorder %v3566_v41, %v504_v9 }
  0x5b   : > { %1889 = vrot.lane.b32.xlu1 %v3018_v6, %s3400_s15 }
  0x5c   : > { %1777 = vrot.lane.b32.xlu0 %v3025_v10, %s3399_s14  ;;  %1434 = vrot.lane.b32.xlu2 %v3015_v0, %s3399_s14 }
  0x63   : > { %1881 = vrot.lane.b32.xlu1 %v3014_v3, %s3400_s15  ;;  %2941 = vmatmul.msk.bf16.gmra.mxu0 %vm570_vm0, %v3016_v2  ;;  %v503_v3 = vadd.s32 16, %v3564_v40 }
  0x64   : > { %1771 = vrot.lane.b32.xlu0 %v3022_v14, %s3399_s14  ;;  %1438 = vrot.lane.b32.xlu2 %v3017_v8, %s3399_s14 }
  0x65   : > { %vm3608_vm4 = vcmp.le.s32.totalorder %v3566_v41, %v503_v3 }
  0x6b   : > { %1436 = vrot.lane.b32.xlu1 %v3016_v2, %s3399_s14 }
  0x6c   : > { %2224 = vrot.lane.b32.xlu0 %v3024_v11, %s3400_s15  ;;  %1885 = vrot.lane.b32.xlu2 %v3016_v2, %s3400_s15 }
  0x73   : > { %1775 = vrot.lane.b32.xlu1 %v3024_v11, %s3399_s14  ;;  %2942 = vmatmul.msk.bf16.gmra.mxu0 %vm570_vm0, %v3017_v8 }
  0x74   : > { %2222 = vrot.lane.b32.xlu0 %v3023_v12, %s3400_s15  ;;  %1887 = vrot.lane.b32.xlu2 %v3017_v8, %s3400_s15 }
  0x7b   : > { %2226 = vrot.lane.b32.xlu1 %v3025_v10, %s3400_s15  ;;  %v3401_v10 = vmov -1e+30  }
  0x7c   : > { %2220 = vrot.lane.b32.xlu0 %v3022_v14, %s3400_s15  ;;  %1773 = vrot.lane.b32.xlu2 %v3023_v12, %s3399_s14  ;;  %398 = vst.msk [vmem:[#allocation2] sm:$0xff] %vm397_vm5, %v3401_v10 }
  0x7d   : > { %399 = vst.msk [vmem:[#allocation2 + $0x8] sm:$0xff] %vm397_vm5, %v3401_v10 }
  0x7e   : > { %v984_v16 = vpop.permute.xlu2 %983  ;;  %400 = vst.msk [vmem:[#allocation2 + $0x10] sm:$0xff] %vm397_vm5, %v3401_v10 }
  0x7f   : > { %401 = vst.msk [vmem:[#allocation2 + $0x18] sm:$0xff] %vm397_vm5, %v3401_v10 }
  0x80   : > { %402 = vst.msk [vmem:[#allocation2 + $0x20] sm:$0xff] %vm397_vm5, %v3401_v10 }
  0x81   : > { %403 = vst.msk [vmem:[#allocation2 + $0x28] sm:$0xff] %vm397_vm5, %v3401_v10 }
  0x82   : > { %404 = vst.msk [vmem:[#allocation2 + $0x30] sm:$0xff] %vm397_vm5, %v3401_v10 }
  0x83   : > { %405 = vst.msk [vmem:[#allocation2 + $0x38] sm:$0xff] %vm397_vm5, %v3401_v10 }
  0x84   : > { %406 = vst.msk [vmem:[#allocation2 + $0x40] sm:$0xff] %vm397_vm5, %v3401_v10 }
  0x85   : > { %407 = vst.msk [vmem:[#allocation2 + $0x48] sm:$0xff] %vm397_vm5, %v3401_v10 }
  0x86   : > { %v3552_v17 = vpop.permute.xlu2 %989  ;;  %408 = vst.msk [vmem:[#allocation2 + $0x50] sm:$0xff] %vm397_vm5, %v3401_v10 }
  0x87   : > { %409 = vst.msk [vmem:[#allocation2 + $0x58] sm:$0xff] %vm397_vm5, %v3401_v10 }
  0x88   : > { %410 = vst.msk [vmem:[#allocation2 + $0x60] sm:$0xff] %vm397_vm5, %v3401_v10 }
  0x89   : > { %411 = vst.msk [vmem:[#allocation2 + $0x68] sm:$0xff] %vm397_vm5, %v3401_v10 }
  0x8a   : > { %412 = vst.msk [vmem:[#allocation2 + $0x70] sm:$0xff] %vm397_vm5, %v3401_v10 }
  0x8b   : > { %413 = vst.msk [vmem:[#allocation2 + $0x78] sm:$0xff] %vm397_vm5, %v3401_v10 }
  0x8c   : > { %414 = vst.msk [vmem:[#allocation2 + $0x80] sm:$0xff] %vm397_vm5, %v3401_v10 }
  0x8d   : > { %415 = vst.msk [vmem:[#allocation2 + $0x88] sm:$0xff] %vm397_vm5, %v3401_v10 }
  0x8e   : > { %v996_v18 = vpop.permute.xlu2 %995  ;;  %416 = vst.msk [vmem:[#allocation2 + $0x90] sm:$0xff] %vm397_vm5, %v3401_v10 }
  0x8f   : > { %v1018_v30 = vsel %vm570_vm0, %v996_v18, 0  ;;  %417 = vst.msk [vmem:[#allocation2 + $0x98] sm:$0xff] %vm397_vm5, %v3401_v10 }
  0x90   : > { %418 = vst.msk [vmem:[#allocation2 + $0xa0] sm:$0xff] %vm397_vm5, %v3401_v10 }
  0x91   : > { %419 = vst.msk [vmem:[#allocation2 + $0xa8] sm:$0xff] %vm397_vm5, %v3401_v10 }
  0x92   : > { %420 = vst.msk [vmem:[#allocation2 + $0xb0] sm:$0xff] %vm397_vm5, %v3401_v10 }
  0x93   : > { %421 = vst.msk [vmem:[#allocation2 + $0xb8] sm:$0xff] %vm397_vm5, %v3401_v10 }
  0x94   : > { %422 = vst.msk [vmem:[#allocation2 + $0xc0] sm:$0xff] %vm397_vm5, %v3401_v10 }
  0x95   : > { %v3554_v19 = vpop.permute.xlu1 %985  ;;  %v3556_v20 = vpop.permute.xlu0 %987  ;;  %423 = vst.msk [vmem:[#allocation2 + $0xc8] sm:$0xff] %vm397_vm5, %v3401_v10 }
  0x96   : > { %v1323_v21 = vpop.permute.xlu2 %1322  ;;  %424 = vst.msk [vmem:[#allocation2 + $0xd0] sm:$0xff] %vm397_vm5, %v3401_v10 }
  0x97   : > { %425 = vst.msk [vmem:[#allocation2 + $0xd8] sm:$0xff] %vm397_vm5, %v3401_v10 }
  0x98   : > { %426 = vst.msk [vmem:[#allocation2 + $0xe0] sm:$0xff] %vm397_vm5, %v3401_v10 }
  0x99   : > { %427 = vst.msk [vmem:[#allocation2 + $0xe8] sm:$0xff] %vm397_vm5, %v3401_v10 }
  0x9a   : > { %428 = vst.msk [vmem:[#allocation2 + $0xf0] sm:$0xff] %vm397_vm5, %v3401_v10 }
  0x9b   : > { %429 = vst.msk [vmem:[#allocation2 + $0xf8] sm:$0xff] %vm397_vm5, %v3401_v10  ;;  %v642_v10 = vld [vmem:[#allocation2 + $0x10] sm:$0xff] }
  0x9d   : > { %v992_v22 = vpop.permute.xlu1 %991  ;;  %v994_v23 = vpop.permute.xlu0 %993 }
  0x9e   : > { %v1329_v24 = vpop.permute.xlu2 %1328  ;;  %v1015_v35 = vsel %vm570_vm0, %v994_v23, 0  ;;  %v1012_v43 = vsel %vm570_vm0, %v992_v22, 0 }
  0x9f   : > { %1350 = vmatpush.bf16.msrb.mxu3 %v1329_v24 }
  0xa5   : > { %v998_v25 = vpop.permute.xlu1 %997  ;;  %v1325_v27 = vpop.permute.xlu0 %1324 }
  0xa6   : > { %v1021_v26 = vsel %vm570_vm0, %v998_v25, 0  ;;  %v1896_v28 = vpop.permute.xlu2 %1895 }
  0xa7   : > { %1027 = vmatpush.bf16.xpose.msra.mxu2 %v1021_v26  ;;  %v1919_v29 = vsel %vm570_vm0, %v1896_v28, 0  ;;  %v506_v28 = vadd.s32 40, %v3564_v40 }
  0xa8   : > { %1925 = vmatpush.bf16.xpose.msrb.mxu0 %v1919_v29 }
  0xa9   : > { %vm3693_vm8 = vcmp.le.s32.totalorder %v3566_v41, %v506_v28 }
  0xad   : > { %v1327_v31 = vpop.permute.xlu1 %1326  ;;  %v1443_v32 = vpop.permute.xlu0 %1442 }
  0xae   : > { %1351 = vmatpush.bf16.msrb.mxu3 %v1327_v31  ;;  %v1894_v33 = vpop.permute.xlu2 %1893  ;;  %v1464_v52 = vsel %vm570_vm0, %v1443_v32, 0 }
  0xaf   : > { %1028 = vmatpush.bf16.xpose.msra.mxu2 %v1018_v30  ;;  %v1916_v34 = vsel %vm570_vm0, %v1894_v33, 0 }
  0xb0   : > { %1926 = vmatpush.bf16.xpose.msrb.mxu0 %v1916_v34 }
  0xb2   : > { %1352 = vmatpush.bf16.msrb.mxu3 %v1325_v27 }
  0xb5   : > { %v1447_v36 = vpop.permute.xlu1 %1446 }
  0xb6   : > { %1353 = vmatpush.bf16.msrb.mxu3 %v1323_v21  ;;  %v1470_v37 = vsel %vm570_vm0, %v1447_v36, 0  ;;  %v1441_v38 = vpop.permute.xlu0 %1440  ;;  %v3634_v15 = vpop.permute.xlu2 %1434 }
  0xb7   : > { %1029 = vmatpush.bf16.xpose.msra.mxu2 %v1015_v35  ;;  %1476 = vmatpush.bf16.xpose.msrb.mxu1 %v1470_v37  ;;  %v1461_v61 = vsel %vm570_vm0, %v1441_v38, 0 }
  0xbd   : > { %v1445_v42 = vpop.permute.xlu1 %1444 }
  0xbe   : > { %v1467_v44 = vsel %vm570_vm0, %v1445_v42, 0  ;;  %v3570_v45 = vpop.permute.xlu0 %1432  ;;  %v3677_v26 = vpop.permute.xlu2 %1438 }
  0xbf   : > { %1030 = vmatpush.bf16.xpose.msra.mxu2 %v1012_v43  ;;  %1477 = vmatpush.bf16.xpose.msrb.mxu1 %v1467_v44  ;;  %v507_v43 = vadd.s32 48, %v3564_v40 }
  0xc0   : > { %v604_v46 = vpop.f32.mrf.mxu0 }
  0xc1   : > { %v624_v48 = vmul.f32 0.25, %v604_v46  ;;  %vm3747_vm9 = vcmp.le.s32.totalorder %v3566_v41, %v507_v43 }
  0xc3   : > { %v3580_v49 = vsel %vm3574_vm1, %v624_v48, -1e+30 }
  0xc4   : > { %v649_v50 = vsel %vm462_vm2, %v3580_v49, -inf }
  0xc5   : > { %v1892_v53 = vpop.permute.xlu1 %1891  ;;  %650 = vmax.xlane.f32.xlu0 %v649_v50 }
  0xc6   : > { %2963 = vmatmul.msk.bf16.vlgmr.msra.gmra.mxu2 %vm570_vm0, %v984_v16  ;;  %v1913_v54 = vsel %vm570_vm0, %v1892_v53, 0  ;;  %v1884_v55 = vpop.permute.xlu0 %1883  ;;  %v1886_v36 = vpop.permute.xlu2 %1885  ;;  %v508_v53 = vadd.s32 56, %v3564_v40 }
  0xc7   : > { %1927 = vmatpush.bf16.xpose.msrb.mxu0 %v1913_v54  ;;  %1478 = vmatpush.bf16.xpose.msrb.mxu1 %v1464_v52 }
  0xc8   : > { %v606_v56 = vpop.f32.mrf.mxu0  ;;  %vm3779_vm10 = vcmp.le.s32.totalorder %v3566_v41, %v508_v53 }
  0xc9   : > { %v625_v58 = vmul.f32 0.25, %v606_v56 }
  0xcb   : > { %v3595_v59 = vsel %vm3589_vm3, %v625_v58, -1e+30 }
  0xcc   : > { %v652_v60 = vsel %vm462_vm2, %v3595_v59, -inf }
  0xcd   : > { %v1890_v62 = vpop.permute.xlu1 %1889  ;;  %653 = vmax.xlane.f32.xlu0 %v652_v60  ;;  %v641_v60 = vld [vmem:[#allocation2 + $0x8] sm:$0xff] }
  0xce   : > { %v1910_v63 = vsel %vm570_vm0, %v1890_v62, 0  ;;  %v3601_v0 = vpop.permute.xlu0 %1777  ;;  %v1888_v38 = vpop.permute.xlu2 %1887 }
  0xcf   : > { %1928 = vmatpush.bf16.xpose.msrb.mxu0 %v1910_v63  ;;  %1479 = vmatpush.bf16.xpose.msrb.mxu1 %v1461_v61 }
  0xd0   : > { %v609_v2 = vpop.f32.mrf.mxu0 }
  0xd1   : > { %v626_v4 = vmul.f32 0.25, %v609_v2 }
  0xd3   : > { %v3614_v6 = vsel %vm3608_vm4, %v626_v4, -1e+30 }
  0xd4   : > { %v655_v8 = vsel %vm462_vm2, %v3614_v6, -inf }
  0xd5   : > { %v1882_v1 = vpop.permute.xlu1 %1881  ;;  %656 = vmax.xlane.f32.xlu1 %v655_v8 }
  0xd6   : > { %2964 = vmatmul.msk.bf16.gmra.mxu2 %vm570_vm0, %v3554_v19  ;;  %2979 = vmatmul.msk.bf16.vlgmr.msrb.gmra.mxu0 %vm570_vm0, %v1882_v1  ;;  %v3616_v7 = vpop.permute.xlu0 %1771  ;;  %v505_v19 = vadd.s32 32, %v3564_v40 }
  0xd8   : > { %v611_v12 = vpop.f32.mrf.mxu0  ;;  %vm3663_vm7 = vcmp.le.s32.totalorder %v3566_v41, %v505_v19  ;;  %v640_v41 = vld [vmem:[#allocation2] sm:$0xff] }
  0xd9   : > { %v627_v14 = vmul.f32 0.25, %v611_v12 }
  0xdb   : > { %v3642_v16 = vsel %vm3628_vm6, %v627_v14, -1e+30 }
  0xdc   : > { %v658_v18 = vsel %vm462_vm2, %v3642_v16, -inf }
  0xdd   : > { %v3623_v11 = vpop.permute.xlu1 %1436  ;;  %659 = vmax.xlane.f32.xlu1 %v658_v18 }
  0xde   : > { %v2225_v21 = vpop.permute.xlu0 %2224 }
  0xe0   : > { %v614_v23 = vpop.f32.mrf.mxu0 }
  0xe1   : > { %v628_v25 = vmul.f32 0.25, %v614_v23  ;;  %v3854_v23 = vpop.permute.xlu2 %1773 }
  0xe5   : > { %v3655_v22 = vpop.permute.xlu1 %1775 }
  0xe6   : > { %2965 = vmatmul.msk.bf16.gmra.mxu2 %vm570_vm0, %v3556_v20  ;;  %2980 = vmatmul.msk.bf16.gmra.mxu0 %vm570_vm0, %v1884_v55  ;;  %v3675_v20 = vsel %vm3663_vm7, %v628_v25, -1e+30  ;;  %v2223_v30 = vpop.permute.xlu0 %2222 }
  0xe7   : > { %v661_v27 = vsel %vm462_vm2, %v3675_v20, -inf }
  0xe8   : > { %662 = vmax.xlane.f32.xlu2 %v661_v27  ;;  %v616_v31 = vpop.f32.mrf.mxu0 }
  0xe9   : > { %v629_v33 = vmul.f32 0.25, %v616_v31 }
  0xeb   : > { %v3705_v34 = vsel %vm3693_vm8, %v629_v33, -1e+30 }
  0xec   : > { %v664_v35 = vsel %vm462_vm2, %v3705_v34, -inf }
  0xed   : > { %v2227_v29 = vpop.permute.xlu1 %2226 }
  0xee   : > { %2248 = vmatpush.bf16.msrb.mxu2 %v2227_v29  ;;  %v2221_v37 = vpop.permute.xlu0 %2220 }
  0xf0   : > { %665 = vmax.xlane.f32.xlu2 %v664_v35  ;;  %v619_v42 = vpop.f32.mrf.mxu0 }
  0xf1   : > { %v630_v44 = vmul.f32 0.25, %v619_v42 }
  0xf2   : > { %2249 = vmatpush.bf16.msrb.mxu2 %v2225_v21 }
  0xf3   : > { %v3755_v48 = vsel %vm3747_vm9, %v630_v44, -1e+30  ;;  %v3876_v44 = vld [vmem:[#allocation2 + $0x28] sm:$0xff] }
  0xf4   : > { %v667_v50 = vsel %vm462_vm2, %v3755_v48, -inf }
  0xf5   : > { %668 = vmax.xlane.f32.xlu0 %v667_v50 }
  0xf6   : > { %2966 = vmatmul.msk.bf16.gmra.mxu2 %vm570_vm0, %v3552_v17  ;;  %2981 = vmatmul.msk.bf16.gmra.mxu0 %vm570_vm0, %v1886_v36  ;;  %v3402_v17 = vmov 0  }
  0xf7   : > { %2250 = vmatpush.bf16.msrb.mxu2 %v2223_v30  ;;  %3119 = vset.pattern.permute.xlu2 %v3402_v17  ;;  %v643_v30 = vld [vmem:[#allocation2 + $0x18] sm:$0xff] }
  0xf8   : > { %3121 = vset.pattern.permute.xlu1 %v3402_v17  ;;  %3120 = vset.pattern.permute.xlu0 %v3402_v17  ;;  %v621_v51 = vpop.f32.mrf.mxu0 }
  0xf9   : > { %v631_v52 = vmul.f32 0.25, %v621_v51 }
  0xfb   : > { %2251 = vmatpush.bf16.msrb.mxu2 %v2221_v37  ;;  %v3787_v55 = vsel %vm3779_vm10, %v631_v52, -1e+30 }
  0xfc   : > { %v670_v40 = vsel %vm462_vm2, %v3787_v55, -inf }
  0xfd   : > { %671 = vmax.xlane.f32.xlu1 %v670_v40 }
 0x106   : > { %2982 = vmatmul.msk.bf16.gmra.mxu0 %vm570_vm0, %v1888_v38  ;;  %v3867_v38 = vld [vmem:[#allocation2 + $0x20] sm:$0xff] }
 0x138   : > { %v651_v56 = vpop.xlane.xlu0 %650 }
 0x139   : > { %v673_v58 = vmax.f32 %v640_v41, %v651_v56 }
 0x13b   : > { %975 = vst.msk [vmem:[#allocation2] sm:$0xff] %vm397_vm5, %v673_v58  ;;  %707 = vperm.xlu2 %3119, %v673_v58   ;;  %v681_v37 = vsub.f32 %v640_v41, %v673_v58 }
 0x13d   : > { %v689_v43 = vmul.f32 1.442695, %v681_v37 }
 0x13f   : > { %3122 = vpow2.f32 %v689_v43 }
 0x140   : > { %v654_v61 = vpop.xlane.xlu0 %653 }
 0x141   : > { %v674_v62 = vmax.f32 %v641_v60, %v654_v61  ;;  %v3889_v61 = vld [vmem:[#allocation2 + $0x30] sm:$0xff] }
 0x143   : > { %976 = vst.msk [vmem:[#allocation2 + $0x8] sm:$0xff] %vm397_vm5, %v674_v62  ;;  %v682_v52 = vsub.f32 %v641_v60, %v674_v62 }
 0x145   : > { %v3883_v53 = vpop.eup %3122  ;;  %v691_v40 = vmul.f32 1.442695, %v682_v52 }
 0x147   : > { %3124 = vpow2.f32 %v691_v40 }
 0x148   : > { %v657_v9 = vpop.xlane.xlu1 %656 }
 0x149   : > { %v1032_v63 = vpop.f32.mrf.mxu2  ;;  %v675_v12 = vmax.f32 %v642_v10, %v657_v9 }
 0x14a   : > { %v1052_v1 = vmul.f32 0.25, %v1032_v63 }
 0x14b   : > { %v683_v19 = vsub.f32 %v642_v10, %v675_v12  ;;  %977 = vst.msk [vmem:[#allocation2 + $0x10] sm:$0xff] %vm397_vm5, %v675_v12 }
 0x14c   : > { %v3843_v2 = vsel %vm3574_vm1, %v1052_v1, -1e+30 }
 0x14d   : > { %v1077_v3 = vsel %vm462_vm2, %v3843_v2, -inf  ;;  %v3886_v41 = vpop.eup %3124 }
 0x14e   : > { %1078 = vmax.xlane.f32.xlu0 %v1077_v3 }
 0x150   : > { %v660_v29 = vpop.xlane.xlu1 %659 }
 0x151   : > { %v1034_v21 = vpop.f32.mrf.mxu2  ;;  %v676_v31 = vmax.f32 %v643_v30, %v660_v29 }
 0x152   : > { %v1053_v27 = vmul.f32 0.25, %v1034_v21 }
 0x153   : > { %v1930_v4 = vpop.f32.mrf.mxu0  ;;  %978 = vst.msk [vmem:[#allocation2 + $0x18] sm:$0xff] %vm397_vm5, %v676_v31 }
 0x154   : > { %v1950_v8 = vmul.f32 0.25, %v1930_v4  ;;  %v3865_v36 = vsel %vm3589_vm3, %v1053_v27, -1e+30 }
 0x155   : > { %v1080_v39 = vsel %vm462_vm2, %v3865_v36, -inf }
 0x156   : > { %v3849_v14 = vsel %vm3574_vm1, %v1950_v8, -1e+30 }
 0x157   : > { %v1975_v18 = vsel %vm462_vm2, %v3849_v14, -inf }
 0x158   : > { %1976 = vmax.xlane.f32.xlu1 %v1975_v18 }
 0x159   : > { %v1037_v60 = vpop.f32.mrf.mxu2 }
 0x15b   : > { %v1932_v25 = vpop.f32.mrf.mxu0  ;;  %v663_v17 = vpop.xlane.xlu2 %662 }
 0x15c   : > { %v1951_v28 = vmul.f32 0.25, %v1932_v25  ;;  %v3872_v42 = vmax.f32 %v3867_v38, %v663_v17  ;;  %v693_v25 = vmul.f32 1.442695, %v683_v19  ;;  %v3927_v19 = vld [vmem:[#allocation2 + $0x40] sm:$0xff] }
 0x15e   : > { %v3858_v33 = vsel %vm3589_vm3, %v1951_v28, -1e+30  ;;  %979 = vst.msk [vmem:[#allocation2 + $0x20] sm:$0xff] %vm397_vm5, %v3872_v42  ;;  %v3914_v28 = vld [vmem:[#allocation2 + $0x38] sm:$0xff]  ;;  %3126 = vpow2.f32 %v693_v25 }
 0x15f   : > { %v1978_v35 = vsel %vm462_vm2, %v3858_v33, -inf }
 0x160   : > { %1979 = vmax.xlane.f32.xlu0 %v1978_v35  ;;  %v684_v35 = vsub.f32 %v643_v30, %v676_v31  ;;  %v3935_v30 = vld [vmem:[#allocation2 + $0xc0] sm:$0xff] }
 0x161   : > { %4958 = vst [vmem:[#allocation9_spill] sm:$0xff] %v3935_v30 }
 0x162   : > { %v695_v17 = vmul.f32 1.442695, %v684_v35 }
 0x163   : > { %v666_v50 = vpop.xlane.xlu2 %665  ;;  %v1935_v56 = vpop.f32.mrf.mxu0 }
 0x164   : > { %1081 = vmax.xlane.f32.xlu2 %v1080_v39  ;;  %v3879_v51 = vmax.f32 %v3876_v44, %v666_v50  ;;  %v1952_v58 = vmul.f32 0.25, %v1935_v56  ;;  %v3921_v37 = vpop.eup %3126  ;;  %3128 = vpow2.f32 %v695_v17  ;;  %v685_v17 = vsub.f32 %v3867_v38, %v3872_v42 }
 0x166   : > { %980 = vst.msk [vmem:[#allocation2 + $0x28] sm:$0xff] %vm397_vm5, %v3879_v51  ;;  %v3893_v3 = vsel %vm3608_vm4, %v1952_v58, -1e+30  ;;  %v3942_v58 = vld [vmem:[#allocation2 + $0xc8] sm:$0xff] }
 0x167   : > { %v1981_v9 = vsel %vm462_vm2, %v3893_v3, -inf  ;;  %4959 = vst [vmem:[#allocation10_spill] sm:$0xff] %v3942_v58 }
 0x168   : > { %v669_v63 = vpop.xlane.xlu0 %668 }
 0x169   : > { %v3896_v4 = vmax.f32 %v3889_v61, %v669_v63 }
 0x16a   : > { %v3924_v39 = vpop.eup %3128 }
 0x16b   : > { %v1937_v1 = vpop.f32.mrf.mxu0  ;;  %981 = vst.msk [vmem:[#allocation2 + $0x30] sm:$0xff] %vm397_vm5, %v3896_v4 }
 0x16c   : > { %v1953_v8 = vmul.f32 0.25, %v1937_v1  ;;  %4957 = vst [vmem:[#allocation8_spill] sm:$0xff] %v3924_v39 }
 0x170   : > { %v672_v27 = vpop.xlane.xlu1 %671 }
 0x171   : > { %844 = vperm.xlu1 %3121, %v3883_v53   ;;  %v3917_v29 = vmax.f32 %v3914_v28, %v672_v27 }
 0x173   : > { %982 = vst.msk [vmem:[#allocation2 + $0x38] sm:$0xff] %vm397_vm5, %v3917_v29  ;;  %v1940_v25 = vpop.f32.mrf.mxu0 }
 0x174   : > { %712 = vperm.xlu0 %3120, %v674_v62   ;;  %v1054_v62 = vmul.f32 0.25, %v1037_v60  ;;  %v1954_v35 = vmul.f32 0.25, %v1940_v25 }
 0x176   : > { %v3904_v10 = vsel %vm3608_vm4, %v1054_v62, -1e+30  ;;  %v3947_v62 = vld [vmem:[#allocation2 + $0x48] sm:$0xff] }
 0x177   : > { %v1083_v18 = vsel %vm462_vm2, %v3904_v10, -inf }
 0x179   : > { %717 = vperm.xlu1 %3121, %v675_v12   ;;  %v3908_v12 = vsel %vm3628_vm6, %v1953_v8, -1e+30 }
 0x17a   : > { %v1984_v21 = vsel %vm462_vm2, %v3908_v12, -inf }
 0x17c   : > { %849 = vperm.xlu2 %3119, %v3886_v41  }
 0x195   : > { %v708_v56 = vpop.permute.xlu2 %707 }
 0x19e   : > { %1982 = vmax.xlane.f32.xlu0 %v1981_v9 }
 0x1a3   : > { %1084 = vmax.xlane.f32.xlu1 %v1083_v18 }
 0x1a5   : > { %1985 = vmax.xlane.f32.xlu2 %v1984_v21 }
 0x1b2   : > { %854 = vperm.xlu0 %3120, %v3921_v37  }
 0x1bc   : > { %859 = vperm.xlu1 %3121, %v3924_v39  }
 0x1bd   : > { %722 = vperm.xlu2 %3119, %v676_v31   ;;  %v1039_v31 = vpop.f32.mrf.mxu2 }
 0x1be   : > { %v1055_v63 = vmul.f32 0.25, %v1039_v31 }
 0x1c0   : > { %v3956_v18 = vsel %vm3628_vm6, %v1055_v63, -1e+30  ;;  %v697_v63 = vmul.f32 1.442695, %v685_v17 }
 0x1c1   : > { %v1079_v43 = vpop.xlane.xlu0 %1078  ;;  %v1086_v27 = vsel %vm462_vm2, %v3956_v18, -inf }
 0x1c2   : > { %v3930_v50 = vmax.f32 %v3927_v19, %v1079_v43  ;;  %v745_v43 = vsub.f32 %v3580_v49, %v708_v56  ;;  %3130 = vpow2.f32 %v697_v63 }
 0x1c4   : > { %1424 = vst.msk [vmem:[#allocation2 + $0x40] sm:$0xff] %vm397_vm5, %v3930_v50  ;;  %732 = vperm.xlu1 %3121, %v3879_v51  }
 0x1c5   : > { %v3958_v21 = vpop.f32.mrf.mxu2 }
 0x1c8   : > { %v3982_v17 = vpop.eup %3130 }
 0x1c9   : > { %4961 = vst [vmem:[#allocation12_spill] sm:$0xff] %v3982_v17 }
 0x1cb   : > { %v1977_v52 = vpop.xlane.xlu1 %1976 }
 0x1cc   : > { %v3938_v40 = vmax.f32 %v3935_v30, %v1977_v52  ;;  %v3969_v52 = vsel %vm3663_vm7, %v1954_v35, -1e+30 }
 0x1cd   : > { %v1044_v31 = vpop.f32.mrf.mxu2  ;;  %v1987_v30 = vsel %vm462_vm2, %v3969_v52, -inf }
 0x1ce   : > { %2322 = vst.msk [vmem:[#allocation2 + $0xc0] sm:$0xff] %vm397_vm5, %v3938_v40 }
 0x1d3   : > { %v1980_v60 = vpop.xlane.xlu0 %1979 }
 0x1d4   : > { %v3945_v1 = vmax.f32 %v3942_v58, %v1980_v60  ;;  %v3971_v60 = vpop.f32.mrf.mxu0  ;;  %v1057_v58 = vmul.f32 0.25, %v1044_v31 }
 0x1d6   : > { %2323 = vst.msk [vmem:[#allocation2 + $0xc8] sm:$0xff] %vm397_vm5, %v3945_v1  ;;  %v3978_v38 = vsel %vm3693_vm8, %v1057_v58, -1e+30 }
 0x1d7   : > { %v1082_v8 = vpop.xlane.xlu2 %1081  ;;  %4960 = vst [vmem:[#allocation11_spill] sm:$0xff] %v3978_v38  ;;  %v1092_v35 = vsel %vm462_vm2, %v3978_v38, -inf  ;;  %v4021_v38 = vld [vmem:[#allocation2 + $0xd8] sm:$0xff] }
 0x1d8   : > { %v3952_v9 = vmax.f32 %v3947_v62, %v1082_v8  ;;  %v753_v8 = vmul.f32 1.442695, %v745_v43  ;;  %4965 = vst [vmem:[#allocation16_spill] sm:$0xff] %v4021_v38 }
 0x1da   : > { %1425 = vst.msk [vmem:[#allocation2 + $0x48] sm:$0xff] %vm397_vm5, %v3952_v9  ;;  %3132 = vpow2.f32 %v753_v8 }
 0x1dc   : > { %1087 = vmax.xlane.f32.xlu0 %v1086_v27  ;;  %v1945_v56 = vpop.f32.mrf.mxu0 }
 0x1dd   : > { %v1956_v43 = vmul.f32 0.25, %v1945_v56 }
 0x1df   : > { %v3995_v63 = vsel %vm3747_vm9, %v1956_v43, -1e+30  ;;  %v1047_v43 = vpop.f32.mrf.mxu2 }
 0x1e0   : > { %v3133_v31 = vpop.eup %3132  ;;  %4962 = vst [vmem:[#allocation13_spill] sm:$0xff] %v3995_v63 }
 0x1e6   : > { %v713_v27 = vpop.permute.xlu0 %712  ;;  %1988 = vmax.xlane.f32.xlu2 %v1987_v30  ;;  %v3987_v30 = vsel %vm3574_vm1, %v3133_v31, 0.0  ;;  %v4008_v31 = vld [vmem:[#allocation2 + $0xd0] sm:$0xff] }
 0x1e7   : > { %v746_v25 = vsub.f32 %v3595_v59, %v713_v27  ;;  %v1993_v27 = vsel %vm462_vm2, %v3995_v63, -inf  ;;  %4963 = vst [vmem:[#allocation14_spill] sm:$0xff] %v4008_v31  ;;  %v1058_v63 = vmul.f32 0.25, %v1047_v43 }
 0x1e9   : > { %v755_v49 = vmul.f32 1.442695, %v746_v25  ;;  %v4003_v25 = vpop.permute.xlu1 %844 }
 0x1eb   : > { %3134 = vpow2.f32 %v755_v49  ;;  %v687_v49 = vsub.f32 %v3889_v61, %v3896_v4 }
 0x1ed   : > { %v701_v56 = vmul.f32 1.442695, %v687_v49 }
 0x1ee   : > { %1093 = vmax.xlane.f32.xlu1 %v1092_v35 }
 0x1ef   : > { %3136 = vpow2.f32 %v701_v56  ;;  %v4025_v56 = vsel %vm3747_vm9, %v1058_v63, -1e+30  ;;  %v1056_v63 = vmul.f32 0.25, %v3958_v21 }
 0x1f0   : > { %864 = vperm.xlu0 %3120, %v3982_v17   ;;  %4966 = vst [vmem:[#allocation17_spill] sm:$0xff] %v4025_v56 }
 0x1f1   : > { %v3135_v59 = vpop.eup %3134  ;;  %v718_v35 = vpop.permute.xlu1 %717 }
 0x1f2   : > { %v3991_v58 = vsel %vm3589_vm3, %v3135_v59, 0.0  ;;  %v4010_v59 = vpop.permute.xlu2 %849  ;;  %v747_v17 = vsub.f32 %v3614_v6, %v718_v35  ;;  %v4050_v35 = vsel %vm3663_vm7, %v1056_v63, -1e+30 }
 0x1f3   : > { %v890_v8 = vpack.c.bf16 %v3991_v58, %v3987_v30 }
 0x1f5   : > { %2959 = vmatmul.msk.bf16.vlgmr.msra.gmra.mxu1 %vm462_vm2, %v890_v8  ;;  %v4019_v61 = vpop.eup %3136 }
 0x1f6   : > { %1994 = vmax.xlane.f32.xlu1 %v1993_v27  ;;  %4964 = vst [vmem:[#allocation15_spill] sm:$0xff] %v4019_v61 }
 0x1fe   : > { %727 = vperm.xlu2 %3119, %v3872_v42   ;;  %v4017_v42 = vld [vmem:[#allocation2 + $0x50] sm:$0xff] }
 0x20f   : > { %742 = vperm.xlu1 %3121, %v3917_v29  }
 0x211   : > { %v1983_v8 = vpop.xlane.xlu0 %1982 }
 0x212   : > { %v4013_v27 = vmax.f32 %v4008_v31, %v1983_v8  ;;  %v1095_v31 = vsel %vm462_vm2, %v4025_v56, -inf }
 0x214   : > { %2324 = vst.msk [vmem:[#allocation2 + $0xd0] sm:$0xff] %vm397_vm5, %v4013_v27 }
 0x216   : > { %v1085_v49 = vpop.xlane.xlu1 %1084 }
 0x217   : > { %v4028_v39 = vmax.f32 %v4017_v42, %v1085_v49  ;;  %874 = vperm.xlu1 %3121, %v4019_v61   ;;  %v688_v49 = vsub.f32 %v3914_v28, %v3917_v29  ;;  %v757_v61 = vmul.f32 1.442695, %v747_v17  ;;  %v1089_v28 = vsel %vm462_vm2, %v4050_v35, -inf }
 0x218   : > { %v1986_v43 = vpop.xlane.xlu2 %1985  ;;  %v1955_v29 = vmul.f32 0.25, %v3971_v60 }
 0x219   : > { %1426 = vst.msk [vmem:[#allocation2 + $0x50] sm:$0xff] %vm397_vm5, %v4028_v39  ;;  %v4034_v8 = vmax.f32 %v4021_v38, %v1986_v43  ;;  %v1109_v43 = vsub.f32 %v3927_v19, %v3930_v50  ;;  %3138 = vpow2.f32 %v757_v61 }
 0x21a   : > { %1096 = vmax.xlane.f32.xlu0 %v1095_v31  ;;  %v703_v31 = vmul.f32 1.442695, %v688_v49  ;;  %v686_v49 = vsub.f32 %v3876_v44, %v3879_v51  ;;  %v4100_v51 = vld [vmem:[#allocation2 + $0xe0] sm:$0xff] }
 0x21b   : > { %2325 = vst.msk [vmem:[#allocation2 + $0xd8] sm:$0xff] %vm397_vm5, %v4034_v8  ;;  %v1117_v21 = vmul.f32 1.442695, %v1109_v43 }
 0x21c   : > { %v699_v43 = vmul.f32 1.442695, %v686_v49  ;;  %v793_v49 = vsel %vm462_vm2, %v3987_v30, 0.0  ;;  %v4123_v30 = vld [vmem:[#allocation2 + $0xf0] sm:$0xff] }
 0x21d   : > { %4967 = vst [vmem:[#allocation18_spill] sm:$0xff] %v4123_v30 }
 0x21f   : > { %1135 = vperm.xlu1 %3121, %v3930_v50   ;;  %v4058_v50 = vsel %vm3693_vm8, %v1955_v29, -1e+30 }
 0x220   : > { %v723_v38 = vpop.permute.xlu2 %722  ;;  %v1990_v63 = vsel %vm462_vm2, %v4058_v50, -inf }
 0x221   : > { %v748_v56 = vsub.f32 %v3642_v16, %v723_v38  ;;  %v3139_v16 = vpop.eup %3138 }
 0x222   : > { %v771_v38 = vsel %vm3608_vm4, %v3139_v16, 0.0 }
 0x223   : > { %v759_v6 = vmul.f32 1.442695, %v748_v56 }
 0x225   : > { %3140 = vpow2.f32 %v759_v6  ;;  %v4084_v6 = vld [vmem:[#allocation2 + $0x58] sm:$0xff] }
 0x226   : > { %3142 = vpow2.f32 %v703_v31  ;;  %v4081_v31 = vpop.permute.xlu0 %854 }
 0x227   : > { %1090 = vmax.xlane.f32.xlu2 %v1089_v28  ;;  %2038 = vperm.xlu1 %3121, %v3945_v1   ;;  %3144 = vpow2.f32 %v1117_v21 }
 0x228   : > { %3146 = vpow2.f32 %v699_v43  ;;  %v4113_v43 = vld [vmem:[#allocation2 + $0x68] sm:$0xff] }
 0x22b   : > { %v3141_v19 = vpop.eup %3140 }
 0x22c   : > { %v4064_v17 = vsel %vm3628_vm6, %v3141_v19, 0.0  ;;  %v4066_v61 = vpop.eup %3142 }
 0x22d   : > { %v891_v60 = vpack.c.bf16 %v4064_v17, %v771_v38  ;;  %v4069_v56 = vpop.eup %3144 }
 0x22e   : > { %879 = vperm.xlu0 %3120, %v4066_v61   ;;  %v4086_v21 = vpop.eup %3146  ;;  %v4088_v28 = vpop.permute.xlu1 %859 }
 0x22f   : > { %1991 = vmax.xlane.f32.xlu2 %v1990_v63  ;;  %1272 = vperm.xlu1 %3121, %v4069_v56  }
 0x230   : > { %2960 = vmatmul.msk.bf16.gmra.mxu1 %vm462_vm2, %v891_v60 }
 0x236   : > { %2033 = vperm.xlu0 %3120, %v3938_v40   ;;  %v733_v16 = vpop.permute.xlu1 %732 }
 0x237   : > { %v750_v63 = vsub.f32 %v3705_v34, %v733_v16 }
 0x240   : > { %2971 = vmatmul.msk.bf16.vlgmr.msrb.gmra.mxu1 %vm570_vm0, %v3570_v45 }
 0x247   : > { %737 = vperm.xlu2 %3119, %v3896_v4   ;;  %v799_v4 = vsel %vm462_vm2, %v771_v38, 0.0  ;;  %v763_v38 = vmul.f32 1.442695, %v750_v63 }
 0x249   : > { %3148 = vpow2.f32 %v763_v38 }
 0x24f   : > { %v1088_v29 = vpop.xlane.xlu0 %1087  ;;  %869 = vperm.xlu2 %3119, %v4086_v21  }
 0x250   : > { %v4092_v44 = vmax.f32 %v4084_v6, %v1088_v29  ;;  %2972 = vmatmul.msk.bf16.gmra.mxu1 %vm570_vm0, %v3634_v15  ;;  %v3149_v15 = vpop.eup %3148 }
 0x252   : > { %1427 = vst.msk [vmem:[#allocation2 + $0x58] sm:$0xff] %vm397_vm5, %v4092_v44 }
 0x259   : > { %v1989_v19 = vpop.xlane.xlu2 %1988  ;;  %800 = vadd.xlane.f32.xlu1 %v799_v4 }
 0x25a   : > { %v4104_v60 = vmax.f32 %v4100_v51, %v1989_v19 }
 0x25c   : > { %2326 = vst.msk [vmem:[#allocation2 + $0xe0] sm:$0xff] %vm397_vm5, %v4104_v60 }
 0x260   : > { %2973 = vmatmul.msk.bf16.gmra.mxu1 %vm570_vm0, %v3623_v11  ;;  %794 = vadd.xlane.f32.xlu0 %v793_v49 }
 0x261   : > { %v728_v29 = vpop.permute.xlu2 %727  ;;  %v1094_v4 = vpop.xlane.xlu1 %1093 }
 0x262   : > { %v749_v34 = vsub.f32 %v3675_v20, %v728_v29  ;;  %v4119_v16 = vmax.f32 %v4113_v43, %v1094_v4  ;;  %v1947_v20 = vpop.f32.mrf.mxu0  ;;  %v4136_v29 = vsel %vm3693_vm8, %v3149_v15, 0.0  ;;  %v834_v4 = vld [vmem:[#allocation4] sm:$0xff] }
 0x264   : > { %v761_v19 = vmul.f32 1.442695, %v749_v34  ;;  %1429 = vst.msk [vmem:[#allocation2 + $0x68] sm:$0xff] %vm397_vm5, %v4119_v16 }
 0x266   : > { %3150 = vpow2.f32 %v761_v19  ;;  %v1957_v19 = vmul.f32 0.25, %v1947_v20 }
 0x268   : > { %v4148_v15 = vsel %vm3779_vm10, %v1957_v19, -1e+30 }
 0x269   : > { %v1995_v63 = vpop.xlane.xlu1 %1994  ;;  %4968 = vst [vmem:[#allocation19_spill] sm:$0xff] %v4148_v15  ;;  %v1996_v20 = vsel %vm462_vm2, %v4148_v15, -inf }
 0x26a   : > { %v4126_v11 = vmax.f32 %v4123_v30, %v1995_v63  ;;  %v882_v63 = vmul.f32 %v4003_v25, %v834_v4  ;;  %v1049_v30 = vpop.f32.mrf.mxu2 }
 0x26b   : > { %v1059_v25 = vmul.f32 0.25, %v1049_v30  ;;  %v4170_v30 = vld [vmem:[#allocation2 + $0x70] sm:$0xff] }
 0x26c   : > { %v3151_v49 = vpop.eup %3150  ;;  %2328 = vst.msk [vmem:[#allocation2 + $0xf0] sm:$0xff] %vm397_vm5, %v4126_v11 }
 0x26d   : > { %v4132_v38 = vsel %vm3663_vm7, %v3151_v49, 0.0  ;;  %v4159_v19 = vsel %vm3779_vm10, %v1059_v25, -1e+30  ;;  %v1073_v25 = vld [vmem:[#allocation2 + $0x60] sm:$0xff] }
 0x26e   : > { %v892_v34 = vpack.c.bf16 %v4136_v29, %v4132_v38 }
 0x270   : > { %2974 = vmatmul.msk.bf16.gmra.mxu1 %vm570_vm0, %v3677_v26  ;;  %2961 = vmatmul.msk.bf16.vlgmr.msra.gmra.mxu3 %vm462_vm2, %v892_v34  ;;  %v835_v26 = vld [vmem:[#allocation4 + $0x8] sm:$0xff] }
 0x271   : > { %1799 = vmatpush.bf16.msra.mxu3 %v3601_v0  ;;  %v883_v0 = vmul.f32 %v4010_v59, %v835_v26  ;;  %v796_v59 = vsel %vm462_vm2, %v3991_v58, 0.0 }
 0x272   : > { %v939_v49 = vpop.f32.mrf.mxu1 }
 0x273   : > { %v959_v45 = vadd.f32 %v939_v49, %v882_v63 }
 0x274   : > { %1140 = vperm.xlu0 %3120, %v3952_v9  }
 0x275   : > { %967 = vst.msk [vmem:[#allocation4] sm:$0xff] %vm570_vm0, %v959_v45  ;;  %1800 = vmatpush.bf16.msra.mxu3 %v3655_v22  ;;  %v1098_v22 = vsel %vm462_vm2, %v4159_v19, -inf }
 0x278   : > { %1997 = vmax.xlane.f32.xlu2 %v1996_v20 }
 0x279   : > { %1801 = vmatpush.bf16.msra.mxu3 %v3854_v23  ;;  %v4166_v23 = vpop.permute.xlu0 %864 }
 0x27a   : > { %v941_v4 = vpop.f32.mrf.mxu1 }
 0x27b   : > { %v960_v34 = vadd.f32 %v941_v4, %v883_v0  ;;  %v1110_v0 = vsub.f32 %v3947_v62, %v3952_v9  ;;  %v4197_v62 = vld [vmem:[#allocation2 + $0xe8] sm:$0xff] }
 0x27c   : > { %2043 = vperm.xlu0 %3120, %v4013_v27  }
 0x27d   : > { %968 = vst.msk [vmem:[#allocation4 + $0x8] sm:$0xff] %vm570_vm0, %v960_v34  ;;  %1802 = vmatpush.bf16.msra.mxu3 %v3616_v7  ;;  %v1111_v7 = vsub.f32 %v4017_v42, %v4028_v39  ;;  %v4969_v42 = vsub.f32 %v4084_v6, %v4092_v44 }
 0x27f   : > { %v1121_v20 = vmul.f32 1.442695, %v1111_v7  ;;  %v1123_v4 = vmul.f32 1.442695, %v4969_v42  ;;  %v1119_v7 = vmul.f32 1.442695, %v1110_v0 }
 0x280   : > { %1099 = vmax.xlane.f32.xlu2 %v1098_v22 }
 0x281   : > { %v743_v45 = vpop.permute.xlu1 %742  ;;  %3152 = vpow2.f32 %v1121_v20 }
 0x282   : > { %3154 = vpow2.f32 %v1123_v4  ;;  %v752_v4 = vsub.f32 %v3787_v55, %v743_v45 }
 0x283   : > { %3156 = vpow2.f32 %v1119_v7  ;;  %v836_v7 = vld [vmem:[#allocation4 + $0x10] sm:$0xff] }
 0x284   : > { %2048 = vperm.xlu0 %3120, %v4034_v8  }
 0x287   : > { %v4190_v22 = vpop.eup %3152 }
 0x288   : > { %797 = vadd.xlane.f32.xlu2 %v796_v59 }
 0x289   : > { %v4172_v63 = vpop.permute.xlu1 %874 }
 0x28c   : > { %1150 = vperm.xlu0 %3120, %v4092_v44   ;;  %v4199_v44 = vpop.eup %3154 }
 0x28d   : > { %v1097_v49 = vpop.xlane.xlu0 %1096 }
 0x28e   : > { %v4178_v26 = vmax.f32 %v4170_v30, %v1097_v49 }
 0x290   : > { %1430 = vst.msk [vmem:[#allocation2 + $0x70] sm:$0xff] %vm397_vm5, %v4178_v26 }
 0x291   : > { %v4183_v58 = vpop.permute.xlu1 %1135 }
 0x294   : > { %2053 = vperm.xlu0 %3120, %v4104_v60  }
 0x299   : > { %v2039_v20 = vpop.permute.xlu1 %2038 }
 0x29a   : > { %v1091_v34 = vpop.xlane.xlu2 %1090  ;;  %v2072_v42 = vsub.f32 %v3858_v33, %v2039_v20  ;;  %v767_v33 = vmul.f32 1.442695, %v752_v4 }
 0x29b   : > { %v1105_v59 = vmax.f32 %v1073_v25, %v1091_v34 }
 0x29c   : > { %1282 = vperm.xlu0 %3120, %v4190_v22   ;;  %v2081_v34 = vmul.f32 1.442695, %v2072_v42 }
 0x29d   : > { %1428 = vst.msk [vmem:[#allocation2 + $0x60] sm:$0xff] %vm397_vm5, %v1105_v59  ;;  %1155 = vperm.xlu1 %3121, %v1105_v59   ;;  %v1113_v49 = vsub.f32 %v1073_v25, %v1105_v59  ;;  %v884_v25 = vmul.f32 %v4081_v31, %v836_v7 }
 0x29f   : > { %v1125_v9 = vmul.f32 1.442695, %v1113_v49 }
 0x2a0   : > { %v4194_v15 = vpop.permute.xlu0 %879  ;;  %1145 = vperm.xlu2 %3119, %v4028_v39   ;;  %v4212_v39 = vpop.eup %3156 }
 0x2a1   : > { %3158 = vpow2.f32 %v1125_v9 }
 0x2a2   : > { %v1992_v6 = vpop.xlane.xlu2 %1991  ;;  %3160 = vpow2.f32 %v2081_v34 }
 0x2a3   : > { %v4203_v0 = vmax.f32 %v4197_v62, %v1992_v6  ;;  %3162 = vpow2.f32 %v767_v33 }
 0x2a4   : > { %1287 = vperm.xlu0 %3120, %v4199_v44  }
 0x2a5   : > { %2327 = vst.msk [vmem:[#allocation2 + $0xe8] sm:$0xff] %vm397_vm5, %v4203_v0  ;;  %2058 = vperm.xlu1 %3121, %v4203_v0  }
 0x2a7   : > { %v4217_v6 = vpop.eup %3158 }
 0x2a8   : > { %v2034_v59 = vpop.permute.xlu0 %2033  ;;  %1277 = vperm.xlu2 %3119, %v4212_v39  }
 0x2a9   : > { %v2071_v55 = vsub.f32 %v3849_v14, %v2034_v59  ;;  %v3161_v14 = vpop.eup %3160  ;;  %v837_v59 = vld [vmem:[#allocation4 + $0x18] sm:$0xff] }
 0x2aa   : > { %v738_v45 = vpop.permute.xlu2 %737  ;;  %v3163_v34 = vpop.eup %3162  ;;  %v4229_v31 = vsel %vm3589_vm3, %v3161_v14, 0.0 }
 0x2ab   : > { %v2079_v49 = vmul.f32 1.442695, %v2071_v55  ;;  %v751_v20 = vsub.f32 %v3755_v48, %v738_v45  ;;  %v885_v48 = vmul.f32 %v4088_v28, %v837_v59  ;;  %v4239_v28 = vsel %vm3779_vm10, %v3163_v34, 0.0 }
 0x2ac   : > { %v805_v34 = vsel %vm462_vm2, %v4132_v38, 0.0  ;;  %v1115_v38 = vsub.f32 %v4170_v30, %v4178_v26 }
 0x2ad   : > { %3164 = vpow2.f32 %v2079_v49  ;;  %v765_v9 = vmul.f32 1.442695, %v751_v20  ;;  %v944_v42 = vpop.f32.mrf.mxu1  ;;  %1292 = vperm.xlu1 %3121, %v4217_v6  }
 0x2ae   : > { %v961_v4 = vadd.f32 %v944_v42, %v884_v25  ;;  %v4246_v42 = vpop.permute.xlu1 %1272 }
 0x2af   : > { %3166 = vpow2.f32 %v765_v9 }
 0x2b0   : > { %969 = vst.msk [vmem:[#allocation4 + $0x10] sm:$0xff] %vm570_vm0, %v961_v4  ;;  %v779_v4 = vld [vmem:[#allocation3 + $0x10] sm:$0xff] }
 0x2b1   : > { %v787_v14 = vmul.f32 %v3921_v37, %v779_v4  ;;  %v808_v37 = vsel %vm462_vm2, %v4136_v29, 0.0  ;;  %v1173_v4 = vsub.f32 %v3843_v2, %v4183_v58  ;;  %v838_v58 = vld [vmem:[#allocation4 + $0x20] sm:$0xff] }
 0x2b3   : > { %v3165_v55 = vpop.eup %3164 }
 0x2b4   : > { %v4225_v45 = vsel %vm3574_vm1, %v3165_v55, 0.0 }
 0x2b5   : > { %v3167_v33 = vpop.eup %3166  ;;  %v946_v7 = vpop.f32.mrf.mxu1  ;;  %v2216_v25 = vpack.c.bf16 %v4229_v31, %v4225_v45 }
 0x2b6   : > { %v962_v49 = vadd.f32 %v946_v7, %v885_v48  ;;  %v4235_v20 = vsel %vm3747_vm9, %v3167_v33, 0.0  ;;  %v777_v48 = vld [vmem:[#allocation3] sm:$0xff]  ;;  %v802_v33 = vsel %vm462_vm2, %v4064_v17, 0.0  ;;  %v1114_v17 = vsub.f32 %v4113_v43, %v4119_v16 }
 0x2b7   : > { %2983 = vmatmul.msk.bf16.vlgmr.msrb.gmra.mxu2 %vm462_vm2, %v2216_v25  ;;  %v893_v9 = vpack.c.bf16 %v4239_v28, %v4235_v20  ;;  %v785_v7 = vmul.f32 %v3883_v53, %v777_v48  ;;  %v870_v53 = vpop.permute.xlu2 %869  ;;  %v4269_v48 = vld [vmem:[#allocation2 + $0xf8] sm:$0xff] }
 0x2b8   : > { %970 = vst.msk [vmem:[#allocation4 + $0x18] sm:$0xff] %vm570_vm0, %v962_v49 }
 0x2b9   : > { %2962 = vmatmul.msk.bf16.gmra.mxu3 %vm462_vm2, %v893_v9  ;;  %v1129_v9 = vmul.f32 1.442695, %v1115_v38 }
 0x2bb   : > { %3168 = vpow2.f32 %v1129_v9 }
 0x2cc   : > { %v801_v59 = vpop.xlane.xlu1 %800 }
 0x2cd   : > { %v819_v55 = vadd.f32 %v801_v59, %v787_v14  ;;  %v1181_v14 = vmul.f32 1.442695, %v1173_v4  ;;  %v1127_v59 = vmul.f32 1.442695, %v1114_v17 }
 0x2ce   : > { %806 = vadd.xlane.f32.xlu0 %v805_v34  ;;  %v4266_v34 = vpop.eup %3168 }
 0x2cf   : > { %828 = vst.msk [vmem:[#allocation3 + $0x10] sm:$0xff] %vm397_vm5, %v819_v55  ;;  %3170 = vpow2.f32 %v1181_v14 }
 0x2d0   : > { %3172 = vpow2.f32 %v1127_v59 }
 0x2d1   : > { %803 = vadd.xlane.f32.xlu2 %v802_v33 }
 0x2d3   : > { %v795_v25 = vpop.xlane.xlu0 %794 }
 0x2d4   : > { %v817_v49 = vadd.f32 %v795_v25, %v785_v7  ;;  %v1076_v25 = vld [vmem:[#allocation2 + $0x78] sm:$0xff] }
 0x2d6   : > { %826 = vst.msk [vmem:[#allocation3] sm:$0xff] %vm397_vm5, %v817_v49  ;;  %v886_v49 = vmul.f32 %v4166_v23, %v838_v58 }
 0x2d7   : > { %809 = vadd.xlane.f32.xlu1 %v808_v37 }
 0x2e2   : > { %1165 = vperm.xlu0 %3120, %v4178_v26   ;;  %v3171_v26 = vpop.eup %3170 }
 0x2e3   : > { %v4277_v33 = vpop.eup %3172  ;;  %v4284_v37 = vsel %vm3574_vm1, %v3171_v26, 0.0 }
 0x2e6   : > { %v1141_v55 = vpop.permute.xlu0 %1140 }
 0x2e7   : > { %v1174_v29 = vsub.f32 %v3865_v36, %v1141_v55 }
 0x2e9   : > { %v1183_v30 = vmul.f32 1.442695, %v1174_v29  ;;  %1160 = vperm.xlu2 %3119, %v4119_v16   ;;  %v839_v29 = vld [vmem:[#allocation4 + $0x28] sm:$0xff] }
 0x2ea   : > { %1302 = vperm.xlu0 %3120, %v4266_v34   ;;  %v887_v58 = vmul.f32 %v870_v53, %v839_v29 }
 0x2eb   : > { %3174 = vpow2.f32 %v1183_v30  ;;  %v1998_v2 = vpop.xlane.xlu2 %1997 }
 0x2ec   : > { %v4273_v43 = vmax.f32 %v4269_v48, %v1998_v2  ;;  %v778_v2 = vld [vmem:[#allocation3 + $0x8] sm:$0xff] }
 0x2ee   : > { %2329 = vst.msk [vmem:[#allocation2 + $0xf8] sm:$0xff] %vm397_vm5, %v4273_v43  ;;  %v2044_v36 = vpop.permute.xlu0 %2043 }
 0x2ef   : > { %v2073_v16 = vsub.f32 %v3893_v3, %v2044_v36 }
 0x2f1   : > { %v3175_v7 = vpop.eup %3174  ;;  %1297 = vperm.xlu2 %3119, %v4277_v33   ;;  %v2083_v59 = vmul.f32 1.442695, %v2073_v16 }
 0x2f2   : > { %v4288_v38 = vsel %vm3589_vm3, %v3175_v7, 0.0  ;;  %v786_v7 = vmul.f32 %v3886_v41, %v778_v2 }
 0x2f3   : > { %v1100_v9 = vpop.xlane.xlu2 %1099  ;;  %v949_v4 = vpop.f32.mrf.mxu3  ;;  %v1318_v17 = vpack.c.bf16 %v4288_v38, %v4284_v37  ;;  %3176 = vpow2.f32 %v2083_v59 }
 0x2f4   : > { %v1108_v14 = vmax.f32 %v1076_v25, %v1100_v9  ;;  %v963_v3 = vadd.f32 %v949_v4, %v886_v49 }
 0x2f5   : > { %2967 = vmatmul.msk.bf16.vlgmr.msrb.gmra.mxu3 %vm462_vm2, %v1318_v17 }
 0x2f6   : > { %v1116_v55 = vsub.f32 %v1076_v25, %v1108_v14  ;;  %1431 = vst.msk [vmem:[#allocation2 + $0x78] sm:$0xff] %vm397_vm5, %v1108_v14  ;;  %v2049_v23 = vpop.permute.xlu0 %2048  ;;  %1170 = vperm.xlu1 %3121, %v1108_v14  }
 0x2f7   : > { %971 = vst.msk [vmem:[#allocation4 + $0x20] sm:$0xff] %vm570_vm0, %v963_v3  ;;  %v2074_v30 = vsub.f32 %v3908_v12, %v2049_v23 }
 0x2f8   : > { %v1131_v36 = vmul.f32 1.442695, %v1116_v55 }
 0x2f9   : > { %v2085_v26 = vmul.f32 1.442695, %v2074_v30  ;;  %v3177_v17 = vpop.eup %3176 }
 0x2fa   : > { %3178 = vpow2.f32 %v1131_v36  ;;  %v4305_v41 = vsel %vm3608_vm4, %v3177_v17, 0.0 }
 0x2fb   : > { %3180 = vpow2.f32 %v2085_v26  ;;  %v798_v16 = vpop.xlane.xlu2 %797  ;;  %v951_v25 = vpop.f32.mrf.mxu3 }
 0x2fc   : > { %v818_v49 = vadd.f32 %v798_v16, %v786_v7  ;;  %v964_v9 = vadd.f32 %v951_v25, %v887_v58 }
 0x2fe   : > { %827 = vst.msk [vmem:[#allocation3 + $0x8] sm:$0xff] %vm397_vm5, %v818_v49  ;;  %v1151_v4 = vpop.permute.xlu0 %1150 }
 0x2ff   : > { %972 = vst.msk [vmem:[#allocation4 + $0x28] sm:$0xff] %vm570_vm0, %v964_v9  ;;  %v1176_v12 = vsub.f32 %v3956_v18, %v1151_v4  ;;  %v814_v9 = vsel %vm462_vm2, %v4239_v28, 0.0 }
 0x300   : > { %v4300_v14 = vpop.eup %3178 }
 0x301   : > { %v3181_v3 = vpop.eup %3180  ;;  %1307 = vperm.xlu1 %3121, %v4300_v14   ;;  %v1187_v53 = vmul.f32 1.442695, %v1176_v12 }
 0x302   : > { %v4309_v59 = vsel %vm3628_vm6, %v3181_v3, 0.0  ;;  %v811_v3 = vsel %vm462_vm2, %v4235_v20, 0.0 }
 0x303   : > { %v1146_v55 = vpop.permute.xlu2 %1145  ;;  %v2217_v23 = vpack.c.bf16 %v4309_v59, %v4305_v41  ;;  %3182 = vpow2.f32 %v1187_v53 }
 0x304   : > { %v1175_v18 = vsub.f32 %v3904_v10, %v1146_v55 }
 0x305   : > { %2984 = vmatmul.msk.bf16.gmra.mxu2 %vm462_vm2, %v2217_v23 }
 0x306   : > { %v1185_v29 = vmul.f32 1.442695, %v1175_v18  ;;  %v2054_v36 = vpop.permute.xlu0 %2053 }
 0x307   : > { %v2075_v10 = vsub.f32 %v3969_v52, %v2054_v36  ;;  %v1225_v52 = vsel %vm462_vm2, %v4288_v38, 0.0 }
 0x308   : > { %3184 = vpow2.f32 %v1185_v29 }
 0x309   : > { %v3183_v30 = vpop.eup %3182  ;;  %v2087_v4 = vmul.f32 1.442695, %v2075_v10 }
 0x30a   : > { %v1200_v7 = vsel %vm3628_vm6, %v3183_v30, 0.0 }
 0x30b   : > { %v4357_v10 = vpop.permute.xlu2 %1277 }
 0x30e   : > { %v3185_v2 = vpop.eup %3184  ;;  %v4352_v36 = vpop.permute.xlu0 %1282 }
 0x30f   : > { %v1156_v26 = vpop.permute.xlu1 %1155  ;;  %v1199_v58 = vsel %vm3608_vm4, %v3185_v2, 0.0  ;;  %v2123_v2 = vsel %vm462_vm2, %v4229_v31, 0.0  ;;  %v1481_v31 = vpop.f32.mrf.mxu1 }
 0x310   : > { %v1177_v16 = vsub.f32 %v4050_v35, %v1156_v26  ;;  %v1319_v25 = vpack.c.bf16 %v1200_v7, %v1199_v58  ;;  %v1228_v30 = vsel %vm462_vm2, %v1199_v58, 0.0  ;;  %v840_v26 = vld [vmem:[#allocation4 + $0x30] sm:$0xff]  ;;  %v841_v58 = vld [vmem:[#allocation4 + $0x38] sm:$0xff] }
 0x312   : > { %2968 = vmatmul.msk.bf16.gmra.mxu3 %vm462_vm2, %v1319_v25  ;;  %v1189_v49 = vmul.f32 1.442695, %v1177_v16  ;;  %v888_v25 = vmul.f32 %v4172_v63, %v840_v26 }
 0x314   : > { %815 = vadd.xlane.f32.xlu0 %v814_v9  ;;  %3186 = vpow2.f32 %v1189_v49 }
 0x315   : > { %3188 = vpow2.f32 %v2087_v4  ;;  %v4970_v4 = vld [vmem:[#allocation12_spill] sm:$0xff] }
 0x316   : > { %v4354_v16 = vpop.permute.xlu0 %1287 }
 0x317   : > { %v2059_v17 = vpop.permute.xlu1 %2058  ;;  %v1483_v26 = vpop.f32.mrf.mxu1 }
 0x318   : > { %v2076_v12 = vsub.f32 %v4058_v50, %v2059_v17  ;;  %v1222_v50 = vsel %vm462_vm2, %v4284_v37, 0.0  ;;  %v1231_v37 = vsel %vm462_vm2, %v1200_v7, 0.0  ;;  %v781_v7 = vld [vmem:[#allocation3 + $0x20] sm:$0xff] }
 0x319   : > { %v789_v17 = vmul.f32 %v4970_v4, %v781_v7 }
 0x31a   : > { %v2089_v35 = vmul.f32 1.442695, %v2076_v12  ;;  %812 = vadd.xlane.f32.xlu2 %v811_v3  ;;  %v3187_v53 = vpop.eup %3186  ;;  %v780_v12 = vld [vmem:[#allocation3 + $0x18] sm:$0xff] }
 0x31b   : > { %v3189_v55 = vpop.eup %3188  ;;  %v4331_v28 = vsel %vm3663_vm7, %v3187_v53, 0.0  ;;  %v889_v53 = vmul.f32 %v4194_v15, %v841_v58  ;;  %v4972_v15 = vld [vmem:[#allocation11_spill] sm:$0xff] }
 0x31c   : > { %3190 = vpow2.f32 %v2089_v35  ;;  %1226 = vadd.xlane.f32.xlu0 %v1225_v52  ;;  %v1234_v20 = vsel %vm462_vm2, %v4331_v28, 0.0  ;;  %v4339_v18 = vsel %vm3663_vm7, %v3189_v55, 0.0  ;;  %v4971_v55 = vld [vmem:[#allocation8_spill] sm:$0xff] }
 0x31d   : > { %v788_v63 = vmul.f32 %v4971_v55, %v780_v12 }
 0x31f   : > { %v4361_v35 = vpop.permute.xlu1 %1292  ;;  %v1486_v4 = vpop.f32.mrf.mxu1 }
 0x322   : > { %v3191_v23 = vpop.eup %3190  ;;  %1223 = vadd.xlane.f32.xlu2 %v1222_v50 }
 0x323   : > { %v4343_v38 = vsel %vm3693_vm8, %v3191_v23, 0.0 }
 0x324   : > { %1235 = vadd.xlane.f32.xlu0 %v1234_v20  ;;  %v2218_v29 = vpack.c.bf16 %v4343_v38, %v4339_v18 }
 0x326   : > { %2985 = vmatmul.msk.bf16.gmra.mxu2 %vm462_vm2, %v2218_v29 }
 0x32a   : > { %1232 = vadd.xlane.f32.xlu2 %v1231_v37  ;;  %v782_v37 = vld [vmem:[#allocation3 + $0x28] sm:$0xff] }
 0x32b   : > { %1229 = vadd.xlane.f32.xlu1 %v1228_v30  ;;  %v790_v30 = vmul.f32 %v4086_v21, %v782_v37 }
 0x32c   : > { %2124 = vadd.xlane.f32.xlu0 %v2123_v2 }
 0x33c   : > { %v954_v49 = vpop.f32.mrf.mxu3 }
 0x33d   : > { %v965_v9 = vadd.f32 %v954_v49, %v888_v25 }
 0x33f   : > { %973 = vst.msk [vmem:[#allocation4 + $0x30] sm:$0xff] %vm570_vm0, %v965_v9 }
 0x341   : > { %v807_v3 = vpop.xlane.xlu0 %806 }
 0x342   : > { %v821_v52 = vadd.f32 %v807_v3, %v789_v17  ;;  %v4973_v17 = vld [vmem:[#allocation17_spill] sm:$0xff] }
 0x344   : > { %830 = vst.msk [vmem:[#allocation3 + $0x20] sm:$0xff] %vm397_vm5, %v821_v52  ;;  %v804_v50 = vpop.xlane.xlu2 %803  ;;  %v956_v23 = vpop.f32.mrf.mxu3 }
 0x345   : > { %v820_v20 = vadd.f32 %v804_v50, %v788_v63  ;;  %v966_v29 = vadd.f32 %v956_v23, %v889_v53  ;;  %v1501_v63 = vmul.f32 0.25, %v1481_v31 }
 0x347   : > { %829 = vst.msk [vmem:[#allocation3 + $0x18] sm:$0xff] %vm397_vm5, %v820_v20  ;;  %v4379_v50 = vsel %vm3574_vm1, %v1501_v63, -1e+30  ;;  %v1488_v20 = vpop.f32.mrf.mxu1 }
 0x348   : > { %974 = vst.msk [vmem:[#allocation4 + $0x38] sm:$0xff] %vm570_vm0, %v966_v29  ;;  %v1526_v37 = vsel %vm462_vm2, %v4379_v50, -inf }
 0x34a   : > { %v810_v2 = vpop.xlane.xlu1 %809 }
 0x34b   : > { %v822_v25 = vadd.f32 %v810_v2, %v790_v30 }
 0x34c   : > { %v1161_v49 = vpop.permute.xlu2 %1160 }
 0x34d   : > { %831 = vst.msk [vmem:[#allocation3 + $0x28] sm:$0xff] %vm397_vm5, %v822_v25  ;;  %v1178_v9 = vsub.f32 %v4972_v15, %v1161_v49  ;;  %v2120_v25 = vsel %vm462_vm2, %v4225_v45, 0.0  ;;  %v2126_v49 = vsel %vm462_vm2, %v4305_v41, 0.0  ;;  %v1503_v15 = vmul.f32 0.25, %v1486_v4 }
 0x34f   : > { %v1191_v7 = vmul.f32 1.442695, %v1178_v9  ;;  %v4386_v31 = vpop.f32.mrf.mxu1 }
 0x351   : > { %3192 = vpow2.f32 %v1191_v7  ;;  %v4395_v7 = vsel %vm3608_vm4, %v1503_v15, -1e+30 }
 0x354   : > { %v1166_v58 = vpop.permute.xlu0 %1165  ;;  %v2346_v54 = vld [vmem:[#allocation3 + $0x28] sm:$0xff] }
 0x355   : > { %v1179_v12 = vsub.f32 %v4973_v17, %v1166_v58  ;;  %v2129_v58 = vsel %vm462_vm2, %v4309_v59, 0.0  ;;  %v1504_v17 = vmul.f32 0.25, %v1488_v20 }
 0x357   : > { %v3193_v3 = vpop.eup %3192  ;;  %v1193_v52 = vmul.f32 1.442695, %v1179_v12  ;;  %v1493_v41 = vpop.f32.mrf.mxu1 }
 0x358   : > { %v1202_v53 = vsel %vm3693_vm8, %v3193_v3, 0.0  ;;  %v1506_v20 = vmul.f32 0.25, %v1493_v41 }
 0x359   : > { %3194 = vpow2.f32 %v1193_v52  ;;  %v1237_v21 = vsel %vm462_vm2, %v1202_v53, 0.0  ;;  %v1320_v55 = vpack.c.bf16 %v1202_v53, %v4331_v28  ;;  %v1502_v52 = vmul.f32 0.25, %v1483_v26 }
 0x35a   : > { %1238 = vadd.xlane.f32.xlu1 %v1237_v21  ;;  %v4406_v53 = vsel %vm3628_vm6, %v1504_v17, -1e+30  ;;  %v4975_v17 = vld [vmem:[#allocation10_spill] sm:$0xff] }
 0x35b   : > { %2969 = vmatmul.msk.bf16.gmra.mxu3 %vm462_vm2, %v1320_v55  ;;  %v1535_v59 = vsel %vm462_vm2, %v4406_v53, -inf  ;;  %v4413_v21 = vsel %vm3589_vm3, %v1502_v52, -1e+30 }
 0x35c   : > { %v1529_v26 = vsel %vm462_vm2, %v4413_v21, -inf  ;;  %v4419_v63 = vpop.permute.xlu0 %1302 }
 0x35f   : > { %v3195_v23 = vpop.eup %3194  ;;  %v4415_v55 = vpop.f32.mrf.mxu1 }
 0x360   : > { %v1203_v29 = vsel %vm3747_vm9, %v3195_v23, 0.0  ;;  %v2135_v23 = vsel %vm462_vm2, %v4343_v38, 0.0 }
 0x361   : > { %v1240_v30 = vsel %vm462_vm2, %v1203_v29, 0.0 }
 0x362   : > { %1527 = vmax.xlane.f32.xlu1 %v1526_v37  ;;  %1241 = vadd.xlane.f32.xlu2 %v1240_v30  ;;  %v4423_v37 = vpop.permute.xlu2 %1297  ;;  %v2132_v30 = vsel %vm462_vm2, %v4339_v18, 0.0  ;;  %v1207_v18 = vld [vmem:[#allocation3 + $0x48] sm:$0xff] }
 0x368   : > { %v1171_v28 = vpop.permute.xlu1 %1170 }
 0x369   : > { %v1180_v2 = vsub.f32 %v4159_v19, %v1171_v28  ;;  %v1532_v19 = vsel %vm462_vm2, %v4395_v7, -inf }
 0x36a   : > { %2121 = vadd.xlane.f32.xlu1 %v2120_v25  ;;  %2127 = vadd.xlane.f32.xlu2 %v2126_v49  ;;  %v1498_v25 = vpop.f32.mrf.mxu1 }
 0x36b   : > { %v1195_v9 = vmul.f32 1.442695, %v1180_v2  ;;  %v4430_v2 = vsel %vm3693_vm8, %v1506_v20, -1e+30  ;;  %v2253_v20 = vpop.f32.mrf.mxu2 }
 0x36c   : > { %v1541_v38 = vsel %vm462_vm2, %v4430_v2, -inf }
 0x36d   : > { %3196 = vpow2.f32 %v1195_v9  ;;  %v783_v9 = vld [vmem:[#allocation3 + $0x30] sm:$0xff] }
 0x372   : > { %2130 = vadd.xlane.f32.xlu1 %v2129_v58  ;;  %1533 = vmax.xlane.f32.xlu2 %v1532_v19  ;;  %v1508_v58 = vmul.f32 0.25, %v1498_v25  ;;  %v4974_v19 = vld [vmem:[#allocation15_spill] sm:$0xff] }
 0x373   : > { %v3197_v45 = vpop.eup %3196  ;;  %v4452_v25 = vpop.permute.xlu1 %1307 }
 0x374   : > { %v1204_v4 = vsel %vm3779_vm10, %v3197_v45, 0.0  ;;  %v2008_v45 = vsub.f32 %v4975_v17, %v3945_v1  ;;  %v4444_v52 = vsel %vm3779_vm10, %v1508_v58, -1e+30  ;;  %v1206_v1 = vld [vmem:[#allocation3 + $0x40] sm:$0xff] }
 0x375   : > { %v1243_v12 = vsel %vm462_vm2, %v1204_v4, 0.0  ;;  %v1321_v3 = vpack.c.bf16 %v1204_v4, %v1203_v29  ;;  %v784_v29 = vld [vmem:[#allocation3 + $0x38] sm:$0xff] }
 0x376   : > { %1244 = vadd.xlane.f32.xlu0 %v1243_v12  ;;  %v792_v28 = vmul.f32 %v4066_v61, %v784_v29  ;;  %v791_v61 = vmul.f32 %v4974_v19, %v783_v9  ;;  %v1547_v29 = vsel %vm462_vm2, %v4444_v52, -inf }
 0x377   : > { %2970 = vmatmul.msk.bf16.gmra.mxu3 %vm462_vm2, %v1321_v3  ;;  %v1215_v3 = vmul.f32 %v4212_v39, %v1207_v18  ;;  %v1210_v39 = vld [vmem:[#allocation3 + $0x60] sm:$0xff]  ;;  %v1209_v18 = vld [vmem:[#allocation3 + $0x58] sm:$0xff] }
 0x378   : > { %v4439_v4 = vpop.f32.mrf.mxu3  ;;  %v1217_v17 = vmul.f32 %v4199_v44, %v1209_v18 }
 0x37a   : > { %1536 = vmax.xlane.f32.xlu1 %v1535_v59 }
 0x37e   : > { %1530 = vmax.xlane.f32.xlu0 %v1529_v26 }
 0x380   : > { %v1357_v9 = vpop.f32.mrf.mxu3 }
 0x382   : > { %2136 = vadd.xlane.f32.xlu1 %v2135_v23  ;;  %v2017_v23 = vmul.f32 1.442695, %v2008_v45 }
 0x384   : > { %3198 = vpow2.f32 %v2017_v23 }
 0x386   : > { %2133 = vadd.xlane.f32.xlu0 %v2132_v30  ;;  %v1214_v30 = vmul.f32 %v4069_v56, %v1206_v1  ;;  %v1208_v56 = vld [vmem:[#allocation3 + $0x50] sm:$0xff]  ;;  %v1211_v1 = vld [vmem:[#allocation3 + $0x68] sm:$0xff] }
 0x387   : > { %v816_v49 = vpop.xlane.xlu0 %815 }
 0x388   : > { %v824_v15 = vadd.f32 %v816_v49, %v792_v28 }
 0x38a   : > { %833 = vst.msk [vmem:[#allocation3 + $0x38] sm:$0xff] %vm397_vm5, %v824_v15  ;;  %2068 = vperm.xlu2 %3119, %v4273_v43   ;;  %1542 = vmax.xlane.f32.xlu1 %v1541_v38  ;;  %v1218_v15 = vmul.f32 %v4217_v6, %v1210_v39  ;;  %v3199_v19 = vpop.eup %3198  ;;  %v1216_v6 = vmul.f32 %v4190_v22, %v1208_v56  ;;  %v1505_v22 = vmul.f32 0.25, %v4386_v31  ;;  %v4976_v39 = vld [vmem:[#allocation9_spill] sm:$0xff] }
 0x38c   : > { %v4470_v44 = vsel %vm3663_vm7, %v1505_v22, -1e+30 }
 0x38d   : > { %v813_v41 = vpop.xlane.xlu2 %812 }
 0x38e   : > { %v823_v12 = vadd.f32 %v813_v41, %v791_v61  ;;  %v2105_v61 = vld [vmem:[#allocation3 + $0xc8] sm:$0xff] }
 0x38f   : > { %v1227_v59 = vpop.xlane.xlu0 %1226 }
 0x390   : > { %832 = vst.msk [vmem:[#allocation3 + $0x30] sm:$0xff] %vm397_vm5, %v823_v12  ;;  %v1247_v26 = vadd.f32 %v1227_v59, %v1215_v3  ;;  %v2113_v3 = vmul.f32 %v3199_v19, %v2105_v61 }
 0x392   : > { %1255 = vst.msk [vmem:[#allocation3 + $0x48] sm:$0xff] %vm397_vm5, %v1247_v26  ;;  %2281 = vrot.lane.b32.xlu2 %v2253_v20, %s3404_s16  ;;  %1548 = vmax.xlane.f32.xlu1 %v1547_v29 }
 0x395   : > { %v1224_v28 = vpop.xlane.xlu2 %1223  ;;  %v4461_v23 = vpop.f32.mrf.mxu3 }
 0x396   : > { %v1246_v49 = vadd.f32 %v1224_v28, %v1214_v30  ;;  %v2007_v30 = vsub.f32 %v4976_v39, %v3938_v40  ;;  %v4977_v28 = vld [vmem:[#allocation14_spill] sm:$0xff] }
 0x397   : > { %v1236_v38 = vpop.xlane.xlu0 %1235 }
 0x398   : > { %1254 = vst.msk [vmem:[#allocation3 + $0x40] sm:$0xff] %vm397_vm5, %v1246_v49  ;;  %v1250_v58 = vadd.f32 %v1236_v38, %v1218_v15  ;;  %v2009_v49 = vsub.f32 %v4977_v28, %v4013_v27  ;;  %v1538_v15 = vsel %vm462_vm2, %v4470_v44, -inf  ;;  %v1507_v38 = vmul.f32 0.25, %v4415_v55  ;;  %v4978_v27 = vld [vmem:[#allocation16_spill] sm:$0xff] }
 0x399   : > { %v2010_v61 = vsub.f32 %v4978_v27, %v4034_v8  ;;  %v2106_v8 = vld [vmem:[#allocation3 + $0xd0] sm:$0xff]  ;;  %v1213_v27 = vld [vmem:[#allocation3 + $0x78] sm:$0xff] }
 0x39a   : > { %1258 = vst.msk [vmem:[#allocation3 + $0x60] sm:$0xff] %vm397_vm5, %v1250_v58  ;;  %1385 = vrot.lane.b32.xlu2 %v1357_v9, %s3405_s17  ;;  %2063 = vperm.xlu0 %3120, %v4126_v11   ;;  %v1219_v9 = vmul.f32 %v4277_v33, %v1211_v1  ;;  %v2015_v58 = vmul.f32 1.442695, %v2007_v30  ;;  %v2019_v56 = vmul.f32 1.442695, %v2009_v49  ;;  %v1518_v33 = vld [vmem:[#allocation2 + $0x80] sm:$0xff] }
 0x39b   : > { %v4483_v40 = vsel %vm3747_vm9, %v1507_v38, -1e+30 }
 0x39c   : > { %3200 = vpow2.f32 %v2015_v58  ;;  %v1544_v55 = vsel %vm462_vm2, %v4483_v40, -inf  ;;  %v4506_v58 = vld [vmem:[#allocation2 + $0x90] sm:$0xff] }
 0x39d   : > { %v1233_v45 = vpop.xlane.xlu2 %1232  ;;  %v1362_v29 = vpop.f32.mrf.mxu3  ;;  %3202 = vpow2.f32 %v2019_v56 }
 0x39e   : > { %v1249_v41 = vadd.f32 %v1233_v45, %v1217_v17  ;;  %v1230_v12 = vpop.xlane.xlu1 %1229 }
 0x39f   : > { %v1248_v59 = vadd.f32 %v1230_v12, %v1216_v6  ;;  %v2125_v26 = vpop.xlane.xlu0 %2124 }
 0x3a0   : > { %1257 = vst.msk [vmem:[#allocation3 + $0x58] sm:$0xff] %vm397_vm5, %v1249_v41  ;;  %v2145_v20 = vadd.f32 %v2125_v26, %v2113_v3  ;;  %v2021_v3 = vmul.f32 1.442695, %v2010_v61 }
 0x3a1   : > { %1256 = vst.msk [vmem:[#allocation3 + $0x50] sm:$0xff] %vm397_vm5, %v1248_v59 }
 0x3a2   : > { %2153 = vst.msk [vmem:[#allocation3 + $0xc8] sm:$0xff] %vm397_vm5, %v2145_v20  ;;  %2175 = vperm.xlu0 %3120, %v3199_v19   ;;  %v1212_v19 = vld [vmem:[#allocation3 + $0x70] sm:$0xff]  ;;  %v4490_v59 = vpop.eup %3200  ;;  %3204 = vpow2.f32 %v2021_v3  ;;  %v4980_v3 = vsub.f32 %v4100_v51, %v4104_v60 }
 0x3a3   : > { %v1220_v17 = vmul.f32 %v4266_v34, %v1212_v19  ;;  %v4493_v20 = vpop.eup %3202 }
 0x3a4   : > { %v2114_v34 = vmul.f32 %v4493_v20, %v2106_v8 }
 0x3a8   : > { %v4500_v38 = vpop.eup %3204 }
 0x3ab   : > { %1389 = vrot.lane.b32.xlu1 %v1362_v29, %s3405_s17  ;;  %v2104_v29 = vld [vmem:[#allocation3 + $0xc0] sm:$0xff] }
 0x3ac   : > { %v2112_v1 = vmul.f32 %v4490_v59, %v2104_v29  ;;  %v1519_v29 = vld [vmem:[#allocation2 + $0x88] sm:$0xff] }
 0x3cc   : > { %1539 = vmax.xlane.f32.xlu0 %v1538_v15 }
 0x3cd   : > { %v1239_v31 = vpop.xlane.xlu1 %1238 }
 0x3ce   : > { %v1251_v18 = vadd.f32 %v1239_v31, %v1219_v9  ;;  %v2107_v9 = vld [vmem:[#allocation3 + $0xd8] sm:$0xff] }
 0x3d0   : > { %1259 = vst.msk [vmem:[#allocation3 + $0x68] sm:$0xff] %vm397_vm5, %v1251_v18  ;;  %v2115_v18 = vmul.f32 %v4500_v38, %v2107_v9 }
 0x3d4   : > { %1545 = vmax.xlane.f32.xlu0 %v1544_v55 }
 0x3d5   : > { %v1242_v45 = vpop.xlane.xlu2 %1241  ;;  %v1528_v6 = vpop.xlane.xlu1 %1527 }
 0x3d6   : > { %v1252_v41 = vadd.f32 %v1242_v45, %v1220_v17  ;;  %v1550_v12 = vmax.f32 %v1518_v33, %v1528_v6  ;;  %v4979_v17 = vsub.f32 %v4197_v62, %v4203_v0  ;;  %v1221_v6 = vmul.f32 %v4300_v14, %v1213_v27  ;;  %v4526_v62 = vld [vmem:[#allocation2 + $0x98] sm:$0xff]  ;;  %v2255_v14 = vpop.f32.mrf.mxu2  ;;  %v4547_v27 = vld [vmem:[#allocation2 + $0xa8] sm:$0xff] }
 0x3d8   : > { %1260 = vst.msk [vmem:[#allocation3 + $0x70] sm:$0xff] %vm397_vm5, %v1252_v41  ;;  %v1558_v26 = vsub.f32 %v1518_v33, %v1550_v12  ;;  %1584 = vperm.xlu2 %3119, %v1550_v12   ;;  %v2025_v45 = vmul.f32 1.442695, %v4979_v17 }
 0x3d9   : > { %1873 = vst.msk [vmem:[#allocation2 + $0x80] sm:$0xff] %vm397_vm5, %v1550_v12 }
 0x3da   : > { %v1566_v22 = vmul.f32 1.442695, %v1558_v26  ;;  %v2023_v26 = vmul.f32 1.442695, %v4980_v3 }
 0x3dc   : > { %3206 = vpow2.f32 %v1566_v22  ;;  %v2109_v22 = vld [vmem:[#allocation3 + $0xe8] sm:$0xff] }
 0x3dd   : > { %v2128_v39 = vpop.xlane.xlu2 %2127  ;;  %v2122_v30 = vpop.xlane.xlu1 %2121  ;;  %3208 = vpow2.f32 %v2025_v45 }
 0x3de   : > { %v2146_v28 = vadd.f32 %v2128_v39, %v2114_v34  ;;  %v2144_v49 = vadd.f32 %v2122_v30, %v2112_v1  ;;  %v1365_v15 = vpop.f32.mrf.mxu3  ;;  %3210 = vpow2.f32 %v2023_v26 }
 0x3e0   : > { %2154 = vst.msk [vmem:[#allocation3 + $0xd0] sm:$0xff] %vm397_vm5, %v2146_v28  ;;  %1391 = vrot.lane.b32.xlu2 %v1365_v15, %s3405_s17 }
 0x3e1   : > { %2152 = vst.msk [vmem:[#allocation3 + $0xc0] sm:$0xff] %vm397_vm5, %v2144_v49  ;;  %v2108_v49 = vld [vmem:[#allocation3 + $0xe0] sm:$0xff] }
 0x3e2   : > { %v4503_v31 = vpop.eup %3206 }
 0x3e3   : > { %1721 = vperm.xlu1 %3121, %v4503_v31   ;;  %v4535_v51 = vpop.eup %3208 }
 0x3e4   : > { %v2117_v1 = vmul.f32 %v4535_v51, %v2109_v22  ;;  %v4539_v39 = vpop.eup %3210 }
 0x3e5   : > { %v1534_v56 = vpop.xlane.xlu2 %1533  ;;  %v2131_v19 = vpop.xlane.xlu1 %2130  ;;  %v2116_v9 = vmul.f32 %v4539_v39, %v2108_v49  ;;  %v4982_v49 = vld [vmem:[#allocation13_spill] sm:$0xff] }
 0x3e6   : > { %v4510_v61 = vmax.f32 %v4506_v58, %v1534_v56  ;;  %v2147_v55 = vadd.f32 %v2131_v19, %v2115_v18  ;;  %v1367_v33 = vpop.f32.mrf.mxu3  ;;  %v1263_v19 = vld [vmem:[#allocation4 + $0x8] sm:$0xff] }
 0x3e8   : > { %1875 = vst.msk [vmem:[#allocation2 + $0x90] sm:$0xff] %vm397_vm5, %v4510_v61  ;;  %1383 = vrot.lane.b32.xlu0 %v4439_v4, %s3405_s17  ;;  %1393 = vrot.lane.b32.xlu2 %v1367_v33, %s3405_s17  ;;  %v4981_v33 = vld [vmem:[#allocation19_spill] sm:$0xff] }
 0x3e9   : > { %2155 = vst.msk [vmem:[#allocation3 + $0xd8] sm:$0xff] %vm397_vm5, %v2147_v55  ;;  %v1245_v41 = vpop.xlane.xlu0 %1244  ;;  %v1311_v55 = vmul.f32 %v4357_v10, %v1263_v19  ;;  %v4558_v10 = vld [vmem:[#allocation2 + $0xb8] sm:$0xff] }
 0x3ea   : > { %v1253_v12 = vadd.f32 %v1245_v41, %v1221_v6 }
 0x3eb   : > { %1594 = vperm.xlu1 %3121, %v4510_v61  }
 0x3ec   : > { %1261 = vst.msk [vmem:[#allocation3 + $0x78] sm:$0xff] %vm397_vm5, %v1253_v12 }
 0x3ed   : > { %v2069_v0 = vpop.permute.xlu2 %2068  ;;  %v1537_v4 = vpop.xlane.xlu1 %1536 }
 0x3ee   : > { %v4530_v8 = vmax.f32 %v4526_v62, %v1537_v4  ;;  %v2078_v17 = vsub.f32 %v4981_v33, %v2069_v0  ;;  %v2342_v4 = vld [vmem:[#allocation3 + $0x8] sm:$0xff]  ;;  %v1560_v33 = vsub.f32 %v4506_v58, %v4510_v61 }
 0x3f0   : > { %1876 = vst.msk [vmem:[#allocation2 + $0x98] sm:$0xff] %vm397_vm5, %v4530_v8  ;;  %2283 = vrot.lane.b32.xlu0 %v2255_v14, %s3404_s16  ;;  %v2093_v3 = vmul.f32 1.442695, %v2078_v17  ;;  %v1561_v58 = vsub.f32 %v4526_v62, %v4530_v8 }
 0x3f1   : > { %v1531_v60 = vpop.xlane.xlu0 %1530 }
 0x3f2   : > { %v1551_v34 = vmax.f32 %v1519_v29, %v1531_v60 }
 0x3f4   : > { %1874 = vst.msk [vmem:[#allocation2 + $0x88] sm:$0xff] %vm397_vm5, %v1551_v34  ;;  %v1559_v60 = vsub.f32 %v1519_v29, %v1551_v34 }
 0x3f5   : > { %v4541_v30 = vpop.permute.xlu2 %2281  ;;  %v2137_v28 = vpop.xlane.xlu1 %2136 }
 0x3f6   : > { %v2149_v15 = vadd.f32 %v2137_v28, %v2117_v1  ;;  %v1568_v1 = vmul.f32 1.442695, %v1559_v60 }
 0x3f8   : > { %2157 = vst.msk [vmem:[#allocation3 + $0xe8] sm:$0xff] %vm397_vm5, %v2149_v15  ;;  %1387 = vrot.lane.b32.xlu0 %v4461_v23, %s3405_s17  ;;  %v2341_v23 = vld [vmem:[#allocation3] sm:$0xff] }
 0x3f9   : > { %v2134_v18 = vpop.xlane.xlu0 %2133  ;;  %3212 = vrcp.f32 %v2341_v23  ;;  %v1570_v23 = vmul.f32 1.442695, %v1560_v33 }
 0x3fa   : > { %v2148_v56 = vadd.f32 %v2134_v18, %v2116_v9  ;;  %3214 = vpow2.f32 %v2093_v3 }
 0x3fb   : > { %3216 = vrcp.f32 %v2342_v4  ;;  %v1370_v4 = vpop.f32.mrf.mxu3 }
 0x3fc   : > { %2156 = vst.msk [vmem:[#allocation3 + $0xe0] sm:$0xff] %vm397_vm5, %v2148_v56  ;;  %3218 = vpow2.f32 %v1568_v1 }
 0x3fd   : > { %v1386_v45 = vpop.permute.xlu2 %1385  ;;  %v1543_v6 = vpop.xlane.xlu1 %1542 }
 0x3fe   : > { %v1408_v41 = vadd.f32 %v1386_v45, %v1311_v55  ;;  %v4553_v12 = vmax.f32 %v4547_v27, %v1543_v6  ;;  %v1265_v6 = vld [vmem:[#allocation4 + $0x18] sm:$0xff] }
 0x3ff   : > { %v3213_v14 = vpop.eup %3212 }
 0x400   : > { %1417 = vst.msk [vmem:[#allocation4 + $0x8] sm:$0xff] %vm1415_vm11, %v1408_v41  ;;  %1589 = vperm.xlu0 %3120, %v1551_v34   ;;  %v3215_v22 = vpop.eup %3214  ;;  %v1313_v41 = vmul.f32 %v4354_v16, %v1265_v6 }
 0x401   : > { %1878 = vst.msk [vmem:[#allocation2 + $0xa8] sm:$0xff] %vm397_vm5, %v4553_v12  ;;  %v2102_v9 = vsel %vm3779_vm10, %v3215_v22, 0.0  ;;  %v3217_v18 = vpop.eup %3216  ;;  %v1563_v22 = vsub.f32 %v4547_v27, %v4553_v12 }
 0x402   : > { %v2141_v19 = vsel %vm462_vm2, %v2102_v9, 0.0  ;;  %v4569_v29 = vpop.eup %3218 }
 0x403   : > { %v1372_v16 = vpop.f32.mrf.mxu3  ;;  %v1576_v62 = vmul.f32 1.442695, %v1563_v22 }
 0x405   : > { %v1549_v26 = vpop.xlane.xlu1 %1548 }
 0x406   : > { %v4561_v0 = vmax.f32 %v4558_v10, %v1549_v26 }
 0x408   : > { %1880 = vst.msk [vmem:[#allocation2 + $0xb8] sm:$0xff] %vm397_vm5, %v4561_v0  ;;  %2359 = vperm.xlu0 %3120, %v3213_v14   ;;  %v1572_v14 = vmul.f32 1.442695, %v1561_v58 }
 0x40c   : > { %v2064_v28 = vpop.permute.xlu0 %2063 }
 0x40d   : > { %v2077_v15 = vsub.f32 %v4982_v49, %v2064_v28  ;;  %v1266_v49 = vld [vmem:[#allocation4 + $0x20] sm:$0xff] }
 0x40f   : > { %v2091_v56 = vmul.f32 1.442695, %v2077_v15 }
 0x410   : > { %2364 = vperm.xlu0 %3120, %v3217_v18  }
 0x411   : > { %3220 = vpow2.f32 %v2091_v56  ;;  %2142 = vadd.xlane.f32.xlu2 %v2141_v19  ;;  %v1267_v56 = vld [vmem:[#allocation4 + $0x28] sm:$0xff] }
 0x412   : > { %3222 = vpow2.f32 %v1570_v23 }
 0x413   : > { %3224 = vpow2.f32 %v1572_v14  ;;  %v1262_v14 = vld [vmem:[#allocation4] sm:$0xff] }
 0x414   : > { %v4596_v28 = vpop.permute.xlu0 %2175  ;;  %3226 = vpow2.f32 %v1576_v62  ;;  %v1310_v22 = vmul.f32 %v4246_v42, %v1262_v14  ;;  %v2258_v62 = vpop.f32.mrf.mxu2  ;;  %v2343_v42 = vld [vmem:[#allocation3 + $0x10] sm:$0xff] }
 0x417   : > { %v3221_v34 = vpop.eup %3220 }
 0x418   : > { %1726 = vperm.xlu0 %3120, %v4569_v29   ;;  %v2101_v55 = vsel %vm3747_vm9, %v3221_v34, 0.0  ;;  %v4583_v61 = vpop.eup %3222  ;;  %v1315_v34 = vmul.f32 %v4423_v37, %v1267_v56 }
 0x419   : > { %v2138_v17 = vsel %vm462_vm2, %v2101_v55, 0.0  ;;  %v2219_v45 = vpack.c.bf16 %v2102_v9, %v2101_v55  ;;  %v4589_v60 = vpop.eup %3224  ;;  %v1522_v9 = vld [vmem:[#allocation2 + $0xa0] sm:$0xff] }
 0x41a   : > { %2139 = vadd.xlane.f32.xlu1 %v2138_v17  ;;  %v4601_v27 = vpop.eup %3226  ;;  %v1524_v17 = vld [vmem:[#allocation2 + $0xb0] sm:$0xff] }
 0x41b   : > { %2986 = vmatmul.msk.bf16.gmra.mxu2 %vm462_vm2, %v2219_v45 }
 0x41d   : > { %v1390_v3 = vpop.permute.xlu1 %1389 }
 0x41e   : > { %v1410_v26 = vadd.f32 %v1390_v3, %v1313_v41  ;;  %v2407_v41 = vld [vmem:[#allocation3 + $0x48] sm:$0xff] }
 0x420   : > { %1419 = vst.msk [vmem:[#allocation4 + $0x18] sm:$0xff] %vm1415_vm11, %v1410_v26  ;;  %1395 = vrot.lane.b32.xlu0 %v1370_v4, %s3405_s17  ;;  %v2406_v4 = vld [vmem:[#allocation3 + $0x40] sm:$0xff] }
 0x428   : > { %1731 = vperm.xlu0 %3120, %v4583_v61  }
 0x429   : > { %2170 = vperm.xlu2 %3119, %v4490_v59   ;;  %v1314_v59 = vmul.f32 %v4361_v35, %v1266_v49 }
 0x430   : > { %1397 = vrot.lane.b32.xlu0 %v1372_v16, %s3405_s17  ;;  %v2344_v16 = vld [vmem:[#allocation3 + $0x18] sm:$0xff] }
 0x431   : > { %1599 = vperm.xlu2 %3119, %v4530_v8  }
 0x432   : > { %v4593_v1 = vpop.permute.xlu2 %1584 }
 0x433   : > { %1736 = vperm.xlu1 %3121, %v4589_v60  }
 0x439   : > { %1609 = vperm.xlu2 %3119, %v4553_v12  }
 0x43a   : > { %v1392_v15 = vpop.permute.xlu2 %1391 }
 0x43b   : > { %v1411_v8 = vadd.f32 %v1392_v15, %v1314_v59  ;;  %v2536_v15 = vld [vmem:[#allocation3 + $0xc0] sm:$0xff] }
 0x43d   : > { %1420 = vst.msk [vmem:[#allocation4 + $0x20] sm:$0xff] %vm1415_vm11, %v1411_v8 }
 0x43f   : > { %v1540_v18 = vpop.xlane.xlu0 %1539 }
 0x440   : > { %v1554_v19 = vmax.f32 %v1522_v9, %v1540_v18 }
 0x441   : > { %1746 = vperm.xlu2 %3119, %v4601_v27  }
 0x442   : > { %v1562_v55 = vsub.f32 %v1522_v9, %v1554_v19  ;;  %1877 = vst.msk [vmem:[#allocation2 + $0xa0] sm:$0xff] %vm397_vm5, %v1554_v19  ;;  %v1394_v35 = vpop.permute.xlu2 %1393  ;;  %1604 = vperm.xlu0 %3120, %v1554_v19   ;;  %v2539_v9 = vld [vmem:[#allocation3 + $0xd8] sm:$0xff]  ;;  %v2537_v19 = vld [vmem:[#allocation3 + $0xc8] sm:$0xff] }
 0x443   : > { %v1412_v12 = vadd.f32 %v1394_v35, %v1315_v34 }
 0x444   : > { %v1574_v33 = vmul.f32 1.442695, %v1562_v55  ;;  %v1264_v55 = vld [vmem:[#allocation4 + $0x10] sm:$0xff] }
 0x445   : > { %1421 = vst.msk [vmem:[#allocation4 + $0x28] sm:$0xff] %vm1415_vm11, %v1412_v12 }
 0x446   : > { %3228 = vpow2.f32 %v1574_v33 }
 0x447   : > { %v1546_v45 = vpop.xlane.xlu0 %1545  ;;  %3230 = vrcp.f32 %v2407_v41  ;;  %v1622_v41 = vsub.f32 %v4379_v50, %v4593_v1 }
 0x448   : > { %v1556_v6 = vmax.f32 %v1524_v17, %v1546_v45  ;;  %v2409_v45 = vld [vmem:[#allocation3 + $0x58] sm:$0xff] }
 0x44a   : > { %v1564_v23 = vsub.f32 %v1524_v17, %v1556_v6  ;;  %1879 = vst.msk [vmem:[#allocation2 + $0xb0] sm:$0xff] %vm397_vm5, %v1556_v6  ;;  %1614 = vperm.xlu1 %3121, %v1556_v6  }
 0x44c   : > { %v4608_v37 = vpop.eup %3228  ;;  %v1578_v3 = vmul.f32 1.442695, %v1564_v23  ;;  %v1630_v23 = vmul.f32 1.442695, %v1622_v41 }
 0x44d   : > { %1741 = vperm.xlu0 %3120, %v4608_v37   ;;  %v3231_v26 = vpop.eup %3230 }
 0x44e   : > { %3232 = vpow2.f32 %v1578_v3  ;;  %v2014_v3 = vsub.f32 %v4269_v48, %v4273_v43 }
 0x44f   : > { %3234 = vrcp.f32 %v2406_v4  ;;  %v2408_v4 = vld [vmem:[#allocation3 + $0x50] sm:$0xff] }
 0x450   : > { %3236 = vrcp.f32 %v2344_v16  ;;  %v2029_v50 = vmul.f32 1.442695, %v2014_v3 }
 0x451   : > { %3238 = vrcp.f32 %v2536_v15 }
 0x452   : > { %2429 = vperm.xlu1 %3121, %v3231_v26   ;;  %3240 = vrcp.f32 %v2539_v9 }
 0x453   : > { %3242 = vrcp.f32 %v2343_v42  ;;  %v2111_v42 = vld [vmem:[#allocation3 + $0xf8] sm:$0xff] }
 0x454   : > { %v4611_v58 = vpop.eup %3232  ;;  %3244 = vrcp.f32 %v2537_v19 }
 0x455   : > { %1751 = vperm.xlu2 %3119, %v4611_v58   ;;  %1619 = vperm.xlu0 %3120, %v4561_v0   ;;  %v3235_v8 = vpop.eup %3234  ;;  %3246 = vrcp.f32 %v2409_v45  ;;  %v4634_v43 = vpop.permute.xlu1 %1721 }
 0x456   : > { %v3237_v18 = vpop.eup %3236  ;;  %3248 = vpow2.f32 %v1630_v23  ;;  %v1268_v23 = vld [vmem:[#allocation4 + $0x30] sm:$0xff] }
 0x457   : > { %v3239_v34 = vpop.eup %3238  ;;  %3250 = vrcp.f32 %v2408_v4 }
 0x458   : > { %v3241_v35 = vpop.eup %3240 }
 0x459   : > { %v3243_v33 = vpop.eup %3242 }
 0x45a   : > { %v1384_v49 = vpop.permute.xlu0 %1383  ;;  %2185 = vperm.xlu1 %3121, %v4500_v38   ;;  %v2260_v38 = vpop.f32.mrf.mxu2 }
 0x45b   : > { %v1407_v59 = vadd.f32 %v1384_v49, %v1310_v22  ;;  %v3245_v6 = vpop.eup %3244  ;;  %v4983_v49 = vld [vmem:[#allocation18_spill] sm:$0xff] }
 0x45c   : > { %v3247_v14 = vpop.eup %3246  ;;  %v2013_v48 = vsub.f32 %v4983_v49, %v4126_v11 }
 0x45d   : > { %1416 = vst.msk [vmem:[#allocation4] sm:$0xff] %vm1415_vm11, %v1407_v59  ;;  %2180 = vperm.xlu2 %3119, %v4493_v20   ;;  %2424 = vperm.xlu0 %3120, %v3235_v8   ;;  %v1312_v20 = vmul.f32 %v4352_v36, %v1264_v55  ;;  %v3249_v22 = vpop.eup %3248  ;;  %v1595_v55 = vpop.permute.xlu1 %1594 }
 0x45e   : > { %v1646_v15 = vsel %vm3574_vm1, %v3249_v22, 0.0  ;;  %v2027_v8 = vmul.f32 1.442695, %v2013_v48  ;;  %v1624_v41 = vsub.f32 %v4395_v7, %v1595_v55  ;;  %v1269_v48 = vld [vmem:[#allocation4 + $0x38] sm:$0xff] }
 0x45f   : > { %v1671_v49 = vsel %vm462_vm2, %v1646_v15, 0.0 }
 0x462   : > { %v4619_v56 = vpop.permute.xlu0 %2283  ;;  %2374 = vperm.xlu1 %3121, %v3237_v18   ;;  %v2263_v19 = vpop.f32.mrf.mxu2 }
 0x465   : > { %2287 = vrot.lane.b32.xlu2 %v2260_v38, %s3404_s16  ;;  %2554 = vperm.xlu0 %3120, %v3239_v34  }
 0x46a   : > { %v1388_v12 = vpop.permute.xlu0 %1387  ;;  %2569 = vperm.xlu1 %3121, %v3241_v35   ;;  %v2110_v35 = vld [vmem:[#allocation3 + $0xf0] sm:$0xff] }
 0x46b   : > { %v1409_v17 = vadd.f32 %v1388_v12, %v1312_v20  ;;  %v2265_v12 = vpop.f32.mrf.mxu2 }
 0x46d   : > { %1418 = vst.msk [vmem:[#allocation4 + $0x10] sm:$0xff] %vm1415_vm11, %v1409_v17  ;;  %2369 = vperm.xlu2 %3119, %v3243_v33   ;;  %2559 = vperm.xlu0 %3120, %v3245_v6  }
 0x472   : > { %v1590_v26 = vpop.permute.xlu0 %1589 }
 0x473   : > { %v1623_v36 = vsub.f32 %v4413_v21, %v1590_v26  ;;  %v3251_v21 = vpop.eup %3250  ;;  %v1634_v26 = vmul.f32 1.442695, %v1624_v41 }
 0x475   : > { %v1632_v16 = vmul.f32 1.442695, %v1623_v36  ;;  %2439 = vperm.xlu2 %3119, %v3247_v14   ;;  %2285 = vrot.lane.b32.xlu0 %v2258_v62, %s3404_s16 }
 0x477   : > { %3252 = vpow2.f32 %v1632_v16 }
 0x478   : > { %3254 = vpow2.f32 %v2029_v50 }
 0x479   : > { %3256 = vpow2.f32 %v2027_v8 }
 0x47a   : > { %v4630_v1 = vpop.permute.xlu0 %2359  ;;  %3258 = vpow2.f32 %v1634_v26 }
 0x47d   : > { %v3253_v59 = vpop.eup %3252  ;;  %2434 = vperm.xlu0 %3120, %v3251_v21  }
 0x47e   : > { %v1647_v62 = vsel %vm3589_vm3, %v3253_v59, 0.0  ;;  %v4640_v18 = vpop.eup %3254 }
 0x47f   : > { %v1767_v9 = vpack.c.bf16 %v1647_v62, %v1646_v15  ;;  %v2119_v34 = vmul.f32 %v4640_v18, %v2111_v42  ;;  %v4648_v57 = vpop.eup %3256  ;;  %v1674_v4 = vsel %vm462_vm2, %v1647_v62, 0.0  ;;  %v1317_v62 = vmul.f32 %v4452_v25, %v1269_v48 }
 0x480   : > { %v2118_v17 = vmul.f32 %v4648_v57, %v2110_v35  ;;  %v3259_v22 = vpop.eup %3258 }
 0x481   : > { %2975 = vmatmul.msk.bf16.vlgmr.msra.gmra.mxu3 %vm462_vm2, %v1767_v9  ;;  %v1648_v21 = vsel %vm3608_vm4, %v3259_v22, 0.0 }
 0x482   : > { %v4643_v11 = vpop.permute.xlu0 %2364  ;;  %v1677_v55 = vsel %vm462_vm2, %v1648_v21, 0.0 }
 0x484   : > { %v2143_v38 = vpop.xlane.xlu2 %2142 }
 0x485   : > { %v2151_v47 = vadd.f32 %v2143_v38, %v2119_v34  ;;  %2190 = vperm.xlu0 %3120, %v4539_v39   ;;  %v1316_v39 = vmul.f32 %v4419_v63, %v1268_v23  ;;  %v2538_v34 = vld [vmem:[#allocation3 + $0xd0] sm:$0xff] }
 0x487   : > { %2159 = vst.msk [vmem:[#allocation3 + $0xf8] sm:$0xff] %vm397_vm5, %v2151_v47 }
 0x48a   : > { %v4650_v20 = vpop.permute.xlu0 %1726 }
 0x48c   : > { %v4652_v33 = vpop.permute.xlu2 %2170 }
 0x48d   : > { %v2140_v45 = vpop.xlane.xlu1 %2139  ;;  %2291 = vrot.lane.b32.xlu0 %v2265_v12, %s3404_s16 }
 0x48e   : > { %v2150_v6 = vadd.f32 %v2140_v45, %v2118_v17 }
 0x490   : > { %2158 = vst.msk [vmem:[#allocation3 + $0xf0] sm:$0xff] %vm397_vm5, %v2150_v6 }
 0x492   : > { %v1396_v3 = vpop.permute.xlu0 %1395 }
 0x493   : > { %v1413_v36 = vadd.f32 %v1396_v3, %v1316_v39 }
 0x494   : > { %v1600_v14 = vpop.permute.xlu2 %1599  ;;  %1675 = vadd.xlane.f32.xlu1 %v1674_v4 }
 0x495   : > { %1422 = vst.msk [vmem:[#allocation4 + $0x30] sm:$0xff] %vm1415_vm11, %v1413_v36  ;;  %v1625_v16 = vsub.f32 %v4406_v53, %v1600_v14 }
 0x497   : > { %v1636_v50 = vmul.f32 1.442695, %v1625_v16 }
 0x499   : > { %3260 = vpow2.f32 %v1636_v50 }
 0x49a   : > { %v4662_v7 = vpop.permute.xlu0 %1731  ;;  %3262 = vrcp.f32 %v2538_v34 }
 0x49c   : > { %v1610_v42 = vpop.permute.xlu2 %1609 }
 0x49d   : > { %v1627_v15 = vsub.f32 %v4430_v2, %v1610_v42 }
 0x49e   : > { %1672 = vadd.xlane.f32.xlu2 %v1671_v49 }
 0x49f   : > { %v3261_v63 = vpop.eup %3260  ;;  %v1640_v5 = vmul.f32 1.442695, %v1627_v15 }
 0x4a0   : > { %v1649_v59 = vsel %vm3628_vm6, %v3261_v63, 0.0  ;;  %v3263_v38 = vpop.eup %3262 }
 0x4a1   : > { %v1768_v53 = vpack.c.bf16 %v1649_v59, %v1648_v21  ;;  %3264 = vpow2.f32 %v1640_v5  ;;  %v1680_v46 = vsel %vm462_vm2, %v1649_v59, 0.0 }
 0x4a2   : > { %v1398_v8 = vpop.permute.xlu0 %1397 }
 0x4a3   : > { %v1414_v9 = vadd.f32 %v1398_v8, %v1317_v62  ;;  %2976 = vmatmul.msk.bf16.gmra.mxu3 %vm462_vm2, %v1768_v53  ;;  %v1565_v53 = vsub.f32 %v4558_v10, %v4561_v0  ;;  %v1656_v10 = vld [vmem:[#allocation3 + $0x88] sm:$0xff] }
 0x4a4   : > { %v4698_v50 = vpop.permute.xlu2 %1746 }
 0x4a5   : > { %1423 = vst.msk [vmem:[#allocation4 + $0x38] sm:$0xff] %vm1415_vm11, %v1414_v9  ;;  %v4676_v47 = vpop.permute.xlu1 %1736  ;;  %v1580_v9 = vmul.f32 1.442695, %v1565_v53 }
 0x4a7   : > { %v3265_v12 = vpop.eup %3264 }
 0x4a8   : > { %v1651_v2 = vsel %vm3693_vm8, %v3265_v12, 0.0 }
 0x4ad   : > { %2289 = vrot.lane.b32.xlu1 %v2263_v19, %s3404_s16  ;;  %v1686_v19 = vsel %vm462_vm2, %v1651_v2, 0.0 }
 0x4af   : > { %v4700_v22 = vpop.permute.xlu2 %1751 }
 0x4b4   : > { %v1605_v13 = vpop.permute.xlu0 %1604 }
 0x4b5   : > { %v1626_v25 = vsub.f32 %v4470_v44, %v1605_v13 }
 0x4b6   : > { %2564 = vperm.xlu2 %3119, %v3263_v38  }
 0x4b7   : > { %v1638_v35 = vmul.f32 1.442695, %v1626_v25  ;;  %1678 = vadd.xlane.f32.xlu0 %v1677_v55  ;;  %v4707_v48 = vpop.permute.xlu2 %2180  ;;  %v1664_v25 = vmul.f32 %v4569_v29, %v1656_v10 }
 0x4b9   : > { %3266 = vpow2.f32 %v1638_v35 }
 0x4bc   : > { %v1615_v45 = vpop.permute.xlu1 %1614 }
 0x4bd   : > { %v1628_v23 = vsub.f32 %v4483_v40, %v1615_v45 }
 0x4be   : > { %2195 = vperm.xlu2 %3119, %v4535_v51   ;;  %v2410_v51 = vld [vmem:[#allocation3 + $0x60] sm:$0xff] }
 0x4bf   : > { %v3267_v17 = vpop.eup %3266  ;;  %1687 = vadd.xlane.f32.xlu0 %v1686_v19  ;;  %v4682_v44 = vpop.permute.xlu0 %1741  ;;  %v1642_v39 = vmul.f32 1.442695, %v1628_v23 }
 0x4c0   : > { %v1650_v6 = vsel %vm3663_vm7, %v3267_v17, 0.0  ;;  %v4715_v42 = vpop.permute.xlu2 %2287  ;;  %v1655_v17 = vld [vmem:[#allocation3 + $0x80] sm:$0xff] }
 0x4c1   : > { %v1769_v41 = vpack.c.bf16 %v1651_v2, %v1650_v6  ;;  %3268 = vpow2.f32 %v1642_v39  ;;  %v2541_v2 = vld [vmem:[#allocation3 + $0xe8] sm:$0xff] }
 0x4c2   : > { %3270 = vrcp.f32 %v2410_v51 }
 0x4c3   : > { %2977 = vmatmul.msk.bf16.gmra.mxu3 %vm462_vm2, %v1769_v41 }
 0x4c4   : > { %v4702_v49 = vpop.permute.xlu1 %2429 }
 0x4c7   : > { %v1620_v32 = vpop.permute.xlu0 %1619  ;;  %v3269_v36 = vpop.eup %3268 }
 0x4c8   : > { %v1629_v3 = vsub.f32 %v4444_v52, %v1620_v32  ;;  %v3271_v4 = vpop.eup %3270  ;;  %v1652_v24 = vsel %vm3747_vm9, %v3269_v36, 0.0  ;;  %v1683_v52 = vsel %vm462_vm2, %v1650_v6, 0.0  ;;  %v4723_v5 = vpop.permute.xlu2 %2369  ;;  %v1663_v6 = vmul.f32 %v4503_v31, %v1655_v17  ;;  %v1657_v36 = vld [vmem:[#allocation3 + $0x90] sm:$0xff] }
 0x4c9   : > { %v1689_v31 = vsel %vm462_vm2, %v1652_v24, 0.0 }
 0x4ca   : > { %v1644_v26 = vmul.f32 1.442695, %v1629_v3 }
 0x4cc   : > { %3272 = vpow2.f32 %v1644_v26  ;;  %v4709_v21 = vpop.permute.xlu1 %2185 }
 0x4cd   : > { %3274 = vrcp.f32 %v2346_v54 }
 0x4ce   : > { %3276 = vpow2.f32 %v1580_v9 }
 0x4cf   : > { %v4704_v63 = vpop.permute.xlu0 %2424  ;;  %3278 = vrcp.f32 %v2541_v2 }
 0x4d0   : > { %v4732_v12 = vpop.permute.xlu2 %2439 }
 0x4d2   : > { %v3273_v14 = vpop.eup %3272 }
 0x4d3   : > { %2444 = vperm.xlu0 %3120, %v3271_v4   ;;  %v4693_v40 = vsel %vm3779_vm10, %v3273_v14, 0.0  ;;  %v3275_v62 = vpop.eup %3274  ;;  %v1665_v4 = vmul.f32 %v4583_v61, %v1657_v36 }
 0x4d4   : > { %v1770_v16 = vpack.c.bf16 %v4693_v40, %v1652_v24  ;;  %v4717_v15 = vpop.permute.xlu1 %2374  ;;  %v4721_v34 = vpop.eup %3276 }
 0x4d5   : > { %v3279_v29 = vpop.eup %3278 }
 0x4d6   : > { %2978 = vmatmul.msk.bf16.gmra.mxu3 %vm462_vm2, %v1770_v16 }
 0x4d7   : > { %1684 = vadd.xlane.f32.xlu1 %v1683_v52  ;;  %v4713_v8 = vpop.permute.xlu0 %2554  ;;  %v1660_v52 = vld [vmem:[#allocation3 + $0xa8] sm:$0xff] }
 0x4d8   : > { %v1668_v54 = vmul.f32 %v4601_v27, %v1660_v52  ;;  %v2347_v52 = vld [vmem:[#allocation3 + $0x30] sm:$0xff] }
 0x4dc   : > { %v4725_v13 = vpop.permute.xlu1 %2569 }
 0x4df   : > { %v4719_v59 = vpop.permute.xlu0 %2559 }
 0x4e7   : > { %1681 = vadd.xlane.f32.xlu2 %v1680_v46  ;;  %v4728_v0 = vpop.permute.xlu0 %2285  ;;  %v1692_v46 = vsel %vm462_vm2, %v4693_v40, 0.0 }
 0x4ef   : > { %v4736_v45 = vpop.permute.xlu0 %2434 }
 0x4f0   : > { %2384 = vperm.xlu1 %3121, %v3275_v62  }
 0x4f7   : > { %v4740_v3 = vpop.permute.xlu0 %2190 }
 0x4ff   : > { %1756 = vperm.xlu2 %3119, %v4721_v34   ;;  %v4742_v51 = vpop.permute.xlu0 %2291 }
 0x504   : > { %v1804_v38 = vpop.f32.mrf.mxu3 }
 0x505   : > { %1832 = vrot.lane.b32.xlu0 %v1804_v38, %s3406_s18  ;;  %v1659_v38 = vld [vmem:[#allocation3 + $0xa0] sm:$0xff] }
 0x506   : > { %v1667_v27 = vmul.f32 %v4608_v37, %v1659_v38 }
 0x507   : > { %v1676_v55 = vpop.xlane.xlu1 %1675 }
 0x508   : > { %v1696_v35 = vadd.f32 %v1676_v55, %v1664_v25  ;;  %v2345_v25 = vld [vmem:[#allocation3 + $0x20] sm:$0xff] }
 0x50a   : > { %1704 = vst.msk [vmem:[#allocation3 + $0x88] sm:$0xff] %vm397_vm5, %v1696_v35 }
 0x50c   : > { %v1806_v19 = vpop.f32.mrf.mxu3 }
 0x50d   : > { %1834 = vrot.lane.b32.xlu1 %v1806_v19, %s3406_s18  ;;  %v2411_v19 = vld [vmem:[#allocation3 + $0x68] sm:$0xff] }
 0x511   : > { %v1673_v41 = vpop.xlane.xlu2 %1672  ;;  %v2472_v23 = vld [vmem:[#allocation3 + $0x88] sm:$0xff] }
 0x512   : > { %v1695_v39 = vadd.f32 %v1673_v41, %v1663_v6  ;;  %3280 = vrcp.f32 %v2472_v23  ;;  %v1658_v23 = vld [vmem:[#allocation3 + $0x98] sm:$0xff] }
 0x513   : > { %v1666_v37 = vmul.f32 %v4589_v60, %v1658_v23  ;;  %v2268_v60 = vpop.f32.mrf.mxu2  ;;  %v1712_v23 = vld [vmem:[#allocation4 + $0x8] sm:$0xff] }
 0x514   : > { %1703 = vst.msk [vmem:[#allocation3 + $0x80] sm:$0xff] %vm397_vm5, %v1695_v39  ;;  %v2540_v39 = vld [vmem:[#allocation3 + $0xe0] sm:$0xff] }
 0x515   : > { %2579 = vperm.xlu1 %3121, %v3279_v29  }
 0x518   : > { %v3281_v32 = vpop.eup %3280 }
 0x519   : > { %2494 = vperm.xlu0 %3120, %v3281_v32   ;;  %v4754_v35 = vpop.permute.xlu2 %2564 }
 0x51b   : > { %v2471_v61 = vld [vmem:[#allocation3 + $0x80] sm:$0xff] }
 0x51f   : > { %v4752_v10 = vpop.permute.xlu1 %2289 }
 0x521   : > { %v4758_v6 = vpop.permute.xlu2 %2195 }
 0x526   : > { %v1809_v26 = vpop.f32.mrf.mxu3 }
 0x527   : > { %1836 = vrot.lane.b32.xlu0 %v1809_v26, %s3406_s18 }
 0x528   : > { %1690 = vadd.xlane.f32.xlu2 %v1689_v31 }
 0x52a   : > { %v1679_v14 = vpop.xlane.xlu0 %1678 }
 0x52b   : > { %v1697_v16 = vadd.f32 %v1679_v14, %v1665_v4 }
 0x52d   : > { %1705 = vst.msk [vmem:[#allocation3 + $0x90] sm:$0xff] %vm397_vm5, %v1697_v16 }
 0x52e   : > { %v1811_v32 = vpop.f32.mrf.mxu3 }
 0x530   : > { %1693 = vadd.xlane.f32.xlu2 %v1692_v46 }
 0x532   : > { %v1688_v62 = vpop.xlane.xlu0 %1687 }
 0x533   : > { %v1700_v53 = vadd.f32 %v1688_v62, %v1668_v54  ;;  %v2413_v62 = vld [vmem:[#allocation3 + $0x78] sm:$0xff] }
 0x534   : > { %v2473_v9 = vld [vmem:[#allocation3 + $0x90] sm:$0xff] }
 0x535   : > { %1708 = vst.msk [vmem:[#allocation3 + $0xa8] sm:$0xff] %vm397_vm5, %v1700_v53  ;;  %3282 = vrcp.f32 %v2473_v9 }
 0x536   : > { %3284 = vrcp.f32 %v2471_v61 }
 0x537   : > { %3286 = vrcp.f32 %v2345_v25  ;;  %v1711_v25 = vld [vmem:[#allocation4] sm:$0xff] }
 0x538   : > { %3288 = vrcp.f32 %v2411_v19 }
 0x53b   : > { %v3283_v24 = vpop.eup %3282 }
 0x53c   : > { %2499 = vperm.xlu1 %3121, %v3283_v24   ;;  %v3285_v55 = vpop.eup %3284  ;;  %v2348_v24 = vld [vmem:[#allocation3 + $0x38] sm:$0xff]  ;;  %v2476_v61 = vld [vmem:[#allocation3 + $0xa8] sm:$0xff] }
 0x53d   : > { %v3287_v17 = vpop.eup %3286 }
 0x53e   : > { %v3289_v29 = vpop.eup %3288 }
 0x545   : > { %v4765_v9 = vpop.permute.xlu0 %2444 }
 0x546   : > { %v1814_v14 = vpop.f32.mrf.mxu3 }
 0x548   : > { %2489 = vperm.xlu2 %3119, %v3285_v55   ;;  %v2542_v55 = vld [vmem:[#allocation3 + $0xf0] sm:$0xff] }
 0x54a   : > { %v1685_v40 = vpop.xlane.xlu1 %1684 }
 0x54b   : > { %v1699_v2 = vadd.f32 %v1685_v40, %v1667_v27 }
 0x54d   : > { %1707 = vst.msk [vmem:[#allocation3 + $0xa0] sm:$0xff] %vm397_vm5, %v1699_v2 }
 0x54e   : > { %v1816_v54 = vpop.f32.mrf.mxu3 }
 0x550   : > { %2379 = vperm.xlu2 %3119, %v3287_v17  }
 0x554   : > { %v2475_v41 = vld [vmem:[#allocation3 + $0xa0] sm:$0xff] }
 0x555   : > { %3290 = vrcp.f32 %v2475_v41 }
 0x556   : > { %3292 = vrcp.f32 %v2540_v39  ;;  %v1760_v39 = vmul.f32 %v4650_v20, %v1712_v23  ;;  %v3028_v20 = vld [vmem:[%s4924_s3 + $0x10] sm:$0xff] }
 0x558   : > { %2449 = vperm.xlu2 %3119, %v3289_v29  }
 0x559   : > { %v1819_v38 = vpop.f32.mrf.mxu3 }
 0x55a   : > { %v1682_v26 = vpop.xlane.xlu2 %1681 }
 0x55b   : > { %v3291_v36 = vpop.eup %3290  ;;  %v1698_v31 = vadd.f32 %v1682_v26, %v1666_v37 }
 0x55c   : > { %2509 = vperm.xlu1 %3121, %v3291_v36   ;;  %v3293_v4 = vpop.eup %3292  ;;  %v3029_v36 = vld [vmem:[%s4924_s3 + $0x18] sm:$0xff] }
 0x55d   : > { %1706 = vst.msk [vmem:[#allocation3 + $0x98] sm:$0xff] %vm397_vm5, %v1698_v31  ;;  %2696 = vmatpush.bf16.msra.mxu1 %v3029_v36 }
 0x560   : > { %2574 = vperm.xlu2 %3119, %v3293_v4  }
 0x561   : > { %2697 = vmatpush.bf16.msra.mxu1 %v3028_v20 }
 0x562   : > { %v4770_v40 = vpop.permute.xlu1 %2384 }
 0x564   : > { %1840 = vrot.lane.b32.xlu1 %v1814_v14, %s3406_s18  ;;  %v2474_v16 = vld [vmem:[#allocation3 + $0x98] sm:$0xff] }
 0x565   : > { %3294 = vrcp.f32 %v2474_v16 }
 0x566   : > { %3296 = vrcp.f32 %v2347_v52 }
 0x567   : > { %3298 = vrcp.f32 %v2413_v62 }
 0x568   : > { %2205 = vperm.xlu2 %3119, %v4640_v18   ;;  %3300 = vrcp.f32 %v2348_v24  ;;  %v1759_v18 = vmul.f32 %v4634_v43, %v1711_v25  ;;  %v2412_v24 = vld [vmem:[#allocation3 + $0x70] sm:$0xff] }
 0x569   : > { %3302 = vrcp.f32 %v2476_v61  ;;  %v2270_v61 = vpop.f32.mrf.mxu2 }
 0x56a   : > { %3304 = vrcp.f32 %v2542_v55 }
 0x56b   : > { %v3295_v46 = vpop.eup %3294  ;;  %3306 = vrcp.f32 %v2412_v24 }
 0x56c   : > { %2504 = vperm.xlu0 %3120, %v3295_v46   ;;  %2293 = vrot.lane.b32.xlu1 %v2268_v60, %s3404_s16  ;;  %v3297_v53 = vpop.eup %3296  ;;  %v1821_v46 = vpop.f32.mrf.mxu3 }
 0x56d   : > { %v3299_v27 = vpop.eup %3298  ;;  %v4795_v60 = vpop.permute.xlu2 %1756 }
 0x56e   : > { %v3301_v17 = vpop.eup %3300 }
 0x56f   : > { %v3303_v41 = vpop.eup %3302 }
 0x570   : > { %2389 = vperm.xlu2 %3119, %v3297_v53   ;;  %v3305_v29 = vpop.eup %3304 }
 0x574   : > { %1838 = vrot.lane.b32.xlu0 %v1811_v32, %s3406_s18  ;;  %1844 = vrot.lane.b32.xlu1 %v1819_v38, %s3406_s18 }
 0x577   : > { %v1833_v2 = vpop.permute.xlu0 %1832 }
 0x578   : > { %v1856_v19 = vadd.f32 %v1833_v2, %v1759_v18  ;;  %2459 = vperm.xlu2 %3119, %v3299_v27   ;;  %v1662_v18 = vld [vmem:[#allocation3 + $0xb8] sm:$0xff] }
 0x579   : > { %v1670_v27 = vmul.f32 %v4721_v34, %v1662_v18  ;;  %v1717_v18 = vld [vmem:[#allocation4 + $0x30] sm:$0xff] }
 0x57a   : > { %1865 = vst.msk [vmem:[#allocation4] sm:$0xff] %vm1864_vm12, %v1856_v19 }
 0x57c   : > { %2394 = vperm.xlu1 %3121, %v3301_v17   ;;  %2514 = vperm.xlu0 %3120, %v3303_v41  }
 0x57f   : > { %v1835_v43 = vpop.permute.xlu1 %1834 }
 0x580   : > { %v1857_v32 = vadd.f32 %v1835_v43, %v1760_v39  ;;  %2584 = vperm.xlu2 %3119, %v3305_v29  }
 0x581   : > { %v2160_v37 = vld [vmem:[#allocation4] sm:$0xff] }
 0x582   : > { %v2208_v26 = vmul.f32 %v4652_v33, %v2160_v37  ;;  %1866 = vst.msk [vmem:[#allocation4 + $0x8] sm:$0xff] %vm1864_vm12, %v1857_v32  ;;  %v3027_v33 = vld [vmem:[%s4924_s3 + $0x8] sm:$0xff] }
 0x583   : > { %2698 = vmatpush.bf16.msra.mxu1 %v3027_v33 }
 0x584   : > { %v2305_v31 = vadd.f32 %v4541_v30, %v2208_v26  ;;  %1842 = vrot.lane.b32.xlu0 %v1816_v54, %s3406_s18  ;;  %v3026_v30 = vld [vmem:[%s4924_s3] sm:$0xff]  ;;  %v1713_v54 = vld [vmem:[#allocation4 + $0x10] sm:$0xff] }
 0x586   : > { %2314 = vst.msk [vmem:[#allocation4] sm:$0xff] %vm2313_vm13, %v2305_v31 }
 0x587   : > { %2699 = vmatpush.bf16.msra.mxu1 %v3026_v30 }
 0x589   : > { %v2161_v4 = vld [vmem:[#allocation4 + $0x8] sm:$0xff] }
 0x58a   : > { %v2209_v14 = vmul.f32 %v4596_v28, %v2161_v4  ;;  %v1661_v28 = vld [vmem:[#allocation3 + $0xb0] sm:$0xff] }
 0x58b   : > { %v2495_v52 = vpop.permute.xlu0 %2494  ;;  %v1669_v53 = vmul.f32 %v4611_v58, %v1661_v28 }
 0x58c   : > { %v2306_v16 = vadd.f32 %v4619_v56, %v2209_v14  ;;  %2200 = vperm.xlu0 %3120, %v4648_v57   ;;  %v1761_v56 = vmul.f32 %v4662_v7, %v1713_v54  ;;  %v3307_v7 = vpop.eup %3306  ;;  %v1715_v54 = vld [vmem:[#allocation4 + $0x20] sm:$0xff] }
 0x58d   : > { %v2333_v43 = vld [vmem:[#allocation4] sm:$0xff]  ;;  %v1763_v28 = vmul.f32 %v4682_v44, %v1715_v54 }
 0x58e   : > { %2315 = vst.msk [vmem:[#allocation4 + $0x8] sm:$0xff] %vm2313_vm13, %v2306_v16  ;;  %v2462_v37 = vmul.f32 %v4704_v63, %v2333_v43  ;;  %v2592_v20 = vmul.f32 %v4713_v8, %v2333_v43  ;;  %v4821_v8 = vpop.permute.xlu1 %2579 }
 0x594   : > { %1846 = vrot.lane.b32.xlu0 %v1821_v46, %s3406_s18 }
 0x595   : > { %v2334_v55 = vld [vmem:[#allocation4 + $0x8] sm:$0xff] }
 0x596   : > { %v2398_v41 = vmul.f32 %v4643_v11, %v2334_v55  ;;  %v2463_v23 = vmul.f32 %v4702_v49, %v2334_v55  ;;  %v2528_v32 = vmul.f32 %v2495_v52, %v2334_v55  ;;  %v2543_v11 = vld [vmem:[#allocation3 + $0xf8] sm:$0xff]  ;;  %v2593_v31 = vmul.f32 %v4719_v59, %v2334_v55 }
 0x598   : > { %v2602_v34 = vsel %vm570_vm0, %v2398_v41, %v2463_v23  ;;  %v1716_v41 = vld [vmem:[#allocation4 + $0x28] sm:$0xff] }
 0x599   : > { %v1837_v62 = vpop.permute.xlu0 %1836 }
 0x59a   : > { %v1858_v57 = vadd.f32 %v1837_v62, %v1761_v56 }
 0x59b   : > { %v1691_v38 = vpop.xlane.xlu2 %1690 }
 0x59c   : > { %1867 = vst.msk [vmem:[#allocation4 + $0x10] sm:$0xff] %vm1864_vm12, %v1858_v57  ;;  %v1701_v25 = vadd.f32 %v1691_v38, %v1669_v53  ;;  %2295 = vrot.lane.b32.xlu0 %v2270_v61, %s3404_s16 }
 0x59e   : > { %1709 = vst.msk [vmem:[#allocation3 + $0xb0] sm:$0xff] %vm397_vm5, %v1701_v25  ;;  %v1714_v25 = vld [vmem:[#allocation4 + $0x18] sm:$0xff] }
 0x59f   : > { %v1762_v55 = vmul.f32 %v4676_v47, %v1714_v25 }
 0x5a3   : > { %v2162_v2 = vld [vmem:[#allocation4 + $0x10] sm:$0xff]  ;;  %v1694_v19 = vpop.xlane.xlu2 %1693 }
 0x5a4   : > { %v2210_v58 = vmul.f32 %v4707_v48, %v2162_v2  ;;  %v1702_v17 = vadd.f32 %v1694_v19, %v1670_v27  ;;  %2454 = vperm.xlu0 %3120, %v3307_v7   ;;  %v2397_v48 = vmul.f32 %v4630_v1, %v2333_v43  ;;  %v1765_v27 = vmul.f32 %v4700_v22, %v1717_v18 }
 0x5a5   : > { %v2477_v39 = vld [vmem:[#allocation3 + $0xb0] sm:$0xff]  ;;  %v1764_v22 = vmul.f32 %v4698_v50, %v1716_v41 }
 0x5a6   : > { %v2307_v29 = vadd.f32 %v4728_v0, %v2210_v58  ;;  %1710 = vst.msk [vmem:[#allocation3 + $0xb8] sm:$0xff] %vm397_vm5, %v1702_v17  ;;  %3308 = vrcp.f32 %v2477_v39  ;;  %v2611_v0 = vsel %vm2609_vm14, %v2602_v34, %v2528_v32  ;;  %v2601_v33 = vsel %vm570_vm0, %v2397_v48, %v2462_v37 }
 0x5a7   : > { %3310 = vrcp.f32 %v2543_v11  ;;  %v2620_v63 = vsel %vm2618_vm15, %v2611_v0, %v2593_v31 }
 0x5a8   : > { %2316 = vst.msk [vmem:[#allocation4 + $0x10] sm:$0xff] %vm2313_vm13, %v2307_v29 }
 0x5ab   : > { %v2490_v26 = vpop.permute.xlu2 %2489 }
 0x5ac   : > { %v3309_v49 = vpop.eup %3308  ;;  %v2527_v36 = vmul.f32 %v2490_v26, %v2333_v43 }
 0x5ad   : > { %2519 = vperm.xlu1 %3121, %v3309_v49   ;;  %v2478_v4 = vld [vmem:[#allocation3 + $0xb8] sm:$0xff]  ;;  %v3311_v30 = vpop.eup %3310 }
 0x5ae   : > { %v2610_v1 = vsel %vm2609_vm14, %v2601_v33, %v2527_v36  ;;  %3312 = vrcp.f32 %v2478_v4  ;;  %v2500_v59 = vpop.permute.xlu1 %2499 }
 0x5af   : > { %v2619_v14 = vsel %vm2618_vm15, %v2610_v1, %v2592_v20  ;;  %v2335_v23 = vld [vmem:[#allocation4 + $0x10] sm:$0xff] }
 0x5b0   : > { %v2627_v16 = vpack.c.bf16 %v2620_v63, %v2619_v14  ;;  %v2399_v32 = vmul.f32 %v4723_v5, %v2335_v23  ;;  %v2464_v34 = vmul.f32 %v4736_v45, %v2335_v23  ;;  %v2529_v48 = vmul.f32 %v2500_v59, %v2335_v23 }
 0x5b1   : > { %v2594_v5 = vmul.f32 %v4754_v35, %v2335_v23 }
 0x5b2   : > { %3003 = vmatmul.msk.bf16.vlgmr.msra.gmra.mxu1 %vm462_vm2, %v2627_v16  ;;  %v1718_v16 = vld [vmem:[#allocation4 + $0x38] sm:$0xff] }
 0x5b3   : > { %v2380_v58 = vpop.permute.xlu2 %2379 }
 0x5b4   : > { %v3313_v52 = vpop.eup %3312 }
 0x5b5   : > { %2589 = vperm.xlu1 %3121, %v3311_v30   ;;  %2524 = vperm.xlu0 %3120, %v3313_v52  }
 0x5bb   : > { %v2450_v39 = vpop.permute.xlu2 %2449 }
 0x5c3   : > { %v2575_v31 = vpop.permute.xlu2 %2574 }
 0x5ce   : > { %v4823_v46 = vpop.permute.xlu1 %2509 }
 0x5d6   : > { %v1841_v56 = vpop.permute.xlu1 %1840 }
 0x5d7   : > { %v1860_v62 = vadd.f32 %v1841_v56, %v1763_v28  ;;  %v2206_v28 = vpop.permute.xlu2 %2205 }
 0x5d9   : > { %1869 = vst.msk [vmem:[#allocation4 + $0x20] sm:$0xff] %vm1864_vm12, %v1860_v62 }
 0x5de   : > { %v2294_v57 = vpop.permute.xlu1 %2293  ;;  %v2505_v53 = vpop.permute.xlu0 %2504 }
 0x5e0   : > { %v2164_v24 = vld [vmem:[#allocation4 + $0x20] sm:$0xff] }
 0x5e1   : > { %v2212_v61 = vmul.f32 %v4740_v3, %v2164_v24 }
 0x5e3   : > { %v2309_v38 = vadd.f32 %v4752_v10, %v2212_v61 }
 0x5e5   : > { %2318 = vst.msk [vmem:[#allocation4 + $0x20] sm:$0xff] %vm2313_vm13, %v2309_v38 }
 0x5e6   : > { %v1845_v44 = vpop.permute.xlu1 %1844  ;;  %v1839_v7 = vpop.permute.xlu0 %1838 }
 0x5e7   : > { %v1862_v2 = vadd.f32 %v1845_v44, %v1765_v27  ;;  %v1859_v19 = vadd.f32 %v1839_v7, %v1762_v55 }
 0x5e9   : > { %1871 = vst.msk [vmem:[#allocation4 + $0x30] sm:$0xff] %vm1864_vm12, %v1862_v2  ;;  %v2390_v2 = vpop.permute.xlu2 %2389 }
 0x5ea   : > { %1868 = vst.msk [vmem:[#allocation4 + $0x18] sm:$0xff] %vm1864_vm12, %v1859_v19 }
 0x5ec   : > { %v2337_v30 = vld [vmem:[#allocation4 + $0x20] sm:$0xff] }
 0x5ed   : > { %v2401_v59 = vmul.f32 %v2380_v58, %v2337_v30  ;;  %v2466_v54 = vmul.f32 %v4765_v9, %v2337_v30  ;;  %v2596_v61 = vmul.f32 %v2575_v31, %v2337_v30 }
 0x5ee   : > { %v2515_v3 = vpop.permute.xlu0 %2514  ;;  %v2395_v19 = vpop.permute.xlu1 %2394 }
 0x5ef   : > { %v2605_v56 = vsel %vm570_vm0, %v2401_v59, %v2466_v54 }
 0x5f0   : > { %v2166_v11 = vld [vmem:[#allocation4 + $0x30] sm:$0xff] }
 0x5f1   : > { %v2163_v17 = vld [vmem:[#allocation4 + $0x18] sm:$0xff] }
 0x5f2   : > { %v2211_v10 = vmul.f32 %v4709_v21, %v2163_v17  ;;  %v2603_v21 = vsel %vm570_vm0, %v2399_v32, %v2464_v34 }
 0x5f3   : > { %v2612_v0 = vsel %vm2609_vm14, %v2603_v21, %v2529_v48 }
 0x5f4   : > { %v2308_v47 = vadd.f32 %v4715_v42, %v2211_v10 }
 0x5f6   : > { %2317 = vst.msk [vmem:[#allocation4 + $0x18] sm:$0xff] %vm2313_vm13, %v2308_v47  ;;  %v1843_v29 = vpop.permute.xlu0 %1842 }
 0x5f7   : > { %v1861_v43 = vadd.f32 %v1843_v29, %v1764_v22 }
 0x5f9   : > { %1870 = vst.msk [vmem:[#allocation4 + $0x28] sm:$0xff] %vm1864_vm12, %v1861_v43 }
 0x5fd   : > { %v2336_v37 = vld [vmem:[#allocation4 + $0x18] sm:$0xff] }
 0x5fe   : > { %v2201_v42 = vpop.permute.xlu0 %2200  ;;  %v2400_v50 = vmul.f32 %v4717_v15, %v2336_v37  ;;  %v2465_v26 = vmul.f32 %v4732_v12, %v2336_v37  ;;  %v2530_v49 = vmul.f32 %v2505_v53, %v2336_v37  ;;  %v2595_v20 = vmul.f32 %v4725_v13, %v2336_v37 }
 0x5ff   : > { %v2214_v36 = vmul.f32 %v2201_v42, %v2166_v11  ;;  %v2621_v15 = vsel %vm2618_vm15, %v2612_v0, %v2594_v5  ;;  %v1766_v13 = vmul.f32 %v4795_v60, %v1718_v16 }
 0x600   : > { %v2165_v45 = vld [vmem:[#allocation4 + $0x28] sm:$0xff]  ;;  %v2604_v33 = vsel %vm570_vm0, %v2400_v50, %v2465_v26  ;;  %v3031_v50 = vld [vmem:[%s3498_s28] sm:$0xff]  }
 0x601   : > { %v2213_v4 = vmul.f32 %v4758_v6, %v2165_v45  ;;  %v2311_v1 = vadd.f32 %v2294_v57, %v2214_v36  ;;  %v2613_v63 = vsel %vm2609_vm14, %v2604_v33, %v2530_v49  ;;  %v3032_v5 = vunpack.c.l.bf16 %v3031_v50 }
 0x602   : > { %v2622_v12 = vsel %vm2618_vm15, %v2613_v63, %v2595_v20  ;;  %v3033_v33 = vunpack.c.h.bf16 %v3031_v50 }
 0x603   : > { %v2310_v14 = vadd.f32 %v4742_v51, %v2213_v4  ;;  %2320 = vst.msk [vmem:[#allocation4 + $0x30] sm:$0xff] %vm2313_vm13, %v2311_v1  ;;  %v2628_v35 = vpack.c.bf16 %v2622_v12, %v2621_v15  ;;  %v2531_v51 = vmul.f32 %v4823_v46, %v2337_v30  ;;  %v3046_v15 = vld [vmem:[%s3498_s28 + $0x8] sm:$0xff]  }
 0x604   : > { %v3036_v12 = vunpack.c.l.bf16 %v3046_v15  ;;  %v3037_v30 = vunpack.c.h.bf16 %v3046_v15 }
 0x605   : > { %2319 = vst.msk [vmem:[#allocation4 + $0x28] sm:$0xff] %vm2313_vm13, %v2310_v14  ;;  %3004 = vmatmul.msk.bf16.gmra.mxu1 %vm462_vm2, %v2628_v35  ;;  %v2614_v24 = vsel %vm2609_vm14, %v2605_v56, %v2531_v51 }
 0x606   : > { %v1847_v6 = vpop.permute.xlu0 %1846  ;;  %v2623_v46 = vsel %vm2618_vm15, %v2614_v24, %v2596_v61  ;;  %v3048_v24 = vld [vmem:[%s3498_s28 + $0x18] sm:$0xff]  }
 0x607   : > { %v1863_v52 = vadd.f32 %v1847_v6, %v1766_v13  ;;  %v3044_v61 = vunpack.c.l.bf16 %v3048_v24 }
 0x609   : > { %1872 = vst.msk [vmem:[#allocation4 + $0x38] sm:$0xff] %vm1864_vm12, %v1863_v52  ;;  %v3047_v52 = vld [vmem:[%s3498_s28 + $0x10] sm:$0xff]  }
 0x60a   : > { %v2339_v17 = vld [vmem:[#allocation4 + $0x30] sm:$0xff]  ;;  %v3040_v54 = vunpack.c.l.bf16 %v3047_v52 }
 0x60b   : > { %v2403_v22 = vmul.f32 %v2390_v2, %v2339_v17 }
 0x60c   : > { %v2338_v62 = vld [vmem:[#allocation4 + $0x28] sm:$0xff] }
 0x60d   : > { %v2402_v57 = vmul.f32 %v4770_v40, %v2338_v62  ;;  %v2467_v60 = vmul.f32 %v2450_v39, %v2338_v62  ;;  %v2532_v53 = vmul.f32 %v2515_v3, %v2338_v62  ;;  %v2597_v38 = vmul.f32 %v4821_v8, %v2338_v62  ;;  %v2460_v8 = vpop.permute.xlu2 %2459 }
 0x60e   : > { %v2296_v44 = vpop.permute.xlu0 %2295  ;;  %v3041_v62 = vunpack.c.h.bf16 %v3047_v52 }
 0x60f   : > { %v2606_v25 = vsel %vm570_vm0, %v2402_v57, %v2467_v60 }
 0x610   : > { %v2167_v9 = vld [vmem:[#allocation4 + $0x38] sm:$0xff]  ;;  %v2615_v18 = vsel %vm2609_vm14, %v2606_v25, %v2532_v53 }
 0x611   : > { %v2215_v55 = vmul.f32 %v2206_v28, %v2167_v9  ;;  %v2624_v27 = vsel %vm2618_vm15, %v2615_v18, %v2597_v38  ;;  %v3045_v18 = vunpack.c.h.bf16 %v3048_v24 }
 0x612   : > { %v2629_v7 = vpack.c.bf16 %v2624_v27, %v2623_v46 }
 0x613   : > { %v2312_v40 = vadd.f32 %v2296_v44, %v2215_v55 }
 0x615   : > { %2321 = vst.msk [vmem:[#allocation4 + $0x38] sm:$0xff] %vm2313_vm13, %v2312_v40  ;;  %3005 = vmatmul.msk.bf16.gmra.mxu1 %vm462_vm2, %v2629_v7  ;;  %v2585_v34 = vpop.permute.xlu2 %2584 }
 0x616   : > { %v2455_v58 = vpop.permute.xlu0 %2454  ;;  %v2598_v11 = vmul.f32 %v2585_v34, %v2339_v17 }
 0x617   : > { %v2468_v41 = vmul.f32 %v2455_v58, %v2339_v17 }
 0x619   : > { %v2607_v29 = vsel %vm570_vm0, %v2403_v22, %v2468_v41 }
 0x61c   : > { %v2340_v10 = vld [vmem:[#allocation4 + $0x38] sm:$0xff] }
 0x61d   : > { %v2404_v23 = vmul.f32 %v2395_v19, %v2340_v10  ;;  %v2469_v39 = vmul.f32 %v2460_v8, %v2340_v10 }
 0x61f   : > { %v2520_v3 = vpop.permute.xlu1 %2519  ;;  %v2608_v42 = vsel %vm570_vm0, %v2404_v23, %v2469_v39  ;;  %vm2729_vm0 = vcmask 519168  }
 0x620   : > { %v2533_v47 = vmul.f32 %v2520_v3, %v2339_v17 }
 0x622   : > { %v2616_v48 = vsel %vm2609_vm14, %v2607_v29, %v2533_v47 }
 0x623   : > { %v2625_v49 = vsel %vm2618_vm15, %v2616_v48, %v2598_v11 }
 0x627   : > { %v2590_v43 = vpop.permute.xlu1 %2589  ;;  %v2525_v32 = vpop.permute.xlu0 %2524 }
 0x628   : > { %v2599_v21 = vmul.f32 %v2590_v43, %v2340_v10  ;;  %v2534_v37 = vmul.f32 %v2525_v32, %v2340_v10 }
 0x62a   : > { %v2617_v26 = vsel %vm2609_vm14, %v2608_v42, %v2534_v37 }
 0x62b   : > { %v2626_v0 = vsel %vm2618_vm15, %v2617_v26, %v2599_v21 }
 0x62c   : > { %v2630_v36 = vpack.c.bf16 %v2626_v0, %v2625_v49 }
 0x62e   : > { %3006 = vmatmul.msk.bf16.gmra.mxu1 %vm462_vm2, %v2630_v36 }
 0x62f   : > { %v2701_v31 = vpop.f32.mrf.mxu1 }
 0x630   : > { %v2702_v45 = vadd.f32 %v3032_v5, %v2701_v31 }
 0x632   : > { %v2721_v20 = vpack.c.bf16 %v2702_v45, %v2702_v45 }
 0x634   : > { %2730 = vst.msk [vmem:[%s4882_s12] sm:$0xf] %vm2729_vm0, %v2721_v20 }
 0x637   : > { %v2703_v4 = vpop.f32.mrf.mxu1 }
 0x638   : > { %v2704_v1 = vadd.f32 %v3033_v33, %v2703_v4 }
 0x63a   : > { %v2722_v63 = vpack.c.bf16 %v2704_v1, %v2704_v1 }
 0x63c   : > { %2731 = vst.msk [vmem:[%s4882_s12 + $0x4] sm:$0xf] %vm2729_vm0, %v2722_v63 }
 0x682   : > { %v2706_v14 = vpop.f32.mrf.mxu1 }
 0x683   : > { %v2707_v35 = vadd.f32 %v3036_v12, %v2706_v14 }
 0x685   : > { %v2723_v16 = vpack.c.bf16 %v2707_v35, %v2707_v35 }
 0x687   : > { %2732 = vst.msk [vmem:[%s4882_s12 + $0x8] sm:$0xf] %vm2729_vm0, %v2723_v16 }
 0x68a   : > { %v2708_v13 = vpop.f32.mrf.mxu1 }
 0x68b   : > { %v2709_v6 = vadd.f32 %v3037_v30, %v2708_v13 }
 0x68d   : > { %v2724_v59 = vpack.c.bf16 %v2709_v6, %v2709_v6 }
 0x68f   : > { %2733 = vst.msk [vmem:[%s4882_s12 + $0xc] sm:$0xf] %vm2729_vm0, %v2724_v59 }
 0x692   : > { %v2711_v28 = vpop.f32.mrf.mxu1 }
 0x693   : > { %v2712_v51 = vadd.f32 %v3040_v54, %v2711_v28 }
 0x695   : > { %v2725_v56 = vpack.c.bf16 %v2712_v51, %v2712_v51 }
 0x697   : > { %2734 = vst.msk [vmem:[%s4882_s12 + $0x10] sm:$0xf] %vm2729_vm0, %v2725_v56 }
 0x69a   : > { %v2713_v57 = vpop.f32.mrf.mxu1 }
 0x69b   : > { %v2714_v60 = vadd.f32 %v3041_v62, %v2713_v57 }
 0x69d   : > { %v2726_v53 = vpack.c.bf16 %v2714_v60, %v2714_v60 }
 0x69f   : > { %2735 = vst.msk [vmem:[%s4882_s12 + $0x14] sm:$0xf] %vm2729_vm0, %v2726_v53 }
 0x6ab   : > { %v2716_v38 = vpop.f32.mrf.mxu1 }
 0x6ac   : > { %v2717_v25 = vadd.f32 %v3044_v61, %v2716_v38 }
 0x6ae   : > { %v2727_v9 = vpack.c.bf16 %v2717_v25, %v2717_v25 }
 0x6b0   : > { %2736 = vst.msk [vmem:[%s4882_s12 + $0x18] sm:$0xf] %vm2729_vm0, %v2727_v9 }
 0x6b3   : > { %v2718_v55 = vpop.f32.mrf.mxu1 }
 0x6b4   : > { %v2719_v46 = vadd.f32 %v3045_v18, %v2718_v55 }
 0x6b6   : > { %v2728_v27 = vpack.c.bf16 %v2719_v46, %v2719_v46 }
 0x6b8   : > { %2737 = vst.msk [vmem:[%s4882_s12 + $0x1c] sm:$0xf] %vm2729_vm0, %v2728_v27 }
 0x6b9 PF: > { %s18_s23 = sadd.s32 1, %s3394_s23   ;;  %s4984_s18 = smov %s3378_s19 }
 0x6ba   : > { %p15_p0 = scmp.ge.s32.totalorder %s18_s23, 4   ;;  %s4985_s19 = smov %s3382_s20 }
 0x6bb   : > { %s4986_s20 = smov %s3486_s30  ;;  %s4987_s21 = smov %s3390_s22 }
 0x6bc   : > { %s4988_s22 = smov %s4990_s25  ;;  %17 = sbr.rel (!%p15_p0) target bundleno = 4 (0x4), region = 110 }
 0x6c1   :  { %2768 = vsyncpa [#allocation6], 1 }
 0x6c2   :  { %2770 = vsyncpa [#allocation6 + $0x1], 1 }

</bundles_post_ra>
